<compile_context>
chip_gen: v6e
topology: v6e:2x2x1
jax: 0.10.0
libtpu: 0.0.40
codegen_flags: <defaults>
</compile_context>

<pallas_src>
import functools

import jax
import jax.numpy as jnp
from jax.experimental import pallas as pl
from jax.experimental.pallas import tpu as pltpu

F32 = jnp.float32
BF16 = jnp.bfloat16
_BN_EPS = 1e-5
_VMEM_LIMIT = 48 * 1024 * 1024


# ----------------------------------------------------------------------------
# small helpers
# ----------------------------------------------------------------------------

def _cparams(n_axes=1):
    return pltpu.CompilerParams(
        dimension_semantics=("parallel",) * n_axes,
        vmem_limit_bytes=_VMEM_LIMIT,
    )


def _row_tile(m, multiple_of=1, target=2048):
    """Largest row tile <= target that divides m; multiple of 16 (safe for bf16 sublane
    tiling) and of `multiple_of`. Falls back to a single full block."""
    if m <= target:
        return m
    for cand in range(target, 15, -1):
        if m % cand == 0 and cand % 16 == 0 and cand % multiple_of == 0:
            return cand
    return m


def _head_tile(bh, L, dk, budget_bytes=10 * 1024 * 1024):
    """Batch-head tile for the attention kernel, sized so double-buffered q/k/v/out (bf16) plus
    prev/scores (f32) blocks stay within `budget_bytes`."""
    per = 2 * (4 * L * dk * 2 + 2 * L * L * 4)   # dbuf * (q,k,v,out bf16 + prev,scores f32)
    cap = max(1, min(bh, budget_bytes // max(per, 1)))
    for cand in range(cap, 0, -1):
        if bh % cand == 0:
            return cand
    return 1


def _batch_tile(bs, cap=4):
    for cand in range(min(bs, cap), 0, -1):
        if bs % cand == 0:
            return cand
    return 1


def _gelu_tanh(x):
    # TODO(synk): nn.GELU() default is exact erf; tanh approximation used because erf lowering
    # inside Mosaic kernels is not guaranteed (max deviation ~1e-3).
    c = 0.7978845608028654  # sqrt(2/pi)
    return 0.5 * x * (1.0 + jnp.tanh(c * (x + 0.044715 * x * x * x)))


def _bn_affine(sum_d, sumsq_d, count, gamma, beta, eps=_BN_EPS):
    # Training-mode BatchNorm1d (biased variance), folded into scale/shift vectors.
    mean = sum_d / count
    var = jnp.maximum(sumsq_d / count - mean * mean, 0.0)
    scale = gamma * jax.lax.rsqrt(var + eps)
    shift = beta - mean * scale
    return scale.reshape(1, -1), shift.reshape(1, -1)


# ----------------------------------------------------------------------------
# Pallas kernels
# ----------------------------------------------------------------------------

def _embed_kernel(x_ref, w_ref, b_ref, pos_ref, o_ref):
    # u = x @ W_P + b_P + W_pos   (pos embedding fused; pos tile pre-replicated per row tile)
    x = x_ref[...].astype(BF16)
    o_ref[...] = (jnp.dot(x, w_ref[...], preferred_element_type=F32)
                  + b_ref[...] + pos_ref[...])


def _linear_bf16_kernel(x_ref, w_ref, b_ref, o_ref):
    # fused QKV projection: o = x @ Wqkv + bqkv  (bf16 out, consumed by attention matmuls)
    x = x_ref[...].astype(BF16)
    y = jnp.dot(x, w_ref[...], preferred_element_type=F32) + b_ref[...]
    o_ref[...] = y.astype(o_ref.dtype)


def _make_attention_kernel(has_prev, emit_scores):
    # TB batch-heads per grid step. Softmax scale already folded into the Q projection.
    # localMask is all-zeros for mask_kernel_ratio=1 -> dropped entirely.
    # `prev` input is omitted for the first layer; the scores output is omitted for the last.
    def kernel(*refs):
        it = iter(refs)
        q_ref = next(it)
        k_ref = next(it)
        v_ref = next(it)
        prev_ref = next(it) if has_prev else None
        o_ref = next(it)
        s_ref = next(it) if emit_scores else None

        s = jnp.einsum("bqd,bkd->bqk", q_ref[...], k_ref[...],
                       preferred_element_type=F32)
        if has_prev:
            s = s + prev_ref[...]
        if emit_scores:
            s_ref[...] = s                             # res_attention: pre-softmax scores
        m = jnp.max(s, axis=-1, keepdims=True)
        e = jnp.exp(s - m)
        p = e / jnp.sum(e, axis=-1, keepdims=True)
        o_ref[...] = jnp.einsum("bqk,bkd->bqd", p.astype(BF16), v_ref[...],
                                preferred_element_type=F32).astype(o_ref.dtype)
    return kernel


def _proj_res_stats_kernel(a_ref, w_ref, b_ref, r_ref, o_ref, s_ref):
    # y = attn @ Wo + bo + residual ; emit y and per-tile BN partial sums (fused epilogue).
    y = (jnp.dot(a_ref[...], w_ref[...], preferred_element_type=F32)
         + b_ref[...] + r_ref[...])
    o_ref[...] = y
    s_ref[0, 0:1, :] = jnp.sum(y, axis=0, keepdims=True)
    s_ref[0, 1:2, :] = jnp.sum(y * y, axis=0, keepdims=True)


def _ffn_res_stats_kernel(x_ref, sc_ref, sh_ref, w1_ref, b1_ref, w2_ref, b2_ref,
                          o_ref, s_ref):
    # BN-apply prologue + W1 -> GELU -> W2 + residual + BN partial stats, all in VMEM.
    xn = x_ref[...] * sc_ref[...] + sh_ref[...]                       # norm1 tile (f32)
    h = jnp.dot(xn.astype(BF16), w1_ref[...], preferred_element_type=F32) + b1_ref[...]
    h = _gelu_tanh(h)
    y = jnp.dot(h.astype(BF16), w2_ref[...], preferred_element_type=F32) + b2_ref[...]
    y = xn + y                                                        # residual uses norm1
    o_ref[...] = y
    s_ref[0, 0:1, :] = jnp.sum(y, axis=0, keepdims=True)
    s_ref[0, 1:2, :] = jnp.sum(y * y, axis=0, keepdims=True)


def _feature_mix_kernel(x_ref, sc_ref, sh_ref, w1_ref, b1_ref, w2_ref, b2_ref,
                        o_ref, s_ref, *, tbs):
    # Feature mix with d_model kept minor: X is [tbs, c_in, L*D]; contraction runs over c_in.
    # BN2 applied as a prologue (scale/shift pre-tiled to L*D in the wrapper).
    sc = sc_ref[...]
    sh = sh_ref[...]
    w1 = w1_ref[...]
    b1 = b1_ref[...]
    w2 = w2_ref[...]
    b2 = b2_ref[...]
    ssum = None
    ssq = None
    for b in range(tbs):                               # static unroll over batch sub-tile
        xn = x_ref[b] * sc + sh                        # [c_in, L*D]
        h = jnp.dot(w1, xn.astype(BF16), preferred_element_type=F32) + b1
        h = _gelu_tanh(h)                              # [d_ff, L*D]
        y = jnp.dot(w2, h.astype(BF16), preferred_element_type=F32) + b2
        o_ref[b] = y                                   # [c_in, L*D]
        ps = jnp.sum(y, axis=0, keepdims=True)
        pq = jnp.sum(y * y, axis=0, keepdims=True)
        ssum = ps if ssum is None else ssum + ps
        ssq = pq if ssq is None else ssq + pq
    s_ref[0, 0:1, :] = ssum
    s_ref[0, 1:2, :] = ssq


def _combine_kernel(r_ref, f_ref, sc2_ref, sh2_ref, sc3_ref, sh3_ref, o_ref):
    # layer_out = norm2 + BN_feat(feature_mix_output)  (both norms as cheap affines)
    norm2 = r_ref[...] * sc2_ref[...] + sh2_ref[...]
    featn = f_ref[...] * sc3_ref[...] + sh3_ref[...]
    o_ref[...] = norm2 + featn


# ----------------------------------------------------------------------------
# pallas_call wrappers
# ----------------------------------------------------------------------------

def embed_pallas(x2d, w_bf16, b, wpos_tiled):
    M, P = x2d.shape
    D = w_bf16.shape[1]
    TM = wpos_tiled.shape[0]
    nt = M // TM
    return pl.pallas_call(
        _embed_kernel,
        grid=(nt,),
        in_specs=[
            pl.BlockSpec((TM, P), lambda i: (i, 0)),
            pl.BlockSpec((P, D), lambda i: (0, 0)),
            pl.BlockSpec((1, D), lambda i: (0, 0)),
            pl.BlockSpec((TM, D), lambda i: (0, 0)),
        ],
        out_specs=pl.BlockSpec((TM, D), lambda i: (i, 0)),
        out_shape=jax.ShapeDtypeStruct((M, D), F32),
        compiler_params=_cparams(1),
    )(x2d, w_bf16, b, wpos_tiled)


def linear_bf16(x2d, w_bf16, b, TM):
    M, K = x2d.shape
    N = w_bf16.shape[1]
    nt = M // TM
    return pl.pallas_call(
        _linear_bf16_kernel,
        grid=(nt,),
        in_specs=[
            pl.BlockSpec((TM, K), lambda i: (i, 0)),
            pl.BlockSpec((K, N), lambda i: (0, 0)),
            pl.BlockSpec((1, N), lambda i: (0, 0)),
        ],
        out_specs=pl.BlockSpec((TM, N), lambda i: (i, 0)),
        out_shape=jax.ShapeDtypeStruct((M, N), BF16),
        compiler_params=_cparams(1),
    )(x2d, w_bf16, b)


def attention_pallas(q, k, v, prev, TB, emit_scores):
    BH, L, dk = q.shape
    nb = BH // TB
    has_prev = prev is not None

    in_specs = [
        pl.BlockSpec((TB, L, dk), lambda i: (i, 0, 0)),
        pl.BlockSpec((TB, L, dk), lambda i: (i, 0, 0)),
        pl.BlockSpec((TB, L, dk), lambda i: (i, 0, 0)),
    ]
    args = [q, k, v]
    if has_prev:
        in_specs.append(pl.BlockSpec((TB, L, L), lambda i: (i, 0, 0)))
        args.append(prev)

    out_specs = [pl.BlockSpec((TB, L, dk), lambda i: (i, 0, 0))]
    out_shapes = [jax.ShapeDtypeStruct((BH, L, dk), BF16)]
    if emit_scores:
        out_specs.append(pl.BlockSpec((TB, L, L), lambda i: (i, 0, 0)))
        out_shapes.append(jax.ShapeDtypeStruct((BH, L, L), F32))

    res = pl.pallas_call(
        _make_attention_kernel(has_prev, emit_scores),
        grid=(nb,),
        in_specs=in_specs,
        out_specs=tuple(out_specs),
        out_shape=tuple(out_shapes),
        compiler_params=_cparams(1),
    )(*args)
    if emit_scores:
        out, scores = res
        return out, scores
    (out,) = res
    return out, None


def proj_residual_stats(a_bf16, w_bf16, b, resid, TM):
    M, D = resid.shape
    K = a_bf16.shape[1]
    nt = M // TM
    return pl.pallas_call(
        _proj_res_stats_kernel,
        grid=(nt,),
        in_specs=[
            pl.BlockSpec((TM, K), lambda i: (i, 0)),
            pl.BlockSpec((K, D), lambda i: (0, 0)),
            pl.BlockSpec((1, D), lambda i: (0, 0)),
            pl.BlockSpec((TM, D), lambda i: (i, 0)),
        ],
        out_specs=(
            pl.BlockSpec((TM, D), lambda i: (i, 0)),
            pl.BlockSpec((1, 2, D), lambda i: (i, 0, 0)),
        ),
        out_shape=(
            jax.ShapeDtypeStruct((M, D), F32),
            jax.ShapeDtypeStruct((nt, 2, D), F32),
        ),
        compiler_params=_cparams(1),
    )(a_bf16, w_bf16, b, resid)


def ffn_residual_stats(res1, sc1, sh1, w1, b1, w2, b2, TM):
    M, D = res1.shape
    d_ff = w1.shape[1]
    nt = M // TM
    return pl.pallas_call(
        _ffn_res_stats_kernel,
        grid=(nt,),
        in_specs=[
            pl.BlockSpec((TM, D), lambda i: (i, 0)),
            pl.BlockSpec((1, D), lambda i: (0, 0)),
            pl.BlockSpec((1, D), lambda i: (0, 0)),
            pl.BlockSpec((D, d_ff), lambda i: (0, 0)),
            pl.BlockSpec((1, d_ff), lambda i: (0, 0)),
            pl.BlockSpec((d_ff, D), lambda i: (0, 0)),
            pl.BlockSpec((1, D), lambda i: (0, 0)),
        ],
        out_specs=(
            pl.BlockSpec((TM, D), lambda i: (i, 0)),
            pl.BlockSpec((1, 2, D), lambda i: (i, 0, 0)),
        ),
        out_shape=(
            jax.ShapeDtypeStruct((M, D), F32),
            jax.ShapeDtypeStruct((nt, 2, D), F32),
        ),
        compiler_params=_cparams(1),
    )(res1, sc1, sh1, w1, b1, w2, b2)


def feature_mix_stats(x_slab, sc_t, sh_t, w1t, b1c, w2t, b2c, TBS):
    bs, c_in, LD = x_slab.shape
    d_ff = w1t.shape[0]
    nb = bs // TBS
    return pl.pallas_call(
        functools.partial(_feature_mix_kernel, tbs=TBS),
        grid=(nb,),
        in_specs=[
            pl.BlockSpec((TBS, c_in, LD), lambda b: (b, 0, 0)),
            pl.BlockSpec((1, LD), lambda b: (0, 0)),
            pl.BlockSpec((1, LD), lambda b: (0, 0)),
            pl.BlockSpec((d_ff, c_in), lambda b: (0, 0)),
            pl.BlockSpec((d_ff, 1), lambda b: (0, 0)),
            pl.BlockSpec((c_in, d_ff), lambda b: (0, 0)),
            pl.BlockSpec((c_in, 1), lambda b: (0, 0)),
        ],
        out_specs=(
            pl.BlockSpec((TBS, c_in, LD), lambda b: (b, 0, 0)),
            pl.BlockSpec((1, 2, LD), lambda b: (b, 0, 0)),
        ),
        out_shape=(
            jax.ShapeDtypeStruct((bs, c_in, LD), F32),
            jax.ShapeDtypeStruct((nb, 2, LD), F32),
        ),
        compiler_params=_cparams(1),
    )(x_slab, sc_t, sh_t, w1t, b1c, w2t, b2c)


def combine_pallas(res2, feat2d, sc2, sh2, sc3, sh3, TM):
    M, D = res2.shape
    nt = M // TM
    return pl.pallas_call(
        _combine_kernel,
        grid=(nt,),
        in_specs=[
            pl.BlockSpec((TM, D), lambda i: (i, 0)),
            pl.BlockSpec((TM, D), lambda i: (i, 0)),
            pl.BlockSpec((1, D), lambda i: (0, 0)),
            pl.BlockSpec((1, D), lambda i: (0, 0)),
            pl.BlockSpec((1, D), lambda i: (0, 0)),
            pl.BlockSpec((1, D), lambda i: (0, 0)),
        ],
        out_specs=pl.BlockSpec((TM, D), lambda i: (i, 0)),
        out_shape=jax.ShapeDtypeStruct((M, D), F32),
        compiler_params=_cparams(1),
    )(res2, feat2d, sc2, sh2, sc3, sh3)


# ----------------------------------------------------------------------------
# Model wiring
# ----------------------------------------------------------------------------

def encoder_layer_forward(src2d, prev_scores, p, *, bs, c_in, L, n_heads, need_scores):
    M, D = src2d.shape
    BN = bs * c_in
    H = n_heads
    dk = D // H
    TM = _row_tile(M)
    TB = _head_tile(BN * H, L, dk)

    # ---- multi-head self attention (fused QKV, scale folded into Wq) ----
    qkv = linear_bf16(src2d, p["Wqkv"], p["bqkv"], TM)                       # [M, 3D] bf16
    qkv = qkv.reshape(BN, L, 3, H, dk).transpose(2, 0, 3, 1, 4).reshape(3, BN * H, L, dk)
    attn, scores = attention_pallas(qkv[0], qkv[1], qkv[2], prev_scores, TB, need_scores)
    attn2d = attn.reshape(BN, H, L, dk).transpose(0, 2, 1, 3).reshape(M, D)  # merge heads

    # out-proj + residual + BN_attn stats in one kernel; finish BN stats in tiny XLA ops
    res1, st1 = proj_residual_stats(attn2d, p["Wo"], p["bo"], src2d, TM)
    t1 = jnp.sum(st1, axis=0)
    sc1, sh1 = _bn_affine(t1[0], t1[1], M, p["g_attn"], p["b_attn"])

    # ---- position-wise FFN (BN1 prologue + W1/GELU/W2 + residual + BN2 stats) ----
    res2, st2 = ffn_residual_stats(res1, sc1, sh1, p["W1"], p["b1"], p["W2"], p["b2"], TM)
    t2 = jnp.sum(st2, axis=0)
    sc2, sh2 = _bn_affine(t2[0], t2[1], M, p["g_ffn"], p["b_ffn"])

    # ---- feature mixing across n_vars, with d_model kept on the lane axis ----
    LD = L * D
    TBS = _batch_tile(bs)
    feat, st3 = feature_mix_stats(
        res2.reshape(bs, c_in, LD),
        jnp.tile(sc2, (1, L)), jnp.tile(sh2, (1, L)),                        # tiny [1, L*D]
        p["Wf1T"], p["bf1c"], p["Wf2T"], p["bf2c"], TBS)
    t3 = jnp.sum(st3, axis=0).reshape(2, L, D).sum(axis=1)
    sc3, sh3 = _bn_affine(t3[0], t3[1], M, p["g_feat"], p["b_feat"])

    out = combine_pallas(res2, feat.reshape(M, D), sc2, sh2, sc3, sh3, TM)
    return out, scores


def tsti_encoder_forward(x, params, *, n_heads):
    bs, n_vars, patch_len, patch_num = x.shape
    L = patch_num
    D = params["b_P"].shape[1]
    BN = bs * n_vars
    M = BN * L
    H = n_heads

    # x: [bs, nvars, patch_len, patch_num] -> permute(0,1,3,2) -> W_P(patch_len -> d_model)
    xt = jnp.transpose(x, (0, 1, 3, 2)).astype(F32).reshape(M, patch_len)
    TM0 = _row_tile(M, multiple_of=L)
    wpos_tiled = jnp.tile(params["W_pos"], (TM0 // L, 1))                    # [TM0, D]
    # layer_pos_embed == 0 -> u = dropout(u + W_pos); dropout p=0 -> fused add in kernel
    z2d = embed_pallas(xt, params["W_P"], params["b_P"], wpos_tiled)         # [M, D]

    # TODO(synk): localMask source not in the reference; with mask_kernel_ratio=1 nothing is
    # masked, so the attention mask is dropped from the kernel entirely.
    n_layers = len(params["layers"])
    prev = None                                                              # layer 0: prev=None
    for li, lp in enumerate(params["layers"]):
        need_scores = li < n_layers - 1                                      # last layer: scores unused
        z2d, prev = encoder_layer_forward(z2d, prev, lp, bs=bs, c_in=n_vars, L=L,
                                          n_heads=H, need_scores=need_scores)

    z = z2d.reshape(bs, n_vars, L, D)
    return jnp.transpose(z, (0, 1, 3, 2))                                    # [bs, nvars, d_model, patch_num]


# ----------------------------------------------------------------------------
# Deterministic parameter init (synthetic, shapes from the module's __init__)
# ----------------------------------------------------------------------------

def _init_linear(key, fan_in, fan_out):
    k1, k2 = jax.random.split(key)
    w = jax.random.normal(k1, (fan_in, fan_out), F32) * 0.02
    b = jax.random.normal(k2, (fan_out,), F32) * 0.02
    return w, b


def init_params(key, *, c_in, patch_len, patch_num, d_model, d_ff, n_layers):
    keys = jax.random.split(key, 2 + n_layers)
    p = {}
    p["W_P"], p["b_P"] = _init_linear(keys[0], patch_len, d_model)
    # positional_encoding('zeros', learn_pe=True): uniform(-0.02, 0.02) of shape [q_len, d_model]
    p["W_pos"] = jax.random.uniform(keys[1], (patch_num, d_model), F32, -0.02, 0.02)

    layers = []
    for i in range(n_layers):
        lk = jax.random.split(keys[2 + i], 8)
        lp = {}
        lp["Wq"], lp["bq"] = _init_linear(lk[0], d_model, d_model)
        lp["Wk"], lp["bk"] = _init_linear(lk[1], d_model, d_model)
        lp["Wv"], lp["bv"] = _init_linear(lk[2], d_model, d_model)
        lp["Wo"], lp["bo"] = _init_linear(lk[3], d_model, d_model)
        lp["W1"], lp["b1"] = _init_linear(lk[4], d_model, d_ff)
        lp["W2"], lp["b2"] = _init_linear(lk[5], d_ff, d_model)
        lp["Wf1"], lp["bf1"] = _init_linear(lk[6], c_in, d_ff)
        lp["Wf2"], lp["bf2"] = _init_linear(lk[7], d_ff, c_in)
        for n in ("attn", "ffn", "feat"):                # BatchNorm1d affine defaults
            lp[f"g_{n}"] = jnp.ones((d_model,), F32)
            lp[f"b_{n}"] = jnp.zeros((d_model,), F32)
        layers.append(lp)
    p["layers"] = layers
    return p


def prepare_params(raw, *, n_heads):
    """One-time hoisting: fold softmax scale into Wq, concat QKV, transpose feature-mix
    weights so d_model stays on lanes, reshape biases, and pre-cast matmul weights to bf16."""
    D = raw["W_P"].shape[1]
    scale = float(D // n_heads) ** -0.5                  # lsa=False -> fixed scale
    p = {
        "W_P": raw["W_P"].astype(BF16),
        "b_P": raw["b_P"].reshape(1, -1).astype(F32),
        "W_pos": raw["W_pos"].astype(F32),
    }
    layers = []
    for lp in raw["layers"]:
        q = {}
        q["Wqkv"] = jnp.concatenate([lp["Wq"] * scale, lp["Wk"], lp["Wv"]], axis=1).astype(BF16)
        q["bqkv"] = jnp.concatenate([lp["bq"] * scale, lp["bk"], lp["bv"]]).reshape(1, -1).astype(F32)
        q["Wo"] = lp["Wo"].astype(BF16)
        q["bo"] = lp["bo"].reshape(1, -1).astype(F32)
        q["W1"] = lp["W1"].astype(BF16)
        q["b1"] = lp["b1"].reshape(1, -1).astype(F32)
        q["W2"] = lp["W2"].astype(BF16)
        q["b2"] = lp["b2"].reshape(1, -1).astype(F32)
        q["Wf1T"] = lp["Wf1"].T.astype(BF16)             # [d_ff, c_in]
        q["bf1c"] = lp["bf1"].reshape(-1, 1).astype(F32)
        q["Wf2T"] = lp["Wf2"].T.astype(BF16)             # [c_in, d_ff]
        q["bf2c"] = lp["bf2"].reshape(-1, 1).astype(F32)
        for n in ("attn", "ffn", "feat"):
            q[f"g_{n}"] = lp[f"g_{n}"]
            q[f"b_{n}"] = lp[f"b_{n}"]
        layers.append(q)
    p["layers"] = layers
    return p


# ----------------------------------------------------------------------------

if __name__ == "__main__":
    bs, c_in, patch_len, patch_num = 2, 4, 16, 8
    d_model, n_heads, d_ff, n_layers = 32, 4, 64, 2

    root = jax.random.PRNGKey(0)
    kx, kp = jax.random.split(root)

    # input layout: [bs, n_vars, patch_len, patch_num] (as fed by PatchTST_backbone)
    x = jax.random.normal(kx, (bs, c_in, patch_len, patch_num), F32)
    raw = init_params(kp, c_in=c_in, patch_len=patch_len, patch_num=patch_num,
                      d_model=d_model, d_ff=d_ff, n_layers=n_layers)
    params = prepare_params(raw, n_heads=n_heads)

    fwd = jax.jit(functools.partial(tsti_encoder_forward, n_heads=n_heads))
    z = fwd(x, params)
    z = jax.block_until_ready(z)

    assert z.shape == (bs, c_in, d_model, patch_num), z.shape
    assert bool(jnp.all(jnp.isfinite(z)))
    print("KERNEL_OK")
</pallas_src>

<mosaic_0001>
module attributes {stable_mosaic.version = 11 : i64} {
  func.func @_linear_bf16_kernel(%arg0: i32, %arg1: memref<64x32xf32, #tpu.memory_space<vmem>>, %arg2: memref<32x96xbf16, #tpu.memory_space<vmem>>, %arg3: memref<1x96xf32, #tpu.memory_space<vmem>>, %arg4: memref<64x96xbf16, #tpu.memory_space<vmem>>) attributes {dimension_semantics = [#tpu.dimension_semantics<parallel>], iteration_bounds = array<i64: 1>, scalar_prefetch = 0 : i64, scratch_operands = 0 : i64, tpu.core_type = #tpu.core_type<tc>, window_params = [{transform_indices = @transform_0, window_bounds = array<i64: 64, 32>}, {pipeline_mode = #tpu.pipeline_mode<synchronous>, transform_indices = @transform_1, window_bounds = array<i64: 32, 96>}, {pipeline_mode = #tpu.pipeline_mode<synchronous>, transform_indices = @transform_2, window_bounds = array<i64: 1, 96>}, {transform_indices = @transform_3, window_bounds = array<i64: 64, 96>}]} {
    %c0 = arith.constant 0 : index
    %c0_0 = arith.constant 0 : index
    %0 = vector.load %arg1[%c0, %c0_0] : memref<64x32xf32, #tpu.memory_space<vmem>>, vector<64x32xf32>
    %1 = arith.truncf %0 : vector<64x32xf32> to vector<64x32xbf16>
    %c0_1 = arith.constant 0 : index
    %c0_2 = arith.constant 0 : index
    %2 = vector.load %arg2[%c0_1, %c0_2] : memref<32x96xbf16, #tpu.memory_space<vmem>>, vector<32x96xbf16>
    %cst = arith.constant dense<0.000000e+00> : vector<64x96xf32>
    %3 = tpu.matmul %1, %2, %cst {dimension_numbers = #tpu.dot_dimension_numbers<[1], [0], [0], [1], [0, 0, 1, 1], [], []>} : vector<64x32xbf16>, vector<32x96xbf16>, vector<64x96xf32> -> vector<64x96xf32>
    %c0_3 = arith.constant 0 : index
    %c0_4 = arith.constant 0 : index
    %4 = vector.load %arg3[%c0_3, %c0_4] : memref<1x96xf32, #tpu.memory_space<vmem>>, vector<1x96xf32>
    %5 = vector.broadcast %4 : vector<1x96xf32> to vector<64x96xf32>
    %6 = arith.addf %3, %5 : vector<64x96xf32>
    %7 = arith.truncf %6 : vector<64x96xf32> to vector<64x96xbf16>
    %c0_5 = arith.constant 0 : index
    %c0_6 = arith.constant 0 : index
    %8 = vector.load %arg4[%c0_5, %c0_6] : memref<64x96xbf16, #tpu.memory_space<vmem>>, vector<64x96xbf16>
    tpu.vector_store %arg4[%c0_5, %c0_6], %7 {strides = array<i32>} : memref<64x96xbf16, #tpu.memory_space<vmem>>, vector<64x96xbf16>,
    return
  }
  func.func @transform_0(%arg0: i32) -> (i32, i32) {
    %c0_i32 = arith.constant 0 : i32
    %c0_i32_0 = arith.constant 0 : i32
    return %arg0, %c0_i32 : i32, i32
  }
  func.func @transform_1(%arg0: i32) -> (i32, i32) {
    %c0_i32 = arith.constant 0 : i32
    %c0_i32_0 = arith.constant 0 : i32
    %c0_i32_1 = arith.constant 0 : i32
    return %c0_i32, %c0_i32_0 : i32, i32
  }
  func.func @transform_2(%arg0: i32) -> (i32, i32) {
    %c0_i32 = arith.constant 0 : i32
    %c0_i32_0 = arith.constant 0 : i32
    %c0_i32_1 = arith.constant 0 : i32
    return %c0_i32, %c0_i32_0 : i32, i32
  }
  func.func @transform_3(%arg0: i32) -> (i32, i32) {
    %c0_i32 = arith.constant 0 : i32
    %c0_i32_0 = arith.constant 0 : i32
    return %arg0, %c0_i32 : i32, i32
  }
}

module attributes {stable_mosaic.version = 11 : i64} {
  func.func @_embed_kernel(%arg0: i32, %arg1: memref<64x16xf32, #tpu.memory_space<vmem>>, %arg2: memref<16x32xbf16, #tpu.memory_space<vmem>>, %arg3: memref<1x32xf32, #tpu.memory_space<vmem>>, %arg4: memref<64x32xf32, #tpu.memory_space<vmem>>, %arg5: memref<64x32xf32, #tpu.memory_space<vmem>>) attributes {dimension_semantics = [#tpu.dimension_semantics<parallel>], iteration_bounds = array<i64: 1>, scalar_prefetch = 0 : i64, scratch_operands = 0 : i64, tpu.core_type = #tpu.core_type<tc>, window_params = [{transform_indices = @transform_0, window_bounds = array<i64: 64, 16>}, {pipeline_mode = #tpu.pipeline_mode<synchronous>, transform_indices = @transform_1, window_bounds = array<i64: 16, 32>}, {pipeline_mode = #tpu.pipeline_mode<synchronous>, transform_indices = @transform_2, window_bounds = array<i64: 1, 32>}, {pipeline_mode = #tpu.pipeline_mode<synchronous>, transform_indices = @transform_3, window_bounds = array<i64: 64, 32>}, {transform_indices = @transform_4, window_bounds = array<i64: 64, 32>}]} {
    %c0 = arith.constant 0 : index
    %c0_0 = arith.constant 0 : index
    %0 = vector.load %arg1[%c0, %c0_0] : memref<64x16xf32, #tpu.memory_space<vmem>>, vector<64x16xf32>
    %1 = arith.truncf %0 : vector<64x16xf32> to vector<64x16xbf16>
    %c0_1 = arith.constant 0 : index
    %c0_2 = arith.constant 0 : index
    %2 = vector.load %arg2[%c0_1, %c0_2] : memref<16x32xbf16, #tpu.memory_space<vmem>>, vector<16x32xbf16>
    %cst = arith.constant dense<0.000000e+00> : vector<64x32xf32>
    %3 = tpu.matmul %1, %2, %cst {dimension_numbers = #tpu.dot_dimension_numbers<[1], [0], [0], [1], [0, 0, 1, 1], [], []>} : vector<64x16xbf16>, vector<16x32xbf16>, vector<64x32xf32> -> vector<64x32xf32>
    %c0_3 = arith.constant 0 : index
    %c0_4 = arith.constant 0 : index
    %4 = vector.load %arg3[%c0_3, %c0_4] : memref<1x32xf32, #tpu.memory_space<vmem>>, vector<1x32xf32>
    %5 = vector.broadcast %4 : vector<1x32xf32> to vector<64x32xf32>
    %6 = arith.addf %3, %5 : vector<64x32xf32>
    %c0_5 = arith.constant 0 : index
    %c0_6 = arith.constant 0 : index
    %7 = vector.load %arg4[%c0_5, %c0_6] : memref<64x32xf32, #tpu.memory_space<vmem>>, vector<64x32xf32>
    %8 = arith.addf %6, %7 : vector<64x32xf32>
    %c0_7 = arith.constant 0 : index
    %c0_8 = arith.constant 0 : index
    %9 = vector.load %arg5[%c0_7, %c0_8] : memref<64x32xf32, #tpu.memory_space<vmem>>, vector<64x32xf32>
    tpu.vector_store %arg5[%c0_7, %c0_8], %8 {strides = array<i32>} : memref<64x32xf32, #tpu.memory_space<vmem>>, vector<64x32xf32>,
    return
  }
  func.func @transform_0(%arg0: i32) -> (i32, i32) {
    %c0_i32 = arith.constant 0 : i32
    %c0_i32_0 = arith.constant 0 : i32
    return %arg0, %c0_i32 : i32, i32
  }
  func.func @transform_1(%arg0: i32) -> (i32, i32) {
    %c0_i32 = arith.constant 0 : i32
    %c0_i32_0 = arith.constant 0 : i32
    %c0_i32_1 = arith.constant 0 : i32
    return %c0_i32, %c0_i32_0 : i32, i32
  }
  func.func @transform_2(%arg0: i32) -> (i32, i32) {
    %c0_i32 = arith.constant 0 : i32
    %c0_i32_0 = arith.constant 0 : i32
    %c0_i32_1 = arith.constant 0 : i32
    return %c0_i32, %c0_i32_0 : i32, i32
  }
  func.func @transform_3(%arg0: i32) -> (i32, i32) {
    %c0_i32 = arith.constant 0 : i32
    %c0_i32_0 = arith.constant 0 : i32
    %c0_i32_1 = arith.constant 0 : i32
    return %c0_i32, %c0_i32_0 : i32, i32
  }
  func.func @transform_4(%arg0: i32) -> (i32, i32) {
    %c0_i32 = arith.constant 0 : i32
    %c0_i32_0 = arith.constant 0 : i32
    return %arg0, %c0_i32 : i32, i32
  }
}

module attributes {stable_mosaic.version = 11 : i64} {
  func.func @kernel(%arg0: i32, %arg1: memref<32x8x8xbf16, #tpu.memory_space<vmem>>, %arg2: memref<32x8x8xbf16, #tpu.memory_space<vmem>>, %arg3: memref<32x8x8xbf16, #tpu.memory_space<vmem>>, %arg4: memref<32x8x8xbf16, #tpu.memory_space<vmem>>, %arg5: memref<32x8x8xf32, #tpu.memory_space<vmem>>) attributes {dimension_semantics = [#tpu.dimension_semantics<parallel>], iteration_bounds = array<i64: 1>, scalar_prefetch = 0 : i64, scratch_operands = 0 : i64, tpu.core_type = #tpu.core_type<tc>, window_params = [{transform_indices = @transform_0, window_bounds = array<i64: 32, 8, 8>}, {transform_indices = @transform_1, window_bounds = array<i64: 32, 8, 8>}, {transform_indices = @transform_2, window_bounds = array<i64: 32, 8, 8>}, {transform_indices = @transform_3, window_bounds = array<i64: 32, 8, 8>}, {transform_indices = @transform_4, window_bounds = array<i64: 32, 8, 8>}]} {
    %c0 = arith.constant 0 : index
    %c0_0 = arith.constant 0 : index
    %c0_1 = arith.constant 0 : index
    %0 = vector.load %arg1[%c0, %c0_0, %c0_1] : memref<32x8x8xbf16, #tpu.memory_space<vmem>>, vector<32x8x8xbf16>
    %c0_2 = arith.constant 0 : index
    %c0_3 = arith.constant 0 : index
    %c0_4 = arith.constant 0 : index
    %1 = vector.load %arg2[%c0_2, %c0_3, %c0_4] : memref<32x8x8xbf16, #tpu.memory_space<vmem>>, vector<32x8x8xbf16>
    "tpu.trace_start"() <{level = 10 : i32, message = "bqd,bkd->bqk"}> : () -> ()
    %cst = arith.constant dense<0.000000e+00> : vector<32x8x8xf32>
    %2 = tpu.matmul %0, %1, %cst {dimension_numbers = #tpu.dot_dimension_numbers<[2], [2], [1], [1], [0, 0, 0, 1, 1, 1], [0], [0]>} : vector<32x8x8xbf16>, vector<32x8x8xbf16>, vector<32x8x8xf32> -> vector<32x8x8xf32>
    "tpu.trace_stop"() : () -> ()
    %c0_5 = arith.constant 0 : index
    %c0_6 = arith.constant 0 : index
    %c0_7 = arith.constant 0 : index
    %3 = vector.load %arg5[%c0_5, %c0_6, %c0_7] : memref<32x8x8xf32, #tpu.memory_space<vmem>>, vector<32x8x8xf32>
    tpu.vector_store %arg5[%c0_5, %c0_6, %c0_7], %2 {strides = array<i32>} : memref<32x8x8xf32, #tpu.memory_space<vmem>>, vector<32x8x8xf32>,
    %cst_8 = arith.constant dense<0xFF800000> : vector<32x8xf32>
    %4 = vector.multi_reduction <maximumf>, %2, %cst_8 [2] : vector<32x8x8xf32> to vector<32x8xf32>
    %5 = vector.shape_cast %4 : vector<32x8xf32> to vector<32x8x1xf32>
    %6 = vector.broadcast %5 : vector<32x8x1xf32> to vector<32x8x8xf32>
    %7 = arith.subf %2, %6 : vector<32x8x8xf32>
    %8 = math.exp %7 : vector<32x8x8xf32>
    %cst_9 = arith.constant dense<0.000000e+00> : vector<32x8xf32>
    %9 = vector.multi_reduction <add>, %8, %cst_9 [2] : vector<32x8x8xf32> to vector<32x8xf32>
    %10 = vector.shape_cast %9 : vector<32x8xf32> to vector<32x8x1xf32>
    %11 = vector.broadcast %10 : vector<32x8x1xf32> to vector<32x8x8xf32>
    %12 = arith.divf %8, %11 : vector<32x8x8xf32>
    %13 = arith.truncf %12 : vector<32x8x8xf32> to vector<32x8x8xbf16>
    %c0_10 = arith.constant 0 : index
    %c0_11 = arith.constant 0 : index
    %c0_12 = arith.constant 0 : index
    %14 = vector.load %arg3[%c0_10, %c0_11, %c0_12] : memref<32x8x8xbf16, #tpu.memory_space<vmem>>, vector<32x8x8xbf16>
    "tpu.trace_start"() <{level = 10 : i32, message = "bqk,bkd->bqd"}> : () -> ()
    %cst_13 = arith.constant dense<0.000000e+00> : vector<32x8x8xf32>
    %15 = tpu.matmul %13, %14, %cst_13 {dimension_numbers = #tpu.dot_dimension_numbers<[2], [1], [1], [2], [0, 0, 0, 1, 1, 2], [0], [0]>} : vector<32x8x8xbf16>, vector<32x8x8xbf16>, vector<32x8x8xf32> -> vector<32x8x8xf32>
    "tpu.trace_stop"() : () -> ()
    %16 = arith.truncf %15 : vector<32x8x8xf32> to vector<32x8x8xbf16>
    %c0_14 = arith.constant 0 : index
    %c0_15 = arith.constant 0 : index
    %c0_16 = arith.constant 0 : index
    %17 = vector.load %arg4[%c0_14, %c0_15, %c0_16] : memref<32x8x8xbf16, #tpu.memory_space<vmem>>, vector<32x8x8xbf16>
    tpu.vector_store %arg4[%c0_14, %c0_15, %c0_16], %16 {strides = array<i32>} : memref<32x8x8xbf16, #tpu.memory_space<vmem>>, vector<32x8x8xbf16>,
    return
  }
  func.func @transform_0(%arg0: i32) -> (i32, i32, i32) {
    %c0_i32 = arith.constant 0 : i32
    %c0_i32_0 = arith.constant 0 : i32
    %c0_i32_1 = arith.constant 0 : i32
    return %arg0, %c0_i32, %c0_i32_0 : i32, i32, i32
  }
  func.func @transform_1(%arg0: i32) -> (i32, i32, i32) {
    %c0_i32 = arith.constant 0 : i32
    %c0_i32_0 = arith.constant 0 : i32
    %c0_i32_1 = arith.constant 0 : i32
    return %arg0, %c0_i32, %c0_i32_0 : i32, i32, i32
  }
  func.func @transform_2(%arg0: i32) -> (i32, i32, i32) {
    %c0_i32 = arith.constant 0 : i32
    %c0_i32_0 = arith.constant 0 : i32
    %c0_i32_1 = arith.constant 0 : i32
    return %arg0, %c0_i32, %c0_i32_0 : i32, i32, i32
  }
  func.func @transform_3(%arg0: i32) -> (i32, i32, i32) {
    %c0_i32 = arith.constant 0 : i32
    %c0_i32_0 = arith.constant 0 : i32
    %c0_i32_1 = arith.constant 0 : i32
    return %arg0, %c0_i32, %c0_i32_0 : i32, i32, i32
  }
  func.func @transform_4(%arg0: i32) -> (i32, i32, i32) {
    %c0_i32 = arith.constant 0 : i32
    %c0_i32_0 = arith.constant 0 : i32
    %c0_i32_1 = arith.constant 0 : i32
    return %arg0, %c0_i32, %c0_i32_0 : i32, i32, i32
  }
}

module attributes {stable_mosaic.version = 11 : i64} {
  func.func @_proj_res_stats_kernel(%arg0: i32, %arg1: memref<64x32xbf16, #tpu.memory_space<vmem>>, %arg2: memref<32x32xbf16, #tpu.memory_space<vmem>>, %arg3: memref<1x32xf32, #tpu.memory_space<vmem>>, %arg4: memref<64x32xf32, #tpu.memory_space<vmem>>, %arg5: memref<64x32xf32, #tpu.memory_space<vmem>>, %arg6: memref<1x2x32xf32, #tpu.memory_space<vmem>>) attributes {dimension_semantics = [#tpu.dimension_semantics<parallel>], iteration_bounds = array<i64: 1>, scalar_prefetch = 0 : i64, scratch_operands = 0 : i64, tpu.core_type = #tpu.core_type<tc>, window_params = [{transform_indices = @transform_0, window_bounds = array<i64: 64, 32>}, {pipeline_mode = #tpu.pipeline_mode<synchronous>, transform_indices = @transform_1, window_bounds = array<i64: 32, 32>}, {pipeline_mode = #tpu.pipeline_mode<synchronous>, transform_indices = @transform_2, window_bounds = array<i64: 1, 32>}, {transform_indices = @transform_3, window_bounds = array<i64: 64, 32>}, {transform_indices = @transform_4, window_bounds = array<i64: 64, 32>}, {transform_indices = @transform_5, window_bounds = array<i64: 1, 2, 32>}]} {
    %c0 = arith.constant 0 : index
    %c0_0 = arith.constant 0 : index
    %0 = vector.load %arg1[%c0, %c0_0] : memref<64x32xbf16, #tpu.memory_space<vmem>>, vector<64x32xbf16>
    %c0_1 = arith.constant 0 : index
    %c0_2 = arith.constant 0 : index
    %1 = vector.load %arg2[%c0_1, %c0_2] : memref<32x32xbf16, #tpu.memory_space<vmem>>, vector<32x32xbf16>
    %cst = arith.constant dense<0.000000e+00> : vector<64x32xf32>
    %2 = tpu.matmul %0, %1, %cst {dimension_numbers = #tpu.dot_dimension_numbers<[1], [0], [0], [1], [0, 0, 1, 1], [], []>} : vector<64x32xbf16>, vector<32x32xbf16>, vector<64x32xf32> -> vector<64x32xf32>
    %c0_3 = arith.constant 0 : index
    %c0_4 = arith.constant 0 : index
    %3 = vector.load %arg3[%c0_3, %c0_4] : memref<1x32xf32, #tpu.memory_space<vmem>>, vector<1x32xf32>
    %4 = vector.broadcast %3 : vector<1x32xf32> to vector<64x32xf32>
    %5 = arith.addf %2, %4 : vector<64x32xf32>
    %c0_5 = arith.constant 0 : index
    %c0_6 = arith.constant 0 : index
    %6 = vector.load %arg4[%c0_5, %c0_6] : memref<64x32xf32, #tpu.memory_space<vmem>>, vector<64x32xf32>
    %7 = arith.addf %5, %6 : vector<64x32xf32>
    %c0_7 = arith.constant 0 : index
    %c0_8 = arith.constant 0 : index
    %8 = vector.load %arg5[%c0_7, %c0_8] : memref<64x32xf32, #tpu.memory_space<vmem>>, vector<64x32xf32>
    tpu.vector_store %arg5[%c0_7, %c0_8], %7 {strides = array<i32>} : memref<64x32xf32, #tpu.memory_space<vmem>>, vector<64x32xf32>,
    %cst_9 = arith.constant dense<0.000000e+00> : vector<32xf32>
    %9 = vector.multi_reduction <add>, %7, %cst_9 [0] : vector<64x32xf32> to vector<32xf32>
    %10 = vector.shape_cast %9 : vector<32xf32> to vector<1x32xf32>
    %c0_10 = arith.constant 0 : index
    %c0_11 = arith.constant 0 : index
    %c0_12 = arith.constant 0 : index
    %11 = vector.load %arg6[%c0_10, %c0_11, %c0_12] : memref<1x2x32xf32, #tpu.memory_space<vmem>>, vector<1x1x32xf32>
    %12 = vector.shape_cast %11 : vector<1x1x32xf32> to vector<1x32xf32>
    %13 = vector.shape_cast %10 : vector<1x32xf32> to vector<1x1x32xf32>
    tpu.vector_store %arg6[%c0_10, %c0_11, %c0_12], %13 {strides = array<i32>} : memref<1x2x32xf32, #tpu.memory_space<vmem>>, vector<1x1x32xf32>,
    %14 = arith.mulf %7, %7 : vector<64x32xf32>
    %cst_13 = arith.constant dense<0.000000e+00> : vector<32xf32>
    %15 = vector.multi_reduction <add>, %14, %cst_13 [0] : vector<64x32xf32> to vector<32xf32>
    %16 = vector.shape_cast %15 : vector<32xf32> to vector<1x32xf32>
    %c0_14 = arith.constant 0 : index
    %c1 = arith.constant 1 : index
    %c0_15 = arith.constant 0 : index
    %17 = vector.load %arg6[%c0_14, %c1, %c0_15] : memref<1x2x32xf32, #tpu.memory_space<vmem>>, vector<1x1x32xf32>
    %18 = vector.shape_cast %17 : vector<1x1x32xf32> to vector<1x32xf32>
    %19 = vector.shape_cast %16 : vector<1x32xf32> to vector<1x1x32xf32>
    tpu.vector_store %arg6[%c0_14, %c1, %c0_15], %19 {strides = array<i32>} : memref<1x2x32xf32, #tpu.memory_space<vmem>>, vector<1x1x32xf32>,
    return
  }
  func.func @transform_0(%arg0: i32) -> (i32, i32) {
    %c0_i32 = arith.constant 0 : i32
    %c0_i32_0 = arith.constant 0 : i32
    return %arg0, %c0_i32 : i32, i32
  }
  func.func @transform_1(%arg0: i32) -> (i32, i32) {
    %c0_i32 = arith.constant 0 : i32
    %c0_i32_0 = arith.constant 0 : i32
    %c0_i32_1 = arith.constant 0 : i32
    return %c0_i32, %c0_i32_0 : i32, i32
  }
  func.func @transform_2(%arg0: i32) -> (i32, i32) {
    %c0_i32 = arith.constant 0 : i32
    %c0_i32_0 = arith.constant 0 : i32
    %c0_i32_1 = arith.constant 0 : i32
    return %c0_i32, %c0_i32_0 : i32, i32
  }
  func.func @transform_3(%arg0: i32) -> (i32, i32) {
    %c0_i32 = arith.constant 0 : i32
    %c0_i32_0 = arith.constant 0 : i32
    return %arg0, %c0_i32 : i32, i32
  }
  func.func @transform_4(%arg0: i32) -> (i32, i32) {
    %c0_i32 = arith.constant 0 : i32
    %c0_i32_0 = arith.constant 0 : i32
    return %arg0, %c0_i32 : i32, i32
  }
  func.func @transform_5(%arg0: i32) -> (i32, i32, i32) {
    %c0_i32 = arith.constant 0 : i32
    %c0_i32_0 = arith.constant 0 : i32
    %c0_i32_1 = arith.constant 0 : i32
    return %arg0, %c0_i32, %c0_i32_0 : i32, i32, i32
  }
}

module attributes {stable_mosaic.version = 11 : i64} {
  func.func @_ffn_res_stats_kernel(%arg0: i32, %arg1: memref<64x32xf32, #tpu.memory_space<vmem>>, %arg2: memref<1x32xf32, #tpu.memory_space<vmem>>, %arg3: memref<1x32xf32, #tpu.memory_space<vmem>>, %arg4: memref<32x64xbf16, #tpu.memory_space<vmem>>, %arg5: memref<1x64xf32, #tpu.memory_space<vmem>>, %arg6: memref<64x32xbf16, #tpu.memory_space<vmem>>, %arg7: memref<1x32xf32, #tpu.memory_space<vmem>>, %arg8: memref<64x32xf32, #tpu.memory_space<vmem>>, %arg9: memref<1x2x32xf32, #tpu.memory_space<vmem>>) attributes {dimension_semantics = [#tpu.dimension_semantics<parallel>], iteration_bounds = array<i64: 1>, scalar_prefetch = 0 : i64, scratch_operands = 0 : i64, tpu.core_type = #tpu.core_type<tc>, window_params = [{transform_indices = @transform_0, window_bounds = array<i64: 64, 32>}, {pipeline_mode = #tpu.pipeline_mode<synchronous>, transform_indices = @transform_1, window_bounds = array<i64: 1, 32>}, {pipeline_mode = #tpu.pipeline_mode<synchronous>, transform_indices = @transform_2, window_bounds = array<i64: 1, 32>}, {pipeline_mode = #tpu.pipeline_mode<synchronous>, transform_indices = @transform_3, window_bounds = array<i64: 32, 64>}, {pipeline_mode = #tpu.pipeline_mode<synchronous>, transform_indices = @transform_4, window_bounds = array<i64: 1, 64>}, {pipeline_mode = #tpu.pipeline_mode<synchronous>, transform_indices = @transform_5, window_bounds = array<i64: 64, 32>}, {pipeline_mode = #tpu.pipeline_mode<synchronous>, transform_indices = @transform_6, window_bounds = array<i64: 1, 32>}, {transform_indices = @transform_7, window_bounds = array<i64: 64, 32>}, {transform_indices = @transform_8, window_bounds = array<i64: 1, 2, 32>}]} {
    %c0 = arith.constant 0 : index
    %c0_0 = arith.constant 0 : index
    %0 = vector.load %arg1[%c0, %c0_0] : memref<64x32xf32, #tpu.memory_space<vmem>>, vector<64x32xf32>
    %c0_1 = arith.constant 0 : index
    %c0_2 = arith.constant 0 : index
    %1 = vector.load %arg2[%c0_1, %c0_2] : memref<1x32xf32, #tpu.memory_space<vmem>>, vector<1x32xf32>
    %2 = vector.broadcast %1 : vector<1x32xf32> to vector<64x32xf32>
    %3 = arith.mulf %0, %2 : vector<64x32xf32>
    %c0_3 = arith.constant 0 : index
    %c0_4 = arith.constant 0 : index
    %4 = vector.load %arg3[%c0_3, %c0_4] : memref<1x32xf32, #tpu.memory_space<vmem>>, vector<1x32xf32>
    %5 = vector.broadcast %4 : vector<1x32xf32> to vector<64x32xf32>
    %6 = arith.addf %3, %5 : vector<64x32xf32>
    %7 = arith.truncf %6 : vector<64x32xf32> to vector<64x32xbf16>
    %c0_5 = arith.constant 0 : index
    %c0_6 = arith.constant 0 : index
    %8 = vector.load %arg4[%c0_5, %c0_6] : memref<32x64xbf16, #tpu.memory_space<vmem>>, vector<32x64xbf16>
    %cst = arith.constant dense<0.000000e+00> : vector<64x64xf32>
    %9 = tpu.matmul %7, %8, %cst {dimension_numbers = #tpu.dot_dimension_numbers<[1], [0], [0], [1], [0, 0, 1, 1], [], []>} : vector<64x32xbf16>, vector<32x64xbf16>, vector<64x64xf32> -> vector<64x64xf32>
    %c0_7 = arith.constant 0 : index
    %c0_8 = arith.constant 0 : index
    %10 = vector.load %arg5[%c0_7, %c0_8] : memref<1x64xf32, #tpu.memory_space<vmem>>, vector<1x64xf32>
    %11 = vector.broadcast %10 : vector<1x64xf32> to vector<64x64xf32>
    %12 = arith.addf %9, %11 : vector<64x64xf32>
    %cst_9 = arith.constant 5.000000e-01 : f32
    %13 = vector.broadcast %cst_9 : f32 to vector<64x64xf32>
    %14 = arith.mulf %13, %12 : vector<64x64xf32>
    %cst_10 = arith.constant 4.471500e-02 : f32
    %15 = vector.broadcast %cst_10 : f32 to vector<64x64xf32>
    %16 = arith.mulf %15, %12 : vector<64x64xf32>
    %17 = arith.mulf %16, %12 : vector<64x64xf32>
    %18 = arith.mulf %17, %12 : vector<64x64xf32>
    %19 = arith.addf %12, %18 : vector<64x64xf32>
    %cst_11 = arith.constant 0.797884583 : f32
    %20 = vector.broadcast %cst_11 : f32 to vector<64x64xf32>
    %21 = arith.mulf %20, %19 : vector<64x64xf32>
    %22 = math.tanh %21 : vector<64x64xf32>
    %cst_12 = arith.constant 1.000000e+00 : f32
    %23 = vector.broadcast %cst_12 : f32 to vector<64x64xf32>
    %24 = arith.addf %23, %22 : vector<64x64xf32>
    %25 = arith.mulf %14, %24 : vector<64x64xf32>
    %26 = arith.truncf %25 : vector<64x64xf32> to vector<64x64xbf16>
    %c0_13 = arith.constant 0 : index
    %c0_14 = arith.constant 0 : index
    %27 = vector.load %arg6[%c0_13, %c0_14] : memref<64x32xbf16, #tpu.memory_space<vmem>>, vector<64x32xbf16>
    %cst_15 = arith.constant dense<0.000000e+00> : vector<64x32xf32>
    %28 = tpu.matmul %26, %27, %cst_15 {dimension_numbers = #tpu.dot_dimension_numbers<[1], [0], [0], [1], [0, 0, 1, 1], [], []>} : vector<64x64xbf16>, vector<64x32xbf16>, vector<64x32xf32> -> vector<64x32xf32>
    %c0_16 = arith.constant 0 : index
    %c0_17 = arith.constant 0 : index
    %29 = vector.load %arg7[%c0_16, %c0_17] : memref<1x32xf32, #tpu.memory_space<vmem>>, vector<1x32xf32>
    %30 = vector.broadcast %29 : vector<1x32xf32> to vector<64x32xf32>
    %31 = arith.addf %28, %30 : vector<64x32xf32>
    %32 = arith.addf %6, %31 : vector<64x32xf32>
    %c0_18 = arith.constant 0 : index
    %c0_19 = arith.constant 0 : index
    %33 = vector.load %arg8[%c0_18, %c0_19] : memref<64x32xf32, #tpu.memory_space<vmem>>, vector<64x32xf32>
    tpu.vector_store %arg8[%c0_18, %c0_19], %32 {strides = array<i32>} : memref<64x32xf32, #tpu.memory_space<vmem>>, vector<64x32xf32>,
    %cst_20 = arith.constant dense<0.000000e+00> : vector<32xf32>
    %34 = vector.multi_reduction <add>, %32, %cst_20 [0] : vector<64x32xf32> to vector<32xf32>
    %35 = vector.shape_cast %34 : vector<32xf32> to vector<1x32xf32>
    %c0_21 = arith.constant 0 : index
    %c0_22 = arith.constant 0 : index
    %c0_23 = arith.constant 0 : index
    %36 = vector.load %arg9[%c0_21, %c0_22, %c0_23] : memref<1x2x32xf32, #tpu.memory_space<vmem>>, vector<1x1x32xf32>
    %37 = vector.shape_cast %36 : vector<1x1x32xf32> to vector<1x32xf32>
    %38 = vector.shape_cast %35 : vector<1x32xf32> to vector<1x1x32xf32>
    tpu.vector_store %arg9[%c0_21, %c0_22, %c0_23], %38 {strides = array<i32>} : memref<1x2x32xf32, #tpu.memory_space<vmem>>, vector<1x1x32xf32>,
    %39 = arith.mulf %32, %32 : vector<64x32xf32>
    %cst_24 = arith.constant dense<0.000000e+00> : vector<32xf32>
    %40 = vector.multi_reduction <add>, %39, %cst_24 [0] : vector<64x32xf32> to vector<32xf32>
    %41 = vector.shape_cast %40 : vector<32xf32> to vector<1x32xf32>
    %c0_25 = arith.constant 0 : index
    %c1 = arith.constant 1 : index
    %c0_26 = arith.constant 0 : index
    %42 = vector.load %arg9[%c0_25, %c1, %c0_26] : memref<1x2x32xf32, #tpu.memory_space<vmem>>, vector<1x1x32xf32>
    %43 = vector.shape_cast %42 : vector<1x1x32xf32> to vector<1x32xf32>
    %44 = vector.shape_cast %41 : vector<1x32xf32> to vector<1x1x32xf32>
    tpu.vector_store %arg9[%c0_25, %c1, %c0_26], %44 {strides = array<i32>} : memref<1x2x32xf32, #tpu.memory_space<vmem>>, vector<1x1x32xf32>,
    return
  }
  func.func @transform_0(%arg0: i32) -> (i32, i32) {
    %c0_i32 = arith.constant 0 : i32
    %c0_i32_0 = arith.constant 0 : i32
    return %arg0, %c0_i32 : i32, i32
  }
  func.func @transform_1(%arg0: i32) -> (i32, i32) {
    %c0_i32 = arith.constant 0 : i32
    %c0_i32_0 = arith.constant 0 : i32
    %c0_i32_1 = arith.constant 0 : i32
    return %c0_i32, %c0_i32_0 : i32, i32
  }
  func.func @transform_2(%arg0: i32) -> (i32, i32) {
    %c0_i32 = arith.constant 0 : i32
    %c0_i32_0 = arith.constant 0 : i32
    %c0_i32_1 = arith.constant 0 : i32
    return %c0_i32, %c0_i32_0 : i32, i32
  }
  func.func @transform_3(%arg0: i32) -> (i32, i32) {
    %c0_i32 = arith.constant 0 : i32
    %c0_i32_0 = arith.constant 0 : i32
    %c0_i32_1 = arith.constant 0 : i32
    return %c0_i32, %c0_i32_0 : i32, i32
  }
  func.func @transform_4(%arg0: i32) -> (i32, i32) {
    %c0_i32 = arith.constant 0 : i32
    %c0_i32_0 = arith.constant 0 : i32
    %c0_i32_1 = arith.constant 0 : i32
    return %c0_i32, %c0_i32_0 : i32, i32
  }
  func.func @transform_5(%arg0: i32) -> (i32, i32) {
    %c0_i32 = arith.constant 0 : i32
    %c0_i32_0 = arith.constant 0 : i32
    %c0_i32_1 = arith.constant 0 : i32
    return %c0_i32, %c0_i32_0 : i32, i32
  }
  func.func @transform_6(%arg0: i32) -> (i32, i32) {
    %c0_i32 = arith.constant 0 : i32
    %c0_i32_0 = arith.constant 0 : i32
    %c0_i32_1 = arith.constant 0 : i32
    return %c0_i32, %c0_i32_0 : i32, i32
  }
  func.func @transform_7(%arg0: i32) -> (i32, i32) {
    %c0_i32 = arith.constant 0 : i32
    %c0_i32_0 = arith.constant 0 : i32
    return %arg0, %c0_i32 : i32, i32
  }
  func.func @transform_8(%arg0: i32) -> (i32, i32, i32) {
    %c0_i32 = arith.constant 0 : i32
    %c0_i32_0 = arith.constant 0 : i32
    %c0_i32_1 = arith.constant 0 : i32
    return %arg0, %c0_i32, %c0_i32_0 : i32, i32, i32
  }
}

module attributes {stable_mosaic.version = 11 : i64} {
  func.func @_feature_mix_kernel(%arg0: i32, %arg1: memref<2x4x256xf32, #tpu.memory_space<vmem>>, %arg2: memref<1x256xf32, #tpu.memory_space<vmem>>, %arg3: memref<1x256xf32, #tpu.memory_space<vmem>>, %arg4: memref<64x4xbf16, #tpu.memory_space<vmem>>, %arg5: memref<64x1xf32, #tpu.memory_space<vmem>>, %arg6: memref<4x64xbf16, #tpu.memory_space<vmem>>, %arg7: memref<4x1xf32, #tpu.memory_space<vmem>>, %arg8: memref<2x4x256xf32, #tpu.memory_space<vmem>>, %arg9: memref<1x2x256xf32, #tpu.memory_space<vmem>>) attributes {dimension_semantics = [#tpu.dimension_semantics<parallel>], iteration_bounds = array<i64: 1>, scalar_prefetch = 0 : i64, scratch_operands = 0 : i64, tpu.core_type = #tpu.core_type<tc>, window_params = [{transform_indices = @transform_0, window_bounds = array<i64: 2, 4, 256>}, {pipeline_mode = #tpu.pipeline_mode<synchronous>, transform_indices = @transform_1, window_bounds = array<i64: 1, 256>}, {pipeline_mode = #tpu.pipeline_mode<synchronous>, transform_indices = @transform_2, window_bounds = array<i64: 1, 256>}, {pipeline_mode = #tpu.pipeline_mode<synchronous>, transform_indices = @transform_3, window_bounds = array<i64: 64, 4>}, {pipeline_mode = #tpu.pipeline_mode<synchronous>, transform_indices = @transform_4, window_bounds = array<i64: 64, 1>}, {pipeline_mode = #tpu.pipeline_mode<synchronous>, transform_indices = @transform_5, window_bounds = array<i64: 4, 64>}, {pipeline_mode = #tpu.pipeline_mode<synchronous>, transform_indices = @transform_6, window_bounds = array<i64: 4, 1>}, {transform_indices = @transform_7, window_bounds = array<i64: 2, 4, 256>}, {transform_indices = @transform_8, window_bounds = array<i64: 1, 2, 256>}]} {
    %c0 = arith.constant 0 : index
    %c0_0 = arith.constant 0 : index
    %0 = vector.load %arg2[%c0, %c0_0] : memref<1x256xf32, #tpu.memory_space<vmem>>, vector<1x256xf32>
    %c0_1 = arith.constant 0 : index
    %c0_2 = arith.constant 0 : index
    %1 = vector.load %arg3[%c0_1, %c0_2] : memref<1x256xf32, #tpu.memory_space<vmem>>, vector<1x256xf32>
    %c0_3 = arith.constant 0 : index
    %c0_4 = arith.constant 0 : index
    %2 = vector.load %arg4[%c0_3, %c0_4] : memref<64x4xbf16, #tpu.memory_space<vmem>>, vector<64x4xbf16>
    %c0_5 = arith.constant 0 : index
    %c0_6 = arith.constant 0 : index
    %3 = vector.load %arg5[%c0_5, %c0_6] : memref<64x1xf32, #tpu.memory_space<vmem>>, vector<64x1xf32>
    %c0_7 = arith.constant 0 : index
    %c0_8 = arith.constant 0 : index
    %4 = vector.load %arg6[%c0_7, %c0_8] : memref<4x64xbf16, #tpu.memory_space<vmem>>, vector<4x64xbf16>
    %c0_9 = arith.constant 0 : index
    %c0_10 = arith.constant 0 : index
    %5 = vector.load %arg7[%c0_9, %c0_10] : memref<4x1xf32, #tpu.memory_space<vmem>>, vector<4x1xf32>
    %c0_11 = arith.constant 0 : index
    %c0_12 = arith.constant 0 : index
    %c0_13 = arith.constant 0 : index
    %6 = vector.load %arg1[%c0_11, %c0_12, %c0_13] : memref<2x4x256xf32, #tpu.memory_space<vmem>>, vector<1x4x256xf32>
    %7 = vector.shape_cast %6 : vector<1x4x256xf32> to vector<4x256xf32>
    %8 = vector.broadcast %0 : vector<1x256xf32> to vector<4x256xf32>
    %9 = arith.mulf %7, %8 : vector<4x256xf32>
    %10 = vector.broadcast %1 : vector<1x256xf32> to vector<4x256xf32>
    %11 = arith.addf %9, %10 : vector<4x256xf32>
    %12 = arith.truncf %11 : vector<4x256xf32> to vector<4x256xbf16>
    %cst = arith.constant dense<0.000000e+00> : vector<64x256xf32>
    %13 = tpu.matmul %2, %12, %cst {dimension_numbers = #tpu.dot_dimension_numbers<[1], [0], [0], [1], [0, 0, 1, 1], [], []>} : vector<64x4xbf16>, vector<4x256xbf16>, vector<64x256xf32> -> vector<64x256xf32>
    %14 = vector.broadcast %3 : vector<64x1xf32> to vector<64x256xf32>
    %15 = arith.addf %13, %14 : vector<64x256xf32>
    %cst_14 = arith.constant 5.000000e-01 : f32
    %16 = vector.broadcast %cst_14 : f32 to vector<64x256xf32>
    %17 = arith.mulf %16, %15 : vector<64x256xf32>
    %cst_15 = arith.constant 4.471500e-02 : f32
    %18 = vector.broadcast %cst_15 : f32 to vector<64x256xf32>
    %19 = arith.mulf %18, %15 : vector<64x256xf32>
    %20 = arith.mulf %19, %15 : vector<64x256xf32>
    %21 = arith.mulf %20, %15 : vector<64x256xf32>
    %22 = arith.addf %15, %21 : vector<64x256xf32>
    %cst_16 = arith.constant 0.797884583 : f32
    %23 = vector.broadcast %cst_16 : f32 to vector<64x256xf32>
    %24 = arith.mulf %23, %22 : vector<64x256xf32>
    %25 = math.tanh %24 : vector<64x256xf32>
    %cst_17 = arith.constant 1.000000e+00 : f32
    %26 = vector.broadcast %cst_17 : f32 to vector<64x256xf32>
    %27 = arith.addf %26, %25 : vector<64x256xf32>
    %28 = arith.mulf %17, %27 : vector<64x256xf32>
    %29 = arith.truncf %28 : vector<64x256xf32> to vector<64x256xbf16>
    %cst_18 = arith.constant dense<0.000000e+00> : vector<4x256xf32>
    %30 = tpu.matmul %4, %29, %cst_18 {dimension_numbers = #tpu.dot_dimension_numbers<[1], [0], [0], [1], [0, 0, 1, 1], [], []>} : vector<4x64xbf16>, vector<64x256xbf16>, vector<4x256xf32> -> vector<4x256xf32>
    %31 = vector.broadcast %5 : vector<4x1xf32> to vector<4x256xf32>
    %32 = arith.addf %30, %31 : vector<4x256xf32>
    %c0_19 = arith.constant 0 : index
    %c0_20 = arith.constant 0 : index
    %c0_21 = arith.constant 0 : index
    %33 = vector.load %arg8[%c0_19, %c0_20, %c0_21] : memref<2x4x256xf32, #tpu.memory_space<vmem>>, vector<1x4x256xf32>
    %34 = vector.shape_cast %33 : vector<1x4x256xf32> to vector<4x256xf32>
    %35 = vector.shape_cast %32 : vector<4x256xf32> to vector<1x4x256xf32>
    tpu.vector_store %arg8[%c0_19, %c0_20, %c0_21], %35 {strides = array<i32>} : memref<2x4x256xf32, #tpu.memory_space<vmem>>, vector<1x4x256xf32>,
    %cst_22 = arith.constant dense<0.000000e+00> : vector<256xf32>
    %36 = vector.multi_reduction <add>, %32, %cst_22 [0] : vector<4x256xf32> to vector<256xf32>
    %37 = vector.shape_cast %36 : vector<256xf32> to vector<1x256xf32>
    %38 = arith.mulf %32, %32 : vector<4x256xf32>
    %cst_23 = arith.constant dense<0.000000e+00> : vector<256xf32>
    %39 = vector.multi_reduction <add>, %38, %cst_23 [0] : vector<4x256xf32> to vector<256xf32>
    %40 = vector.shape_cast %39 : vector<256xf32> to vector<1x256xf32>
    %c1 = arith.constant 1 : index
    %c0_24 = arith.constant 0 : index
    %c0_25 = arith.constant 0 : index
    %41 = vector.load %arg1[%c1, %c0_24, %c0_25] : memref<2x4x256xf32, #tpu.memory_space<vmem>>, vector<1x4x256xf32>
    %42 = vector.shape_cast %41 : vector<1x4x256xf32> to vector<4x256xf32>
    %43 = vector.broadcast %0 : vector<1x256xf32> to vector<4x256xf32>
    %44 = arith.mulf %42, %43 : vector<4x256xf32>
    %45 = vector.broadcast %1 : vector<1x256xf32> to vector<4x256xf32>
    %46 = arith.addf %44, %45 : vector<4x256xf32>
    %47 = arith.truncf %46 : vector<4x256xf32> to vector<4x256xbf16>
    %cst_26 = arith.constant dense<0.000000e+00> : vector<64x256xf32>
    %48 = tpu.matmul %2, %47, %cst_26 {dimension_numbers = #tpu.dot_dimension_numbers<[1], [0], [0], [1], [0, 0, 1, 1], [], []>} : vector<64x4xbf16>, vector<4x256xbf16>, vector<64x256xf32> -> vector<64x256xf32>
    %49 = vector.broadcast %3 : vector<64x1xf32> to vector<64x256xf32>
    %50 = arith.addf %48, %49 : vector<64x256xf32>
    %cst_27 = arith.constant 5.000000e-01 : f32
    %51 = vector.broadcast %cst_27 : f32 to vector<64x256xf32>
    %52 = arith.mulf %51, %50 : vector<64x256xf32>
    %cst_28 = arith.constant 4.471500e-02 : f32
    %53 = vector.broadcast %cst_28 : f32 to vector<64x256xf32>
    %54 = arith.mulf %53, %50 : vector<64x256xf32>
    %55 = arith.mulf %54, %50 : vector<64x256xf32>
    %56 = arith.mulf %55, %50 : vector<64x256xf32>
    %57 = arith.addf %50, %56 : vector<64x256xf32>
    %cst_29 = arith.constant 0.797884583 : f32
    %58 = vector.broadcast %cst_29 : f32 to vector<64x256xf32>
    %59 = arith.mulf %58, %57 : vector<64x256xf32>
    %60 = math.tanh %59 : vector<64x256xf32>
    %cst_30 = arith.constant 1.000000e+00 : f32
    %61 = vector.broadcast %cst_30 : f32 to vector<64x256xf32>
    %62 = arith.addf %61, %60 : vector<64x256xf32>
    %63 = arith.mulf %52, %62 : vector<64x256xf32>
    %64 = arith.truncf %63 : vector<64x256xf32> to vector<64x256xbf16>
    %cst_31 = arith.constant dense<0.000000e+00> : vector<4x256xf32>
    %65 = tpu.matmul %4, %64, %cst_31 {dimension_numbers = #tpu.dot_dimension_numbers<[1], [0], [0], [1], [0, 0, 1, 1], [], []>} : vector<4x64xbf16>, vector<64x256xbf16>, vector<4x256xf32> -> vector<4x256xf32>
    %66 = vector.broadcast %5 : vector<4x1xf32> to vector<4x256xf32>
    %67 = arith.addf %65, %66 : vector<4x256xf32>
    %c1_32 = arith.constant 1 : index
    %c0_33 = arith.constant 0 : index
    %c0_34 = arith.constant 0 : index
    %68 = vector.load %arg8[%c1_32, %c0_33, %c0_34] : memref<2x4x256xf32, #tpu.memory_space<vmem>>, vector<1x4x256xf32>
    %69 = vector.shape_cast %68 : vector<1x4x256xf32> to vector<4x256xf32>
    %70 = vector.shape_cast %67 : vector<4x256xf32> to vector<1x4x256xf32>
    tpu.vector_store %arg8[%c1_32, %c0_33, %c0_34], %70 {strides = array<i32>} : memref<2x4x256xf32, #tpu.memory_space<vmem>>, vector<1x4x256xf32>,
    %cst_35 = arith.constant dense<0.000000e+00> : vector<256xf32>
    %71 = vector.multi_reduction <add>, %67, %cst_35 [0] : vector<4x256xf32> to vector<256xf32>
    %72 = vector.shape_cast %71 : vector<256xf32> to vector<1x256xf32>
    %73 = arith.mulf %67, %67 : vector<4x256xf32>
    %cst_36 = arith.constant dense<0.000000e+00> : vector<256xf32>
    %74 = vector.multi_reduction <add>, %73, %cst_36 [0] : vector<4x256xf32> to vector<256xf32>
    %75 = vector.shape_cast %74 : vector<256xf32> to vector<1x256xf32>
    %76 = arith.addf %37, %72 : vector<1x256xf32>
    %77 = arith.addf %40, %75 : vector<1x256xf32>
    %c0_37 = arith.constant 0 : index
    %c0_38 = arith.constant 0 : index
    %c0_39 = arith.constant 0 : index
    %78 = vector.load %arg9[%c0_37, %c0_38, %c0_39] : memref<1x2x256xf32, #tpu.memory_space<vmem>>, vector<1x1x256xf32>
    %79 = vector.shape_cast %78 : vector<1x1x256xf32> to vector<1x256xf32>
    %80 = vector.shape_cast %76 : vector<1x256xf32> to vector<1x1x256xf32>
    tpu.vector_store %arg9[%c0_37, %c0_38, %c0_39], %80 {strides = array<i32>} : memref<1x2x256xf32, #tpu.memory_space<vmem>>, vector<1x1x256xf32>,
    %c0_40 = arith.constant 0 : index
    %c1_41 = arith.constant 1 : index
    %c0_42 = arith.constant 0 : index
    %81 = vector.load %arg9[%c0_40, %c1_41, %c0_42] : memref<1x2x256xf32, #tpu.memory_space<vmem>>, vector<1x1x256xf32>
    %82 = vector.shape_cast %81 : vector<1x1x256xf32> to vector<1x256xf32>
    %83 = vector.shape_cast %77 : vector<1x256xf32> to vector<1x1x256xf32>
    tpu.vector_store %arg9[%c0_40, %c1_41, %c0_42], %83 {strides = array<i32>} : memref<1x2x256xf32, #tpu.memory_space<vmem>>, vector<1x1x256xf32>,
    return
  }
  func.func @transform_0(%arg0: i32) -> (i32, i32, i32) {
    %c0_i32 = arith.constant 0 : i32
    %c0_i32_0 = arith.constant 0 : i32
    %c0_i32_1 = arith.constant 0 : i32
    return %arg0, %c0_i32, %c0_i32_0 : i32, i32, i32
  }
  func.func @transform_1(%arg0: i32) -> (i32, i32) {
    %c0_i32 = arith.constant 0 : i32
    %c0_i32_0 = arith.constant 0 : i32
    %c0_i32_1 = arith.constant 0 : i32
    return %c0_i32, %c0_i32_0 : i32, i32
  }
  func.func @transform_2(%arg0: i32) -> (i32, i32) {
    %c0_i32 = arith.constant 0 : i32
    %c0_i32_0 = arith.constant 0 : i32
    %c0_i32_1 = arith.constant 0 : i32
    return %c0_i32, %c0_i32_0 : i32, i32
  }
  func.func @transform_3(%arg0: i32) -> (i32, i32) {
    %c0_i32 = arith.constant 0 : i32
    %c0_i32_0 = arith.constant 0 : i32
    %c0_i32_1 = arith.constant 0 : i32
    return %c0_i32, %c0_i32_0 : i32, i32
  }
  func.func @transform_4(%arg0: i32) -> (i32, i32) {
    %c0_i32 = arith.constant 0 : i32
    %c0_i32_0 = arith.constant 0 : i32
    %c0_i32_1 = arith.constant 0 : i32
    return %c0_i32, %c0_i32_0 : i32, i32
  }
  func.func @transform_5(%arg0: i32) -> (i32, i32) {
    %c0_i32 = arith.constant 0 : i32
    %c0_i32_0 = arith.constant 0 : i32
    %c0_i32_1 = arith.constant 0 : i32
    return %c0_i32, %c0_i32_0 : i32, i32
  }
  func.func @transform_6(%arg0: i32) -> (i32, i32) {
    %c0_i32 = arith.constant 0 : i32
    %c0_i32_0 = arith.constant 0 : i32
    %c0_i32_1 = arith.constant 0 : i32
    return %c0_i32, %c0_i32_0 : i32, i32
  }
  func.func @transform_7(%arg0: i32) -> (i32, i32, i32) {
    %c0_i32 = arith.constant 0 : i32
    %c0_i32_0 = arith.constant 0 : i32
    %c0_i32_1 = arith.constant 0 : i32
    return %arg0, %c0_i32, %c0_i32_0 : i32, i32, i32
  }
  func.func @transform_8(%arg0: i32) -> (i32, i32, i32) {
    %c0_i32 = arith.constant 0 : i32
    %c0_i32_0 = arith.constant 0 : i32
    %c0_i32_1 = arith.constant 0 : i32
    return %arg0, %c0_i32, %c0_i32_0 : i32, i32, i32
  }
}

module attributes {stable_mosaic.version = 11 : i64} {
  func.func @kernel(%arg0: i32, %arg1: memref<32x8x8xbf16, #tpu.memory_space<vmem>>, %arg2: memref<32x8x8xbf16, #tpu.memory_space<vmem>>, %arg3: memref<32x8x8xbf16, #tpu.memory_space<vmem>>, %arg4: memref<32x8x8xf32, #tpu.memory_space<vmem>>, %arg5: memref<32x8x8xbf16, #tpu.memory_space<vmem>>) attributes {dimension_semantics = [#tpu.dimension_semantics<parallel>], iteration_bounds = array<i64: 1>, scalar_prefetch = 0 : i64, scratch_operands = 0 : i64, tpu.core_type = #tpu.core_type<tc>, window_params = [{transform_indices = @transform_0, window_bounds = array<i64: 32, 8, 8>}, {transform_indices = @transform_1, window_bounds = array<i64: 32, 8, 8>}, {transform_indices = @transform_2, window_bounds = array<i64: 32, 8, 8>}, {transform_indices = @transform_3, window_bounds = array<i64: 32, 8, 8>}, {transform_indices = @transform_4, window_bounds = array<i64: 32, 8, 8>}]} {
    %c0 = arith.constant 0 : index
    %c0_0 = arith.constant 0 : index
    %c0_1 = arith.constant 0 : index
    %0 = vector.load %arg1[%c0, %c0_0, %c0_1] : memref<32x8x8xbf16, #tpu.memory_space<vmem>>, vector<32x8x8xbf16>
    %c0_2 = arith.constant 0 : index
    %c0_3 = arith.constant 0 : index
    %c0_4 = arith.constant 0 : index
    %1 = vector.load %arg2[%c0_2, %c0_3, %c0_4] : memref<32x8x8xbf16, #tpu.memory_space<vmem>>, vector<32x8x8xbf16>
    "tpu.trace_start"() <{level = 10 : i32, message = "bqd,bkd->bqk"}> : () -> ()
    %cst = arith.constant dense<0.000000e+00> : vector<32x8x8xf32>
    %2 = tpu.matmul %0, %1, %cst {dimension_numbers = #tpu.dot_dimension_numbers<[2], [2], [1], [1], [0, 0, 0, 1, 1, 1], [0], [0]>} : vector<32x8x8xbf16>, vector<32x8x8xbf16>, vector<32x8x8xf32> -> vector<32x8x8xf32>
    "tpu.trace_stop"() : () -> ()
    %c0_5 = arith.constant 0 : index
    %c0_6 = arith.constant 0 : index
    %c0_7 = arith.constant 0 : index
    %3 = vector.load %arg4[%c0_5, %c0_6, %c0_7] : memref<32x8x8xf32, #tpu.memory_space<vmem>>, vector<32x8x8xf32>
    %4 = arith.addf %2, %3 : vector<32x8x8xf32>
    %cst_8 = arith.constant dense<0xFF800000> : vector<32x8xf32>
    %5 = vector.multi_reduction <maximumf>, %4, %cst_8 [2] : vector<32x8x8xf32> to vector<32x8xf32>
    %6 = vector.shape_cast %5 : vector<32x8xf32> to vector<32x8x1xf32>
    %7 = vector.broadcast %6 : vector<32x8x1xf32> to vector<32x8x8xf32>
    %8 = arith.subf %4, %7 : vector<32x8x8xf32>
    %9 = math.exp %8 : vector<32x8x8xf32>
    %cst_9 = arith.constant dense<0.000000e+00> : vector<32x8xf32>
    %10 = vector.multi_reduction <add>, %9, %cst_9 [2] : vector<32x8x8xf32> to vector<32x8xf32>
    %11 = vector.shape_cast %10 : vector<32x8xf32> to vector<32x8x1xf32>
    %12 = vector.broadcast %11 : vector<32x8x1xf32> to vector<32x8x8xf32>
    %13 = arith.divf %9, %12 : vector<32x8x8xf32>
    %14 = arith.truncf %13 : vector<32x8x8xf32> to vector<32x8x8xbf16>
    %c0_10 = arith.constant 0 : index
    %c0_11 = arith.constant 0 : index
    %c0_12 = arith.constant 0 : index
    %15 = vector.load %arg3[%c0_10, %c0_11, %c0_12] : memref<32x8x8xbf16, #tpu.memory_space<vmem>>, vector<32x8x8xbf16>
    "tpu.trace_start"() <{level = 10 : i32, message = "bqk,bkd->bqd"}> : () -> ()
    %cst_13 = arith.constant dense<0.000000e+00> : vector<32x8x8xf32>
    %16 = tpu.matmul %14, %15, %cst_13 {dimension_numbers = #tpu.dot_dimension_numbers<[2], [1], [1], [2], [0, 0, 0, 1, 1, 2], [0], [0]>} : vector<32x8x8xbf16>, vector<32x8x8xbf16>, vector<32x8x8xf32> -> vector<32x8x8xf32>
    "tpu.trace_stop"() : () -> ()
    %17 = arith.truncf %16 : vector<32x8x8xf32> to vector<32x8x8xbf16>
    %c0_14 = arith.constant 0 : index
    %c0_15 = arith.constant 0 : index
    %c0_16 = arith.constant 0 : index
    %18 = vector.load %arg5[%c0_14, %c0_15, %c0_16] : memref<32x8x8xbf16, #tpu.memory_space<vmem>>, vector<32x8x8xbf16>
    tpu.vector_store %arg5[%c0_14, %c0_15, %c0_16], %17 {strides = array<i32>} : memref<32x8x8xbf16, #tpu.memory_space<vmem>>, vector<32x8x8xbf16>,
    return
  }
  func.func @transform_0(%arg0: i32) -> (i32, i32, i32) {
    %c0_i32 = arith.constant 0 : i32
    %c0_i32_0 = arith.constant 0 : i32
    %c0_i32_1 = arith.constant 0 : i32
    return %arg0, %c0_i32, %c0_i32_0 : i32, i32, i32
  }
  func.func @transform_1(%arg0: i32) -> (i32, i32, i32) {
    %c0_i32 = arith.constant 0 : i32
    %c0_i32_0 = arith.constant 0 : i32
    %c0_i32_1 = arith.constant 0 : i32
    return %arg0, %c0_i32, %c0_i32_0 : i32, i32, i32
  }
  func.func @transform_2(%arg0: i32) -> (i32, i32, i32) {
    %c0_i32 = arith.constant 0 : i32
    %c0_i32_0 = arith.constant 0 : i32
    %c0_i32_1 = arith.constant 0 : i32
    return %arg0, %c0_i32, %c0_i32_0 : i32, i32, i32
  }
  func.func @transform_3(%arg0: i32) -> (i32, i32, i32) {
    %c0_i32 = arith.constant 0 : i32
    %c0_i32_0 = arith.constant 0 : i32
    %c0_i32_1 = arith.constant 0 : i32
    return %arg0, %c0_i32, %c0_i32_0 : i32, i32, i32
  }
  func.func @transform_4(%arg0: i32) -> (i32, i32, i32) {
    %c0_i32 = arith.constant 0 : i32
    %c0_i32_0 = arith.constant 0 : i32
    %c0_i32_1 = arith.constant 0 : i32
    return %arg0, %c0_i32, %c0_i32_0 : i32, i32, i32
  }
}

module attributes {stable_mosaic.version = 11 : i64} {
  func.func @_combine_kernel(%arg0: i32, %arg1: memref<64x32xf32, #tpu.memory_space<vmem>>, %arg2: memref<64x32xf32, #tpu.memory_space<vmem>>, %arg3: memref<1x32xf32, #tpu.memory_space<vmem>>, %arg4: memref<1x32xf32, #tpu.memory_space<vmem>>, %arg5: memref<1x32xf32, #tpu.memory_space<vmem>>, %arg6: memref<1x32xf32, #tpu.memory_space<vmem>>, %arg7: memref<64x32xf32, #tpu.memory_space<vmem>>) attributes {dimension_semantics = [#tpu.dimension_semantics<parallel>], iteration_bounds = array<i64: 1>, scalar_prefetch = 0 : i64, scratch_operands = 0 : i64, tpu.core_type = #tpu.core_type<tc>, window_params = [{transform_indices = @transform_0, window_bounds = array<i64: 64, 32>}, {transform_indices = @transform_1, window_bounds = array<i64: 64, 32>}, {pipeline_mode = #tpu.pipeline_mode<synchronous>, transform_indices = @transform_2, window_bounds = array<i64: 1, 32>}, {pipeline_mode = #tpu.pipeline_mode<synchronous>, transform_indices = @transform_3, window_bounds = array<i64: 1, 32>}, {pipeline_mode = #tpu.pipeline_mode<synchronous>, transform_indices = @transform_4, window_bounds = array<i64: 1, 32>}, {pipeline_mode = #tpu.pipeline_mode<synchronous>, transform_indices = @transform_5, window_bounds = array<i64: 1, 32>}, {transform_indices = @transform_6, window_bounds = array<i64: 64, 32>}]} {
    %c0 = arith.constant 0 : index
    %c0_0 = arith.constant 0 : index
    %0 = vector.load %arg1[%c0, %c0_0] : memref<64x32xf32, #tpu.memory_space<vmem>>, vector<64x32xf32>
    %c0_1 = arith.constant 0 : index
    %c0_2 = arith.constant 0 : index
    %1 = vector.load %arg3[%c0_1, %c0_2] : memref<1x32xf32, #tpu.memory_space<vmem>>, vector<1x32xf32>
    %2 = vector.broadcast %1 : vector<1x32xf32> to vector<64x32xf32>
    %3 = arith.mulf %0, %2 : vector<64x32xf32>
    %c0_3 = arith.constant 0 : index
    %c0_4 = arith.constant 0 : index
    %4 = vector.load %arg4[%c0_3, %c0_4] : memref<1x32xf32, #tpu.memory_space<vmem>>, vector<1x32xf32>
    %5 = vector.broadcast %4 : vector<1x32xf32> to vector<64x32xf32>
    %6 = arith.addf %3, %5 : vector<64x32xf32>
    %c0_5 = arith.constant 0 : index
    %c0_6 = arith.constant 0 : index
    %7 = vector.load %arg2[%c0_5, %c0_6] : memref<64x32xf32, #tpu.memory_space<vmem>>, vector<64x32xf32>
    %c0_7 = arith.constant 0 : index
    %c0_8 = arith.constant 0 : index
    %8 = vector.load %arg5[%c0_7, %c0_8] : memref<1x32xf32, #tpu.memory_space<vmem>>, vector<1x32xf32>
    %9 = vector.broadcast %8 : vector<1x32xf32> to vector<64x32xf32>
    %10 = arith.mulf %7, %9 : vector<64x32xf32>
    %c0_9 = arith.constant 0 : index
    %c0_10 = arith.constant 0 : index
    %11 = vector.load %arg6[%c0_9, %c0_10] : memref<1x32xf32, #tpu.memory_space<vmem>>, vector<1x32xf32>
    %12 = vector.broadcast %11 : vector<1x32xf32> to vector<64x32xf32>
    %13 = arith.addf %10, %12 : vector<64x32xf32>
    %14 = arith.addf %6, %13 : vector<64x32xf32>
    %c0_11 = arith.constant 0 : index
    %c0_12 = arith.constant 0 : index
    %15 = vector.load %arg7[%c0_11, %c0_12] : memref<64x32xf32, #tpu.memory_space<vmem>>, vector<64x32xf32>
    tpu.vector_store %arg7[%c0_11, %c0_12], %14 {strides = array<i32>} : memref<64x32xf32, #tpu.memory_space<vmem>>, vector<64x32xf32>,
    return
  }
  func.func @transform_0(%arg0: i32) -> (i32, i32) {
    %c0_i32 = arith.constant 0 : i32
    %c0_i32_0 = arith.constant 0 : i32
    return %arg0, %c0_i32 : i32, i32
  }
  func.func @transform_1(%arg0: i32) -> (i32, i32) {
    %c0_i32 = arith.constant 0 : i32
    %c0_i32_0 = arith.constant 0 : i32
    return %arg0, %c0_i32 : i32, i32
  }
  func.func @transform_2(%arg0: i32) -> (i32, i32) {
    %c0_i32 = arith.constant 0 : i32
    %c0_i32_0 = arith.constant 0 : i32
    %c0_i32_1 = arith.constant 0 : i32
    return %c0_i32, %c0_i32_0 : i32, i32
  }
  func.func @transform_3(%arg0: i32) -> (i32, i32) {
    %c0_i32 = arith.constant 0 : i32
    %c0_i32_0 = arith.constant 0 : i32
    %c0_i32_1 = arith.constant 0 : i32
    return %c0_i32, %c0_i32_0 : i32, i32
  }
  func.func @transform_4(%arg0: i32) -> (i32, i32) {
    %c0_i32 = arith.constant 0 : i32
    %c0_i32_0 = arith.constant 0 : i32
    %c0_i32_1 = arith.constant 0 : i32
    return %c0_i32, %c0_i32_0 : i32, i32
  }
  func.func @transform_5(%arg0: i32) -> (i32, i32) {
    %c0_i32 = arith.constant 0 : i32
    %c0_i32_0 = arith.constant 0 : i32
    %c0_i32_1 = arith.constant 0 : i32
    return %c0_i32, %c0_i32_0 : i32, i32
  }
  func.func @transform_6(%arg0: i32) -> (i32, i32) {
    %c0_i32 = arith.constant 0 : i32
    %c0_i32_0 = arith.constant 0 : i32
    return %arg0, %c0_i32 : i32, i32
  }
}

module attributes {stable_mosaic.version = 11 : i64} {
  func.func @_combine_kernel(%arg0: i32, %arg1: memref<64x32xf32, #tpu.memory_space<vmem>>, %arg2: memref<64x32xf32, #tpu.memory_space<vmem>>, %arg3: memref<1x32xf32, #tpu.memory_space<vmem>>, %arg4: memref<1x32xf32, #tpu.memory_space<vmem>>, %arg5: memref<1x32xf32, #tpu.memory_space<vmem>>, %arg6: memref<1x32xf32, #tpu.memory_space<vmem>>, %arg7: memref<64x32xf32, #tpu.memory_space<vmem>>) attributes {dimension_semantics = [#tpu.dimension_semantics<parallel>], iteration_bounds = array<i64: 1>, scalar_prefetch = 0 : i64, scratch_operands = 0 : i64, tpu.core_type = #tpu.core_type<tc>, window_params = [{transform_indices = @transform_0, window_bounds = array<i64: 64, 32>}, {transform_indices = @transform_1, window_bounds = array<i64: 64, 32>}, {pipeline_mode = #tpu.pipeline_mode<synchronous>, transform_indices = @transform_2, window_bounds = array<i64: 1, 32>}, {pipeline_mode = #tpu.pipeline_mode<synchronous>, transform_indices = @transform_3, window_bounds = array<i64: 1, 32>}, {pipeline_mode = #tpu.pipeline_mode<synchronous>, transform_indices = @transform_4, window_bounds = array<i64: 1, 32>}, {pipeline_mode = #tpu.pipeline_mode<synchronous>, transform_indices = @transform_5, window_bounds = array<i64: 1, 32>}, {transform_indices = @transform_6, window_bounds = array<i64: 64, 32>}]} {
    %c0 = arith.constant 0 : index
    %c0_0 = arith.constant 0 : index
    %0 = vector.load %arg1[%c0, %c0_0] : memref<64x32xf32, #tpu.memory_space<vmem>>, vector<64x32xf32>
    %c0_1 = arith.constant 0 : index
    %c0_2 = arith.constant 0 : index
    %1 = vector.load %arg3[%c0_1, %c0_2] : memref<1x32xf32, #tpu.memory_space<vmem>>, vector<1x32xf32>
    %2 = vector.broadcast %1 : vector<1x32xf32> to vector<64x32xf32>
    %3 = arith.mulf %0, %2 : vector<64x32xf32>
    %c0_3 = arith.constant 0 : index
    %c0_4 = arith.constant 0 : index
    %4 = vector.load %arg4[%c0_3, %c0_4] : memref<1x32xf32, #tpu.memory_space<vmem>>, vector<1x32xf32>
    %5 = vector.broadcast %4 : vector<1x32xf32> to vector<64x32xf32>
    %6 = arith.addf %3, %5 : vector<64x32xf32>
    %c0_5 = arith.constant 0 : index
    %c0_6 = arith.constant 0 : index
    %7 = vector.load %arg2[%c0_5, %c0_6] : memref<64x32xf32, #tpu.memory_space<vmem>>, vector<64x32xf32>
    %c0_7 = arith.constant 0 : index
    %c0_8 = arith.constant 0 : index
    %8 = vector.load %arg5[%c0_7, %c0_8] : memref<1x32xf32, #tpu.memory_space<vmem>>, vector<1x32xf32>
    %9 = vector.broadcast %8 : vector<1x32xf32> to vector<64x32xf32>
    %10 = arith.mulf %7, %9 : vector<64x32xf32>
    %c0_9 = arith.constant 0 : index
    %c0_10 = arith.constant 0 : index
    %11 = vector.load %arg6[%c0_9, %c0_10] : memref<1x32xf32, #tpu.memory_space<vmem>>, vector<1x32xf32>
    %12 = vector.broadcast %11 : vector<1x32xf32> to vector<64x32xf32>
    %13 = arith.addf %10, %12 : vector<64x32xf32>
    %14 = arith.addf %6, %13 : vector<64x32xf32>
    %c0_11 = arith.constant 0 : index
    %c0_12 = arith.constant 0 : index
    %15 = vector.load %arg7[%c0_11, %c0_12] : memref<64x32xf32, #tpu.memory_space<vmem>>, vector<64x32xf32>
    tpu.vector_store %arg7[%c0_11, %c0_12], %14 {strides = array<i32>} : memref<64x32xf32, #tpu.memory_space<vmem>>, vector<64x32xf32>,
    return
  }
  func.func @transform_0(%arg0: i32) -> (i32, i32) {
    %c0_i32 = arith.constant 0 : i32
    %c0_i32_0 = arith.constant 0 : i32
    return %arg0, %c0_i32 : i32, i32
  }
  func.func @transform_1(%arg0: i32) -> (i32, i32) {
    %c0_i32 = arith.constant 0 : i32
    %c0_i32_0 = arith.constant 0 : i32
    return %arg0, %c0_i32 : i32, i32
  }
  func.func @transform_2(%arg0: i32) -> (i32, i32) {
    %c0_i32 = arith.constant 0 : i32
    %c0_i32_0 = arith.constant 0 : i32
    %c0_i32_1 = arith.constant 0 : i32
    return %c0_i32, %c0_i32_0 : i32, i32
  }
  func.func @transform_3(%arg0: i32) -> (i32, i32) {
    %c0_i32 = arith.constant 0 : i32
    %c0_i32_0 = arith.constant 0 : i32
    %c0_i32_1 = arith.constant 0 : i32
    return %c0_i32, %c0_i32_0 : i32, i32
  }
  func.func @transform_4(%arg0: i32) -> (i32, i32) {
    %c0_i32 = arith.constant 0 : i32
    %c0_i32_0 = arith.constant 0 : i32
    %c0_i32_1 = arith.constant 0 : i32
    return %c0_i32, %c0_i32_0 : i32, i32
  }
  func.func @transform_5(%arg0: i32) -> (i32, i32) {
    %c0_i32 = arith.constant 0 : i32
    %c0_i32_0 = arith.constant 0 : i32
    %c0_i32_1 = arith.constant 0 : i32
    return %c0_i32, %c0_i32_0 : i32, i32
  }
  func.func @transform_6(%arg0: i32) -> (i32, i32) {
    %c0_i32 = arith.constant 0 : i32
    %c0_i32_0 = arith.constant 0 : i32
    return %arg0, %c0_i32 : i32, i32
  }
}

</mosaic_0001>

<bundles_post_ra>
// kernel: tsti_encoder_forward.14
= control target key start
LH: loop header
LB: loop body
LE: loop exit
PB: predicated region body
PF: predicated region fallthrough
CT: control target
= control target key end

     0   :  { %vm50_vm0 = vcmask 261120   ;;  %vm160_vm1 = vcmask 781312   ;;  %s309_s1 = inlined_call_operand.vmem [shape: bf16[32,96], index: 1, kind: input, shape index: {}]   ;;  %s310_s0 = inlined_call_operand.vmem [shape: f32[64,32], index: 0, kind: input, shape index: {}]   ;;  %s311_s2 = inlined_call_operand.vmem [shape: f32[1,96], index: 2, kind: input, shape index: {}]   ;;  %s312_s3 = inlined_call_operand.vmem [shape: bf16[64,96], index: 3, kind: output, shape index: {}]  }
   0x1   :  { %v218_v0 = vld [vmem:[%s309_s1 + $0x8] sm:$0xff]   ;;  %v219_v1 = vld [vmem:[%s309_s1] sm:$0xff]   ;;  %v17_v7 = vld [vmem:[%s310_s0 + $0x10] sm:$0xff] }
   0x2   :  { %202 = vmatprep.subr.bf16.mxu0 %v218_v0  ;;  %214 = vmatprep.subr.bf16.mxu1 %v218_v0  ;;  %v15_v2 = vld [vmem:[%s310_s0] sm:$0xff]  ;;  %v16_v3 = vld [vmem:[%s310_s0 + $0x8] sm:$0xff]  ;;  %v18_v8 = vld [vmem:[%s310_s0 + $0x18] sm:$0xff] }
   0x3   :  { %v19_v4 = vld [vmem:[%s310_s0 + $0x20] sm:$0xff]  ;;  %203 = vmatpush3.bf16.msra.mxu0 %v218_v0  ;;  %216 = vmatpush3.bf16.msra.mxu1 %v218_v0  ;;  %v23_v5 = vpack.c.bf16 %v16_v3, %v15_v2  ;;  %v20_v6 = vld [vmem:[%s310_s0 + $0x28] sm:$0xff]  ;;  %v21_v10 = vld [vmem:[%s310_s0 + $0x30] sm:$0xff]  ;;  %v24_v12 = vpack.c.bf16 %v18_v8, %v17_v7 }
   0x4   :  { %204 = vmatprep.subr.bf16.mxu0 %v219_v1  ;;  %215 = vmatprep.subr.bf16.mxu1 %v219_v1  ;;  %v25_v9 = vpack.c.bf16 %v20_v6, %v19_v4  ;;  %v22_v11 = vld [vmem:[%s310_s0 + $0x38] sm:$0xff]  ;;  %v173_v14 = vld [vmem:[%s311_s2] ss:$0 sm:$0xff] }
   0x5   :  { %206 = vmatprep.mubr.msk.bf16.mxu0 %vm50_vm0, %v23_v5  ;;  %v26_v13 = vpack.c.bf16 %v22_v11, %v21_v10 }
   0x6   :  { %210 = vmatprep.mubr.msk.bf16.mxu1 %vm50_vm0, %v25_v9 }
   0x7   :  { %205 = vmatpush3.bf16.msra.mxu0 %v219_v1  ;;  %217 = vmatpush3.bf16.msra.mxu1 %v219_v1 }
   0xa   :  { %207 = vmatmul.mubr.msk.bf16.vlgmr.msra.gmra.mxu0 %vm50_vm0, %v24_v12  ;;  %211 = vmatmul.mubr.msk.bf16.vlgmr.msra.gmra.mxu1 %vm50_vm0, %v26_v13 }
  0xca   :  { %v208_v15 = vpop.f32.mrf.mxu0  ;;  %v212_v16 = vpop.f32.mrf.mxu1 }
  0xcb   :  { %v106_v17 = vadd.f32 %v208_v15, %v173_v14  ;;  %v122_v18 = vadd.f32 %v212_v16, %v173_v14 }
  0xcc   :  { %v97_v19 = vpop.f32.mrf.mxu0  ;;  %v113_v20 = vpop.f32.mrf.mxu1 }
  0xcd   :  { %v190_v21 = vpack.c.bf16 %v106_v17, %v106_v17  ;;  %v194_v22 = vpack.c.bf16 %v122_v18, %v122_v18  ;;  %v98_v23 = vadd.f32 %v173_v14, %v97_v19  ;;  %v114_v24 = vadd.f32 %v173_v14, %v113_v20 }
  0xce   :  { %v209_v25 = vpop.f32.mrf.mxu0  ;;  %v213_v26 = vpop.f32.mrf.mxu1 }
  0xcf   :  { %163 = vst.msk [vmem:[%s312_s3 + $0x8] sm:$0xf] %vm160_vm1, %v190_v21  ;;  %167 = vst.msk [vmem:[%s312_s3 + $0x18] sm:$0xf] %vm160_vm1, %v194_v22  ;;  %v188_v27 = vpack.c.bf16 %v98_v23, %v98_v23  ;;  %v192_v28 = vpack.c.bf16 %v114_v24, %v114_v24  ;;  %v109_v29 = vadd.f32 %v209_v25, %v173_v14 }
  0xd0   :  { %v125_v30 = vadd.f32 %v213_v26, %v173_v14  ;;  %v100_v31 = vpop.f32.mrf.mxu0  ;;  %v116_v32 = vpop.f32.mrf.mxu1 }
  0xd1   :  { %161 = vst.msk [vmem:[%s312_s3] sm:$0xf] %vm160_vm1, %v188_v27  ;;  %165 = vst.msk [vmem:[%s312_s3 + $0x10] sm:$0xf] %vm160_vm1, %v192_v28  ;;  %v191_v33 = vpack.c.bf16 %v109_v29, %v109_v29  ;;  %v101_v35 = vadd.f32 %v173_v14, %v100_v31  ;;  %v117_v36 = vadd.f32 %v173_v14, %v116_v32 }
  0xd2   :  { %v195_v34 = vpack.c.bf16 %v125_v30, %v125_v30 }
  0xd3   :  { %164 = vst.msk [vmem:[%s312_s3 + $0xc] sm:$0xf] %vm160_vm1, %v191_v33  ;;  %v189_v37 = vpack.c.bf16 %v101_v35, %v101_v35  ;;  %v193_v38 = vpack.c.bf16 %v117_v36, %v117_v36 }
  0xd4   :  { %168 = vst.msk [vmem:[%s312_s3 + $0x1c] sm:$0xf] %vm160_vm1, %v195_v34 }
  0xd5   :  { %162 = vst.msk [vmem:[%s312_s3 + $0x4] sm:$0xf] %vm160_vm1, %v189_v37  ;;  %166 = vst.msk [vmem:[%s312_s3 + $0x14] sm:$0xf] %vm160_vm1, %v193_v38 }

// kernel: tsti_encoder_forward.13
= control target key start
LH: loop header
LB: loop body
LE: loop exit
PB: predicated region body
PF: predicated region fallthrough
CT: control target
= control target key end

     0   :  { %vm45_vm0 = vcmask 130048   ;;  %vm139_vm1 = vcmask 261120   ;;  %s291_s1 = inlined_call_operand.vmem [shape: bf16[16,32], index: 1, kind: input, shape index: {}]   ;;  %s292_s0 = inlined_call_operand.vmem [shape: f32[64,16], index: 0, kind: input, shape index: {}]   ;;  %s293_s2 = inlined_call_operand.vmem [shape: f32[1,32], index: 2, kind: input, shape index: {}]   ;;  %s294_s3 = inlined_call_operand.vmem [shape: f32[64,32], index: 3, kind: input, shape index: {}]   ;;  %s295_s4 = inlined_call_operand.vmem [shape: f32[64,32], index: 4, kind: output, shape index: {}]  }
   0x1   :  { %v175_v0 = vld [vmem:[%s291_s1] sm:$0xff]   ;;  %v19_v2 = vld [vmem:[%s292_s0 + $0x8] sm:$0xff]  ;;  %v20_v6 = vld [vmem:[%s292_s0 + $0x10] sm:$0xff] }
   0x2   :  { %v18_v1 = vld [vmem:[%s292_s0] sm:$0xff]  ;;  %163 = vmatprep.subr.bf16.mxu0 %v175_v0  ;;  %173 = vmatprep.subr.bf16.mxu1 %v175_v0  ;;  %v23_v5 = vld [vmem:[%s292_s0 + $0x28] sm:$0xff]  ;;  %v21_v7 = vld [vmem:[%s292_s0 + $0x18] sm:$0xff] }
   0x3   :  { %v22_v3 = vld [vmem:[%s292_s0 + $0x20] sm:$0xff]  ;;  %v26_v4 = vpack.c.bf16 %v19_v2, %v18_v1  ;;  %164 = vmatpush3.bf16.msra.mxu0 %v175_v0  ;;  %174 = vmatpush3.bf16.msra.mxu1 %v175_v0  ;;  %v27_v9 = vpack.c.bf16 %v21_v7, %v20_v6  ;;  %v24_v10 = vld [vmem:[%s292_s0 + $0x30] sm:$0xff]  ;;  %v25_v11 = vld [vmem:[%s292_s0 + $0x38] sm:$0xff] }
   0x4   :  { %v28_v8 = vpack.c.bf16 %v23_v5, %v22_v3  ;;  %v29_v12 = vpack.c.bf16 %v25_v11, %v24_v10  ;;  %v152_v13 = vld [vmem:[%s293_s2] ss:$0 sm:$0xff]  ;;  %v125_v15 = vld [vmem:[%s294_s3 + $0x10] sm:$0xff]  ;;  %v126_v29 = vld [vmem:[%s294_s3 + $0x18] sm:$0xff] }
   0x5   :  { %165 = vmatprep.mubr.msk.bf16.mxu0 %vm45_vm0, %v26_v4  ;;  %v129_v17 = vld [vmem:[%s294_s3 + $0x30] sm:$0xff]  ;;  %v123_v21 = vld [vmem:[%s294_s3] sm:$0xff]  ;;  %v130_v31 = vld [vmem:[%s294_s3 + $0x38] sm:$0xff] }
   0x6   :  { %169 = vmatprep.mubr.msk.bf16.mxu1 %vm45_vm0, %v28_v8  ;;  %166 = vmatmul.mubr.msk.bf16.vlgmr.msra.gmra.mxu0 %vm45_vm0, %v27_v9  ;;  %v127_v23 = vld [vmem:[%s294_s3 + $0x20] sm:$0xff]  ;;  %v124_v37 = vld [vmem:[%s294_s3 + $0x8] sm:$0xff] }
   0x7   :  { %170 = vmatmul.mubr.msk.bf16.vlgmr.msra.gmra.mxu1 %vm45_vm0, %v29_v12  ;;  %v128_v39 = vld [vmem:[%s294_s3 + $0x28] sm:$0xff] }
  0xc6   :  { %v167_v14 = vpop.f32.mrf.mxu0 }
  0xc7   :  { %v171_v16 = vpop.f32.mrf.mxu1  ;;  %v101_v18 = vadd.f32 %v167_v14, %v152_v13 }
  0xc8   :  { %v117_v19 = vadd.f32 %v171_v16, %v152_v13  ;;  %v92_v20 = vpop.f32.mrf.mxu0 }
  0xc9   :  { %v108_v22 = vpop.f32.mrf.mxu1  ;;  %v133_v24 = vadd.f32 %v125_v15, %v101_v18  ;;  %v93_v26 = vadd.f32 %v152_v13, %v92_v20 }
  0xca   :  { %v137_v25 = vadd.f32 %v129_v17, %v117_v19  ;;  %v109_v27 = vadd.f32 %v152_v13, %v108_v22  ;;  %v168_v28 = vpop.f32.mrf.mxu0 }
  0xcb   :  { %v172_v30 = vpop.f32.mrf.mxu1  ;;  %142 = vst.msk [vmem:[%s295_s4 + $0x10] sm:$0xff] %vm139_vm1, %v133_v24  ;;  %v131_v32 = vadd.f32 %v123_v21, %v93_v26  ;;  %v104_v34 = vadd.f32 %v168_v28, %v152_v13 }
  0xcc   :  { %146 = vst.msk [vmem:[%s295_s4 + $0x30] sm:$0xff] %vm139_vm1, %v137_v25  ;;  %v135_v33 = vadd.f32 %v127_v23, %v109_v27  ;;  %v120_v35 = vadd.f32 %v172_v30, %v152_v13  ;;  %v95_v36 = vpop.f32.mrf.mxu0 }
  0xcd   :  { %v111_v38 = vpop.f32.mrf.mxu1  ;;  %140 = vst.msk [vmem:[%s295_s4] sm:$0xff] %vm139_vm1, %v131_v32  ;;  %v134_v40 = vadd.f32 %v126_v29, %v104_v34  ;;  %v96_v42 = vadd.f32 %v152_v13, %v95_v36 }
  0xce   :  { %144 = vst.msk [vmem:[%s295_s4 + $0x20] sm:$0xff] %vm139_vm1, %v135_v33  ;;  %v138_v41 = vadd.f32 %v130_v31, %v120_v35  ;;  %v112_v43 = vadd.f32 %v152_v13, %v111_v38 }
  0xcf   :  { %143 = vst.msk [vmem:[%s295_s4 + $0x18] sm:$0xff] %vm139_vm1, %v134_v40  ;;  %v132_v44 = vadd.f32 %v124_v37, %v96_v42 }
  0xd0   :  { %147 = vst.msk [vmem:[%s295_s4 + $0x38] sm:$0xff] %vm139_vm1, %v138_v41  ;;  %v136_v45 = vadd.f32 %v128_v39, %v112_v43 }
  0xd1   :  { %141 = vst.msk [vmem:[%s295_s4 + $0x8] sm:$0xff] %vm139_vm1, %v132_v44 }
  0xd2   :  { %145 = vst.msk [vmem:[%s295_s4 + $0x28] sm:$0xff] %vm139_vm1, %v136_v45 }

// kernel: tsti_encoder_forward.16
= control target key start
LH: loop header
LB: loop body
LE: loop exit
PB: predicated region body
PF: predicated region fallthrough
CT: control target
= control target key end

     0   :  { %vm71_vm0 = vcmask 261120   ;;  %vm194_vm1 = vcmask 253952   ;;  %s406_s1 = inlined_call_operand.vmem [shape: bf16[32,32], index: 1, kind: input, shape index: {}]   ;;  %s407_s0 = inlined_call_operand.vmem [shape: bf16[64,32], index: 0, kind: input, shape index: {}]   ;;  %s408_s2 = inlined_call_operand.vmem [shape: f32[1,32], index: 2, kind: input, shape index: {}]   ;;  %s409_s3 = inlined_call_operand.vmem [shape: f32[64,32], index: 3, kind: input, shape index: {}]   ;;  %s410_s4 = inlined_call_operand.vmem [shape: f32[64,32], index: 4, kind: output, shape index: {0}]   ;;  %s411_s5 = inlined_call_operand.vmem [shape: f32[1,2,32], index: 5, kind: output, shape index: {1}]  }
   0x1   :  { %v267_v0 = vld [vmem:[%s406_s1 + $0x8] sm:$0xff]   ;;  %v268_v1 = vld [vmem:[%s406_s1] sm:$0xff]   ;;  %v271_v3 = vld [vmem:[%s407_s0 + $0x10] sm:$0xff]  }
   0x2   :  { %251 = vmatprep.subr.bf16.mxu0 %v267_v0  ;;  %263 = vmatprep.subr.bf16.mxu1 %v267_v0  ;;  %v269_v2 = vld [vmem:[%s407_s0] sm:$0xff]   ;;  %v270_v4 = vld [vmem:[%s407_s0 + $0x8] sm:$0xff]   ;;  %v272_v5 = vld [vmem:[%s407_s0 + $0x18] sm:$0xff]  }
   0x3   :  { %252 = vmatpush3.bf16.msra.mxu0 %v267_v0  ;;  %265 = vmatpush3.bf16.msra.mxu1 %v267_v0  ;;  %v234_v6 = vld [vmem:[%s408_s2] ss:$0 sm:$0xff]  ;;  %v151_v8 = vld [vmem:[%s409_s3 + $0x10] sm:$0xff]  ;;  %v152_v24 = vld [vmem:[%s409_s3 + $0x18] sm:$0xff] }
   0x4   :  { %253 = vmatprep.subr.bf16.mxu0 %v268_v1  ;;  %264 = vmatprep.subr.bf16.mxu1 %v268_v1  ;;  %v155_v10 = vld [vmem:[%s409_s3 + $0x30] sm:$0xff]  ;;  %v149_v14 = vld [vmem:[%s409_s3] sm:$0xff]  ;;  %v150_v28 = vld [vmem:[%s409_s3 + $0x8] sm:$0xff] }
   0x5   :  { %255 = vmatprep.mubr.msk.bf16.mxu0 %vm71_vm0, %v269_v2  ;;  %259 = vmatprep.mubr.msk.bf16.mxu1 %vm71_vm0, %v271_v3  ;;  %v153_v20 = vld [vmem:[%s409_s3 + $0x20] sm:$0xff]  ;;  %v156_v30 = vld [vmem:[%s409_s3 + $0x38] sm:$0xff]  ;;  %v154_v38 = vld [vmem:[%s409_s3 + $0x28] sm:$0xff] }
   0x7   :  { %254 = vmatpush3.bf16.msra.mxu0 %v268_v1  ;;  %266 = vmatpush3.bf16.msra.mxu1 %v268_v1 }
   0xa   :  { %256 = vmatmul.mubr.msk.bf16.vlgmr.msra.gmra.mxu0 %vm71_vm0, %v270_v4  ;;  %260 = vmatmul.mubr.msk.bf16.vlgmr.msra.gmra.mxu1 %vm71_vm0, %v272_v5 }
  0xca   :  { %v257_v7 = vpop.f32.mrf.mxu0  ;;  %v261_v9 = vpop.f32.mrf.mxu1 }
  0xcb   :  { %v127_v11 = vadd.f32 %v257_v7, %v234_v6  ;;  %v143_v12 = vadd.f32 %v261_v9, %v234_v6 }
  0xcc   :  { %v118_v13 = vpop.f32.mrf.mxu0  ;;  %v134_v15 = vpop.f32.mrf.mxu1 }
  0xcd   :  { %v159_v16 = vadd.f32 %v151_v8, %v127_v11  ;;  %v119_v17 = vadd.f32 %v234_v6, %v118_v13  ;;  %v163_v18 = vadd.f32 %v155_v10, %v143_v12  ;;  %v135_v19 = vadd.f32 %v234_v6, %v134_v15 }
  0xce   :  { %v258_v21 = vpop.f32.mrf.mxu0  ;;  %v262_v22 = vpop.f32.mrf.mxu1 }
  0xcf   :  { %167 = vst.msk [vmem:[%s410_s4 + $0x10] sm:$0xff] %vm71_vm0, %v159_v16  ;;  %v157_v23 = vadd.f32 %v149_v14, %v119_v17  ;;  %171 = vst.msk [vmem:[%s410_s4 + $0x30] sm:$0xff] %vm71_vm0, %v163_v18  ;;  %v130_v25 = vadd.f32 %v258_v21, %v234_v6  ;;  %v161_v26 = vadd.f32 %v153_v20, %v135_v19  ;;  %v176_v45 = vsel %vm71_vm0, %v159_v16, 0.0 }
  0xd0   :  { %v121_v27 = vpop.f32.mrf.mxu0  ;;  %v146_v29 = vadd.f32 %v262_v22, %v234_v6  ;;  %v137_v31 = vpop.f32.mrf.mxu1  ;;  %v198_v39 = vmul.f32 %v159_v16, %v159_v16  ;;  %v202_v61 = vmul.f32 %v163_v18, %v163_v18  ;;  %v184_v2 = vsel %vm71_vm0, %v163_v18, 0.0 }
  0xd1   :  { %165 = vst.msk [vmem:[%s410_s4] sm:$0xff] %vm71_vm0, %v157_v23  ;;  %v122_v32 = vadd.f32 %v234_v6, %v121_v27  ;;  %v160_v33 = vadd.f32 %v152_v24, %v130_v25  ;;  %169 = vst.msk [vmem:[%s410_s4 + $0x20] sm:$0xff] %vm71_vm0, %v161_v26  ;;  %v196_v34 = vmul.f32 %v157_v23, %v157_v23  ;;  %v173_v40 = vsel %vm71_vm0, %v157_v23, 0.0 }
  0xd2   :  { %v164_v36 = vadd.f32 %v156_v30, %v146_v29  ;;  %v138_v37 = vadd.f32 %v234_v6, %v137_v31  ;;  %v207_v51 = vsel %vm71_vm0, %v198_v39, 0.0  ;;  %v200_v53 = vmul.f32 %v161_v26, %v161_v26 }
  0xd3   :  { %v158_v35 = vadd.f32 %v150_v28, %v122_v32  ;;  %168 = vst.msk [vmem:[%s410_s4 + $0x18] sm:$0xff] %vm71_vm0, %v160_v33  ;;  %v204_v46 = vsel %vm71_vm0, %v196_v34, 0.0  ;;  %v199_v47 = vmul.f32 %v160_v33, %v160_v33  ;;  %v178_v52 = vsel %vm71_vm0, %v160_v33, 0.0 }
  0xd4   :  { %172 = vst.msk [vmem:[%s410_s4 + $0x38] sm:$0xff] %vm71_vm0, %v164_v36  ;;  %v162_v44 = vadd.f32 %v154_v38, %v138_v37  ;;  %v180_v57 = vsel %vm71_vm0, %v161_v26, 0.0  ;;  %v211_v62 = vsel %vm71_vm0, %v200_v53, 0.0  ;;  %v203_v3 = vmul.f32 %v164_v36, %v164_v36 }
  0xd5   :  { %166 = vst.msk [vmem:[%s410_s4 + $0x8] sm:$0xff] %vm71_vm0, %v158_v35  ;;  %v174_v41 = vsel %vm71_vm0, %v158_v35, 0.0  ;;  %v197_v42 = vmul.f32 %v158_v35, %v158_v35  ;;  %v209_v56 = vsel %vm71_vm0, %v199_v47, 0.0  ;;  %v215_v7 = vsel %vm71_vm0, %v202_v61, 0.0 }
  0xd6   :  { %v175_v43 = vadd.f32 %v174_v41, %v173_v40  ;;  %170 = vst.msk [vmem:[%s410_s4 + $0x28] sm:$0xff] %vm71_vm0, %v162_v44  ;;  %v201_v58 = vmul.f32 %v162_v44, %v162_v44  ;;  %v182_v63 = vsel %vm71_vm0, %v162_v44, 0.0  ;;  %v186_v8 = vsel %vm71_vm0, %v164_v36, 0.0 }
  0xd7   :  { %v205_v48 = vsel %vm71_vm0, %v197_v42, 0.0  ;;  %v217_v11 = vsel %vm71_vm0, %v203_v3, 0.0 }
  0xd8   :  { %v177_v49 = vadd.f32 %v176_v45, %v175_v43  ;;  %v206_v50 = vadd.f32 %v205_v48, %v204_v46  ;;  %v213_v4 = vsel %vm71_vm0, %v201_v58, 0.0 }
  0xda   :  { %v208_v54 = vadd.f32 %v207_v51, %v206_v50  ;;  %v179_v55 = vadd.f32 %v178_v52, %v177_v49 }
  0xdc   :  { %v181_v59 = vadd.f32 %v180_v57, %v179_v55  ;;  %v210_v60 = vadd.f32 %v209_v56, %v208_v54 }
  0xde   :  { %v183_v0 = vadd.f32 %v182_v63, %v181_v59  ;;  %v212_v1 = vadd.f32 %v211_v62, %v210_v60 }
  0xe0   :  { %v185_v5 = vadd.f32 %v184_v2, %v183_v0  ;;  %v214_v6 = vadd.f32 %v213_v4, %v212_v1 }
  0xe2   :  { %v187_v9 = vadd.f32 %v186_v8, %v185_v5  ;;  %v216_v10 = vadd.f32 %v215_v7, %v214_v6 }
  0xe4   :  { %v188_v12 = vrot.slane %v187_v9, 4  ;;  %v218_v13 = vadd.f32 %v217_v11, %v216_v10 }
  0xe6   :  { %v189_v14 = vadd.f32 %v188_v12, %v187_v9  ;;  %v219_v15 = vrot.slane %v218_v13, 4 }
  0xe8   :  { %v190_v16 = vrot.slane %v189_v14, 2  ;;  %v220_v17 = vadd.f32 %v219_v15, %v218_v13 }
  0xea   :  { %v191_v18 = vadd.f32 %v190_v16, %v189_v14  ;;  %v221_v19 = vrot.slane %v220_v17, 2 }
  0xec   :  { %v192_v20 = vrot.slane %v191_v18, 1  ;;  %v222_v21 = vadd.f32 %v221_v19, %v220_v17 }
  0xee   :  { %v193_v22 = vadd.f32 %v192_v20, %v191_v18  ;;  %v223_v23 = vrot.slane %v222_v21, 1 }
  0xf0   :  { %195 = vst.msk [vmem:[%s411_s5] sm:$0x1] %vm194_vm1, %v193_v22  ;;  %v224_v24 = vadd.f32 %v223_v23, %v222_v21 }
  0xf2   :  { %225 = vst.msk [vmem:[%s411_s5 + $0x1] sm:$0x1] %vm194_vm1, %v224_v24 }

// kernel: tsti_encoder_forward.17
= control target key start
LH: loop header
LB: loop body
LE: loop exit
PB: predicated region body
PF: predicated region fallthrough
CT: control target
= control target key end

     0   :  { %vm94_vm0 = vcmask 261120   ;;  %vm287_vm1 = vcmask 523264   ;;  %vm402_vm2 = vcmask 253952   ;;  %s752_s3 = inlined_call_operand.vmem [shape: bf16[32,64], index: 3, kind: input, shape index: {}]   ;;  %s753_s0 = inlined_call_operand.vmem [shape: f32[64,32], index: 0, kind: input, shape index: {}]   ;;  %s754_s1 = inlined_call_operand.vmem [shape: f32[1,32], index: 1, kind: input, shape index: {}]   ;;  %s755_s2 = inlined_call_operand.vmem [shape: f32[1,32], index: 2, kind: input, shape index: {}]   ;;  %s756_s5 = inlined_call_operand.vmem [shape: bf16[64,32], index: 5, kind: input, shape index: {}]   ;;  %s757_s4 = inlined_call_operand.vmem [shape: f32[1,64], index: 4, kind: input, shape index: {}]   ;;  %s758_s6 = inlined_call_operand.vmem [shape: f32[1,32], index: 6, kind: input, shape index: {}]   ;;  %s759_s7 = inlined_call_operand.vmem [shape: f32[64,32], index: 7, kind: output, shape index: {0}]   ;;  %s760_s8 = inlined_call_operand.vmem [shape: f32[1,2,32], index: 8, kind: output, shape index: {1}]  }
   0x1   :  { %v502_v0 = vld [vmem:[%s752_s3 + $0x8] sm:$0xff]   ;;  %v503_v1 = vld [vmem:[%s752_s3] sm:$0xff]   ;;  %v31_v8 = vld [vmem:[%s753_s0 + $0x10] sm:$0xff] }
   0x2   :  { %474 = vmatprep.subr.bf16.mxu0 %v502_v0  ;;  %v29_v2 = vld [vmem:[%s753_s0] sm:$0xff]  ;;  %v30_v3 = vld [vmem:[%s753_s0 + $0x8] sm:$0xff]  ;;  %v32_v9 = vld [vmem:[%s753_s0 + $0x18] sm:$0xff] }
   0x3   :  { %v442_v4 = vld [vmem:[%s754_s1] ss:$0 sm:$0xff]  ;;  %475 = vmatpush3.bf16.msra.mxu0 %v502_v0  ;;  %v34_v13 = vld [vmem:[%s753_s0 + $0x28] sm:$0xff]  ;;  %v35_v14 = vld [vmem:[%s753_s0 + $0x30] sm:$0xff] }
   0x4   :  { %v44_v5 = vmul.f32 %v442_v4, %v29_v2  ;;  %v45_v6 = vmul.f32 %v442_v4, %v30_v3  ;;  %v443_v7 = vld [vmem:[%s755_s2] ss:$0 sm:$0xff]  ;;  %476 = vmatprep.subr.bf16.mxu0 %v503_v1  ;;  %v46_v10 = vmul.f32 %v442_v4, %v31_v8  ;;  %v47_v11 = vmul.f32 %v442_v4, %v32_v9  ;;  %v36_v19 = vld [vmem:[%s753_s0 + $0x38] sm:$0xff]  ;;  %v505_v33 = vld [vmem:[%s756_s5 + $0x10] sm:$0xff]  }
   0x5   :  { %v33_v12 = vld [vmem:[%s753_s0 + $0x20] sm:$0xff]  ;;  %v49_v18 = vmul.f32 %v442_v4, %v34_v13  ;;  %v50_v22 = vmul.f32 %v442_v4, %v35_v14  ;;  %v51_v23 = vmul.f32 %v442_v4, %v36_v19  ;;  %v504_v32 = vld [vmem:[%s756_s5 + $0x18] sm:$0xff]   ;;  %v506_v34 = vld [vmem:[%s756_s5 + $0x8] sm:$0xff]  }
   0x6   :  { %v602_v15 = vadd.f32 %v443_v7, %v44_v5  ;;  %v604_v16 = vadd.f32 %v443_v7, %v45_v6  ;;  %v48_v17 = vmul.f32 %v442_v4, %v33_v12  ;;  %v609_v20 = vadd.f32 %v443_v7, %v46_v10  ;;  %486 = vmatprep.subr.bf16.mxu1 %v504_v32  ;;  %v507_v35 = vld [vmem:[%s756_s5] sm:$0xff]  }
   0x7   :  { %v611_v21 = vadd.f32 %v443_v7, %v47_v11  ;;  %477 = vmatpush3.bf16.msra.mxu0 %v503_v1  ;;  %v617_v26 = vadd.f32 %v443_v7, %v49_v18  ;;  %v625_v29 = vadd.f32 %v443_v7, %v50_v22  ;;  %v627_v30 = vadd.f32 %v443_v7, %v51_v23  ;;  %v444_v36 = vld [vmem:[%s757_s4] ss:$0 sm:$0xff] }
   0x8   :  { %v67_v24 = vpack.c.bf16 %v604_v16, %v602_v15  ;;  %v615_v25 = vadd.f32 %v443_v7, %v48_v17  ;;  %487 = vmatpush3.bf16.msra.mxu1 %v504_v32 }
   0x9   :  { %v68_v27 = vpack.c.bf16 %v611_v21, %v609_v20  ;;  %v70_v31 = vpack.c.bf16 %v627_v30, %v625_v29  ;;  %488 = vmatprep.subr.bf16.mxu1 %v505_v33 }
   0xa   :  { %478 = vmatprep.mubr.msk.bf16.mxu0 %vm94_vm0, %v67_v24  ;;  %v69_v28 = vpack.c.bf16 %v617_v26, %v615_v25 }
   0xb   :  { %479 = vmatmul.mubr.msk.bf16.vlgmr.msra.gmra.mxu0 %vm94_vm0, %v68_v27 }
   0xc   :  { %482 = vmatprep.mubr.msk.bf16.mxu0 %vm94_vm0, %v69_v28  ;;  %489 = vmatpush3.bf16.msra.mxu1 %v505_v33 }
   0xd   :  { %490 = vmatprep.subr.bf16.mxu1 %v506_v34 }
  0x10   :  { %491 = vmatpush3.bf16.msra.mxu1 %v506_v34 }
  0x11   :  { %492 = vmatprep.subr.bf16.mxu1 %v507_v35 }
  0x13   :  { %483 = vmatmul.mubr.msk.bf16.gmra.mxu0 %vm94_vm0, %v70_v31 }
  0x14   :  { %493 = vmatpush3.bf16.msra.mxu1 %v507_v35 }
  0xcb   :  { %v480_v37 = vpop.f32.mrf.mxu0 }
  0xcc   :  { %v648_v38 = vadd.f32 %v480_v37, %v444_v36 }
  0xcd   :  { %v141_v39 = vpop.f32.mrf.mxu0 }
  0xce   :  { %v182_v40 = vmul.f32 0.044715, %v648_v38  ;;  %v651_v41 = vadd.f32 %v444_v36, %v141_v39 }
  0xcf   :  { %v481_v42 = vpop.f32.mrf.mxu0 }
  0xd0   :  { %v190_v43 = vmul.f32 %v182_v40, %v648_v38  ;;  %v180_v44 = vmul.f32 0.044715, %v651_v41  ;;  %v153_v45 = vadd.f32 %v481_v42, %v444_v36 }
  0xd1   :  { %v144_v46 = vpop.f32.mrf.mxu0 }
  0xd2   :  { %v198_v47 = vmul.f32 %v190_v43, %v648_v38  ;;  %v188_v48 = vmul.f32 %v180_v44, %v651_v41  ;;  %v183_v49 = vmul.f32 0.044715, %v153_v45  ;;  %v145_v50 = vadd.f32 %v444_v36, %v144_v46 }
  0xd3   :  { %v484_v51 = vpop.f32.mrf.mxu0  ;;  %v175_v46 = vmul.f32 0.5, %v153_v45 }
  0xd4   :  { %v206_v52 = vadd.f32 %v198_v47, %v648_v38  ;;  %v191_v53 = vmul.f32 %v183_v49, %v153_v45  ;;  %v181_v54 = vmul.f32 0.044715, %v145_v50  ;;  %v658_v55 = vadd.f32 %v484_v51, %v444_v36 }
  0xd5   :  { %v157_v56 = vpop.f32.mrf.mxu0  ;;  %v196_v57 = vmul.f32 %v188_v48, %v651_v41  ;;  %v172_v48 = vmul.f32 0.5, %v651_v41  ;;  %v173_v49 = vmul.f32 0.5, %v145_v50 }
  0xd6   :  { %v214_v58 = vmul.f32 0.7978846, %v206_v52  ;;  %v199_v59 = vmul.f32 %v191_v53, %v153_v45  ;;  %v189_v60 = vmul.f32 %v181_v54, %v145_v50  ;;  %v186_v61 = vmul.f32 0.044715, %v658_v55 }
  0xd7   :  { %v662_v62 = vadd.f32 %v444_v36, %v157_v56  ;;  %v485_v63 = vpop.f32.mrf.mxu0  ;;  %v204_v0 = vadd.f32 %v196_v57, %v651_v41  ;;  %v174_v52 = vmul.f32 0.5, %v648_v38 }
  0xd8   :  { %v207_v1 = vadd.f32 %v199_v59, %v153_v45  ;;  %v194_v2 = vmul.f32 %v186_v61, %v658_v55  ;;  %v666_v3 = vadd.f32 %v485_v63, %v444_v36  ;;  %508 = vtanh.f32 %v214_v58 }
  0xd9   :  { %v184_v4 = vmul.f32 0.044715, %v662_v62  ;;  %v160_v5 = vpop.f32.mrf.mxu0  ;;  %v197_v6 = vmul.f32 %v189_v60, %v145_v50  ;;  %v212_v7 = vmul.f32 0.7978846, %v204_v0  ;;  %v176_v41 = vmul.f32 0.5, %v662_v62 }
  0xda   :  { %v215_v8 = vmul.f32 0.7978846, %v207_v1  ;;  %v202_v9 = vmul.f32 %v194_v2, %v658_v55  ;;  %v187_v10 = vmul.f32 0.044715, %v666_v3  ;;  %v161_v11 = vadd.f32 %v444_v36, %v160_v5 }
  0xdb   :  { %v192_v12 = vmul.f32 %v184_v4, %v662_v62  ;;  %v205_v13 = vadd.f32 %v197_v6, %v145_v50  ;;  %510 = vtanh.f32 %v212_v7  ;;  %v179_v2 = vmul.f32 0.5, %v666_v3 }
  0xdc   :  { %512 = vtanh.f32 %v215_v8  ;;  %v210_v14 = vadd.f32 %v202_v9, %v658_v55  ;;  %v195_v17 = vmul.f32 %v187_v10, %v666_v3  ;;  %v185_v18 = vmul.f32 0.044715, %v161_v11 }
  0xdd   :  { %v200_v19 = vmul.f32 %v192_v12, %v662_v62  ;;  %v213_v22 = vmul.f32 0.7978846, %v205_v13  ;;  %v177_v38 = vmul.f32 0.5, %v161_v11  ;;  %v178_v7 = vmul.f32 0.5, %v658_v55 }
  0xde   :  { %v218_v23 = vmul.f32 0.7978846, %v210_v14  ;;  %v203_v24 = vmul.f32 %v195_v17, %v666_v3  ;;  %v193_v27 = vmul.f32 %v185_v18, %v161_v11 }
  0xdf   :  { %v208_v28 = vadd.f32 %v200_v19, %v662_v62  ;;  %514 = vtanh.f32 %v213_v22  ;;  %v451_v62 = vld [vmem:[%s758_s6] ss:$0 sm:$0xff] }
  0xe0   :  { %v211_v31 = vadd.f32 %v203_v24, %v666_v3  ;;  %v201_v32 = vmul.f32 %v193_v27, %v161_v11  ;;  %516 = vtanh.f32 %v218_v23 }
  0xe1   :  { %v216_v33 = vmul.f32 0.7978846, %v208_v28 }
  0xe2   :  { %v219_v34 = vmul.f32 0.7978846, %v211_v31  ;;  %v209_v35 = vadd.f32 %v201_v32, %v161_v11 }
  0xe3   :  { %518 = vtanh.f32 %v216_v33 }
  0xe4   :  { %520 = vtanh.f32 %v219_v34  ;;  %v217_v36 = vmul.f32 0.7978846, %v209_v35 }
  0xe5   :  { %v509_v37 = vpop.eup %508 }
  0xe6   :  { %522 = vtanh.f32 %v217_v36  ;;  %v230_v47 = vadd.f32 1.0, %v509_v37 }
  0xe8   :  { %v511_v39 = vpop.eup %510  ;;  %v238_v59 = vmul.f32 %v230_v47, %v174_v52 }
  0xe9   :  { %v513_v40 = vpop.eup %512  ;;  %v228_v43 = vadd.f32 1.0, %v511_v39 }
  0xea   :  { %v231_v42 = vadd.f32 1.0, %v513_v40 }
  0xeb   :  { %v236_v56 = vmul.f32 %v228_v43, %v172_v48 }
  0xec   :  { %v515_v44 = vpop.eup %514  ;;  %v239_v53 = vmul.f32 %v231_v42, %v175_v46 }
  0xed   :  { %v229_v51 = vadd.f32 1.0, %v515_v44  ;;  %v517_v54 = vpop.eup %516 }
  0xee   :  { %v245_v63 = vpack.c.bf16 %v239_v53, %v238_v59  ;;  %v234_v4 = vadd.f32 1.0, %v517_v54 }
  0xef   :  { %v237_v57 = vmul.f32 %v229_v51, %v173_v49 }
  0xf0   :  { %v519_v58 = vpop.eup %518  ;;  %v242_v10 = vmul.f32 %v234_v4, %v178_v7 }
  0xf1   :  { %v521_v60 = vpop.eup %520  ;;  %v244_v61 = vpack.c.bf16 %v237_v57, %v236_v56  ;;  %v232_v0 = vadd.f32 1.0, %v519_v58 }
  0xf2   :  { %v235_v1 = vadd.f32 1.0, %v521_v60 }
  0xf3   :  { %v523_v45 = vpop.eup %522  ;;  %494 = vmatprep.mubr.msk.bf16.mxu1 %vm287_vm1, %v244_v61  ;;  %v240_v5 = vmul.f32 %v232_v0, %v176_v41 }
  0xf4   :  { %495 = vmatmul.mubr.msk.bf16.vlgmr.msra.gmra.mxu1 %vm287_vm1, %v245_v63  ;;  %v233_v50 = vadd.f32 1.0, %v523_v45  ;;  %v243_v8 = vmul.f32 %v235_v1, %v179_v2 }
  0xf6   :  { %v241_v6 = vmul.f32 %v233_v50, %v177_v38  ;;  %v247_v12 = vpack.c.bf16 %v243_v8, %v242_v10 }
  0xf8   :  { %v246_v9 = vpack.c.bf16 %v241_v6, %v240_v5 }
  0xfa   :  { %498 = vmatprep.mubr.msk.bf16.mxu1 %vm287_vm1, %v246_v9 }
  0xfc   :  { %499 = vmatmul.mubr.msk.bf16.gmra.mxu1 %vm287_vm1, %v247_v12 }
 0x1b4   :  { %v496_v11 = vpop.f32.mrf.mxu1 }
 0x1b5   :  { %v343_v13 = vadd.f32 %v496_v11, %v451_v62 }
 0x1b6   :  { %v334_v3 = vpop.f32.mrf.mxu1 }
 0x1b7   :  { %v367_v14 = vadd.f32 %v343_v13, %v609_v20  ;;  %v335_v17 = vadd.f32 %v451_v62, %v334_v3 }
 0x1b8   :  { %v497_v18 = vpop.f32.mrf.mxu1 }
 0x1b9   :  { %375 = vst.msk [vmem:[%s759_s7 + $0x10] sm:$0xff] %vm94_vm0, %v367_v14  ;;  %v365_v55 = vadd.f32 %v335_v17, %v602_v15  ;;  %v346_v19 = vadd.f32 %v497_v18, %v451_v62  ;;  %v406_v32 = vmul.f32 %v367_v14, %v367_v14  ;;  %v384_v39 = vsel %vm94_vm0, %v367_v14, 0.0 }
 0x1ba   :  { %v337_v22 = vpop.f32.mrf.mxu1 }
 0x1bb   :  { %373 = vst.msk [vmem:[%s759_s7] sm:$0xff] %vm94_vm0, %v365_v55  ;;  %v368_v23 = vadd.f32 %v346_v19, %v611_v21  ;;  %v338_v24 = vadd.f32 %v451_v62, %v337_v22  ;;  %v404_v28 = vmul.f32 %v365_v55, %v365_v55  ;;  %v381_v35 = vsel %vm94_vm0, %v365_v55, 0.0 }
 0x1bc   :  { %v500_v20 = vpop.f32.mrf.mxu1  ;;  %v415_v47 = vsel %vm94_vm0, %v406_v32, 0.0 }
 0x1bd   :  { %376 = vst.msk [vmem:[%s759_s7 + $0x18] sm:$0xff] %vm94_vm0, %v368_v23  ;;  %v359_v27 = vadd.f32 %v500_v20, %v451_v62  ;;  %v366_v15 = vadd.f32 %v338_v24, %v604_v16  ;;  %v407_v42 = vmul.f32 %v368_v23, %v368_v23  ;;  %v386_v51 = vsel %vm94_vm0, %v368_v23, 0.0 }
 0x1be   :  { %v350_v31 = vpop.f32.mrf.mxu1 }
 0x1bf   :  { %v371_v33 = vadd.f32 %v359_v27, %v625_v29  ;;  %v351_v34 = vadd.f32 %v451_v62, %v350_v31  ;;  %374 = vst.msk [vmem:[%s759_s7 + $0x8] sm:$0xff] %vm94_vm0, %v366_v15  ;;  %v382_v21 = vsel %vm94_vm0, %v366_v15, 0.0  ;;  %v405_v36 = vmul.f32 %v366_v15, %v366_v15 }
 0x1c0   :  { %v501_v37 = vpop.f32.mrf.mxu1  ;;  %v383_v40 = vadd.f32 %v382_v21, %v381_v35  ;;  %v412_v29 = vsel %vm94_vm0, %v404_v28, 0.0  ;;  %v417_v57 = vsel %vm94_vm0, %v407_v42, 0.0 }
 0x1c1   :  { %379 = vst.msk [vmem:[%s759_s7 + $0x30] sm:$0xff] %vm94_vm0, %v371_v33  ;;  %v369_v16 = vadd.f32 %v351_v34, %v615_v25  ;;  %v413_v43 = vsel %vm94_vm0, %v405_v36, 0.0  ;;  %v362_v44 = vadd.f32 %v501_v37, %v451_v62  ;;  %v410_v63 = vmul.f32 %v371_v33, %v371_v33 }
 0x1c2   :  { %v353_v46 = vpop.f32.mrf.mxu1  ;;  %v385_v48 = vadd.f32 %v384_v39, %v383_v40  ;;  %v414_v49 = vadd.f32 %v413_v43, %v412_v29  ;;  %v392_v38 = vsel %vm94_vm0, %v371_v33, 0.0 }
 0x1c3   :  { %377 = vst.msk [vmem:[%s759_s7 + $0x20] sm:$0xff] %vm94_vm0, %v369_v16  ;;  %v408_v52 = vmul.f32 %v369_v16, %v369_v16  ;;  %v372_v25 = vadd.f32 %v362_v44, %v627_v30  ;;  %v354_v53 = vadd.f32 %v451_v62, %v353_v46  ;;  %v388_v58 = vsel %vm94_vm0, %v369_v16, 0.0 }
 0x1c4   :  { %v416_v54 = vadd.f32 %v415_v47, %v414_v49  ;;  %v387_v56 = vadd.f32 %v386_v51, %v385_v48  ;;  %v423_v5 = vsel %vm94_vm0, %v410_v63, 0.0 }
 0x1c5   :  { %380 = vst.msk [vmem:[%s759_s7 + $0x38] sm:$0xff] %vm94_vm0, %v372_v25  ;;  %v370_v59 = vadd.f32 %v354_v53, %v617_v26  ;;  %v419_v0 = vsel %vm94_vm0, %v408_v52, 0.0  ;;  %v411_v50 = vmul.f32 %v372_v25, %v372_v25  ;;  %v394_v6 = vsel %vm94_vm0, %v372_v25, 0.0 }
 0x1c6   :  { %v389_v60 = vadd.f32 %v388_v58, %v387_v56  ;;  %v418_v61 = vadd.f32 %v417_v57, %v416_v54 }
 0x1c7   :  { %378 = vst.msk [vmem:[%s759_s7 + $0x28] sm:$0xff] %vm94_vm0, %v370_v59  ;;  %v390_v30 = vsel %vm94_vm0, %v370_v59, 0.0  ;;  %v409_v1 = vmul.f32 %v370_v59, %v370_v59  ;;  %v425_v9 = vsel %vm94_vm0, %v411_v50, 0.0 }
 0x1c8   :  { %v420_v45 = vadd.f32 %v419_v0, %v418_v61  ;;  %v391_v41 = vadd.f32 %v390_v30, %v389_v60 }
 0x1c9   :  { %v421_v26 = vsel %vm94_vm0, %v409_v1, 0.0 }
 0x1ca   :  { %v393_v2 = vadd.f32 %v392_v38, %v391_v41  ;;  %v422_v4 = vadd.f32 %v421_v26, %v420_v45 }
 0x1cc   :  { %v395_v7 = vadd.f32 %v394_v6, %v393_v2  ;;  %v424_v8 = vadd.f32 %v423_v5, %v422_v4 }
 0x1ce   :  { %v396_v10 = vrot.slane %v395_v7, 4  ;;  %v426_v12 = vadd.f32 %v425_v9, %v424_v8 }
 0x1d0   :  { %v397_v62 = vadd.f32 %v396_v10, %v395_v7  ;;  %v427_v11 = vrot.slane %v426_v12, 4 }
 0x1d2   :  { %v398_v13 = vrot.slane %v397_v62, 2  ;;  %v428_v3 = vadd.f32 %v427_v11, %v426_v12 }
 0x1d4   :  { %v399_v14 = vadd.f32 %v398_v13, %v397_v62  ;;  %v429_v17 = vrot.slane %v428_v3, 2 }
 0x1d6   :  { %v400_v18 = vrot.slane %v399_v14, 1  ;;  %v430_v55 = vadd.f32 %v429_v17, %v428_v3 }
 0x1d8   :  { %v401_v19 = vadd.f32 %v400_v18, %v399_v14  ;;  %v431_v22 = vrot.slane %v430_v55, 1 }
 0x1da   :  { %403 = vst.msk [vmem:[%s760_s8] sm:$0x1] %vm402_vm2, %v401_v19  ;;  %v432_v23 = vadd.f32 %v431_v22, %v430_v55 }
 0x1dc   :  { %433 = vst.msk [vmem:[%s760_s8 + $0x1] sm:$0x1] %vm402_vm2, %v432_v23 }

// kernel: tsti_encoder_forward.18
= control target key start
LH: loop header
LB: loop body
LE: loop exit
PB: predicated region body
PF: predicated region fallthrough
CT: control target
= control target key end

     0   :  { %v51_v0 = vlaneseq  ;;  %v933_v2 = vmov 0   ;;  %vm152_vm0 = vcmask 1041408   ;;  %vm139_vm1 = vcmask 31744   ;;  %s1412_s1 = inlined_call_operand.vmem [shape: f32[1,256], index: 1, kind: input, shape index: {}]   ;;  %s1413_s2 = inlined_call_operand.vmem [shape: f32[1,256], index: 2, kind: input, shape index: {}]   ;;  %s1414_s3 = inlined_call_operand.vmem [shape: bf16[64,4], index: 3, kind: input, shape index: {}]   ;;  %s1415_s4 = inlined_call_operand.vmem [shape: f32[64,1], index: 4, kind: input, shape index: {}]   ;;  %s1416_s0 = inlined_call_operand.vmem [shape: f32[2,4,256], index: 0, kind: input, shape index: {}]   ;;  %s1417_s6 = inlined_call_operand.vmem [shape: f32[4,1], index: 6, kind: input, shape index: {}]   ;;  %s1418_s5 = inlined_call_operand.vmem [shape: bf16[4,64], index: 5, kind: input, shape index: {}]   ;;  %s1419_s7 = inlined_call_operand.vmem [shape: f32[2,4,256], index: 7, kind: output, shape index: {0}]   ;;  %s1420_s8 = inlined_call_operand.vmem [shape: f32[1,2,256], index: 8, kind: output, shape index: {1}]  }
   0x1   :  { %v29_v1 = vld [vmem:[%s1412_s1] sm:$0x3]  ;;  %191 = vmatprep.mubr.bf16.mxu0 %v933_v2  ;;  %863 = vset.pattern.permute.xlu0 %v933_v2  ;;  %v45_v11 = vld [vmem:[%s1415_s4 + $0x30] sm:$0xff]  ;;  %v852_v13 = vld [vmem:[%s1416_s0 + $0x8] sm:$0xff]  ;;  %vm389_vm2 = vcmask 523264   ;;  %vm439_vm3 = vcmask 1043456  }
   0x2   :  { %v30_v3 = vld [vmem:[%s1413_s2] sm:$0x3]  ;;  %v989_v4 = vshrl.u32 %v51_v0, 7  ;;  %864 = vset.pattern.permute.xlu1 %v933_v2  ;;  %425 = vmatprep.mubr.bf16.mxu1 %v933_v2  ;;  %v46_v17 = vld [vmem:[%s1415_s4 + $0x38] sm:$0xff]  ;;  %v44_v18 = vld [vmem:[%s1415_s4 + $0x28] sm:$0xff]  ;;  %vm811_vm4 = vcmp.lt.s32.totalorder %v51_v0, 256 }
   0x3   :  { %v49_v12 = vld [vmem:[%s1416_s0] sm:$0xff]  ;;  %111 = vperm.xlu0 %863, %v45_v11   ;;  %v41_v23 = vld [vmem:[%s1415_s4 + $0x10] sm:$0xff]  ;;  %v42_v24 = vld [vmem:[%s1415_s4 + $0x18] sm:$0xff] }
   0x4   :  { %v53_v5 = vsub.s32 0, %v989_v4  ;;  %v57_v6 = vsub.s32 1, %v989_v4  ;;  %v43_v14 = vld [vmem:[%s1415_s4 + $0x20] sm:$0xff]  ;;  %v40_v30 = vld [vmem:[%s1415_s4 + $0x8] sm:$0xff]  ;;  %v1051_v34 = vld [vmem:[%s1414_s3 + $0x10] sm:$0xff]  }
   0x5   :  { %101 = vperm.xlu1 %864, %v43_v14   ;;  %v39_v29 = vld [vmem:[%s1415_s4] sm:$0xff]  ;;  %v1043_v33 = vld [vmem:[%s1414_s3 + $0x8] sm:$0xff]   ;;  %v1059_v35 = vld [vmem:[%s1414_s3 + $0x18] sm:$0xff]  }
   0x6   :  { %v54_v7 = vrot.slane %v29_v1, %v53_v5  ;;  %v58_v8 = vrot.slane %v29_v1, %v57_v6  ;;  %v66_v9 = vrot.slane %v30_v3, %v53_v5  ;;  %v70_v10 = vrot.slane %v30_v3, %v57_v6  ;;  %v1032_v31 = vld [vmem:[%s1414_s3] sm:$0xff]  }
   0x7   :  { %116 = vperm.xlu0 %863, %v46_v17   ;;  %v48_v32 = vld [vmem:[%s1417_s6] sm:$0xf] }
   0x8   :  { %v59_v15 = vcombine.low %v54_v7, %v58_v8  ;;  %v71_v16 = vcombine.low %v66_v9, %v70_v10 }
   0x9   :  { %106 = vperm.xlu1 %864, %v44_v18  }
   0xa   :  { %v61_v19 = vmul.f32 %v59_v15, %v49_v12  ;;  %v472_v20 = vmul.f32 %v852_v13, %v59_v15 }
   0xb   :  { %91 = vperm.xlu0 %863, %v41_v23  }
   0xc   :  { %v73_v21 = vadd.f32 %v71_v16, %v61_v19  ;;  %v1013_v22 = vadd.f32 %v472_v20, %v71_v16 }
   0xd   :  { %96 = vperm.xlu1 %864, %v42_v24  }
   0xe   :  { %v75_v25 = vcombine.high %v73_v21, %v73_v21  ;;  %v77_v26 = vpack.c.bf16 %v73_v21, %v73_v21 }
   0xf   :  { %81 = vperm.xlu0 %863, %v39_v29  }
  0x10   :  { %v78_v27 = vpack.c.bf16 %v75_v25, %v75_v25  ;;  %v154_v28 = vsel %vm152_vm0, %v77_v26, 0 }
  0x11   :  { %86 = vperm.xlu1 %864, %v40_v30  }
  0x12   :  { %846 = vmatprep.subr.msk.bf16.mxu0 %vm152_vm0, %v78_v27 }
  0x13   :  { %174 = vmatpush1.bf16.msra.mxu0 %v154_v28  ;;  %386 = vperm.xlu0 %863, %v48_v32  }
  0x16   :  { %847 = vmatmul.mubr.msk.bf16.vlgmr.msra.gmra.mxu0 %vm139_vm1, %v1032_v31 }
  0x17   :  { %201 = vmatprep.mubr.bf16.mxu0 %v933_v2 }
  0x1e   :  { %848 = vmatmul.mubr.msk.bf16.gmra.mxu0 %vm139_vm1, %v1043_v33 }
  0x1f   :  { %211 = vmatprep.mubr.bf16.mxu0 %v933_v2 }
  0x26   :  { %849 = vmatmul.mubr.msk.bf16.gmra.mxu0 %vm139_vm1, %v1051_v34 }
  0x27   :  { %221 = vmatprep.mubr.bf16.mxu0 %v933_v2 }
  0x2e   :  { %850 = vmatmul.mubr.msk.bf16.gmra.mxu0 %vm139_vm1, %v1059_v35 }
  0x2f   :  { %742 = vmatprep.mubr.bf16.mxu0 %v933_v2 }
  0x7e   :  { %v1064_v36 = vpop.permute.xlu0 %111 }
  0x80   :  { %v1066_v37 = vpop.permute.xlu1 %101 }
  0x82   :  { %v1068_v38 = vpop.permute.xlu0 %116 }
  0x84   :  { %v1070_v42 = vpop.permute.xlu1 %106 }
  0x86   :  { %v1072_v43 = vpop.permute.xlu0 %91 }
  0x88   :  { %v1074_v47 = vpop.permute.xlu1 %96 }
  0x8a   :  { %v1076_v48 = vpop.permute.xlu0 %81 }
  0x8c   :  { %v1088_v56 = vpop.permute.xlu1 %86 }
  0xd6   :  { %v193_v39 = vpop.f32.mrf.mxu0 }
  0xd7   :  { %v1085_v53 = vadd.f32 %v193_v39, %v1076_v48 }
  0xd8   :  { %v195_v40 = vpop.f32.mrf.mxu0 }
  0xd9   :  { %v1079_v50 = vadd.f32 %v195_v40, %v1076_v48  ;;  %v248_v62 = vmul.f32 0.044715, %v1085_v53 }
  0xda   :  { %v197_v41 = vpop.f32.mrf.mxu0 }
  0xdb   :  { %v249_v55 = vmul.f32 0.044715, %v1079_v50  ;;  %v1102_v63 = vadd.f32 %v197_v41, %v1088_v56  ;;  %v1127_v17 = vmul.f32 %v248_v62, %v1085_v53 }
  0xdc   :  { %v199_v44 = vpop.f32.mrf.mxu0 }
  0xdd   :  { %v1092_v58 = vadd.f32 %v199_v44, %v1088_v56  ;;  %v265_v6 = vmul.f32 %v249_v55, %v1079_v50  ;;  %v250_v18 = vmul.f32 0.044715, %v1102_v63 }
  0xde   :  { %v203_v45 = vpop.f32.mrf.mxu0 }
  0xdf   :  { %v251_v9 = vmul.f32 0.044715, %v1092_v58  ;;  %v1115_v10 = vadd.f32 %v203_v45, %v1072_v43  ;;  %v1133_v23 = vmul.f32 %v265_v6, %v1079_v50  ;;  %v266_v45 = vmul.f32 %v250_v18, %v1102_v63 }
  0xe0   :  { %v205_v46 = vpop.f32.mrf.mxu0 }
  0xe1   :  { %v1095_v60 = vadd.f32 %v205_v46, %v1072_v43  ;;  %v267_v27 = vmul.f32 %v251_v9, %v1092_v58  ;;  %v252_v28 = vmul.f32 0.044715, %v1115_v10 }
  0xe2   :  { %v207_v49 = vpop.f32.mrf.mxu0 }
  0xe3   :  { %v1118_v11 = vadd.f32 %v207_v49, %v1074_v47  ;;  %v253_v13 = vmul.f32 0.044715, %v1095_v60 }
  0xe4   :  { %v209_v51 = vpop.f32.mrf.mxu0 }
  0xe5   :  { %v1082_v52 = vadd.f32 %v209_v51, %v1074_v47  ;;  %v254_v29 = vmul.f32 0.044715, %v1118_v11  ;;  %v269_v39 = vmul.f32 %v253_v13, %v1095_v60 }
  0xe6   :  { %v213_v54 = vpop.f32.mrf.mxu0 }
  0xe7   :  { %v255_v57 = vmul.f32 0.044715, %v1082_v52  ;;  %v1106_v3 = vadd.f32 %v213_v54, %v1066_v37  ;;  %v270_v6 = vmul.f32 %v254_v29, %v1118_v11 }
  0xe8   :  { %v215_v59 = vpop.f32.mrf.mxu0 }
  0xe9   :  { %v1098_v61 = vadd.f32 %v215_v59, %v1066_v37  ;;  %v271_v1 = vmul.f32 %v255_v57, %v1082_v52  ;;  %v256_v20 = vmul.f32 0.044715, %v1106_v3  ;;  %v286_v29 = vmul.f32 %v270_v6, %v1118_v11 }
  0xea   :  { %v217_v5 = vpop.f32.mrf.mxu0 }
  0xeb   :  { %v257_v7 = vmul.f32 0.044715, %v1098_v61  ;;  %v1111_v8 = vadd.f32 %v217_v5, %v1070_v42  ;;  %v287_v19 = vmul.f32 %v271_v1, %v1082_v52  ;;  %v272_v46 = vmul.f32 %v256_v20, %v1106_v3 }
  0xec   :  { %v219_v12 = vpop.f32.mrf.mxu0  ;;  %v283_v1 = vmul.f32 %v267_v27, %v1092_v58  ;;  %v268_v5 = vmul.f32 %v252_v28, %v1115_v10 }
  0xed   :  { %v273_v14 = vmul.f32 %v257_v7, %v1098_v61  ;;  %v258_v15 = vmul.f32 0.044715, %v1111_v8  ;;  %v1124_v16 = vadd.f32 %v219_v12, %v1070_v42  ;;  %v303_v54 = vadd.f32 %v287_v19, %v1082_v52 }
  0xee   :  { %v223_v21 = vpop.f32.mrf.mxu0  ;;  %v285_v12 = vmul.f32 %v269_v39, %v1095_v60  ;;  %v288_v18 = vmul.f32 %v272_v46, %v1106_v3 }
  0xef   :  { %v289_v24 = vmul.f32 %v273_v14, %v1098_v61  ;;  %v259_v25 = vmul.f32 0.044715, %v1124_v16  ;;  %v1138_v26 = vadd.f32 %v223_v21, %v1064_v36  ;;  %v274_v30 = vmul.f32 %v258_v15, %v1111_v8 }
  0xf0   :  { %v225_v32 = vpop.f32.mrf.mxu0  ;;  %v319_v21 = vmul.f32 0.7978846, %v303_v54 }
  0xf1   :  { %v275_v40 = vmul.f32 %v259_v25, %v1124_v16  ;;  %v260_v41 = vmul.f32 0.044715, %v1138_v26  ;;  %v1148_v44 = vadd.f32 %v225_v32, %v1064_v36  ;;  %v305_v51 = vadd.f32 %v289_v24, %v1098_v61 }
  0xf2   :  { %v227_v49 = vpop.f32.mrf.mxu0  ;;  %v290_v7 = vmul.f32 %v274_v30, %v1111_v8  ;;  %869 = vtanh.f32 %v319_v21 }
  0xf3   :  { %v291_v55 = vmul.f32 %v275_v40, %v1124_v16  ;;  %v276_v57 = vmul.f32 %v260_v41, %v1138_v26  ;;  %v261_v59 = vmul.f32 0.044715, %v1148_v44  ;;  %v1158_v62 = vadd.f32 %v227_v49, %v1068_v38 }
  0xf4   :  { %v229_v9 = vpop.f32.mrf.mxu0  ;;  %v321_v28 = vmul.f32 0.7978846, %v305_v51  ;;  %v306_v39 = vadd.f32 %v290_v7, %v1111_v8  ;;  %v284_v40 = vmul.f32 %v268_v5, %v1115_v10  ;;  %v301_v51 = vadd.f32 %v285_v12, %v1095_v60 }
  0xf5   :  { %v262_v13 = vmul.f32 0.044715, %v1158_v62  ;;  %v1167_v14 = vadd.f32 %v229_v9, %v1068_v38  ;;  %v277_v15 = vmul.f32 %v261_v59, %v1148_v44  ;;  %v292_v19 = vmul.f32 %v276_v57, %v1138_v26 }
  0xf6   :  { %v307_v20 = vadd.f32 %v291_v55, %v1124_v16  ;;  %v304_v55 = vadd.f32 %v288_v18, %v1106_v3  ;;  %871 = vtanh.f32 %v321_v28  ;;  %v282_v5 = vmul.f32 %v266_v45, %v1102_v63 }
  0xf7   :  { %v278_v24 = vmul.f32 %v262_v13, %v1158_v62  ;;  %v263_v25 = vmul.f32 0.044715, %v1167_v14  ;;  %v293_v27 = vmul.f32 %v277_v15, %v1148_v44  ;;  %v308_v30 = vadd.f32 %v292_v19, %v1138_v26 }
  0xf8   :  { %v323_v32 = vmul.f32 0.7978846, %v307_v20  ;;  %v322_v7 = vmul.f32 0.7978846, %v306_v39  ;;  %v302_v9 = vadd.f32 %v286_v29, %v1118_v11  ;;  %v299_v18 = vadd.f32 %v283_v1, %v1092_v58 }
  0xf9   :  { %v279_v41 = vmul.f32 %v263_v25, %v1167_v14  ;;  %v309_v46 = vadd.f32 %v293_v27, %v1148_v44  ;;  %v294_v49 = vmul.f32 %v278_v24, %v1158_v62  ;;  %v324_v54 = vmul.f32 0.7978846, %v308_v30 }
  0xfa   :  { %873 = vtanh.f32 %v323_v32  ;;  %v280_v12 = vmul.f32 %v1127_v17, %v1085_v53  ;;  %v320_v19 = vmul.f32 0.7978846, %v304_v55  ;;  %v300_v20 = vadd.f32 %v284_v40, %v1115_v10 }
  0xfb   :  { %v295_v57 = vmul.f32 %v279_v41, %v1167_v14  ;;  %v325_v59 = vmul.f32 0.7978846, %v309_v46  ;;  %v310_v6 = vadd.f32 %v294_v49, %v1158_v62  ;;  %v317_v45 = vmul.f32 0.7978846, %v301_v51 }
  0xfc   :  { %v297_v24 = vadd.f32 %v1133_v23, %v1079_v50  ;;  %v318_v25 = vmul.f32 0.7978846, %v302_v9  ;;  %v298_v27 = vadd.f32 %v282_v5, %v1102_v63  ;;  %v315_v28 = vmul.f32 0.7978846, %v299_v18 }
  0xfd   :  { %v311_v13 = vadd.f32 %v295_v57, %v1167_v14  ;;  %875 = vtanh.f32 %v325_v59  ;;  %v326_v15 = vmul.f32 0.7978846, %v310_v6  ;;  %v316_v1 = vmul.f32 0.7978846, %v300_v20 }
  0xfe   :  { %877 = vtanh.f32 %v324_v54  ;;  %v296_v17 = vadd.f32 %v280_v12, %v1085_v53  ;;  %v313_v29 = vmul.f32 0.7978846, %v297_v24  ;;  %v314_v30 = vmul.f32 0.7978846, %v298_v27 }
  0xff   :  { %v327_v21 = vmul.f32 0.7978846, %v311_v13  ;;  %879 = vtanh.f32 %v326_v15  ;;  %v870_v39 = vpop.eup %869  ;;  %v246_v6 = vmul.f32 0.5, %v1158_v62  ;;  %v245_v13 = vmul.f32 0.5, %v1148_v44 }
 0x100   :  { %881 = vtanh.f32 %v322_v7  ;;  %v312_v32 = vmul.f32 0.7978846, %v296_v17  ;;  %v243_v7 = vmul.f32 0.5, %v1124_v16  ;;  %v247_v15 = vmul.f32 0.5, %v1167_v14 }
 0x101   :  { %883 = vtanh.f32 %v327_v21  ;;  %v244_v20 = vmul.f32 0.5, %v1138_v26  ;;  %v242_v44 = vmul.f32 0.5, %v1111_v8 }
 0x102   :  { %885 = vtanh.f32 %v320_v19 }
 0x103   :  { %887 = vtanh.f32 %v317_v45  ;;  %v872_v23 = vpop.eup %871  ;;  %v241_v45 = vmul.f32 0.5, %v1098_v61  ;;  %v240_v61 = vmul.f32 0.5, %v1106_v3 }
 0x104   :  { %889 = vtanh.f32 %v318_v25  ;;  %v353_v12 = vadd.f32 1.0, %v872_v23  ;;  %v239_v23 = vmul.f32 0.5, %v1082_v52 }
 0x105   :  { %891 = vtanh.f32 %v315_v28 }
 0x106   :  { %893 = vtanh.f32 %v316_v1  ;;  %v351_v1 = vadd.f32 1.0, %v870_v39 }
 0x107   :  { %895 = vtanh.f32 %v313_v29  ;;  %v874_v40 = vpop.eup %873 }
 0x108   :  { %897 = vtanh.f32 %v314_v30  ;;  %v355_v57 = vadd.f32 1.0, %v874_v40 }
 0x109   :  { %899 = vtanh.f32 %v312_v32  ;;  %v369_v32 = vmul.f32 %v353_v12, %v241_v45 }
 0x10a   :  { %v876_v41 = vpop.eup %875  ;;  %v371_v28 = vmul.f32 %v355_v57, %v243_v7  ;;  %v235_v7 = vmul.f32 0.5, %v1092_v58  ;;  %v475_v58 = vcombine.high %v1013_v22, %v1013_v22 }
 0x10b   :  { %v878_v46 = vpop.eup %877  ;;  %v357_v55 = vadd.f32 1.0, %v876_v41 }
 0x10c   :  { %v880_v49 = vpop.eup %879  ;;  %v356_v5 = vadd.f32 1.0, %v878_v46  ;;  %v381_v39 = vpack.c.bf16 %v371_v28, %v369_v32  ;;  %v477_v28 = vpack.c.bf16 %v1013_v22, %v1013_v22 }
 0x10d   :  { %v882_v54 = vpop.eup %881  ;;  %v358_v51 = vadd.f32 1.0, %v880_v49  ;;  %v373_v27 = vmul.f32 %v357_v55, %v245_v13  ;;  %v237_v55 = vmul.f32 0.5, %v1095_v60  ;;  %v236_v13 = vmul.f32 0.5, %v1115_v10 }
 0x10e   :  { %v884_v59 = vpop.eup %883  ;;  %v354_v24 = vadd.f32 1.0, %v882_v54  ;;  %v372_v17 = vmul.f32 %v356_v5, %v244_v20  ;;  %v233_v60 = vmul.f32 0.5, %v1079_v50  ;;  %v478_v50 = vpack.c.bf16 %v475_v58, %v475_v58 }
 0x10f   :  { %v886_v9 = vpop.eup %885  ;;  %v359_v18 = vadd.f32 1.0, %v884_v59  ;;  %v374_v21 = vmul.f32 %v358_v51, %v246_v6  ;;  %v367_v51 = vmul.f32 %v351_v1, %v239_v23  ;;  %v238_v59 = vmul.f32 0.5, %v1118_v11 }
 0x110   :  { %v888_v19 = vpop.eup %887  ;;  %v352_v29 = vadd.f32 1.0, %v886_v9  ;;  %v370_v46 = vmul.f32 %v354_v24, %v242_v44  ;;  %v234_v11 = vmul.f32 0.5, %v1102_v63  ;;  %v1221_v63 = vld [vmem:[%s1418_s5] sm:$0x3] }
 0x111   :  { %v890_v25 = vpop.eup %889  ;;  %v375_v62 = vmul.f32 %v359_v18, %v247_v15  ;;  %v349_v26 = vadd.f32 1.0, %v888_v19  ;;  %v382_v41 = vpack.c.bf16 %v374_v21, %v372_v17 }
 0x112   :  { %v892_v16 = vpop.eup %891  ;;  %v350_v49 = vadd.f32 1.0, %v890_v25  ;;  %v368_v57 = vmul.f32 %v352_v29, %v240_v61  ;;  %v232_v25 = vmul.f32 0.5, %v1085_v53  ;;  %v480_v53 = vsel %vm152_vm0, %v477_v28, 0 }
 0x113   :  { %v894_v14 = vpop.eup %893  ;;  %v383_v30 = vpack.c.bf16 %v375_v62, %v373_v27  ;;  %v347_v8 = vadd.f32 1.0, %v892_v16  ;;  %v365_v5 = vmul.f32 %v349_v26, %v237_v55  ;;  %v1239_v16 = vpop.permute.xlu0 %386 }
 0x114   :  { %v896_v40 = vpop.eup %895  ;;  %v348_v6 = vadd.f32 1.0, %v894_v14  ;;  %v380_v9 = vpack.c.bf16 %v370_v46, %v368_v57  ;;  %v366_v15 = vmul.f32 %v350_v49, %v238_v59 }
 0x115   :  { %v898_v54 = vpop.eup %897  ;;  %401 = vmatprep.subr.bf16.mxu1 %v383_v30  ;;  %v345_v3 = vadd.f32 1.0, %v896_v40  ;;  %v379_v12 = vpack.c.bf16 %v367_v51, %v365_v5  ;;  %v363_v19 = vmul.f32 %v347_v8, %v235_v7 }
 0x116   :  { %402 = vmatpush1.bf16.msra.mxu1 %v382_v41  ;;  %v900_v52 = vpop.eup %899  ;;  %v346_v18 = vadd.f32 1.0, %v898_v54  ;;  %v364_v20 = vmul.f32 %v348_v6, %v236_v13 }
 0x117   :  { %403 = vmatprep.subr.bf16.mxu1 %v381_v39  ;;  %v344_v21 = vadd.f32 1.0, %v900_v52  ;;  %v361_v45 = vmul.f32 %v345_v3, %v233_v60 }
 0x118   :  { %v378_v24 = vpack.c.bf16 %v366_v15, %v364_v20  ;;  %v362_v10 = vmul.f32 %v346_v18, %v234_v11 }
 0x119   :  { %v377_v27 = vpack.c.bf16 %v363_v19, %v361_v45  ;;  %v360_v62 = vmul.f32 %v344_v21, %v232_v25 }
 0x11a   :  { %404 = vmatpush1.bf16.msra.mxu1 %v380_v9 }
 0x11b   :  { %405 = vmatprep.subr.bf16.mxu1 %v379_v12  ;;  %v376_v1 = vpack.c.bf16 %v362_v10, %v360_v62 }
 0x11e   :  { %406 = vmatpush1.bf16.msra.mxu1 %v378_v24 }
 0x11f   :  { %407 = vmatprep.subr.bf16.mxu1 %v377_v27 }
 0x122   :  { %408 = vmatpush1.bf16.msra.mxu1 %v376_v1 }
 0x123   :  { %853 = vmatprep.subr.msk.bf16.mxu1 %vm152_vm0, %v478_v50 }
 0x125   :  { %851 = vmatmul.mubr.msk.bf16.vlgmr.msra.gmra.mxu1 %vm389_vm2, %v1221_v63 }
 0x126   :  { %500 = vmatpush1.bf16.msra.mxu1 %v480_v53  ;;  %517 = vmatprep.mubr.bf16.mxu1 %v933_v2 }
 0x12d   :  { %854 = vmatmul.mubr.msk.bf16.vlgmr.msra.gmra.mxu1 %vm139_vm1, %v1032_v31 }
 0x12e   :  { %527 = vmatprep.mubr.bf16.mxu1 %v933_v2 }
 0x135   :  { %855 = vmatmul.mubr.msk.bf16.gmra.mxu1 %vm139_vm1, %v1043_v33 }
 0x136   :  { %537 = vmatprep.mubr.bf16.mxu1 %v933_v2 }
 0x13d   :  { %856 = vmatmul.mubr.msk.bf16.gmra.mxu1 %vm139_vm1, %v1051_v34 }
 0x13e   :  { %547 = vmatprep.mubr.bf16.mxu1 %v933_v2 }
 0x145   :  { %857 = vmatmul.mubr.msk.bf16.gmra.mxu1 %vm139_vm1, %v1059_v35 }
 0x1e5   :  { %v427_v22 = vpop.f32.mrf.mxu1 }
 0x1e6   :  { %v1242_v31 = vadd.f32 %v427_v22, %v1239_v16 }
 0x1e7   :  { %v429_v17 = vpop.f32.mrf.mxu1 }
 0x1e8   :  { %v1245_v44 = vadd.f32 %v429_v17, %v1239_v16 }
 0x1e9   :  { %v431_v33 = vpop.f32.mrf.mxu1 }
 0x1ea   :  { %v436_v29 = vcombine.low %v1242_v31, %v1245_v44 }
 0x1eb   :  { %v432_v34 = vpop.f32.mrf.mxu1 }
 0x1ec   :  { %438 = vst [vmem:[%s1419_s7] sm:$0xff] %v436_v29 }
 0x1ed   :  { %v519_v2 = vpop.f32.mrf.mxu1 }
 0x1ee   :  { %v1262_v54 = vadd.f32 %v519_v2, %v1076_v48 }
 0x1ef   :  { %v521_v35 = vpop.f32.mrf.mxu1 }
 0x1f0   :  { %v1253_v40 = vadd.f32 %v521_v35, %v1076_v48  ;;  %v574_v7 = vmul.f32 0.044715, %v1262_v54 }
 0x1f1   :  { %v523_v14 = vpop.f32.mrf.mxu1 }
 0x1f2   :  { %v575_v55 = vmul.f32 0.044715, %v1253_v40  ;;  %v1267_v51 = vadd.f32 %v523_v14, %v1088_v56 }
 0x1f3   :  { %v525_v30 = vpop.f32.mrf.mxu1 }
 0x1f4   :  { %v1259_v46 = vadd.f32 %v525_v30, %v1088_v56  ;;  %v591_v9 = vmul.f32 %v575_v55, %v1253_v40  ;;  %v576_v13 = vmul.f32 0.044715, %v1267_v51 }
 0x1f5   :  { %v529_v32 = vpop.f32.mrf.mxu1 }
 0x1f6   :  { %v577_v6 = vmul.f32 0.044715, %v1259_v46  ;;  %v1288_v15 = vadd.f32 %v529_v32, %v1072_v43  ;;  %v1307_v10 = vmul.f32 %v591_v9, %v1253_v40  ;;  %v592_v28 = vmul.f32 %v576_v13, %v1267_v51 }
 0x1f7   :  { %v531_v23 = vpop.f32.mrf.mxu1 }
 0x1f8   :  { %v1270_v57 = vadd.f32 %v531_v23, %v1072_v43  ;;  %v593_v11 = vmul.f32 %v577_v6, %v1259_v46 }
 0x1f9   :  { %v533_v26 = vpop.f32.mrf.mxu1 }
 0x1fa   :  { %v1291_v18 = vadd.f32 %v533_v26, %v1074_v47  ;;  %v579_v12 = vmul.f32 0.044715, %v1270_v57  ;;  %v609_v17 = vmul.f32 %v593_v11, %v1259_v46 }
 0x1fb   :  { %v535_v41 = vpop.f32.mrf.mxu1 }
 0x1fc   :  { %v1256_v61 = vadd.f32 %v535_v41, %v1074_v47  ;;  %v590_v47 = vmul.f32 %v574_v7, %v1262_v54  ;;  %v580_v27 = vmul.f32 0.044715, %v1291_v18  ;;  %v595_v1 = vmul.f32 %v579_v12, %v1270_v57 }
 0x1fd   :  { %v539_v49 = vpop.f32.mrf.mxu1 }
 0x1fe   :  { %v581_v39 = vmul.f32 0.044715, %v1256_v61  ;;  %v1278_v48 = vadd.f32 %v539_v49, %v1066_v37  ;;  %v596_v23 = vmul.f32 %v580_v27, %v1291_v18 }
 0x1ff   :  { %v541_v8 = vpop.f32.mrf.mxu1 }
 0x200   :  { %v1273_v59 = vadd.f32 %v541_v8, %v1066_v37  ;;  %v597_v52 = vmul.f32 %v581_v39, %v1256_v61  ;;  %v582_v43 = vmul.f32 0.044715, %v1278_v48  ;;  %v611_v39 = vmul.f32 %v595_v1, %v1270_v57 }
 0x201   :  { %v543_v5 = vpop.f32.mrf.mxu1 }
 0x202   :  { %v583_v56 = vmul.f32 0.044715, %v1273_v59  ;;  %v1283_v3 = vadd.f32 %v543_v5, %v1070_v42  ;;  %v613_v21 = vmul.f32 %v597_v52, %v1256_v61  ;;  %v598_v33 = vmul.f32 %v582_v43, %v1278_v48 }
 0x203   :  { %v545_v37 = vpop.f32.mrf.mxu1 }
 0x204   :  { %v599_v60 = vmul.f32 %v583_v56, %v1273_v59  ;;  %v584_v19 = vmul.f32 0.044715, %v1283_v3  ;;  %v1297_v20 = vadd.f32 %v545_v37, %v1070_v42  ;;  %v578_v42 = vmul.f32 0.044715, %v1288_v15 }
 0x205   :  { %v549_v45 = vpop.f32.mrf.mxu1  ;;  %v629_v2 = vadd.f32 %v613_v21, %v1256_v61  ;;  %v614_v52 = vmul.f32 %v598_v33, %v1278_v48 }
 0x206   :  { %v615_v58 = vmul.f32 %v599_v60, %v1273_v59  ;;  %v600_v24 = vmul.f32 %v584_v19, %v1283_v3  ;;  %v585_v25 = vmul.f32 0.044715, %v1297_v20  ;;  %v1312_v62 = vadd.f32 %v549_v45, %v1064_v36 }
 0x207   :  { %v551_v50 = vpop.f32.mrf.mxu1  ;;  %v645_v56 = vmul.f32 0.7978846, %v629_v2  ;;  %v612_v60 = vmul.f32 %v596_v23, %v1291_v18  ;;  %v623_v23 = vadd.f32 %v1307_v10, %v1253_v40 }
 0x208   :  { %v601_v53 = vmul.f32 %v585_v25, %v1297_v20  ;;  %v1318_v22 = vadd.f32 %v551_v50, %v1064_v36  ;;  %v586_v29 = vmul.f32 0.044715, %v1312_v62  ;;  %v616_v35 = vmul.f32 %v600_v24, %v1283_v3 }
 0x209   :  { %v553_v34 = vpop.f32.mrf.mxu1  ;;  %v631_v32 = vadd.f32 %v615_v58, %v1273_v59  ;;  %v594_v36 = vmul.f32 %v578_v42, %v1288_v15  ;;  %v627_v58 = vadd.f32 %v611_v39, %v1270_v57  ;;  %v630_v24 = vadd.f32 %v614_v52, %v1278_v48 }
 0x20a   :  { %v617_v14 = vmul.f32 %v601_v53, %v1297_v20  ;;  %v587_v30 = vmul.f32 0.044715, %v1318_v22  ;;  %v602_v26 = vmul.f32 %v586_v29, %v1312_v62  ;;  %v1332_v41 = vadd.f32 %v553_v34, %v1068_v38 }
 0x20b   :  { %v555_v49 = vpop.f32.mrf.mxu1  ;;  %v632_v9 = vadd.f32 %v616_v35, %v1283_v3  ;;  %v647_v12 = vmul.f32 0.7978846, %v631_v32  ;;  %v610_v21 = vmul.f32 %v594_v36, %v1288_v15  ;;  %901 = vtanh.f32 %v645_v56 }
 0x20c   :  { %v603_v55 = vmul.f32 %v587_v30, %v1318_v22  ;;  %v1337_v8 = vadd.f32 %v555_v49, %v1068_v38  ;;  %v633_v6 = vadd.f32 %v617_v14, %v1297_v20  ;;  %v618_v5 = vmul.f32 %v602_v26, %v1312_v62 }
 0x20d   :  { %v588_v7 = vmul.f32 0.044715, %v1332_v41  ;;  %v648_v27 = vmul.f32 0.7978846, %v632_v9  ;;  %903 = vtanh.f32 %v647_v12  ;;  %v608_v53 = vmul.f32 %v592_v28, %v1267_v51 }
 0x20e   :  { %v619_v13 = vmul.f32 %v603_v55, %v1318_v22  ;;  %v589_v37 = vmul.f32 0.044715, %v1337_v8  ;;  %v634_v38 = vadd.f32 %v618_v5, %v1312_v62  ;;  %v649_v11 = vmul.f32 0.7978846, %v633_v6 }
 0x20f   :  { %v604_v19 = vmul.f32 %v588_v7, %v1332_v41  ;;  %v628_v33 = vadd.f32 %v612_v60, %v1291_v18  ;;  %v606_v34 = vmul.f32 %v590_v47, %v1262_v54  ;;  %v625_v35 = vadd.f32 %v609_v17, %v1259_v46 }
 0x210   :  { %v605_v43 = vmul.f32 %v589_v37, %v1337_v8  ;;  %v635_v45 = vadd.f32 %v619_v13, %v1318_v22  ;;  %v650_v25 = vmul.f32 0.7978846, %v634_v38  ;;  %905 = vtanh.f32 %v649_v11 }
 0x211   :  { %v620_v42 = vmul.f32 %v604_v19, %v1332_v41  ;;  %v626_v14 = vadd.f32 %v610_v21, %v1288_v15  ;;  %v646_v30 = vmul.f32 0.7978846, %v630_v24  ;;  %v643_v28 = vmul.f32 0.7978846, %v627_v58 }
 0x212   :  { %v621_v50 = vmul.f32 %v605_v43, %v1337_v8  ;;  %v651_v1 = vmul.f32 0.7978846, %v635_v45  ;;  %v624_v26 = vadd.f32 %v608_v53, %v1267_v51  ;;  %v644_v49 = vmul.f32 0.7978846, %v628_v33 }
 0x213   :  { %v636_v29 = vadd.f32 %v620_v42, %v1332_v41  ;;  %v641_v47 = vmul.f32 0.7978846, %v625_v35  ;;  %v622_v39 = vadd.f32 %v606_v34, %v1262_v54  ;;  %v642_v17 = vmul.f32 0.7978846, %v626_v14 }
 0x214   :  { %v637_v2 = vadd.f32 %v621_v50, %v1337_v8  ;;  %907 = vtanh.f32 %v651_v1  ;;  %v639_v55 = vmul.f32 0.7978846, %v623_v23  ;;  %v640_v6 = vmul.f32 0.7978846, %v624_v26 }
 0x215   :  { %909 = vtanh.f32 %v650_v25  ;;  %v652_v32 = vmul.f32 0.7978846, %v636_v29  ;;  %v638_v52 = vmul.f32 0.7978846, %v622_v39  ;;  %v572_v19 = vmul.f32 0.5, %v1332_v41 }
 0x216   :  { %911 = vtanh.f32 %v648_v27  ;;  %v653_v36 = vmul.f32 0.7978846, %v637_v2  ;;  %v569_v43 = vmul.f32 0.5, %v1297_v20  ;;  %v571_v58 = vmul.f32 0.5, %v1318_v22 }
 0x217   :  { %913 = vtanh.f32 %v652_v32  ;;  %v573_v24 = vmul.f32 0.5, %v1337_v8  ;;  %v570_v50 = vmul.f32 0.5, %v1312_v62  ;;  %v567_v53 = vmul.f32 0.5, %v1273_v59 }
 0x218   :  { %915 = vtanh.f32 %v653_v36  ;;  %v902_v5 = vpop.eup %901  ;;  %v568_v22 = vmul.f32 0.5, %v1283_v3  ;;  %v566_v59 = vmul.f32 0.5, %v1278_v48 }
 0x219   :  { %917 = vtanh.f32 %v646_v30  ;;  %v677_v35 = vadd.f32 1.0, %v902_v5  ;;  %v564_v5 = vmul.f32 0.5, %v1291_v18  ;;  %v560_v18 = vmul.f32 0.5, %v1267_v51 }
 0x21a   :  { %919 = vtanh.f32 %v643_v28  ;;  %v904_v10 = vpop.eup %903  ;;  %v565_v28 = vmul.f32 0.5, %v1256_v61  ;;  %v455_v51 = vmul.f32 %v1245_v44, %v1245_v44 }
 0x21b   :  { %921 = vtanh.f32 %v644_v49  ;;  %v679_v42 = vadd.f32 1.0, %v904_v10 }
 0x21c   :  { %923 = vtanh.f32 %v641_v47 }
 0x21d   :  { %925 = vtanh.f32 %v642_v17  ;;  %v906_v7 = vpop.eup %905  ;;  %v695_v36 = vmul.f32 %v679_v42, %v567_v53 }
 0x21e   :  { %927 = vtanh.f32 %v639_v55  ;;  %v681_v60 = vadd.f32 1.0, %v906_v7  ;;  %v563_v55 = vmul.f32 0.5, %v1270_v57  ;;  %v559_v57 = vmul.f32 0.5, %v1253_v40 }
 0x21f   :  { %929 = vtanh.f32 %v640_v6  ;;  %v693_v6 = vmul.f32 %v677_v35, %v565_v28  ;;  %v454_v40 = vmul.f32 %v1242_v31, %v1242_v31 }
 0x220   :  { %931 = vtanh.f32 %v638_v52  ;;  %v697_v2 = vmul.f32 %v681_v60, %v569_v43 }
 0x221   :  { %v908_v56 = vpop.eup %907  ;;  %v456_v42 = vsel %vm439_vm3, %v454_v40, 0.0 }
 0x222   :  { %v910_v9 = vpop.eup %909  ;;  %v683_v12 = vadd.f32 1.0, %v908_v56  ;;  %v707_v17 = vpack.c.bf16 %v697_v2, %v695_v36  ;;  %v561_v56 = vmul.f32 0.5, %v1259_v46  ;;  %v558_v46 = vmul.f32 0.5, %v1262_v54 }
 0x223   :  { %v912_v13 = vpop.eup %911  ;;  %v682_v11 = vadd.f32 1.0, %v910_v9  ;;  %v440_v54 = vsel %vm439_vm3, %v1242_v31, 0.0 }
 0x224   :  { %v914_v37 = vpop.eup %913  ;;  %v680_v33 = vadd.f32 1.0, %v912_v13  ;;  %v699_v41 = vmul.f32 %v683_v12, %v571_v58  ;;  %v562_v13 = vmul.f32 0.5, %v1288_v15 }
 0x225   :  { %v916_v38 = vpop.eup %915  ;;  %v684_v21 = vadd.f32 1.0, %v914_v37  ;;  %v698_v14 = vmul.f32 %v682_v11, %v570_v50  ;;  %v441_v50 = vrot.slane %v440_v54, 4 }
 0x226   :  { %v918_v45 = vpop.eup %917  ;;  %v685_v25 = vadd.f32 1.0, %v916_v38  ;;  %v696_v49 = vmul.f32 %v680_v33, %v568_v22 }
 0x227   :  { %v920_v27 = vpop.eup %919  ;;  %v700_v1 = vmul.f32 %v684_v21, %v572_v19  ;;  %v678_v30 = vadd.f32 1.0, %v918_v45  ;;  %v442_v33 = vadd.f32 %v441_v50, %v440_v54 }
 0x228   :  { %v922_v29 = vpop.eup %921  ;;  %v701_v34 = vmul.f32 %v685_v25, %v573_v24  ;;  %v675_v62 = vadd.f32 1.0, %v920_v27  ;;  %v447_v25 = vsel %vm439_vm3, %v1245_v44, 0.0  ;;  %v463_v27 = vsel %vm439_vm3, %v455_v51, 0.0 }
 0x229   :  { %v924_v20 = vpop.eup %923  ;;  %v708_v26 = vpack.c.bf16 %v700_v1, %v698_v14  ;;  %v676_v47 = vadd.f32 1.0, %v922_v29  ;;  %v694_v52 = vmul.f32 %v678_v30, %v566_v59  ;;  %v448_v1 = vrot.slane %v447_v25, 4 }
 0x22a   :  { %v926_v8 = vpop.eup %925  ;;  %v709_v32 = vpack.c.bf16 %v701_v34, %v699_v41  ;;  %v673_v3 = vadd.f32 1.0, %v924_v20  ;;  %v691_v7 = vmul.f32 %v675_v62, %v563_v55  ;;  %v464_v53 = vrot.slane %v463_v27, 4 }
 0x22b   :  { %v928_v23 = vpop.eup %927  ;;  %v674_v10 = vadd.f32 1.0, %v926_v8  ;;  %v706_v9 = vpack.c.bf16 %v696_v49, %v694_v52  ;;  %v692_v37 = vmul.f32 %v676_v47, %v564_v5  ;;  %v449_v29 = vadd.f32 %v448_v1, %v447_v25 }
 0x22c   :  { %v930_v39 = vpop.eup %929  ;;  %718 = vmatprep.subr.bf16.mxu0 %v709_v32  ;;  %v671_v48 = vadd.f32 1.0, %v928_v23  ;;  %v705_v60 = vpack.c.bf16 %v693_v6, %v691_v7  ;;  %v689_v38 = vmul.f32 %v673_v3, %v561_v56  ;;  %v465_v34 = vadd.f32 %v464_v53, %v463_v27 }
 0x22d   :  { %719 = vmatpush1.bf16.msra.mxu0 %v708_v26  ;;  %v932_v61 = vpop.eup %931  ;;  %v672_v12 = vadd.f32 1.0, %v930_v39  ;;  %v690_v19 = vmul.f32 %v674_v10, %v562_v13  ;;  %v443_v20 = vrot.slane %v442_v33, 2  ;;  %v450_v14 = vrot.slane %v449_v29, 2 }
 0x22e   :  { %720 = vmatprep.subr.bf16.mxu0 %v707_v17  ;;  %v670_v11 = vadd.f32 1.0, %v932_v61  ;;  %v687_v21 = vmul.f32 %v671_v48, %v559_v57  ;;  %v466_v32 = vrot.slane %v465_v34, 2  ;;  %v934_v61 = vmov 1966171168  }
 0x22f   :  { %v704_v43 = vpack.c.bf16 %v692_v37, %v690_v19  ;;  %v688_v45 = vmul.f32 %v672_v12, %v560_v18  ;;  %v444_v55 = vadd.f32 %v443_v20, %v442_v33  ;;  %v451_v6 = vadd.f32 %v450_v14, %v449_v29 }
 0x230   :  { %v703_v58 = vpack.c.bf16 %v689_v38, %v687_v21  ;;  %v686_v15 = vmul.f32 %v670_v11, %v558_v46  ;;  %v795_v7 = vunpack.c.l.s4 %v934_v61  ;;  %v467_v48 = vadd.f32 %v466_v32, %v465_v34 }
 0x231   :  { %721 = vmatpush1.bf16.msra.mxu0 %v706_v9  ;;  %v452_v57 = vrot.slane %v451_v6, 1 }
 0x232   :  { %722 = vmatprep.subr.bf16.mxu0 %v705_v60  ;;  %v702_v24 = vpack.c.bf16 %v688_v45, %v686_v15  ;;  %v445_v60 = vrot.slane %v444_v55, 1  ;;  %v796_v21 = vunpack.c.0.s8 %v795_v7  ;;  %v468_v46 = vrot.slane %v467_v48, 1 }
 0x233   :  { %v453_v51 = vadd.f32 %v452_v57, %v451_v6 }
 0x234   :  { %v446_v40 = vadd.f32 %v445_v60, %v444_v55  ;;  %v799_v27 = vsub.s32 %v796_v21, %v989_v4  ;;  %v469_v1 = vadd.f32 %v468_v46, %v467_v48 }
 0x235   :  { %723 = vmatpush1.bf16.msra.mxu0 %v704_v43 }
 0x236   :  { %724 = vmatprep.subr.bf16.mxu0 %v703_v58 }
 0x239   :  { %725 = vmatpush1.bf16.msra.mxu0 %v702_v24 }
 0x23c   :  { %858 = vmatmul.mubr.msk.bf16.vlgmr.msra.gmra.mxu0 %vm389_vm2, %v1221_v63  ;;  %v457_v63 = vrot.slane %v456_v42, 4 }
 0x23e   :  { %v458_v41 = vadd.f32 %v457_v63, %v456_v42 }
 0x240   :  { %v459_v8 = vrot.slane %v458_v41, 2 }
 0x242   :  { %v460_v56 = vadd.f32 %v459_v8, %v458_v41 }
 0x244   :  { %v461_v43 = vrot.slane %v460_v56, 1 }
 0x246   :  { %v462_v50 = vadd.f32 %v461_v43, %v460_v56 }
 0x2fc   :  { %v744_v2 = vpop.f32.mrf.mxu0 }
 0x2fd   :  { %v745_v35 = vadd.f32 %v744_v2, %v1239_v16 }
 0x2fe   :  { %v746_v31 = vpop.f32.mrf.mxu0 }
 0x2ff   :  { %v757_v44 = vsel %vm439_vm3, %v745_v35, 0.0  ;;  %v771_v22 = vmul.f32 %v745_v35, %v745_v35  ;;  %v747_v30 = vadd.f32 %v746_v31, %v1239_v16 }
 0x300   :  { %v758_v36 = vrot.slane %v757_v44, 4  ;;  %v748_v28 = vpop.f32.mrf.mxu0 }
 0x301   :  { %v773_v62 = vsel %vm439_vm3, %v771_v22, 0.0  ;;  %v753_v23 = vcombine.low %v745_v35, %v747_v30  ;;  %v764_v26 = vsel %vm439_vm3, %v747_v30, 0.0  ;;  %v772_v59 = vmul.f32 %v747_v30, %v747_v30 }
 0x302   :  { %v759_v49 = vadd.f32 %v758_v36, %v757_v44  ;;  %v774_v47 = vrot.slane %v773_v62, 4  ;;  %v765_v39 = vrot.slane %v764_v26, 4  ;;  %v749_v17 = vpop.f32.mrf.mxu0 }
 0x303   :  { %859 = vst [vmem:[%s1419_s7 + $0x8] sm:$0xff] %v753_v23  ;;  %v780_v16 = vsel %vm439_vm3, %v772_v59, 0.0 }
 0x304   :  { %v760_v3 = vrot.slane %v759_v49, 2  ;;  %v775_v52 = vadd.f32 %v774_v47, %v773_v62  ;;  %v766_v5 = vadd.f32 %v765_v39, %v764_v26  ;;  %v781_v10 = vrot.slane %v780_v16, 4 }
 0x306   :  { %v761_v9 = vadd.f32 %v760_v3, %v759_v49  ;;  %v776_v13 = vrot.slane %v775_v52, 2  ;;  %v767_v37 = vrot.slane %v766_v5, 2  ;;  %v782_v12 = vadd.f32 %v781_v10, %v780_v16 }
 0x308   :  { %v762_v38 = vrot.slane %v761_v9, 1  ;;  %v777_v19 = vadd.f32 %v776_v13, %v775_v52  ;;  %v768_v18 = vadd.f32 %v767_v37, %v766_v5  ;;  %v783_v11 = vrot.slane %v782_v12, 2 }
 0x30a   :  { %v763_v45 = vadd.f32 %v762_v38, %v761_v9  ;;  %v778_v58 = vrot.slane %v777_v19, 1  ;;  %v769_v15 = vrot.slane %v768_v18, 1  ;;  %v784_v24 = vadd.f32 %v783_v11, %v782_v12 }
 0x30c   :  { %v779_v54 = vadd.f32 %v778_v58, %v777_v19  ;;  %v770_v25 = vadd.f32 %v769_v15, %v768_v18  ;;  %v785_v42 = vrot.slane %v784_v24, 1  ;;  %v787_v63 = vadd.f32 %v763_v45, %v446_v40 }
 0x30e   :  { %v786_v53 = vadd.f32 %v785_v42, %v784_v24  ;;  %v788_v33 = vadd.f32 %v770_v25, %v453_v51  ;;  %v789_v29 = vadd.f32 %v779_v54, %v462_v50 }
 0x310   :  { %v790_v41 = vadd.f32 %v786_v53, %v469_v1  ;;  %v793_v34 = vcombine.low %v787_v63, %v788_v33 }
 0x312   :  { %v800_v2 = vrot.slane %v793_v34, %v799_v27  ;;  %v816_v35 = vcombine.low %v789_v29, %v790_v41 }
 0x314   :  { %v807_v20 = vrot.slane %v800_v2, %v799_v27  ;;  %v823_v31 = vrot.slane %v816_v35, %v799_v27 }
 0x316   :  { %813 = vst.msk [vmem:[%s1420_s8] ss:$2 sm:$0x3] %vm811_vm4, %v807_v20  ;;  %v830_v14 = vrot.slane %v823_v31, %v799_v27 }
 0x318   :  { %860 = vst.msk [vmem:[%s1420_s8 + $0x1] ss:$2 sm:$0x3] %vm811_vm4, %v830_v14 }

// kernel: tsti_encoder_forward.19
= control target key start
LH: loop header
LB: loop body
LE: loop exit
PB: predicated region body
PF: predicated region fallthrough
CT: control target
= control target key end

     0   :  { %vm107_vm0 = vcmask 261120   ;;  %s251_s0 = inlined_call_operand.vmem [shape: f32[64,32], index: 0, kind: input, shape index: {}]   ;;  %s252_s1 = inlined_call_operand.vmem [shape: f32[64,32], index: 1, kind: input, shape index: {}]   ;;  %s253_s2 = inlined_call_operand.vmem [shape: f32[1,32], index: 2, kind: input, shape index: {}]   ;;  %s254_s3 = inlined_call_operand.vmem [shape: f32[1,32], index: 3, kind: input, shape index: {}]   ;;  %s255_s4 = inlined_call_operand.vmem [shape: f32[1,32], index: 4, kind: input, shape index: {}]   ;;  %s256_s5 = inlined_call_operand.vmem [shape: f32[1,32], index: 5, kind: input, shape index: {}]   ;;  %s257_s6 = inlined_call_operand.vmem [shape: f32[64,32], index: 6, kind: output, shape index: {}]  }
   0x1   :  { %v23_v0 = vld [vmem:[%s251_s0] sm:$0xff]  ;;  %v24_v8 = vld [vmem:[%s251_s0 + $0x8] sm:$0xff]  ;;  %v25_v10 = vld [vmem:[%s251_s0 + $0x10] sm:$0xff] }
   0x2   :  { %v120_v1 = vld [vmem:[%s253_s2] ss:$0 sm:$0xff]  ;;  %v62_v9 = vld [vmem:[%s252_s1 + $0x8] sm:$0xff]  ;;  %v63_v15 = vld [vmem:[%s252_s1 + $0x10] sm:$0xff] }
   0x3   :  { %v121_v2 = vld [vmem:[%s254_s3] ss:$0 sm:$0xff]  ;;  %v38_v3 = vmul.f32 %v120_v1, %v23_v0  ;;  %v39_v12 = vmul.f32 %v120_v1, %v24_v8  ;;  %v40_v14 = vmul.f32 %v120_v1, %v25_v10  ;;  %v26_v16 = vld [vmem:[%s251_s0 + $0x18] sm:$0xff]  ;;  %v28_v24 = vld [vmem:[%s251_s0 + $0x28] sm:$0xff] }
   0x4   :  { %v61_v4 = vld [vmem:[%s252_s1] sm:$0xff]  ;;  %v64_v17 = vld [vmem:[%s252_s1 + $0x18] sm:$0xff]  ;;  %v41_v20 = vmul.f32 %v120_v1, %v26_v16  ;;  %v66_v29 = vld [vmem:[%s252_s1 + $0x28] sm:$0xff]  ;;  %v43_v40 = vmul.f32 %v120_v1, %v28_v24 }
   0x5   :  { %v122_v5 = vld [vmem:[%s255_s4] ss:$0 sm:$0xff]  ;;  %v53_v11 = vadd.f32 %v121_v2, %v38_v3  ;;  %v54_v25 = vadd.f32 %v121_v2, %v39_v12  ;;  %v55_v27 = vadd.f32 %v121_v2, %v40_v14  ;;  %v29_v30 = vld [vmem:[%s251_s0 + $0x30] sm:$0xff]  ;;  %v30_v36 = vld [vmem:[%s251_s0 + $0x38] sm:$0xff] }
   0x6   :  { %v123_v6 = vld [vmem:[%s256_s5] ss:$0 sm:$0xff]  ;;  %v76_v7 = vmul.f32 %v122_v5, %v61_v4  ;;  %v77_v13 = vmul.f32 %v122_v5, %v62_v9  ;;  %v78_v19 = vmul.f32 %v122_v5, %v63_v15  ;;  %v79_v21 = vmul.f32 %v122_v5, %v64_v17  ;;  %v67_v35 = vld [vmem:[%s252_s1 + $0x30] sm:$0xff]  ;;  %v68_v41 = vld [vmem:[%s252_s1 + $0x38] sm:$0xff] }
   0x7   :  { %v27_v22 = vld [vmem:[%s251_s0 + $0x20] sm:$0xff]  ;;  %v56_v33 = vadd.f32 %v121_v2, %v41_v20  ;;  %v81_v44 = vmul.f32 %v122_v5, %v66_v29  ;;  %v44_v45 = vmul.f32 %v120_v1, %v29_v30  ;;  %v58_v47 = vadd.f32 %v121_v2, %v43_v40 }
   0x8   :  { %v91_v18 = vadd.f32 %v123_v6, %v76_v7  ;;  %v65_v23 = vld [vmem:[%s252_s1 + $0x20] sm:$0xff]  ;;  %v92_v26 = vadd.f32 %v123_v6, %v77_v13  ;;  %v42_v28 = vmul.f32 %v120_v1, %v27_v22  ;;  %v93_v32 = vadd.f32 %v123_v6, %v78_v19 }
   0x9   :  { %v94_v34 = vadd.f32 %v123_v6, %v79_v21  ;;  %v80_v39 = vmul.f32 %v122_v5, %v65_v23  ;;  %v82_v48 = vmul.f32 %v122_v5, %v67_v35  ;;  %v45_v49 = vmul.f32 %v120_v1, %v30_v36 }
   0xa   :  { %v99_v31 = vadd.f32 %v91_v18, %v53_v11  ;;  %v100_v37 = vadd.f32 %v92_v26, %v54_v25  ;;  %v57_v38 = vadd.f32 %v121_v2, %v42_v28  ;;  %v101_v42 = vadd.f32 %v93_v32, %v55_v27 }
   0xb   :  { %v102_v43 = vadd.f32 %v94_v34, %v56_v33  ;;  %v95_v46 = vadd.f32 %v123_v6, %v80_v39  ;;  %v96_v50 = vadd.f32 %v123_v6, %v81_v44  ;;  %v59_v51 = vadd.f32 %v121_v2, %v44_v45 }
   0xc   :  { %108 = vst.msk [vmem:[%s257_s6] sm:$0xff] %vm107_vm0, %v99_v31  ;;  %109 = vst.msk [vmem:[%s257_s6 + $0x8] sm:$0xff] %vm107_vm0, %v100_v37  ;;  %v83_v52 = vmul.f32 %v122_v5, %v68_v41  ;;  %v97_v54 = vadd.f32 %v123_v6, %v82_v48  ;;  %v60_v55 = vadd.f32 %v121_v2, %v45_v49 }
   0xd   :  { %110 = vst.msk [vmem:[%s257_s6 + $0x10] sm:$0xff] %vm107_vm0, %v101_v42  ;;  %111 = vst.msk [vmem:[%s257_s6 + $0x18] sm:$0xff] %vm107_vm0, %v102_v43  ;;  %v103_v53 = vadd.f32 %v95_v46, %v57_v38  ;;  %v104_v56 = vadd.f32 %v96_v50, %v58_v47 }
   0xe   :  { %v98_v57 = vadd.f32 %v123_v6, %v83_v52  ;;  %v105_v58 = vadd.f32 %v97_v54, %v59_v51 }
   0xf   :  { %112 = vst.msk [vmem:[%s257_s6 + $0x20] sm:$0xff] %vm107_vm0, %v103_v53  ;;  %113 = vst.msk [vmem:[%s257_s6 + $0x28] sm:$0xff] %vm107_vm0, %v104_v56 }
  0x10   :  { %v106_v59 = vadd.f32 %v98_v57, %v60_v55  ;;  %114 = vst.msk [vmem:[%s257_s6 + $0x30] sm:$0xff] %vm107_vm0, %v105_v58 }
  0x12   :  { %115 = vst.msk [vmem:[%s257_s6 + $0x38] sm:$0xff] %vm107_vm0, %v106_v59 }

// kernel: tsti_encoder_forward.15
= control target key start
LH: loop header
LB: loop body
LE: loop exit
PB: predicated region body
PF: predicated region fallthrough
CT: control target
= control target key end

     0   :  { %vm81_vm0 = vcmask 64512   ;;  %v4254_v0 = vmov 0.0   ;;  %vm4255_vm1 = vmmov 0   ;;  %vm2005_vm2 = vcmask 1043456   ;;  %s5497_s1 = inlined_call_operand.vmem [shape: bf16[32,8,8], index: 1, kind: input, shape index: {}]   ;;  %s5498_s0 = inlined_call_operand.vmem [shape: bf16[32,8,8], index: 0, kind: input, shape index: {}]   ;;  %s5499_s4 = inlined_call_operand.vmem [shape: f32[32,8,8], index: 4, kind: output, shape index: {1}]   ;;  %s5500_s2 = inlined_call_operand.vmem [shape: bf16[32,8,8], index: 2, kind: input, shape index: {}]   ;;  %s5501_s3 = inlined_call_operand.vmem [shape: bf16[32,8,8], index: 3, kind: output, shape index: {0}]  }
   0x1   :  { %3740 = vmatprep.subr.bf16.mxu0 %v4254_v0  ;;  %3746 = vmatprep.subr.bf16.mxu1 %v4254_v0  ;;  %v49_v1 = vld [vmem:[%s5497_s1] sm:$0xf]  ;;  %v50_v2 = vld [vmem:[%s5497_s1 + $0x4] sm:$0xf]  ;;  %v51_v5 = vld [vmem:[%s5497_s1 + $0x8] sm:$0xf] }
   0x2   :  { %v86_v3 = vsel %vm81_vm0, %v49_v1, 0  ;;  %v132_v4 = vsel %vm81_vm0, %v50_v2, 0  ;;  %3742 = vmatprep.mubr.msk.bf16.mxu0 %vm4255_vm1, %v4254_v0  ;;  %3748 = vmatprep.mubr.msk.bf16.mxu1 %vm4255_vm1, %v4254_v0  ;;  %v52_v6 = vld [vmem:[%s5497_s1 + $0xc] sm:$0xf]  ;;  %v17_v7 = vld [vmem:[%s5498_s0] sm:$0xf] }
   0x3   :  { %3741 = vmatpush3.bf16.xpose.msra.mxu0 %v86_v3  ;;  %3747 = vmatpush3.bf16.xpose.msra.mxu1 %v132_v4  ;;  %v18_v8 = vld [vmem:[%s5498_s0 + $0x4] sm:$0xf]  ;;  %v178_v9 = vsel %vm81_vm0, %v51_v5, 0  ;;  %v224_v10 = vsel %vm81_vm0, %v52_v6, 0  ;;  %v53_v11 = vld [vmem:[%s5497_s1 + $0x10] sm:$0xf] }
   0x4   :  { %3752 = vmatprep.subr.bf16.mxu0 %v4254_v0  ;;  %3758 = vmatprep.subr.bf16.mxu1 %v4254_v0  ;;  %v54_v12 = vld [vmem:[%s5497_s1 + $0x14] sm:$0xf]  ;;  %v19_v13 = vld [vmem:[%s5498_s0 + $0x8] sm:$0xf]  ;;  %v20_v14 = vld [vmem:[%s5498_s0 + $0xc] sm:$0xf] }
   0x5   :  { %v270_v15 = vsel %vm81_vm0, %v53_v11, 0  ;;  %v316_v16 = vsel %vm81_vm0, %v54_v12, 0  ;;  %v55_v17 = vld [vmem:[%s5497_s1 + $0x18] sm:$0xf]  ;;  %v56_v18 = vld [vmem:[%s5497_s1 + $0x1c] sm:$0xf] }
   0x6   :  { %v21_v19 = vld [vmem:[%s5498_s0 + $0x10] sm:$0xf]  ;;  %v22_v20 = vld [vmem:[%s5498_s0 + $0x14] sm:$0xf]  ;;  %v362_v21 = vsel %vm81_vm0, %v55_v17, 0  ;;  %v408_v22 = vsel %vm81_vm0, %v56_v18, 0 }
   0x7   :  { %v57_v23 = vld [vmem:[%s5497_s1 + $0x20] sm:$0xf]  ;;  %v58_v24 = vld [vmem:[%s5497_s1 + $0x24] sm:$0xf]  ;;  %v23_v25 = vld [vmem:[%s5498_s0 + $0x18] sm:$0xf] }
   0x8   :  { %v24_v26 = vld [vmem:[%s5498_s0 + $0x1c] sm:$0xf]  ;;  %v454_v27 = vsel %vm81_vm0, %v57_v23, 0  ;;  %v500_v28 = vsel %vm81_vm0, %v58_v24, 0  ;;  %v59_v29 = vld [vmem:[%s5497_s1 + $0x28] sm:$0xf] }
   0x9   :  { %v60_v30 = vld [vmem:[%s5497_s1 + $0x2c] sm:$0xf]  ;;  %v25_v31 = vld [vmem:[%s5498_s0 + $0x20] sm:$0xf]  ;;  %v26_v32 = vld [vmem:[%s5498_s0 + $0x24] sm:$0xf] }
   0xa   :  { %3743 = vmatmul.mubr.msk.bf16.vlgmr.msra.gmra.mxu0 %vm81_vm0, %v17_v7  ;;  %3749 = vmatmul.mubr.msk.bf16.vlgmr.msra.gmra.mxu1 %vm81_vm0, %v18_v8  ;;  %v546_v33 = vsel %vm81_vm0, %v59_v29, 0  ;;  %v592_v34 = vsel %vm81_vm0, %v60_v30, 0  ;;  %v61_v35 = vld [vmem:[%s5497_s1 + $0x30] sm:$0xf]  ;;  %v62_v36 = vld [vmem:[%s5497_s1 + $0x34] sm:$0xf] }
   0xb   :  { %3753 = vmatpush3.bf16.xpose.msra.mxu0 %v178_v9  ;;  %3759 = vmatpush3.bf16.xpose.msra.mxu1 %v224_v10  ;;  %v27_v37 = vld [vmem:[%s5498_s0 + $0x28] sm:$0xf]  ;;  %v28_v38 = vld [vmem:[%s5498_s0 + $0x2c] sm:$0xf]  ;;  %v638_v39 = vsel %vm81_vm0, %v61_v35, 0  ;;  %v684_v40 = vsel %vm81_vm0, %v62_v36, 0 }
   0xc   :  { %3754 = vmatprep.mubr.msk.bf16.mxu0 %vm4255_vm1, %v4254_v0  ;;  %3760 = vmatprep.mubr.msk.bf16.mxu1 %vm4255_vm1, %v4254_v0  ;;  %v63_v41 = vld [vmem:[%s5497_s1 + $0x38] sm:$0xf]  ;;  %v64_v42 = vld [vmem:[%s5497_s1 + $0x3c] sm:$0xf]  ;;  %v29_v43 = vld [vmem:[%s5498_s0 + $0x30] sm:$0xf] }
   0xd   :  { %3764 = vmatprep.subr.bf16.mxu0 %v4254_v0  ;;  %3770 = vmatprep.subr.bf16.mxu1 %v4254_v0  ;;  %v30_v44 = vld [vmem:[%s5498_s0 + $0x34] sm:$0xf]  ;;  %v730_v45 = vsel %vm81_vm0, %v63_v41, 0  ;;  %v776_v46 = vsel %vm81_vm0, %v64_v42, 0  ;;  %v65_v47 = vld [vmem:[%s5497_s1 + $0x40] sm:$0xf] }
   0xe   :  { %v66_v48 = vld [vmem:[%s5497_s1 + $0x44] sm:$0xf]  ;;  %v31_v49 = vld [vmem:[%s5498_s0 + $0x38] sm:$0xf]  ;;  %v32_v50 = vld [vmem:[%s5498_s0 + $0x3c] sm:$0xf] }
   0xf   :  { %v822_v51 = vsel %vm81_vm0, %v65_v47, 0  ;;  %v868_v52 = vsel %vm81_vm0, %v66_v48, 0  ;;  %v67_v53 = vld [vmem:[%s5497_s1 + $0x48] sm:$0xf]  ;;  %v68_v54 = vld [vmem:[%s5497_s1 + $0x4c] sm:$0xf] }
  0x10   :  { %v33_v55 = vld [vmem:[%s5498_s0 + $0x40] sm:$0xf]  ;;  %v34_v56 = vld [vmem:[%s5498_s0 + $0x44] sm:$0xf]  ;;  %v914_v57 = vsel %vm81_vm0, %v67_v53, 0  ;;  %v960_v58 = vsel %vm81_vm0, %v68_v54, 0 }
  0x11   :  { %v69_v59 = vld [vmem:[%s5497_s1 + $0x50] sm:$0xf]  ;;  %v70_v60 = vld [vmem:[%s5497_s1 + $0x54] sm:$0xf]  ;;  %v35_v61 = vld [vmem:[%s5498_s0 + $0x48] sm:$0xf] }
  0x12   :  { %3755 = vmatmul.mubr.msk.bf16.vlgmr.msra.gmra.mxu0 %vm81_vm0, %v19_v13  ;;  %3761 = vmatmul.mubr.msk.bf16.vlgmr.msra.gmra.mxu1 %vm81_vm0, %v20_v14  ;;  %v36_v62 = vld [vmem:[%s5498_s0 + $0x4c] sm:$0xf]  ;;  %v1006_v63 = vsel %vm81_vm0, %v69_v59, 0  ;;  %v1052_v1 = vsel %vm81_vm0, %v70_v60, 0  ;;  %v71_v2 = vld [vmem:[%s5497_s1 + $0x58] sm:$0xf] }
  0x13   :  { %3765 = vmatpush3.bf16.xpose.msra.mxu0 %v270_v15  ;;  %3771 = vmatpush3.bf16.xpose.msra.mxu1 %v316_v16  ;;  %v72_v3 = vld [vmem:[%s5497_s1 + $0x5c] sm:$0xf]  ;;  %v37_v4 = vld [vmem:[%s5498_s0 + $0x50] sm:$0xf]  ;;  %v38_v5 = vld [vmem:[%s5498_s0 + $0x54] sm:$0xf] }
  0x14   :  { %3766 = vmatprep.mubr.msk.bf16.mxu0 %vm4255_vm1, %v4254_v0  ;;  %3772 = vmatprep.mubr.msk.bf16.mxu1 %vm4255_vm1, %v4254_v0  ;;  %v1098_v6 = vsel %vm81_vm0, %v71_v2, 0  ;;  %v1144_v7 = vsel %vm81_vm0, %v72_v3, 0  ;;  %v73_v8 = vld [vmem:[%s5497_s1 + $0x60] sm:$0xf]  ;;  %v74_v9 = vld [vmem:[%s5497_s1 + $0x64] sm:$0xf] }
  0x15   :  { %3776 = vmatprep.subr.bf16.mxu0 %v4254_v0  ;;  %3782 = vmatprep.subr.bf16.mxu1 %v4254_v0  ;;  %v39_v10 = vld [vmem:[%s5498_s0 + $0x58] sm:$0xf]  ;;  %v40_v11 = vld [vmem:[%s5498_s0 + $0x5c] sm:$0xf]  ;;  %v1190_v12 = vsel %vm81_vm0, %v73_v8, 0  ;;  %v1236_v13 = vsel %vm81_vm0, %v74_v9, 0 }
  0x16   :  { %v75_v14 = vld [vmem:[%s5497_s1 + $0x68] sm:$0xf]  ;;  %v76_v15 = vld [vmem:[%s5497_s1 + $0x6c] sm:$0xf]  ;;  %v41_v16 = vld [vmem:[%s5498_s0 + $0x60] sm:$0xf] }
  0x17   :  { %v42_v17 = vld [vmem:[%s5498_s0 + $0x64] sm:$0xf]  ;;  %v1282_v18 = vsel %vm81_vm0, %v75_v14, 0  ;;  %v44_v23 = vld [vmem:[%s5498_s0 + $0x6c] sm:$0xf]  ;;  %vm3507_vm3 = vcmask 60416  }
  0x18   :  { %v46_v29 = vld [vmem:[%s5498_s0 + $0x74] sm:$0xf] }
  0x1a   :  { %3767 = vmatmul.mubr.msk.bf16.vlgmr.msra.gmra.mxu0 %vm81_vm0, %v21_v19  ;;  %3773 = vmatmul.mubr.msk.bf16.vlgmr.msra.gmra.mxu1 %vm81_vm0, %v22_v20  ;;  %v1328_v19 = vsel %vm81_vm0, %v76_v15, 0  ;;  %v77_v20 = vld [vmem:[%s5497_s1 + $0x70] sm:$0xf] }
  0x1b   :  { %3777 = vmatpush3.bf16.xpose.msra.mxu0 %v362_v21  ;;  %3783 = vmatpush3.bf16.xpose.msra.mxu1 %v408_v22  ;;  %v78_v21 = vld [vmem:[%s5497_s1 + $0x74] sm:$0xf]  ;;  %v43_v22 = vld [vmem:[%s5498_s0 + $0x68] sm:$0xf]  ;;  %v1374_v24 = vsel %vm81_vm0, %v77_v20, 0 }
  0x1c   :  { %3778 = vmatprep.mubr.msk.bf16.mxu0 %vm4255_vm1, %v4254_v0  ;;  %3784 = vmatprep.mubr.msk.bf16.mxu1 %vm4255_vm1, %v4254_v0 }
  0x1d   :  { %3788 = vmatprep.subr.bf16.mxu0 %v4254_v0  ;;  %3794 = vmatprep.subr.bf16.mxu1 %v4254_v0 }
  0x22   :  { %3779 = vmatmul.mubr.msk.bf16.vlgmr.msra.gmra.mxu0 %vm81_vm0, %v23_v25  ;;  %3785 = vmatmul.mubr.msk.bf16.vlgmr.msra.gmra.mxu1 %vm81_vm0, %v24_v26  ;;  %v1420_v25 = vsel %vm81_vm0, %v78_v21, 0  ;;  %v79_v26 = vld [vmem:[%s5497_s1 + $0x78] sm:$0xf] }
  0x23   :  { %3789 = vmatpush3.bf16.xpose.msra.mxu0 %v454_v27  ;;  %3795 = vmatpush3.bf16.xpose.msra.mxu1 %v500_v28  ;;  %v80_v27 = vld [vmem:[%s5497_s1 + $0x7c] sm:$0xf]  ;;  %v45_v28 = vld [vmem:[%s5498_s0 + $0x70] sm:$0xf]  ;;  %v1466_v30 = vsel %vm81_vm0, %v79_v26, 0 }
  0x24   :  { %3790 = vmatprep.mubr.msk.bf16.mxu0 %vm4255_vm1, %v4254_v0  ;;  %3796 = vmatprep.mubr.msk.bf16.mxu1 %vm4255_vm1, %v4254_v0 }
  0x25   :  { %3800 = vmatprep.subr.bf16.mxu0 %v4254_v0  ;;  %3806 = vmatprep.subr.bf16.mxu1 %v4254_v0 }
  0x2a   :  { %3791 = vmatmul.mubr.msk.bf16.vlgmr.msra.gmra.mxu0 %vm81_vm0, %v25_v31  ;;  %3797 = vmatmul.mubr.msk.bf16.vlgmr.msra.gmra.mxu1 %vm81_vm0, %v26_v32  ;;  %v1512_v31 = vsel %vm81_vm0, %v80_v27, 0  ;;  %v47_v32 = vld [vmem:[%s5498_s0 + $0x78] sm:$0xf] }
  0x2b   :  { %3801 = vmatpush3.bf16.xpose.msra.mxu0 %v546_v33  ;;  %3807 = vmatpush3.bf16.xpose.msra.mxu1 %v592_v34  ;;  %v48_v33 = vld [vmem:[%s5498_s0 + $0x7c] sm:$0xf] }
  0x2c   :  { %3802 = vmatprep.mubr.msk.bf16.mxu0 %vm4255_vm1, %v4254_v0  ;;  %3808 = vmatprep.mubr.msk.bf16.mxu1 %vm4255_vm1, %v4254_v0 }
  0x2d   :  { %3812 = vmatprep.subr.bf16.mxu0 %v4254_v0  ;;  %3818 = vmatprep.subr.bf16.mxu1 %v4254_v0 }
  0x32   :  { %3803 = vmatmul.mubr.msk.bf16.vlgmr.msra.gmra.mxu0 %vm81_vm0, %v27_v37  ;;  %3809 = vmatmul.mubr.msk.bf16.vlgmr.msra.gmra.mxu1 %vm81_vm0, %v28_v38 }
  0x33   :  { %3813 = vmatpush3.bf16.xpose.msra.mxu0 %v638_v39  ;;  %3819 = vmatpush3.bf16.xpose.msra.mxu1 %v684_v40 }
  0x34   :  { %3814 = vmatprep.mubr.msk.bf16.mxu0 %vm4255_vm1, %v4254_v0  ;;  %3820 = vmatprep.mubr.msk.bf16.mxu1 %vm4255_vm1, %v4254_v0 }
  0x35   :  { %3824 = vmatprep.subr.bf16.mxu0 %v4254_v0  ;;  %3830 = vmatprep.subr.bf16.mxu1 %v4254_v0 }
  0x3a   :  { %3815 = vmatmul.mubr.msk.bf16.vlgmr.msra.gmra.mxu0 %vm81_vm0, %v29_v43  ;;  %3821 = vmatmul.mubr.msk.bf16.vlgmr.msra.gmra.mxu1 %vm81_vm0, %v30_v44 }
  0x3b   :  { %3825 = vmatpush3.bf16.xpose.msra.mxu0 %v730_v45  ;;  %3831 = vmatpush3.bf16.xpose.msra.mxu1 %v776_v46 }
  0x3c   :  { %3826 = vmatprep.mubr.msk.bf16.mxu0 %vm4255_vm1, %v4254_v0  ;;  %3832 = vmatprep.mubr.msk.bf16.mxu1 %vm4255_vm1, %v4254_v0 }
  0x3d   :  { %3836 = vmatprep.subr.bf16.mxu0 %v4254_v0  ;;  %3842 = vmatprep.subr.bf16.mxu1 %v4254_v0 }
  0x42   :  { %3827 = vmatmul.mubr.msk.bf16.vlgmr.msra.gmra.mxu0 %vm81_vm0, %v31_v49  ;;  %3833 = vmatmul.mubr.msk.bf16.vlgmr.msra.gmra.mxu1 %vm81_vm0, %v32_v50 }
  0x43   :  { %3837 = vmatpush3.bf16.xpose.msra.mxu0 %v822_v51  ;;  %3843 = vmatpush3.bf16.xpose.msra.mxu1 %v868_v52 }
  0x44   :  { %3838 = vmatprep.mubr.msk.bf16.mxu0 %vm4255_vm1, %v4254_v0  ;;  %3844 = vmatprep.mubr.msk.bf16.mxu1 %vm4255_vm1, %v4254_v0 }
  0x45   :  { %3848 = vmatprep.subr.bf16.mxu0 %v4254_v0  ;;  %3854 = vmatprep.subr.bf16.mxu1 %v4254_v0 }
  0x4a   :  { %3839 = vmatmul.mubr.msk.bf16.vlgmr.msra.gmra.mxu0 %vm81_vm0, %v33_v55  ;;  %3845 = vmatmul.mubr.msk.bf16.vlgmr.msra.gmra.mxu1 %vm81_vm0, %v34_v56 }
  0x4b   :  { %3849 = vmatpush3.bf16.xpose.msra.mxu0 %v914_v57  ;;  %3855 = vmatpush3.bf16.xpose.msra.mxu1 %v960_v58 }
  0x4c   :  { %3850 = vmatprep.mubr.msk.bf16.mxu0 %vm4255_vm1, %v4254_v0  ;;  %3856 = vmatprep.mubr.msk.bf16.mxu1 %vm4255_vm1, %v4254_v0 }
  0x4d   :  { %3860 = vmatprep.subr.bf16.mxu0 %v4254_v0  ;;  %3866 = vmatprep.subr.bf16.mxu1 %v4254_v0 }
  0x52   :  { %3851 = vmatmul.mubr.msk.bf16.vlgmr.msra.gmra.mxu0 %vm81_vm0, %v35_v61  ;;  %3857 = vmatmul.mubr.msk.bf16.vlgmr.msra.gmra.mxu1 %vm81_vm0, %v36_v62 }
  0x53   :  { %3861 = vmatpush3.bf16.xpose.msra.mxu0 %v1006_v63  ;;  %3867 = vmatpush3.bf16.xpose.msra.mxu1 %v1052_v1 }
  0x54   :  { %3862 = vmatprep.mubr.msk.bf16.mxu0 %vm4255_vm1, %v4254_v0  ;;  %3868 = vmatprep.mubr.msk.bf16.mxu1 %vm4255_vm1, %v4254_v0 }
  0x55   :  { %3872 = vmatprep.subr.bf16.mxu0 %v4254_v0  ;;  %3878 = vmatprep.subr.bf16.mxu1 %v4254_v0 }
  0x5a   :  { %3863 = vmatmul.mubr.msk.bf16.vlgmr.msra.gmra.mxu0 %vm81_vm0, %v37_v4  ;;  %3869 = vmatmul.mubr.msk.bf16.vlgmr.msra.gmra.mxu1 %vm81_vm0, %v38_v5 }
  0x5b   :  { %3873 = vmatpush3.bf16.xpose.msra.mxu0 %v1098_v6  ;;  %3879 = vmatpush3.bf16.xpose.msra.mxu1 %v1144_v7 }
  0x5c   :  { %3874 = vmatprep.mubr.msk.bf16.mxu0 %vm4255_vm1, %v4254_v0  ;;  %3880 = vmatprep.mubr.msk.bf16.mxu1 %vm4255_vm1, %v4254_v0 }
  0x5d   :  { %3884 = vmatprep.subr.bf16.mxu0 %v4254_v0  ;;  %3890 = vmatprep.subr.bf16.mxu1 %v4254_v0 }
  0x62   :  { %3875 = vmatmul.mubr.msk.bf16.vlgmr.msra.gmra.mxu0 %vm81_vm0, %v39_v10  ;;  %3881 = vmatmul.mubr.msk.bf16.vlgmr.msra.gmra.mxu1 %vm81_vm0, %v40_v11 }
  0x63   :  { %3885 = vmatpush3.bf16.xpose.msra.mxu0 %v1190_v12  ;;  %3891 = vmatpush3.bf16.xpose.msra.mxu1 %v1236_v13 }
  0x64   :  { %3886 = vmatprep.mubr.msk.bf16.mxu0 %vm4255_vm1, %v4254_v0  ;;  %3892 = vmatprep.mubr.msk.bf16.mxu1 %vm4255_vm1, %v4254_v0 }
  0x65   :  { %3896 = vmatprep.subr.bf16.mxu0 %v4254_v0  ;;  %3902 = vmatprep.subr.bf16.mxu1 %v4254_v0 }
  0x6a   :  { %3887 = vmatmul.mubr.msk.bf16.vlgmr.msra.gmra.mxu0 %vm81_vm0, %v41_v16  ;;  %3893 = vmatmul.mubr.msk.bf16.vlgmr.msra.gmra.mxu1 %vm81_vm0, %v42_v17 }
  0x6b   :  { %3897 = vmatpush3.bf16.xpose.msra.mxu0 %v1282_v18  ;;  %3903 = vmatpush3.bf16.xpose.msra.mxu1 %v1328_v19 }
  0x6c   :  { %3898 = vmatprep.mubr.msk.bf16.mxu0 %vm4255_vm1, %v4254_v0  ;;  %3904 = vmatprep.mubr.msk.bf16.mxu1 %vm4255_vm1, %v4254_v0 }
  0x6d   :  { %3908 = vmatprep.subr.bf16.mxu0 %v4254_v0  ;;  %3914 = vmatprep.subr.bf16.mxu1 %v4254_v0 }
  0x72   :  { %3899 = vmatmul.mubr.msk.bf16.vlgmr.msra.gmra.mxu0 %vm81_vm0, %v43_v22  ;;  %3905 = vmatmul.mubr.msk.bf16.vlgmr.msra.gmra.mxu1 %vm81_vm0, %v44_v23 }
  0x73   :  { %3909 = vmatpush3.bf16.xpose.msra.mxu0 %v1374_v24  ;;  %3915 = vmatpush3.bf16.xpose.msra.mxu1 %v1420_v25 }
  0x74   :  { %3910 = vmatprep.mubr.msk.bf16.mxu0 %vm4255_vm1, %v4254_v0  ;;  %3916 = vmatprep.mubr.msk.bf16.mxu1 %vm4255_vm1, %v4254_v0 }
  0x75   :  { %3920 = vmatprep.subr.bf16.mxu0 %v4254_v0  ;;  %3926 = vmatprep.subr.bf16.mxu1 %v4254_v0 }
  0x7a   :  { %3911 = vmatmul.mubr.msk.bf16.vlgmr.msra.gmra.mxu0 %vm81_vm0, %v45_v28  ;;  %3917 = vmatmul.mubr.msk.bf16.vlgmr.msra.gmra.mxu1 %vm81_vm0, %v46_v29 }
  0x7b   :  { %3921 = vmatpush3.bf16.xpose.msra.mxu0 %v1466_v30  ;;  %3927 = vmatpush3.bf16.xpose.msra.mxu1 %v1512_v31 }
  0x7c   :  { %3922 = vmatprep.mubr.msk.bf16.mxu0 %vm4255_vm1, %v4254_v0  ;;  %3928 = vmatprep.mubr.msk.bf16.mxu1 %vm4255_vm1, %v4254_v0 }
  0x7d   :  { %3932 = vmatprep.subr.bf16.mxu0 %v4254_v0  ;;  %3938 = vmatprep.subr.bf16.mxu1 %v4254_v0 }
  0x82   :  { %3923 = vmatmul.mubr.msk.bf16.vlgmr.msra.gmra.mxu0 %vm81_vm0, %v47_v32  ;;  %3929 = vmatmul.mubr.msk.bf16.vlgmr.msra.gmra.mxu1 %vm81_vm0, %v48_v33 }
  0x83   :  { %3934 = vmatprep.mubr.msk.bf16.mxu0 %vm4255_vm1, %v4254_v0  ;;  %3940 = vmatprep.mubr.msk.bf16.mxu1 %vm4255_vm1, %v4254_v0 }
  0xca   :  { %v4639_v34 = vpop.f32.mrf.mxu0  ;;  %v4641_v35 = vpop.f32.mrf.mxu1 }
  0xcb   :  { %1554 = vst.msk [vmem:[%s5499_s4] sm:$0xff] %vm81_vm0, %v4639_v34  ;;  %1555 = vst.msk [vmem:[%s5499_s4 + $0x8] sm:$0xff] %vm81_vm0, %v4641_v35  ;;  %v1586_v36 = vsel %vm81_vm0, %v4639_v34, -inf  ;;  %v1589_v39 = vsel %vm81_vm0, %v4641_v35, -inf }
  0xcc   :  { %v3750_v37 = vpop.f32.mrf.mxu1  ;;  %1587 = vmax.xlane.f32.xlu0 %v1586_v36  ;;  %v3744_v38 = vpop.f32.mrf.mxu0 }
  0xce   :  { %v125_v40 = vpop.f32.mrf.mxu0  ;;  %v171_v41 = vpop.f32.mrf.mxu1 }
  0xd0   :  { %v3751_v42 = vpop.f32.mrf.mxu1  ;;  %1590 = vmax.xlane.f32.xlu0 %v1589_v39  ;;  %v3745_v43 = vpop.f32.mrf.mxu0 }
  0xd2   :  { %v4657_v44 = vpop.f32.mrf.mxu0  ;;  %v4659_v45 = vpop.f32.mrf.mxu1 }
  0xd3   :  { %1556 = vst.msk [vmem:[%s5499_s4 + $0x10] sm:$0xff] %vm81_vm0, %v4657_v44  ;;  %1557 = vst.msk [vmem:[%s5499_s4 + $0x18] sm:$0xff] %vm81_vm0, %v4659_v45  ;;  %v1592_v46 = vsel %vm81_vm0, %v4657_v44, -inf  ;;  %v1595_v49 = vsel %vm81_vm0, %v4659_v45, -inf }
  0xd4   :  { %v3762_v47 = vpop.f32.mrf.mxu1  ;;  %1593 = vmax.xlane.f32.xlu1 %v1592_v46  ;;  %v3756_v48 = vpop.f32.mrf.mxu0 }
  0xd6   :  { %v217_v50 = vpop.f32.mrf.mxu0  ;;  %v263_v51 = vpop.f32.mrf.mxu1 }
  0xd8   :  { %v3763_v52 = vpop.f32.mrf.mxu1  ;;  %1596 = vmax.xlane.f32.xlu1 %v1595_v49  ;;  %v3757_v53 = vpop.f32.mrf.mxu0 }
  0xda   :  { %v4675_v54 = vpop.f32.mrf.mxu0  ;;  %v4677_v55 = vpop.f32.mrf.mxu1 }
  0xdb   :  { %1558 = vst.msk [vmem:[%s5499_s4 + $0x20] sm:$0xff] %vm81_vm0, %v4675_v54  ;;  %1559 = vst.msk [vmem:[%s5499_s4 + $0x28] sm:$0xff] %vm81_vm0, %v4677_v55  ;;  %v1601_v56 = vsel %vm81_vm0, %v4677_v55, -inf  ;;  %v1598_v57 = vsel %vm81_vm0, %v4675_v54, -inf }
  0xdc   :  { %v3774_v58 = vpop.f32.mrf.mxu1  ;;  %1602 = vmax.xlane.f32.xlu1 %v1601_v56  ;;  %1599 = vmax.xlane.f32.xlu0 %v1598_v57  ;;  %v3768_v59 = vpop.f32.mrf.mxu0 }
  0xde   :  { %v309_v60 = vpop.f32.mrf.mxu0  ;;  %v355_v61 = vpop.f32.mrf.mxu1 }
  0xe0   :  { %v3769_v62 = vpop.f32.mrf.mxu0  ;;  %v3775_v63 = vpop.f32.mrf.mxu1 }
  0xe2   :  { %v4693_v1 = vpop.f32.mrf.mxu0  ;;  %v4695_v2 = vpop.f32.mrf.mxu1 }
  0xe3   :  { %1560 = vst.msk [vmem:[%s5499_s4 + $0x30] sm:$0xff] %vm81_vm0, %v4693_v1  ;;  %1561 = vst.msk [vmem:[%s5499_s4 + $0x38] sm:$0xff] %vm81_vm0, %v4695_v2  ;;  %v1607_v3 = vsel %vm81_vm0, %v4695_v2, -inf  ;;  %v1604_v4 = vsel %vm81_vm0, %v4693_v1, -inf }
  0xe4   :  { %v3786_v5 = vpop.f32.mrf.mxu1  ;;  %1608 = vmax.xlane.f32.xlu1 %v1607_v3  ;;  %1605 = vmax.xlane.f32.xlu0 %v1604_v4  ;;  %v3780_v6 = vpop.f32.mrf.mxu0 }
  0xe6   :  { %v401_v7 = vpop.f32.mrf.mxu0  ;;  %v447_v8 = vpop.f32.mrf.mxu1 }
  0xe8   :  { %v3781_v9 = vpop.f32.mrf.mxu0  ;;  %v3787_v10 = vpop.f32.mrf.mxu1 }
  0xea   :  { %v4711_v11 = vpop.f32.mrf.mxu0  ;;  %v4713_v12 = vpop.f32.mrf.mxu1 }
  0xeb   :  { %1562 = vst.msk [vmem:[%s5499_s4 + $0x40] sm:$0xff] %vm81_vm0, %v4711_v11  ;;  %1563 = vst.msk [vmem:[%s5499_s4 + $0x48] sm:$0xff] %vm81_vm0, %v4713_v12  ;;  %v1613_v13 = vsel %vm81_vm0, %v4713_v12, -inf  ;;  %v1610_v14 = vsel %vm81_vm0, %v4711_v11, -inf }
  0xec   :  { %v3798_v15 = vpop.f32.mrf.mxu1  ;;  %1614 = vmax.xlane.f32.xlu1 %v1613_v13  ;;  %1611 = vmax.xlane.f32.xlu0 %v1610_v14  ;;  %v3792_v16 = vpop.f32.mrf.mxu0 }
  0xee   :  { %v493_v17 = vpop.f32.mrf.mxu0  ;;  %v539_v18 = vpop.f32.mrf.mxu1 }
  0xf0   :  { %v3793_v19 = vpop.f32.mrf.mxu0  ;;  %v3799_v20 = vpop.f32.mrf.mxu1 }
  0xf2   :  { %v4729_v21 = vpop.f32.mrf.mxu0  ;;  %v4731_v22 = vpop.f32.mrf.mxu1 }
  0xf3   :  { %1564 = vst.msk [vmem:[%s5499_s4 + $0x50] sm:$0xff] %vm81_vm0, %v4729_v21  ;;  %1565 = vst.msk [vmem:[%s5499_s4 + $0x58] sm:$0xff] %vm81_vm0, %v4731_v22  ;;  %v1619_v23 = vsel %vm81_vm0, %v4731_v22, -inf  ;;  %v1616_v24 = vsel %vm81_vm0, %v4729_v21, -inf }
  0xf4   :  { %v3810_v25 = vpop.f32.mrf.mxu1  ;;  %1620 = vmax.xlane.f32.xlu1 %v1619_v23  ;;  %1617 = vmax.xlane.f32.xlu0 %v1616_v24  ;;  %v3804_v26 = vpop.f32.mrf.mxu0 }
  0xf6   :  { %v585_v27 = vpop.f32.mrf.mxu0  ;;  %v631_v28 = vpop.f32.mrf.mxu1 }
  0xf8   :  { %v3805_v29 = vpop.f32.mrf.mxu0  ;;  %v3811_v30 = vpop.f32.mrf.mxu1 }
  0xfa   :  { %v4747_v31 = vpop.f32.mrf.mxu0  ;;  %v4749_v32 = vpop.f32.mrf.mxu1 }
  0xfb   :  { %1566 = vst.msk [vmem:[%s5499_s4 + $0x60] sm:$0xff] %vm81_vm0, %v4747_v31  ;;  %1567 = vst.msk [vmem:[%s5499_s4 + $0x68] sm:$0xff] %vm81_vm0, %v4749_v32  ;;  %v1625_v33 = vsel %vm81_vm0, %v4749_v32, -inf  ;;  %v1622_v36 = vsel %vm81_vm0, %v4747_v31, -inf }
  0xfc   :  { %v3822_v37 = vpop.f32.mrf.mxu1  ;;  %1626 = vmax.xlane.f32.xlu1 %v1625_v33  ;;  %1623 = vmax.xlane.f32.xlu0 %v1622_v36  ;;  %v3816_v38 = vpop.f32.mrf.mxu0 }
  0xfe   :  { %v677_v39 = vpop.f32.mrf.mxu0  ;;  %v723_v40 = vpop.f32.mrf.mxu1 }
 0x100   :  { %v3817_v41 = vpop.f32.mrf.mxu0  ;;  %v3823_v42 = vpop.f32.mrf.mxu1 }
 0x102   :  { %v4765_v43 = vpop.f32.mrf.mxu0  ;;  %v4767_v46 = vpop.f32.mrf.mxu1 }
 0x103   :  { %1568 = vst.msk [vmem:[%s5499_s4 + $0x70] sm:$0xff] %vm81_vm0, %v4765_v43  ;;  %1569 = vst.msk [vmem:[%s5499_s4 + $0x78] sm:$0xff] %vm81_vm0, %v4767_v46  ;;  %v1631_v47 = vsel %vm81_vm0, %v4767_v46, -inf  ;;  %v1628_v48 = vsel %vm81_vm0, %v4765_v43, -inf }
 0x104   :  { %v3834_v49 = vpop.f32.mrf.mxu1  ;;  %1632 = vmax.xlane.f32.xlu1 %v1631_v47  ;;  %1629 = vmax.xlane.f32.xlu0 %v1628_v48  ;;  %v3828_v50 = vpop.f32.mrf.mxu0 }
 0x106   :  { %v769_v51 = vpop.f32.mrf.mxu0  ;;  %v815_v52 = vpop.f32.mrf.mxu1 }
 0x108   :  { %v3829_v53 = vpop.f32.mrf.mxu0  ;;  %v3835_v56 = vpop.f32.mrf.mxu1 }
 0x10a   :  { %v4783_v57 = vpop.f32.mrf.mxu0  ;;  %v4785_v58 = vpop.f32.mrf.mxu1 }
 0x10b   :  { %1570 = vst.msk [vmem:[%s5499_s4 + $0x80] sm:$0xff] %vm81_vm0, %v4783_v57  ;;  %1571 = vst.msk [vmem:[%s5499_s4 + $0x88] sm:$0xff] %vm81_vm0, %v4785_v58  ;;  %v1637_v59 = vsel %vm81_vm0, %v4785_v58, -inf  ;;  %v1634_v60 = vsel %vm81_vm0, %v4783_v57, -inf }
 0x10c   :  { %v3846_v61 = vpop.f32.mrf.mxu1  ;;  %1638 = vmax.xlane.f32.xlu1 %v1637_v59  ;;  %1635 = vmax.xlane.f32.xlu0 %v1634_v60  ;;  %v3840_v62 = vpop.f32.mrf.mxu0 }
 0x10e   :  { %v861_v63 = vpop.f32.mrf.mxu0  ;;  %v907_v3 = vpop.f32.mrf.mxu1 }
 0x110   :  { %v3841_v4 = vpop.f32.mrf.mxu0  ;;  %v3847_v5 = vpop.f32.mrf.mxu1 }
 0x112   :  { %v4801_v6 = vpop.f32.mrf.mxu0  ;;  %v4803_v7 = vpop.f32.mrf.mxu1 }
 0x113   :  { %1572 = vst.msk [vmem:[%s5499_s4 + $0x90] sm:$0xff] %vm81_vm0, %v4801_v6  ;;  %1573 = vst.msk [vmem:[%s5499_s4 + $0x98] sm:$0xff] %vm81_vm0, %v4803_v7  ;;  %v1643_v8 = vsel %vm81_vm0, %v4803_v7, -inf  ;;  %v1640_v9 = vsel %vm81_vm0, %v4801_v6, -inf }
 0x114   :  { %v3858_v10 = vpop.f32.mrf.mxu1  ;;  %1644 = vmax.xlane.f32.xlu1 %v1643_v8  ;;  %1641 = vmax.xlane.f32.xlu0 %v1640_v9  ;;  %v3852_v13 = vpop.f32.mrf.mxu0 }
 0x116   :  { %v953_v14 = vpop.f32.mrf.mxu0  ;;  %v999_v15 = vpop.f32.mrf.mxu1 }
 0x118   :  { %v3853_v16 = vpop.f32.mrf.mxu0  ;;  %v3859_v17 = vpop.f32.mrf.mxu1 }
 0x11a   :  { %v4819_v18 = vpop.f32.mrf.mxu0  ;;  %v4821_v19 = vpop.f32.mrf.mxu1 }
 0x11b   :  { %1574 = vst.msk [vmem:[%s5499_s4 + $0xa0] sm:$0xff] %vm81_vm0, %v4819_v18  ;;  %1575 = vst.msk [vmem:[%s5499_s4 + $0xa8] sm:$0xff] %vm81_vm0, %v4821_v19  ;;  %v1649_v20 = vsel %vm81_vm0, %v4821_v19, -inf  ;;  %v1646_v23 = vsel %vm81_vm0, %v4819_v18, -inf }
 0x11c   :  { %v3870_v24 = vpop.f32.mrf.mxu1  ;;  %1650 = vmax.xlane.f32.xlu1 %v1649_v20  ;;  %1647 = vmax.xlane.f32.xlu0 %v1646_v23  ;;  %v3864_v25 = vpop.f32.mrf.mxu0 }
 0x11e   :  { %v1045_v26 = vpop.f32.mrf.mxu0  ;;  %v1091_v27 = vpop.f32.mrf.mxu1 }
 0x120   :  { %v3865_v28 = vpop.f32.mrf.mxu0  ;;  %v3871_v29 = vpop.f32.mrf.mxu1 }
 0x122   :  { %v4837_v30 = vpop.f32.mrf.mxu0  ;;  %v4839_v33 = vpop.f32.mrf.mxu1 }
 0x123   :  { %1576 = vst.msk [vmem:[%s5499_s4 + $0xb0] sm:$0xff] %vm81_vm0, %v4837_v30  ;;  %1577 = vst.msk [vmem:[%s5499_s4 + $0xb8] sm:$0xff] %vm81_vm0, %v4839_v33  ;;  %v1655_v36 = vsel %vm81_vm0, %v4839_v33, -inf  ;;  %v1652_v37 = vsel %vm81_vm0, %v4837_v30, -inf }
 0x124   :  { %1656 = vmax.xlane.f32.xlu1 %v1655_v36  ;;  %1653 = vmax.xlane.f32.xlu0 %v1652_v37  ;;  %v3876_v38 = vpop.f32.mrf.mxu0  ;;  %v3882_v39 = vpop.f32.mrf.mxu1 }
 0x126   :  { %v1137_v40 = vpop.f32.mrf.mxu0  ;;  %v1183_v41 = vpop.f32.mrf.mxu1 }
 0x128   :  { %v3877_v42 = vpop.f32.mrf.mxu0  ;;  %v3883_v47 = vpop.f32.mrf.mxu1 }
 0x12a   :  { %v4855_v48 = vpop.f32.mrf.mxu0  ;;  %v4857_v49 = vpop.f32.mrf.mxu1 }
 0x12b   :  { %1578 = vst.msk [vmem:[%s5499_s4 + $0xc0] sm:$0xff] %vm81_vm0, %v4855_v48  ;;  %1579 = vst.msk [vmem:[%s5499_s4 + $0xc8] sm:$0xff] %vm81_vm0, %v4857_v49 }
 0x12c   :  { %v3888_v50 = vpop.f32.mrf.mxu0  ;;  %v3894_v51 = vpop.f32.mrf.mxu1 }
 0x12e   :  { %v1229_v52 = vpop.f32.mrf.mxu0  ;;  %v1275_v53 = vpop.f32.mrf.mxu1 }
 0x130   :  { %v3889_v56 = vpop.f32.mrf.mxu0  ;;  %v3895_v59 = vpop.f32.mrf.mxu1 }
 0x132   :  { %v4869_v60 = vpop.f32.mrf.mxu0  ;;  %v4871_v61 = vpop.f32.mrf.mxu1 }
 0x133   :  { %1580 = vst.msk [vmem:[%s5499_s4 + $0xd0] sm:$0xff] %vm81_vm0, %v4869_v60  ;;  %1581 = vst.msk [vmem:[%s5499_s4 + $0xd8] sm:$0xff] %vm81_vm0, %v4871_v61 }
 0x134   :  { %v3900_v62 = vpop.f32.mrf.mxu0  ;;  %v3906_v63 = vpop.f32.mrf.mxu1 }
 0x136   :  { %v1321_v3 = vpop.f32.mrf.mxu0  ;;  %v1367_v4 = vpop.f32.mrf.mxu1 }
 0x138   :  { %v3901_v5 = vpop.f32.mrf.mxu0  ;;  %v3907_v8 = vpop.f32.mrf.mxu1 }
 0x139   :  { %v1658_v5 = vsel %vm81_vm0, %v4855_v48, -inf }
 0x13a   :  { %v4883_v9 = vpop.f32.mrf.mxu0  ;;  %v4885_v10 = vpop.f32.mrf.mxu1 }
 0x13b   :  { %1582 = vst.msk [vmem:[%s5499_s4 + $0xe0] sm:$0xff] %vm81_vm0, %v4883_v9  ;;  %1583 = vst.msk [vmem:[%s5499_s4 + $0xe8] sm:$0xff] %vm81_vm0, %v4885_v10 }
 0x13c   :  { %v3912_v13 = vpop.f32.mrf.mxu0  ;;  %v3918_v14 = vpop.f32.mrf.mxu1 }
 0x13e   :  { %v1413_v15 = vpop.f32.mrf.mxu0  ;;  %v1459_v16 = vpop.f32.mrf.mxu1 }
 0x13f   :  { %v1661_v15 = vsel %vm81_vm0, %v4857_v49, -inf }
 0x140   :  { %v3913_v17 = vpop.f32.mrf.mxu0  ;;  %v3919_v20 = vpop.f32.mrf.mxu1 }
 0x142   :  { %v4897_v23 = vpop.f32.mrf.mxu0  ;;  %v4899_v24 = vpop.f32.mrf.mxu1 }
 0x143   :  { %1584 = vst.msk [vmem:[%s5499_s4 + $0xf0] sm:$0xff] %vm81_vm0, %v4897_v23  ;;  %1585 = vst.msk [vmem:[%s5499_s4 + $0xf8] sm:$0xff] %vm81_vm0, %v4899_v24 }
 0x144   :  { %v3924_v25 = vpop.f32.mrf.mxu0  ;;  %v3930_v26 = vpop.f32.mrf.mxu1 }
 0x145   :  { %v1664_v26 = vsel %vm81_vm0, %v4869_v60, -inf }
 0x146   :  { %v1505_v27 = vpop.f32.mrf.mxu0  ;;  %v1551_v28 = vpop.f32.mrf.mxu1 }
 0x148   :  { %v3925_v29 = vpop.f32.mrf.mxu0  ;;  %v3931_v36 = vpop.f32.mrf.mxu1 }
 0x155   :  { %v1588_v37 = vpop.xlane.xlu0 %1587 }
 0x156   :  { %v1682_v38 = vsub.f32 %v4639_v34, %v1588_v37  ;;  %v1667_v37 = vsel %vm81_vm0, %v4871_v61, -inf }
 0x158   :  { %v1714_v39 = vmul.f32 1.442695, %v1682_v38 }
 0x159   :  { %v1591_v40 = vpop.xlane.xlu0 %1590 }
 0x15a   :  { %4126 = vpow2.f32 %v1714_v39  ;;  %v1683_v41 = vsub.f32 %v4641_v35, %v1591_v40 }
 0x15c   :  { %v1716_v42 = vmul.f32 1.442695, %v1683_v41 }
 0x15d   :  { %v1594_v47 = vpop.xlane.xlu1 %1593 }
 0x15e   :  { %4128 = vpow2.f32 %v1716_v42  ;;  %v1684_v50 = vsub.f32 %v4657_v44, %v1594_v47 }
 0x160   :  { %v1718_v51 = vmul.f32 1.442695, %v1684_v50 }
 0x161   :  { %v1597_v52 = vpop.xlane.xlu1 %1596 }
 0x162   :  { %4130 = vpow2.f32 %v1718_v51  ;;  %v1685_v53 = vsub.f32 %v4659_v45, %v1597_v52 }
 0x164   :  { %v1720_v56 = vmul.f32 1.442695, %v1685_v53  ;;  %v1673_v53 = vsel %vm81_vm0, %v4885_v10, -inf }
 0x165   :  { %v1603_v59 = vpop.xlane.xlu1 %1602  ;;  %v1600_v62 = vpop.xlane.xlu0 %1599 }
 0x166   :  { %4132 = vpow2.f32 %v1720_v56  ;;  %v1687_v34 = vsub.f32 %v4677_v55, %v1603_v59  ;;  %v1686_v63 = vsub.f32 %v4675_v54, %v1600_v62 }
 0x167   :  { %v4917_v3 = vpop.eup %4126 }
 0x168   :  { %v1724_v35 = vmul.f32 1.442695, %v1687_v34  ;;  %v1722_v4 = vmul.f32 1.442695, %v1686_v63  ;;  %v1778_v44 = vsel %vm81_vm0, %v4917_v3, 0.0 }
 0x169   :  { %1779 = vadd.xlane.f32.xlu0 %v1778_v44 }
 0x16a   :  { %4134 = vpow2.f32 %v1722_v4 }
 0x16b   :  { %v4923_v45 = vpop.eup %4128  ;;  %4136 = vpow2.f32 %v1724_v35  ;;  %v1676_v35 = vsel %vm81_vm0, %v4897_v23, -inf }
 0x16c   :  { %v1781_v55 = vsel %vm81_vm0, %v4923_v45, 0.0 }
 0x16d   :  { %1782 = vadd.xlane.f32.xlu1 %v1781_v55  ;;  %v1609_v54 = vpop.xlane.xlu1 %1608  ;;  %v1606_v8 = vpop.xlane.xlu0 %1605  ;;  %1659 = vmax.xlane.f32.xlu0 %v1658_v5  ;;  %v1971_v55 = vld [vmem:[%s5500_s2 + $0x4] sm:$0xf] }
 0x16e   :  { %v1689_v13 = vsub.f32 %v4695_v2, %v1609_v54  ;;  %v1688_v14 = vsub.f32 %v4693_v1, %v1606_v8 }
 0x16f   :  { %v4931_v16 = vpop.eup %4130 }
 0x170   :  { %v1728_v17 = vmul.f32 1.442695, %v1689_v13  ;;  %v1726_v20 = vmul.f32 1.442695, %v1688_v14  ;;  %v1784_v25 = vsel %vm81_vm0, %v4931_v16, 0.0  ;;  %v1679_v13 = vsel %vm81_vm0, %v4899_v24, -inf }
 0x171   :  { %1662 = vmax.xlane.f32.xlu1 %v1661_v15  ;;  %1785 = vadd.xlane.f32.xlu0 %v1784_v25  ;;  %v2053_v14 = vsel %vm2005_vm2, %v1971_v55, 0 }
 0x172   :  { %4138 = vpow2.f32 %v1726_v20  ;;  %3939 = vmatpush3.bf16.msra.mxu1 %v2053_v14 }
 0x173   :  { %v4937_v27 = vpop.eup %4132  ;;  %4140 = vpow2.f32 %v1728_v17  ;;  %3950 = vmatprep.subr.bf16.mxu1 %v4254_v0 }
 0x174   :  { %v1787_v1 = vsel %vm81_vm0, %v4937_v27, 0.0 }
 0x175   :  { %1788 = vadd.xlane.f32.xlu1 %v1787_v1  ;;  %v1615_v2 = vpop.xlane.xlu1 %1614  ;;  %v1612_v28 = vpop.xlane.xlu0 %1611  ;;  %1665 = vmax.xlane.f32.xlu0 %v1664_v26 }
 0x176   :  { %v1691_v29 = vsub.f32 %v4713_v12, %v1615_v2  ;;  %v1690_v36 = vsub.f32 %v4711_v11, %v1612_v28  ;;  %v1670_v12 = vsel %vm81_vm0, %v4883_v9, -inf }
 0x177   :  { %v4945_v38 = vpop.eup %4134 }
 0x178   :  { %v1732_v39 = vmul.f32 1.442695, %v1691_v29  ;;  %v1730_v40 = vmul.f32 1.442695, %v1690_v36  ;;  %v4947_v41 = vpop.eup %4136  ;;  %v1790_v42 = vsel %vm81_vm0, %v4945_v38, 0.0 }
 0x179   :  { %1668 = vmax.xlane.f32.xlu1 %v1667_v37  ;;  %1791 = vadd.xlane.f32.xlu0 %v1790_v42  ;;  %v1793_v11 = vsel %vm81_vm0, %v4947_v41, 0.0 }
 0x17a   :  { %4142 = vpow2.f32 %v1730_v40 }
 0x17b   :  { %4144 = vpow2.f32 %v1732_v39 }
 0x17d   :  { %1794 = vadd.xlane.f32.xlu1 %v1793_v11  ;;  %v1621_v47 = vpop.xlane.xlu1 %1620  ;;  %v1618_v50 = vpop.xlane.xlu0 %1617  ;;  %1671 = vmax.xlane.f32.xlu0 %v1670_v12 }
 0x17e   :  { %v1693_v51 = vsub.f32 %v4731_v22, %v1621_v47  ;;  %v1692_v52 = vsub.f32 %v4729_v21, %v1618_v50  ;;  %v1970_v22 = vld [vmem:[%s5500_s2] sm:$0xf] }
 0x17f   :  { %v4959_v56 = vpop.eup %4138  ;;  %v2007_v21 = vsel %vm2005_vm2, %v1970_v22, 0 }
 0x180   :  { %v1736_v59 = vmul.f32 1.442695, %v1693_v51  ;;  %v1734_v62 = vmul.f32 1.442695, %v1692_v52  ;;  %v4961_v34 = vpop.eup %4140  ;;  %v1796_v63 = vsel %vm81_vm0, %v4959_v56, 0.0  ;;  %3933 = vmatpush3.bf16.msra.mxu0 %v2007_v21 }
 0x181   :  { %1674 = vmax.xlane.f32.xlu1 %v1673_v53  ;;  %1797 = vadd.xlane.f32.xlu0 %v1796_v63  ;;  %v1799_v4 = vsel %vm81_vm0, %v4961_v34, 0.0 }
 0x182   :  { %4146 = vpow2.f32 %v1736_v59  ;;  %3944 = vmatprep.subr.bf16.mxu0 %v4254_v0 }
 0x183   :  { %4148 = vpow2.f32 %v1734_v62 }
 0x185   :  { %1800 = vadd.xlane.f32.xlu1 %v1799_v4  ;;  %v1627_v44 = vpop.xlane.xlu1 %1626  ;;  %v1624_v5 = vpop.xlane.xlu0 %1623  ;;  %1677 = vmax.xlane.f32.xlu0 %v1676_v35 }
 0x186   :  { %v1695_v54 = vsub.f32 %v4749_v32, %v1627_v44  ;;  %v1694_v8 = vsub.f32 %v4747_v31, %v1624_v5 }
 0x187   :  { %v4982_v15 = vpop.eup %4142 }
 0x188   :  { %v1740_v17 = vmul.f32 1.442695, %v1695_v54  ;;  %v1738_v20 = vmul.f32 1.442695, %v1694_v8  ;;  %v4985_v25 = vpop.eup %4144  ;;  %v1802_v32 = vsel %vm81_vm0, %v4982_v15, 0.0 }
 0x189   :  { %1680 = vmax.xlane.f32.xlu1 %v1679_v13  ;;  %1803 = vadd.xlane.f32.xlu0 %v1802_v32  ;;  %v1805_v31 = vsel %vm81_vm0, %v4985_v25, 0.0 }
 0x18a   :  { %4150 = vpow2.f32 %v1740_v17 }
 0x18b   :  { %4152 = vpow2.f32 %v1738_v20 }
 0x18d   :  { %1806 = vadd.xlane.f32.xlu1 %v1805_v31  ;;  %v1633_v26 = vpop.xlane.xlu1 %1632  ;;  %v1630_v1 = vpop.xlane.xlu0 %1629 }
 0x18e   :  { %v1697_v2 = vsub.f32 %v4767_v46, %v1633_v26  ;;  %v1696_v28 = vsub.f32 %v4765_v43, %v1630_v1 }
 0x18f   :  { %v4993_v29 = vpop.eup %4146 }
 0x190   :  { %v4995_v36 = vpop.eup %4148  ;;  %v1744_v37 = vmul.f32 1.442695, %v1697_v2  ;;  %v1742_v39 = vmul.f32 1.442695, %v1696_v28  ;;  %v1811_v40 = vsel %vm81_vm0, %v4993_v29, 0.0 }
 0x191   :  { %1812 = vadd.xlane.f32.xlu1 %v1811_v40  ;;  %v1808_v42 = vsel %vm81_vm0, %v4995_v36, 0.0 }
 0x192   :  { %4154 = vpow2.f32 %v1744_v37  ;;  %1809 = vadd.xlane.f32.xlu0 %v1808_v42 }
 0x193   :  { %4156 = vpow2.f32 %v1742_v39 }
 0x195   :  { %v1639_v12 = vpop.xlane.xlu1 %1638  ;;  %v1636_v46 = vpop.xlane.xlu0 %1635 }
 0x196   :  { %v1699_v43 = vsub.f32 %v4785_v58, %v1639_v12  ;;  %v1698_v11 = vsub.f32 %v4783_v57, %v1636_v46 }
 0x197   :  { %v5003_v47 = vpop.eup %4150 }
 0x198   :  { %v5005_v50 = vpop.eup %4152  ;;  %v1748_v51 = vmul.f32 1.442695, %v1699_v43  ;;  %v1746_v52 = vmul.f32 1.442695, %v1698_v11  ;;  %v1817_v53 = vsel %vm81_vm0, %v5003_v47, 0.0 }
 0x199   :  { %1818 = vadd.xlane.f32.xlu1 %v1817_v53  ;;  %v1814_v59 = vsel %vm81_vm0, %v5005_v50, 0.0 }
 0x19a   :  { %4158 = vpow2.f32 %v1748_v51  ;;  %1815 = vadd.xlane.f32.xlu0 %v1814_v59 }
 0x19b   :  { %4160 = vpow2.f32 %v1746_v52 }
 0x19d   :  { %v1645_v62 = vpop.xlane.xlu1 %1644  ;;  %v1642_v58 = vpop.xlane.xlu0 %1641 }
 0x19e   :  { %v1701_v57 = vsub.f32 %v4803_v7, %v1645_v62  ;;  %v1700_v63 = vsub.f32 %v4801_v6, %v1642_v58 }
 0x19f   :  { %v5013_v22 = vpop.eup %4154 }
 0x1a0   :  { %v5015_v21 = vpop.eup %4156  ;;  %v1752_v35 = vmul.f32 1.442695, %v1701_v57  ;;  %v1750_v4 = vmul.f32 1.442695, %v1700_v63  ;;  %v1823_v44 = vsel %vm81_vm0, %v5013_v22, 0.0 }
 0x1a1   :  { %1824 = vadd.xlane.f32.xlu1 %v1823_v44  ;;  %v1820_v5 = vsel %vm81_vm0, %v5015_v21, 0.0 }
 0x1a2   :  { %4162 = vpow2.f32 %v1752_v35  ;;  %1821 = vadd.xlane.f32.xlu0 %v1820_v5 }
 0x1a3   :  { %4164 = vpow2.f32 %v1750_v4 }
 0x1a5   :  { %v1651_v55 = vpop.xlane.xlu1 %1650  ;;  %v1648_v7 = vpop.xlane.xlu0 %1647 }
 0x1a6   :  { %v1703_v6 = vsub.f32 %v4821_v19, %v1651_v55  ;;  %v1702_v54 = vsub.f32 %v4819_v18, %v1648_v7 }
 0x1a7   :  { %v5023_v8 = vpop.eup %4158 }
 0x1a8   :  { %v5025_v13 = vpop.eup %4160  ;;  %v1756_v14 = vmul.f32 1.442695, %v1703_v6  ;;  %v1754_v17 = vmul.f32 1.442695, %v1702_v54  ;;  %v1829_v20 = vsel %vm81_vm0, %v5023_v8, 0.0 }
 0x1a9   :  { %1830 = vadd.xlane.f32.xlu1 %v1829_v20  ;;  %v1826_v32 = vsel %vm81_vm0, %v5025_v13, 0.0  ;;  %v1972_v6 = vld [vmem:[%s5500_s2 + $0x8] sm:$0xf] }
 0x1aa   :  { %4166 = vpow2.f32 %v1756_v14  ;;  %1827 = vadd.xlane.f32.xlu0 %v1826_v32  ;;  %v2099_v32 = vsel %vm2005_vm2, %v1972_v6, 0 }
 0x1ab   :  { %4168 = vpow2.f32 %v1754_v17 }
 0x1ad   :  { %v1657_v31 = vpop.xlane.xlu1 %1656  ;;  %v1654_v19 = vpop.xlane.xlu0 %1653 }
 0x1ae   :  { %v1705_v18 = vsub.f32 %v4839_v33, %v1657_v31  ;;  %v1704_v26 = vsub.f32 %v4837_v30, %v1654_v19 }
 0x1af   :  { %v5033_v1 = vpop.eup %4162 }
 0x1b0   :  { %v5035_v2 = vpop.eup %4164  ;;  %v1760_v28 = vmul.f32 1.442695, %v1705_v18  ;;  %v1758_v37 = vmul.f32 1.442695, %v1704_v26  ;;  %v1835_v39 = vsel %vm81_vm0, %v5033_v1, 0.0 }
 0x1b1   :  { %1836 = vadd.xlane.f32.xlu1 %v1835_v39  ;;  %v1832_v40 = vsel %vm81_vm0, %v5035_v2, 0.0 }
 0x1b2   :  { %4170 = vpow2.f32 %v1760_v28  ;;  %1833 = vadd.xlane.f32.xlu0 %v1832_v40 }
 0x1b3   :  { %4172 = vpow2.f32 %v1758_v37 }
 0x1b7   :  { %v5041_v42 = vpop.eup %4166 }
 0x1b8   :  { %v5043_v33 = vpop.eup %4168  ;;  %v1841_v30 = vsel %vm81_vm0, %v5041_v42, 0.0 }
 0x1b9   :  { %1842 = vadd.xlane.f32.xlu1 %v1841_v30  ;;  %v1838_v12 = vsel %vm81_vm0, %v5043_v33, 0.0  ;;  %v1974_v30 = vld [vmem:[%s5500_s2 + $0x10] sm:$0xf] }
 0x1ba   :  { %1839 = vadd.xlane.f32.xlu0 %v1838_v12 }
 0x1bf   :  { %v5049_v46 = vpop.eup %4170 }
 0x1c0   :  { %v5051_v43 = vpop.eup %4172  ;;  %v1847_v11 = vsel %vm81_vm0, %v5049_v46, 0.0 }
 0x1c1   :  { %1848 = vadd.xlane.f32.xlu1 %v1847_v11  ;;  %v1844_v51 = vsel %vm81_vm0, %v5051_v43, 0.0 }
 0x1c2   :  { %1845 = vadd.xlane.f32.xlu0 %v1844_v51 }
 0x1f2   :  { %v1780_v52 = vpop.xlane.xlu0 %1779 }
 0x1f3   :  { %4174 = vrcp.f32 %v1780_v52 }
 0x1f6   :  { %v1783_v53 = vpop.xlane.xlu1 %1782  ;;  %v1660_v59 = vpop.xlane.xlu0 %1659 }
 0x1f7   :  { %4176 = vrcp.f32 %v1783_v53  ;;  %v1706_v62 = vsub.f32 %v4855_v48, %v1660_v59 }
 0x1f9   :  { %v1762_v58 = vmul.f32 1.442695, %v1706_v62  ;;  %v2191_v62 = vsel %vm2005_vm2, %v1974_v30, 0 }
 0x1fa   :  { %v1663_v57 = vpop.xlane.xlu1 %1662  ;;  %v1786_v63 = vpop.xlane.xlu0 %1785 }
 0x1fb   :  { %4178 = vpow2.f32 %v1762_v58  ;;  %v1707_v35 = vsub.f32 %v4857_v49, %v1663_v57 }
 0x1fc   :  { %4180 = vrcp.f32 %v1786_v63 }
 0x1fd   :  { %v1764_v4 = vmul.f32 1.442695, %v1707_v35 }
 0x1fe   :  { %v1789_v44 = vpop.xlane.xlu1 %1788  ;;  %v1666_v5 = vpop.xlane.xlu0 %1665 }
 0x1ff   :  { %4182 = vpow2.f32 %v1764_v4  ;;  %v1708_v55 = vsub.f32 %v4869_v60, %v1666_v5  ;;  %v1973_v60 = vld [vmem:[%s5500_s2 + $0xc] sm:$0xf] }
 0x200   :  { %v4175_v7 = vpop.eup %4174  ;;  %4184 = vrcp.f32 %v1789_v44  ;;  %v2145_v28 = vsel %vm2005_vm2, %v1973_v60, 0 }
 0x201   :  { %v1766_v48 = vmul.f32 1.442695, %v1708_v55  ;;  %v1875_v54 = vmul.f32 %v4175_v7, %v4917_v3 }
 0x202   :  { %v1669_v14 = vpop.xlane.xlu1 %1668  ;;  %v1792_v17 = vpop.xlane.xlu0 %1791 }
 0x203   :  { %4186 = vpow2.f32 %v1766_v48  ;;  %v1709_v49 = vsub.f32 %v4871_v61, %v1669_v14  ;;  %v1938_v20 = vpack.c.bf16 %v1875_v54, %v1875_v54  ;;  %v1976_v48 = vld [vmem:[%s5500_s2 + $0x18] sm:$0xf] }
 0x204   :  { %v4177_v31 = vpop.eup %4176  ;;  %4188 = vrcp.f32 %v1792_v17 }
 0x205   :  { %v1768_v19 = vmul.f32 1.442695, %v1709_v49  ;;  %3935 = vmatmul.mubr.msk.bf16.vlgmr.msra.gmra.mxu0 %vm81_vm0, %v1938_v20  ;;  %v1877_v18 = vmul.f32 %v4177_v31, %v4923_v45  ;;  %v2283_v31 = vsel %vm2005_vm2, %v1976_v48, 0 }
 0x206   :  { %v1795_v3 = vpop.xlane.xlu1 %1794  ;;  %3945 = vmatpush3.bf16.msra.mxu0 %v2099_v32  ;;  %3946 = vmatprep.mubr.msk.bf16.mxu0 %vm4255_vm1, %v4254_v0  ;;  %v1672_v61 = vpop.xlane.xlu0 %1671 }
 0x207   :  { %4190 = vpow2.f32 %v1768_v19  ;;  %v1939_v26 = vpack.c.bf16 %v1877_v18, %v1877_v18  ;;  %3956 = vmatprep.subr.bf16.mxu0 %v4254_v0  ;;  %v1710_v39 = vsub.f32 %v4883_v9, %v1672_v61 }
 0x208   :  { %v5075_v37 = vpop.eup %4178  ;;  %4192 = vrcp.f32 %v1795_v3 }
 0x209   :  { %v4181_v40 = vpop.eup %4180  ;;  %3941 = vmatmul.mubr.msk.bf16.vlgmr.msra.gmra.mxu1 %vm81_vm0, %v1939_v26  ;;  %v1850_v45 = vsel %vm81_vm0, %v5075_v37, 0.0  ;;  %v1770_v12 = vmul.f32 1.442695, %v1710_v39 }
 0x20a   :  { %v1675_v11 = vpop.xlane.xlu1 %1674  ;;  %1851 = vadd.xlane.f32.xlu0 %v1850_v45  ;;  %v1879_v51 = vmul.f32 %v4181_v40, %v4931_v16  ;;  %3951 = vmatpush3.bf16.msra.mxu1 %v2145_v28  ;;  %v1798_v53 = vpop.xlane.xlu0 %1797  ;;  %v1978_v45 = vld [vmem:[%s5500_s2 + $0x20] sm:$0xf] }
 0x20b   :  { %v1711_v52 = vsub.f32 %v4885_v10, %v1675_v11  ;;  %3952 = vmatprep.mubr.msk.bf16.mxu1 %vm4255_vm1, %v4254_v0  ;;  %3962 = vmatprep.subr.bf16.mxu1 %v4254_v0  ;;  %4194 = vpow2.f32 %v1770_v12  ;;  %v1975_v10 = vld [vmem:[%s5500_s2 + $0x14] sm:$0xf] }
 0x20c   :  { %v5089_v9 = vpop.eup %4182  ;;  %v1940_v59 = vpack.c.bf16 %v1879_v51, %v1879_v51  ;;  %4196 = vrcp.f32 %v1798_v53  ;;  %v2237_v7 = vsel %vm2005_vm2, %v1975_v10, 0 }
 0x20d   :  { %v4185_v58 = vpop.eup %4184  ;;  %v1772_v57 = vmul.f32 1.442695, %v1711_v52  ;;  %v1853_v16 = vsel %vm81_vm0, %v5089_v9, 0.0 }
 0x20e   :  { %3947 = vmatmul.mubr.msk.bf16.vlgmr.msra.gmra.mxu0 %vm81_vm0, %v1940_v59  ;;  %1854 = vadd.xlane.f32.xlu1 %v1853_v16  ;;  %v1801_v63 = vpop.xlane.xlu1 %1800  ;;  %v1881_v35 = vmul.f32 %v4185_v58, %v4937_v27  ;;  %v1678_v4 = vpop.xlane.xlu0 %1677  ;;  %v2375_v59 = vsel %vm2005_vm2, %v1978_v45, 0 }
 0x20f   :  { %4198 = vpow2.f32 %v1772_v57  ;;  %3957 = vmatpush3.bf16.msra.mxu0 %v2191_v62  ;;  %3958 = vmatprep.mubr.msk.bf16.mxu0 %vm4255_vm1, %v4254_v0  ;;  %v1712_v5 = vsub.f32 %v4897_v23, %v1678_v4 }
 0x210   :  { %v5101_v44 = vpop.eup %4186  ;;  %4200 = vrcp.f32 %v1801_v63  ;;  %v1941_v55 = vpack.c.bf16 %v1881_v35, %v1881_v35  ;;  %3968 = vmatprep.subr.bf16.mxu0 %v4254_v0  ;;  %v1980_v35 = vld [vmem:[%s5500_s2 + $0x28] sm:$0xf] }
 0x211   :  { %v4189_v6 = vpop.eup %4188  ;;  %v1856_v27 = vsel %vm81_vm0, %v5101_v44, 0.0  ;;  %v1774_v54 = vmul.f32 1.442695, %v1712_v5  ;;  %v2467_v48 = vsel %vm2005_vm2, %v1980_v35, 0 }
 0x212   :  { %3953 = vmatmul.mubr.msk.bf16.vlgmr.msra.gmra.mxu1 %vm81_vm0, %v1941_v55  ;;  %v1681_v14 = vpop.xlane.xlu1 %1680  ;;  %1857 = vadd.xlane.f32.xlu0 %v1856_v27  ;;  %v1883_v23 = vmul.f32 %v4189_v6, %v4945_v38  ;;  %v1804_v17 = vpop.xlane.xlu0 %1803 }
 0x213   :  { %v1713_v49 = vsub.f32 %v4899_v24, %v1681_v14  ;;  %3963 = vmatpush3.bf16.msra.mxu1 %v2237_v7  ;;  %3964 = vmatprep.mubr.msk.bf16.mxu1 %vm4255_vm1, %v4254_v0  ;;  %4202 = vpow2.f32 %v1774_v54  ;;  %v1977_v24 = vld [vmem:[%s5500_s2 + $0x1c] sm:$0xf] }
 0x214   :  { %v5116_v20 = vpop.eup %4190  ;;  %v1942_v32 = vpack.c.bf16 %v1883_v23, %v1883_v23  ;;  %3974 = vmatprep.subr.bf16.mxu1 %v4254_v0  ;;  %4204 = vrcp.f32 %v1804_v17  ;;  %v2329_v26 = vsel %vm2005_vm2, %v1977_v24, 0 }
 0x215   :  { %v4193_v60 = vpop.eup %4192  ;;  %v1776_v19 = vmul.f32 1.442695, %v1713_v49  ;;  %v1859_v38 = vsel %vm81_vm0, %v5116_v20, 0.0 }
 0x216   :  { %3959 = vmatmul.mubr.msk.bf16.vlgmr.msra.gmra.mxu0 %vm81_vm0, %v1942_v32  ;;  %1860 = vadd.xlane.f32.xlu1 %v1859_v38  ;;  %v1807_v18 = vpop.xlane.xlu1 %1806  ;;  %v1885_v3 = vmul.f32 %v4193_v60, %v4947_v41 }
 0x217   :  { %4206 = vpow2.f32 %v1776_v19  ;;  %3969 = vmatpush3.bf16.msra.mxu0 %v2283_v31  ;;  %3970 = vmatprep.mubr.msk.bf16.mxu0 %vm4255_vm1, %v4254_v0 }
 0x218   :  { %4208 = vrcp.f32 %v1807_v18  ;;  %v1943_v61 = vpack.c.bf16 %v1885_v3, %v1885_v3  ;;  %3980 = vmatprep.subr.bf16.mxu0 %v4254_v0  ;;  %v5131_v28 = vpop.eup %4194 }
 0x219   :  { %v4197_v39 = vpop.eup %4196  ;;  %v1862_v41 = vsel %vm81_vm0, %v5131_v28, 0.0 }
 0x21a   :  { %3965 = vmatmul.mubr.msk.bf16.vlgmr.msra.gmra.mxu1 %vm81_vm0, %v1943_v61  ;;  %v1813_v40 = vpop.xlane.xlu1 %1812  ;;  %1863 = vadd.xlane.f32.xlu0 %v1862_v41  ;;  %v1887_v12 = vmul.f32 %v4197_v39, %v4959_v56  ;;  %v1979_v56 = vld [vmem:[%s5500_s2 + $0x24] sm:$0xf] }
 0x21b   :  { %4210 = vrcp.f32 %v1813_v40  ;;  %v1810_v30 = vpop.xlane.xlu0 %1809  ;;  %3975 = vmatpush3.bf16.msra.mxu1 %v2329_v26  ;;  %3976 = vmatprep.mubr.msk.bf16.mxu1 %vm4255_vm1, %v4254_v0  ;;  %v2421_v57 = vsel %vm2005_vm2, %v1979_v56, 0  ;;  %v1984_v40 = vld [vmem:[%s5500_s2 + $0x38] sm:$0xf] }
 0x21c   :  { %v5140_v11 = vpop.eup %4198  ;;  %4212 = vrcp.f32 %v1810_v30  ;;  %3986 = vmatprep.subr.bf16.mxu1 %v4254_v0  ;;  %v1944_v52 = vpack.c.bf16 %v1887_v12, %v1887_v12  ;;  %v2651_v12 = vsel %vm2005_vm2, %v1984_v40, 0  ;;  %v1993_v40 = vld [vmem:[%s5500_s2 + $0x5c] sm:$0xf] }
 0x21d   :  { %v4201_v51 = vpop.eup %4200  ;;  %v1865_v53 = vsel %vm81_vm0, %v5140_v11, 0.0 }
 0x21e   :  { %1866 = vadd.xlane.f32.xlu1 %v1865_v53  ;;  %v1889_v62 = vmul.f32 %v4201_v51, %v4961_v34  ;;  %3971 = vmatmul.mubr.msk.bf16.vlgmr.msra.gmra.mxu0 %vm81_vm0, %v1944_v52 }
 0x21f   :  { %3981 = vmatpush3.bf16.msra.mxu0 %v2375_v59  ;;  %3982 = vmatprep.mubr.msk.bf16.mxu0 %vm4255_vm1, %v4254_v0 }
 0x220   :  { %v1945_v58 = vpack.c.bf16 %v1889_v62, %v1889_v62  ;;  %v5156_v16 = vpop.eup %4202  ;;  %3992 = vmatprep.subr.bf16.mxu0 %v4254_v0  ;;  %v1986_v62 = vld [vmem:[%s5500_s2 + $0x40] sm:$0xf] }
 0x221   :  { %v4205_v10 = vpop.eup %4204  ;;  %v1868_v34 = vsel %vm81_vm0, %v5156_v16, 0.0 }
 0x222   :  { %3977 = vmatmul.mubr.msk.bf16.vlgmr.msra.gmra.mxu1 %vm81_vm0, %v1945_v58  ;;  %v1819_v63 = vpop.xlane.xlu1 %1818  ;;  %1869 = vadd.xlane.f32.xlu0 %v1868_v34  ;;  %v1891_v5 = vmul.f32 %v4205_v10, %v4982_v15  ;;  %v1981_v15 = vld [vmem:[%s5500_s2 + $0x2c] sm:$0xf] }
 0x223   :  { %4214 = vrcp.f32 %v1819_v63  ;;  %v1816_v4 = vpop.xlane.xlu0 %1815  ;;  %3987 = vmatpush3.bf16.msra.mxu1 %v2421_v57  ;;  %3988 = vmatprep.mubr.msk.bf16.mxu1 %vm4255_vm1, %v4254_v0  ;;  %v2513_v49 = vsel %vm2005_vm2, %v1981_v15, 0  ;;  %v2743_v63 = vsel %vm2005_vm2, %v1986_v62, 0 }
 0x224   :  { %v5166_v55 = vpop.eup %4206  ;;  %4216 = vrcp.f32 %v1816_v4  ;;  %3998 = vmatprep.subr.bf16.mxu1 %v4254_v0  ;;  %v1946_v6 = vpack.c.bf16 %v1891_v5, %v1891_v5 }
 0x225   :  { %v4209_v7 = vpop.eup %4208  ;;  %v1871_v27 = vsel %vm81_vm0, %v5166_v55, 0.0 }
 0x226   :  { %1872 = vadd.xlane.f32.xlu1 %v1871_v27  ;;  %v1893_v54 = vmul.f32 %v4209_v7, %v4985_v25  ;;  %3983 = vmatmul.mubr.msk.bf16.vlgmr.msra.gmra.mxu0 %vm81_vm0, %v1946_v6  ;;  %v1982_v25 = vld [vmem:[%s5500_s2 + $0x30] sm:$0xf]  ;;  %v1988_v6 = vld [vmem:[%s5500_s2 + $0x48] sm:$0xf] }
 0x227   :  { %3993 = vmatpush3.bf16.msra.mxu0 %v2467_v48  ;;  %3994 = vmatprep.mubr.msk.bf16.mxu0 %vm4255_vm1, %v4254_v0  ;;  %v2559_v24 = vsel %vm2005_vm2, %v1982_v25, 0 }
 0x228   :  { %v4211_v14 = vpop.eup %4210  ;;  %v1947_v23 = vpack.c.bf16 %v1893_v54, %v1893_v54  ;;  %4004 = vmatprep.subr.bf16.mxu0 %v4254_v0  ;;  %v2835_v54 = vsel %vm2005_vm2, %v1988_v6, 0 }
 0x229   :  { %v4213_v17 = vpop.eup %4212  ;;  %v1897_v38 = vmul.f32 %v4211_v14, %v4993_v29 }
 0x22a   :  { %3989 = vmatmul.mubr.msk.bf16.vlgmr.msra.gmra.mxu1 %vm81_vm0, %v1947_v23  ;;  %v1825_v32 = vpop.xlane.xlu1 %1824  ;;  %v1895_v31 = vmul.f32 %v4213_v17, %v4995_v36  ;;  %v1983_v36 = vld [vmem:[%s5500_s2 + $0x34] sm:$0xf] }
 0x22b   :  { %4218 = vrcp.f32 %v1825_v32  ;;  %v1822_v60 = vpop.xlane.xlu0 %1821  ;;  %3999 = vmatpush3.bf16.msra.mxu1 %v2513_v49  ;;  %4000 = vmatprep.mubr.msk.bf16.mxu1 %vm4255_vm1, %v4254_v0  ;;  %v1949_v3 = vpack.c.bf16 %v1897_v38, %v1897_v38  ;;  %v2605_v61 = vsel %vm2005_vm2, %v1983_v36, 0 }
 0x22c   :  { %4220 = vrcp.f32 %v1822_v60  ;;  %v1948_v19 = vpack.c.bf16 %v1895_v31, %v1895_v31  ;;  %4010 = vmatprep.subr.bf16.mxu1 %v4254_v0  ;;  %v1990_v31 = vld [vmem:[%s5500_s2 + $0x50] sm:$0xf] }
 0x22d   :  { %v2927_v38 = vsel %vm2005_vm2, %v1990_v31, 0 }
 0x22e   :  { %3995 = vmatmul.mubr.msk.bf16.vlgmr.msra.gmra.mxu0 %vm81_vm0, %v1948_v19 }
 0x22f   :  { %4005 = vmatpush3.bf16.msra.mxu0 %v2559_v24  ;;  %4006 = vmatprep.mubr.msk.bf16.mxu0 %vm4255_vm1, %v4254_v0 }
 0x230   :  { %v4215_v18 = vpop.eup %4214  ;;  %4016 = vmatprep.subr.bf16.mxu0 %v4254_v0 }
 0x231   :  { %v4217_v26 = vpop.eup %4216  ;;  %v1901_v30 = vmul.f32 %v4215_v18, %v5003_v47 }
 0x232   :  { %4001 = vmatmul.mubr.msk.bf16.vlgmr.msra.gmra.mxu1 %vm81_vm0, %v1949_v3  ;;  %v1831_v29 = vpop.xlane.xlu1 %1830  ;;  %v1899_v39 = vmul.f32 %v4217_v26, %v5005_v50  ;;  %v1985_v50 = vld [vmem:[%s5500_s2 + $0x3c] sm:$0xf] }
 0x233   :  { %4222 = vrcp.f32 %v1831_v29  ;;  %v1828_v41 = vpop.xlane.xlu0 %1827  ;;  %4011 = vmatpush3.bf16.msra.mxu1 %v2605_v61  ;;  %4012 = vmatprep.mubr.msk.bf16.mxu1 %vm4255_vm1, %v4254_v0  ;;  %v1951_v52 = vpack.c.bf16 %v1901_v30, %v1901_v30  ;;  %v2697_v53 = vsel %vm2005_vm2, %v1985_v50, 0  ;;  %v1992_v61 = vld [vmem:[%s5500_s2 + $0x58] sm:$0xf] }
 0x234   :  { %4224 = vrcp.f32 %v1828_v41  ;;  %v1950_v45 = vpack.c.bf16 %v1899_v39, %v1899_v39  ;;  %4022 = vmatprep.subr.bf16.mxu1 %v4254_v0  ;;  %v3019_v39 = vsel %vm2005_vm2, %v1992_v61, 0 }
 0x236   :  { %4007 = vmatmul.mubr.msk.bf16.vlgmr.msra.gmra.mxu0 %vm81_vm0, %v1950_v45  ;;  %v3065_v45 = vsel %vm2005_vm2, %v1993_v40, 0 }
 0x237   :  { %4017 = vmatpush3.bf16.msra.mxu0 %v2651_v12  ;;  %4018 = vmatprep.mubr.msk.bf16.mxu0 %vm4255_vm1, %v4254_v0  ;;  %v1994_v12 = vld [vmem:[%s5500_s2 + $0x60] sm:$0xf] }
 0x238   :  { %v4219_v51 = vpop.eup %4218  ;;  %4028 = vmatprep.subr.bf16.mxu0 %v4254_v0 }
 0x239   :  { %v4221_v59 = vpop.eup %4220  ;;  %v1905_v10 = vmul.f32 %v4219_v51, %v5013_v22 }
 0x23a   :  { %4013 = vmatmul.mubr.msk.bf16.vlgmr.msra.gmra.mxu1 %vm81_vm0, %v1951_v52  ;;  %v1837_v47 = vpop.xlane.xlu1 %1836  ;;  %v1903_v56 = vmul.f32 %v4221_v59, %v5015_v21  ;;  %v1987_v21 = vld [vmem:[%s5500_s2 + $0x44] sm:$0xf]  ;;  %v3111_v52 = vsel %vm2005_vm2, %v1994_v12, 0 }
 0x23b   :  { %4226 = vrcp.f32 %v1837_v47  ;;  %v1834_v58 = vpop.xlane.xlu0 %1833  ;;  %4023 = vmatpush3.bf16.msra.mxu1 %v2697_v53  ;;  %4024 = vmatprep.mubr.msk.bf16.mxu1 %vm4255_vm1, %v4254_v0  ;;  %v1953_v35 = vpack.c.bf16 %v1905_v10, %v1905_v10  ;;  %v2789_v4 = vsel %vm2005_vm2, %v1987_v21, 0  ;;  %v1995_v53 = vld [vmem:[%s5500_s2 + $0x64] sm:$0xf] }
 0x23c   :  { %4228 = vrcp.f32 %v1834_v58  ;;  %v1952_v57 = vpack.c.bf16 %v1903_v56, %v1903_v56  ;;  %4034 = vmatprep.subr.bf16.mxu1 %v4254_v0  ;;  %v3157_v59 = vsel %vm2005_vm2, %v1995_v53, 0 }
 0x23e   :  { %4019 = vmatmul.mubr.msk.bf16.vlgmr.msra.gmra.mxu0 %vm81_vm0, %v1952_v57  ;;  %v1996_v57 = vld [vmem:[%s5500_s2 + $0x68] sm:$0xf] }
 0x23f   :  { %4029 = vmatpush3.bf16.msra.mxu0 %v2743_v63  ;;  %4030 = vmatprep.mubr.msk.bf16.mxu0 %vm4255_vm1, %v4254_v0 }
 0x240   :  { %v4223_v34 = vpop.eup %4222  ;;  %4040 = vmatprep.subr.bf16.mxu0 %v4254_v0 }
 0x241   :  { %v4225_v5 = vpop.eup %4224  ;;  %v1909_v15 = vmul.f32 %v4223_v34, %v5023_v8  ;;  %v3203_v34 = vsel %vm2005_vm2, %v1996_v57, 0 }
 0x242   :  { %4025 = vmatmul.mubr.msk.bf16.vlgmr.msra.gmra.mxu1 %vm81_vm0, %v1953_v35  ;;  %v1843_v22 = vpop.xlane.xlu1 %1842  ;;  %v1907_v7 = vmul.f32 %v4225_v5, %v5025_v13  ;;  %v1989_v13 = vld [vmem:[%s5500_s2 + $0x4c] sm:$0xf] }
 0x243   :  { %4230 = vrcp.f32 %v1843_v22  ;;  %v1840_v27 = vpop.xlane.xlu0 %1839  ;;  %4035 = vmatpush3.bf16.msra.mxu1 %v2789_v4  ;;  %4036 = vmatprep.mubr.msk.bf16.mxu1 %vm4255_vm1, %v4254_v0  ;;  %v1955_v23 = vpack.c.bf16 %v1909_v15, %v1909_v15  ;;  %v2881_v49 = vsel %vm2005_vm2, %v1989_v13, 0  ;;  %v1997_v4 = vld [vmem:[%s5500_s2 + $0x6c] sm:$0xf] }
 0x244   :  { %4232 = vrcp.f32 %v1840_v27  ;;  %v1954_v48 = vpack.c.bf16 %v1907_v7, %v1907_v7  ;;  %4046 = vmatprep.subr.bf16.mxu1 %v4254_v0  ;;  %v3249_v7 = vsel %vm2005_vm2, %v1997_v4, 0  ;;  %v1998_v27 = vld [vmem:[%s5500_s2 + $0x70] sm:$0xf] }
 0x246   :  { %4031 = vmatmul.mubr.msk.bf16.vlgmr.msra.gmra.mxu0 %vm81_vm0, %v1954_v48 }
 0x247   :  { %4041 = vmatpush3.bf16.msra.mxu0 %v2835_v54  ;;  %4042 = vmatprep.mubr.msk.bf16.mxu0 %vm4255_vm1, %v4254_v0  ;;  %v3295_v54 = vsel %vm2005_vm2, %v1998_v27, 0 }
 0x248   :  { %v4227_v14 = vpop.eup %4226  ;;  %4052 = vmatprep.subr.bf16.mxu0 %v4254_v0 }
 0x249   :  { %v4229_v17 = vpop.eup %4228  ;;  %v1913_v19 = vmul.f32 %v4227_v14, %v5033_v1  ;;  %v1999_v14 = vld [vmem:[%s5500_s2 + $0x74] sm:$0xf] }
 0x24a   :  { %4037 = vmatmul.mubr.msk.bf16.vlgmr.msra.gmra.mxu1 %vm81_vm0, %v1955_v23  ;;  %v1849_v8 = vpop.xlane.xlu1 %1848  ;;  %v1911_v32 = vmul.f32 %v4229_v17, %v5035_v2  ;;  %v1991_v2 = vld [vmem:[%s5500_s2 + $0x54] sm:$0xf]  ;;  %v3341_v17 = vsel %vm2005_vm2, %v1999_v14, 0 }
 0x24b   :  { %4234 = vrcp.f32 %v1849_v8  ;;  %v1846_v25 = vpop.xlane.xlu0 %1845  ;;  %4047 = vmatpush3.bf16.msra.mxu1 %v2881_v49  ;;  %4048 = vmatprep.mubr.msk.bf16.mxu1 %vm4255_vm1, %v4254_v0  ;;  %v1957_v36 = vpack.c.bf16 %v1913_v19, %v1913_v19  ;;  %v2973_v18 = vsel %vm2005_vm2, %v1991_v2, 0  ;;  %v2001_v19 = vld [vmem:[%s5500_s2 + $0x7c] sm:$0xf] }
 0x24c   :  { %4236 = vrcp.f32 %v1846_v25  ;;  %v1956_v60 = vpack.c.bf16 %v1911_v32, %v1911_v32  ;;  %4058 = vmatprep.subr.bf16.mxu1 %v4254_v0 }
 0x24e   :  { %4043 = vmatmul.mubr.msk.bf16.vlgmr.msra.gmra.mxu0 %vm81_vm0, %v1956_v60 }
 0x24f   :  { %4053 = vmatpush3.bf16.msra.mxu0 %v2927_v38  ;;  %4054 = vmatprep.mubr.msk.bf16.mxu0 %vm4255_vm1, %v4254_v0 }
 0x250   :  { %v4231_v24 = vpop.eup %4230  ;;  %4064 = vmatprep.subr.bf16.mxu0 %v4254_v0 }
 0x251   :  { %v4233_v3 = vpop.eup %4232  ;;  %v1917_v29 = vmul.f32 %v4231_v24, %v5041_v42 }
 0x252   :  { %4049 = vmatmul.mubr.msk.bf16.vlgmr.msra.gmra.mxu1 %vm81_vm0, %v1957_v36  ;;  %v1915_v1 = vmul.f32 %v4233_v3, %v5043_v33 }
 0x253   :  { %4059 = vmatpush3.bf16.msra.mxu1 %v2973_v18  ;;  %4060 = vmatprep.mubr.msk.bf16.mxu1 %vm4255_vm1, %v4254_v0  ;;  %v1959_v41 = vpack.c.bf16 %v1917_v29, %v1917_v29 }
 0x254   :  { %v1958_v26 = vpack.c.bf16 %v1915_v1, %v1915_v1  ;;  %4070 = vmatprep.subr.bf16.mxu1 %v4254_v0 }
 0x256   :  { %4055 = vmatmul.mubr.msk.bf16.vlgmr.msra.gmra.mxu0 %vm81_vm0, %v1958_v26 }
 0x257   :  { %4065 = vmatpush3.bf16.msra.mxu0 %v3019_v39  ;;  %4066 = vmatprep.mubr.msk.bf16.mxu0 %vm4255_vm1, %v4254_v0 }
 0x258   :  { %v4235_v33 = vpop.eup %4234  ;;  %4076 = vmatprep.subr.bf16.mxu0 %v4254_v0 }
 0x259   :  { %v4237_v30 = vpop.eup %4236  ;;  %v1921_v51 = vmul.f32 %v4235_v33, %v5049_v46 }
 0x25a   :  { %4061 = vmatmul.mubr.msk.bf16.vlgmr.msra.gmra.mxu1 %vm81_vm0, %v1959_v41  ;;  %v1919_v42 = vmul.f32 %v4237_v30, %v5051_v43 }
 0x25b   :  { %4071 = vmatpush3.bf16.msra.mxu1 %v3065_v45  ;;  %4072 = vmatprep.mubr.msk.bf16.mxu1 %vm4255_vm1, %v4254_v0  ;;  %v1961_v43 = vpack.c.bf16 %v1921_v51, %v1921_v51 }
 0x25c   :  { %v1960_v50 = vpack.c.bf16 %v1919_v42, %v1919_v42  ;;  %4082 = vmatprep.subr.bf16.mxu1 %v4254_v0 }
 0x25e   :  { %4067 = vmatmul.mubr.msk.bf16.vlgmr.msra.gmra.mxu0 %vm81_vm0, %v1960_v50 }
 0x25f   :  { %4077 = vmatpush3.bf16.msra.mxu0 %v3111_v52  ;;  %4078 = vmatprep.mubr.msk.bf16.mxu0 %vm4255_vm1, %v4254_v0 }
 0x260   :  { %4088 = vmatprep.subr.bf16.mxu0 %v4254_v0 }
 0x262   :  { %4073 = vmatmul.mubr.msk.bf16.vlgmr.msra.gmra.mxu1 %vm81_vm0, %v1961_v43 }
 0x263   :  { %4083 = vmatpush3.bf16.msra.mxu1 %v3157_v59  ;;  %4084 = vmatprep.mubr.msk.bf16.mxu1 %vm4255_vm1, %v4254_v0 }
 0x264   :  { %4094 = vmatprep.subr.bf16.mxu1 %v4254_v0 }
 0x293   :  { %v1852_v46 = vpop.xlane.xlu0 %1851 }
 0x294   :  { %4238 = vrcp.f32 %v1852_v46 }
 0x297   :  { %v1855_v47 = vpop.xlane.xlu1 %1854 }
 0x298   :  { %4240 = vrcp.f32 %v1855_v47 }
 0x29b   :  { %v1858_v56 = vpop.xlane.xlu0 %1857 }
 0x29c   :  { %4242 = vrcp.f32 %v1858_v56 }
 0x29f   :  { %v1861_v62 = vpop.xlane.xlu1 %1860 }
 0x2a0   :  { %4244 = vrcp.f32 %v1861_v62 }
 0x2a1   :  { %v4239_v58 = vpop.eup %4238 }
 0x2a2   :  { %v1923_v10 = vmul.f32 %v4239_v58, %v5075_v37 }
 0x2a3   :  { %v1864_v21 = vpop.xlane.xlu0 %1863 }
 0x2a4   :  { %v1962_v63 = vpack.c.bf16 %v1923_v10, %v1923_v10  ;;  %4246 = vrcp.f32 %v1864_v21 }
 0x2a5   :  { %v4241_v35 = vpop.eup %4240 }
 0x2a6   :  { %v1925_v5 = vmul.f32 %v4241_v35, %v5089_v9  ;;  %4079 = vmatmul.mubr.msk.bf16.vlgmr.msra.gmra.mxu0 %vm81_vm0, %v1962_v63 }
 0x2a7   :  { %v1867_v22 = vpop.xlane.xlu1 %1866  ;;  %4089 = vmatpush3.bf16.msra.mxu0 %v3203_v34  ;;  %4090 = vmatprep.mubr.msk.bf16.mxu0 %vm4255_vm1, %v4254_v0 }
 0x2a8   :  { %v1963_v37 = vpack.c.bf16 %v1925_v5, %v1925_v5  ;;  %4248 = vrcp.f32 %v1867_v22  ;;  %4100 = vmatprep.subr.bf16.mxu0 %v4254_v0 }
 0x2a9   :  { %v4243_v6 = vpop.eup %4242 }
 0x2aa   :  { %v1927_v9 = vmul.f32 %v4243_v6, %v5101_v44  ;;  %4085 = vmatmul.mubr.msk.bf16.vlgmr.msra.gmra.mxu1 %vm81_vm0, %v1963_v37 }
 0x2ab   :  { %4095 = vmatpush3.bf16.msra.mxu1 %v3249_v7  ;;  %4096 = vmatprep.mubr.msk.bf16.mxu1 %vm4255_vm1, %v4254_v0  ;;  %v1870_v15 = vpop.xlane.xlu0 %1869 }
 0x2ac   :  { %v1964_v48 = vpack.c.bf16 %v1927_v9, %v1927_v9  ;;  %4106 = vmatprep.subr.bf16.mxu1 %v4254_v0  ;;  %4250 = vrcp.f32 %v1870_v15 }
 0x2ad   :  { %v4245_v13 = vpop.eup %4244 }
 0x2ae   :  { %v1929_v44 = vmul.f32 %v4245_v13, %v5116_v20  ;;  %4091 = vmatmul.mubr.msk.bf16.vlgmr.msra.gmra.mxu0 %vm81_vm0, %v1964_v48  ;;  %v2000_v20 = vld [vmem:[%s5500_s2 + $0x78] sm:$0xf] }
 0x2af   :  { %v1873_v23 = vpop.xlane.xlu1 %1872  ;;  %4101 = vmatpush3.bf16.msra.mxu0 %v3295_v54  ;;  %4102 = vmatprep.mubr.msk.bf16.mxu0 %vm4255_vm1, %v4254_v0  ;;  %v3387_v60 = vsel %vm2005_vm2, %v2000_v20, 0 }
 0x2b0   :  { %v1965_v49 = vpack.c.bf16 %v1929_v44, %v1929_v44  ;;  %4252 = vrcp.f32 %v1873_v23  ;;  %4112 = vmatprep.subr.bf16.mxu0 %v4254_v0 }
 0x2b1   :  { %v4247_v8 = vpop.eup %4246 }
 0x2b2   :  { %4097 = vmatmul.mubr.msk.bf16.vlgmr.msra.gmra.mxu1 %vm81_vm0, %v1965_v49  ;;  %v1931_v32 = vmul.f32 %v4247_v8, %v5131_v28  ;;  %v3433_v28 = vsel %vm2005_vm2, %v2001_v19, 0 }
 0x2b3   :  { %4107 = vmatpush3.bf16.msra.mxu1 %v3341_v17  ;;  %4108 = vmatprep.mubr.msk.bf16.mxu1 %vm4255_vm1, %v4254_v0 }
 0x2b4   :  { %4118 = vmatprep.subr.bf16.mxu1 %v4254_v0  ;;  %v1966_v25 = vpack.c.bf16 %v1931_v32, %v1931_v32 }
 0x2b5   :  { %v4249_v31 = vpop.eup %4248 }
 0x2b6   :  { %v1933_v38 = vmul.f32 %v4249_v31, %v5140_v11  ;;  %4103 = vmatmul.mubr.msk.bf16.vlgmr.msra.gmra.mxu0 %vm81_vm0, %v1966_v25 }
 0x2b7   :  { %4113 = vmatpush3.bf16.msra.mxu0 %v3387_v60  ;;  %4114 = vmatprep.mubr.msk.bf16.mxu0 %vm4255_vm1, %v4254_v0 }
 0x2b8   :  { %v1967_v2 = vpack.c.bf16 %v1933_v38, %v1933_v38 }
 0x2b9   :  { %v4251_v24 = vpop.eup %4250 }
 0x2ba   :  { %4109 = vmatmul.mubr.msk.bf16.vlgmr.msra.gmra.mxu1 %vm81_vm0, %v1967_v2  ;;  %v1935_v36 = vmul.f32 %v4251_v24, %v5156_v16 }
 0x2bb   :  { %4119 = vmatpush3.bf16.msra.mxu1 %v3433_v28  ;;  %4120 = vmatprep.mubr.msk.bf16.mxu1 %vm4255_vm1, %v4254_v0 }
 0x2bc   :  { %v1968_v11 = vpack.c.bf16 %v1935_v36, %v1935_v36 }
 0x2bd   :  { %v4253_v18 = vpop.eup %4252 }
 0x2be   :  { %v1937_v3 = vmul.f32 %v4253_v18, %v5166_v55  ;;  %4115 = vmatmul.mubr.msk.bf16.vlgmr.msra.gmra.mxu0 %vm81_vm0, %v1968_v11 }
 0x2c0   :  { %v1969_v1 = vpack.c.bf16 %v1937_v3, %v1937_v3 }
 0x2c2   :  { %4121 = vmatmul.mubr.msk.bf16.vlgmr.msra.gmra.mxu1 %vm81_vm0, %v1969_v1 }
 0x2c5   :  { %v2043_v61 = vpop.f32.mrf.mxu0 }
 0x2c6   :  { %v3475_v26 = vpack.c.bf16 %v2043_v61, %v2043_v61 }
 0x2c7   :  { %v3936_v29 = vpop.f32.mrf.mxu0 }
 0x2c8   :  { %3508 = vst.msk [vmem:[%s5501_s3] sm:$0xf] %vm3507_vm3, %v3475_v26 }
 0x2c9   :  { %v2046_v16 = vpop.f32.mrf.mxu0  ;;  %v2089_v0 = vpop.f32.mrf.mxu1 }
 0x2ca   :  { %v3476_v39 = vpack.c.bf16 %v2089_v0, %v2089_v0 }
 0x2cb   :  { %v3937_v40 = vpop.f32.mrf.mxu0  ;;  %v3942_v33 = vpop.f32.mrf.mxu1 }
 0x2cc   :  { %3509 = vst.msk [vmem:[%s5501_s3 + $0x4] sm:$0xf] %vm3507_vm3, %v3476_v39 }
 0x2cd   :  { %v2092_v55 = vpop.f32.mrf.mxu1 }
 0x2ce   :  { %v2135_v41 = vpop.f32.mrf.mxu0 }
 0x2cf   :  { %v3477_v45 = vpack.c.bf16 %v2135_v41, %v2135_v41  ;;  %v3943_v30 = vpop.f32.mrf.mxu1 }
 0x2d0   :  { %v3948_v42 = vpop.f32.mrf.mxu0 }
 0x2d1   :  { %3510 = vst.msk [vmem:[%s5501_s3 + $0x8] sm:$0xf] %vm3507_vm3, %v3477_v45 }
 0x2d2   :  { %v2138_v12 = vpop.f32.mrf.mxu0  ;;  %v2181_v50 = vpop.f32.mrf.mxu1 }
 0x2d3   :  { %v3478_v51 = vpack.c.bf16 %v2181_v50, %v2181_v50 }
 0x2d4   :  { %v3949_v52 = vpop.f32.mrf.mxu0  ;;  %v3954_v53 = vpop.f32.mrf.mxu1 }
 0x2d5   :  { %3511 = vst.msk [vmem:[%s5501_s3 + $0xc] sm:$0xf] %vm3507_vm3, %v3478_v51 }
 0x2d6   :  { %v2184_v43 = vpop.f32.mrf.mxu1  ;;  %v2227_v59 = vpop.f32.mrf.mxu0 }
 0x2d7   :  { %v3479_v46 = vpack.c.bf16 %v2227_v59, %v2227_v59 }
 0x2d8   :  { %v3955_v47 = vpop.f32.mrf.mxu1  ;;  %v3960_v56 = vpop.f32.mrf.mxu0 }
 0x2d9   :  { %3512 = vst.msk [vmem:[%s5501_s3 + $0x10] sm:$0xf] %vm3507_vm3, %v3479_v46 }
 0x2da   :  { %v2230_v62 = vpop.f32.mrf.mxu0  ;;  %v2273_v58 = vpop.f32.mrf.mxu1 }
 0x2db   :  { %v3480_v57 = vpack.c.bf16 %v2273_v58, %v2273_v58 }
 0x2dc   :  { %v3961_v10 = vpop.f32.mrf.mxu0  ;;  %v3966_v63 = vpop.f32.mrf.mxu1 }
 0x2dd   :  { %3513 = vst.msk [vmem:[%s5501_s3 + $0x14] sm:$0xf] %vm3507_vm3, %v3480_v57 }
 0x2de   :  { %v2276_v21 = vpop.f32.mrf.mxu1  ;;  %v2319_v34 = vpop.f32.mrf.mxu0 }
 0x2df   :  { %v3481_v35 = vpack.c.bf16 %v2319_v34, %v2319_v34 }
 0x2e0   :  { %v3967_v4 = vpop.f32.mrf.mxu1  ;;  %v3972_v5 = vpop.f32.mrf.mxu0 }
 0x2e1   :  { %3514 = vst.msk [vmem:[%s5501_s3 + $0x18] sm:$0xf] %vm3507_vm3, %v3481_v35 }
 0x2e2   :  { %v2365_v22 = vpop.f32.mrf.mxu1  ;;  %v2322_v37 = vpop.f32.mrf.mxu0 }
 0x2e3   :  { %v3482_v7 = vpack.c.bf16 %v2365_v22, %v2365_v22 }
 0x2e4   :  { %v3978_v6 = vpop.f32.mrf.mxu1  ;;  %v3973_v27 = vpop.f32.mrf.mxu0 }
 0x2e5   :  { %3515 = vst.msk [vmem:[%s5501_s3 + $0x1c] sm:$0xf] %vm3507_vm3, %v3482_v7 }
 0x2e6   :  { %v2368_v9 = vpop.f32.mrf.mxu1  ;;  %v2411_v48 = vpop.f32.mrf.mxu0 }
 0x2e7   :  { %v3483_v15 = vpack.c.bf16 %v2411_v48, %v2411_v48 }
 0x2e8   :  { %v3979_v54 = vpop.f32.mrf.mxu1  ;;  %v3984_v13 = vpop.f32.mrf.mxu0 }
 0x2e9   :  { %3516 = vst.msk [vmem:[%s5501_s3 + $0x20] sm:$0xf] %vm3507_vm3, %v3483_v15 }
 0x2ea   :  { %v2457_v14 = vpop.f32.mrf.mxu1  ;;  %v2414_v44 = vpop.f32.mrf.mxu0 }
 0x2eb   :  { %v3484_v23 = vpack.c.bf16 %v2457_v14, %v2457_v14 }
 0x2ec   :  { %v3990_v49 = vpop.f32.mrf.mxu1  ;;  %v3985_v17 = vpop.f32.mrf.mxu0 }
 0x2ed   :  { %3517 = vst.msk [vmem:[%s5501_s3 + $0x24] sm:$0xf] %vm3507_vm3, %v3484_v23 }
 0x2ee   :  { %v2460_v8 = vpop.f32.mrf.mxu1  ;;  %v2503_v20 = vpop.f32.mrf.mxu0 }
 0x2ef   :  { %v3485_v32 = vpack.c.bf16 %v2503_v20, %v2503_v20 }
 0x2f0   :  { %v3991_v31 = vpop.f32.mrf.mxu1  ;;  %v3996_v25 = vpop.f32.mrf.mxu0 }
 0x2f1   :  { %3518 = vst.msk [vmem:[%s5501_s3 + $0x28] sm:$0xf] %vm3507_vm3, %v3485_v32 }
 0x2f2   :  { %v2549_v60 = vpop.f32.mrf.mxu1  ;;  %v2506_v19 = vpop.f32.mrf.mxu0 }
 0x2f3   :  { %v3486_v38 = vpack.c.bf16 %v2549_v60, %v2549_v60 }
 0x2f4   :  { %v4002_v2 = vpop.f32.mrf.mxu1  ;;  %v3997_v28 = vpop.f32.mrf.mxu0 }
 0x2f5   :  { %3519 = vst.msk [vmem:[%s5501_s3 + $0x2c] sm:$0xf] %vm3507_vm3, %v3486_v38 }
 0x2f6   :  { %v2552_v24 = vpop.f32.mrf.mxu1  ;;  %v2595_v36 = vpop.f32.mrf.mxu0 }
 0x2f7   :  { %v3487_v18 = vpack.c.bf16 %v2595_v36, %v2595_v36 }
 0x2f8   :  { %v4003_v11 = vpop.f32.mrf.mxu1  ;;  %v4008_v3 = vpop.f32.mrf.mxu0 }
 0x2f9   :  { %3520 = vst.msk [vmem:[%s5501_s3 + $0x30] sm:$0xf] %vm3507_vm3, %v3487_v18 }
 0x2fa   :  { %v2641_v1 = vpop.f32.mrf.mxu1  ;;  %v2598_v61 = vpop.f32.mrf.mxu0 }
 0x2fb   :  { %v3488_v26 = vpack.c.bf16 %v2641_v1, %v2641_v1 }
 0x2fc   :  { %v4014_v29 = vpop.f32.mrf.mxu1  ;;  %v4009_v16 = vpop.f32.mrf.mxu0 }
 0x2fd   :  { %3521 = vst.msk [vmem:[%s5501_s3 + $0x34] sm:$0xf] %vm3507_vm3, %v3488_v26 }
 0x2fe   :  { %v2644_v0 = vpop.f32.mrf.mxu1  ;;  %v2687_v39 = vpop.f32.mrf.mxu0 }
 0x2ff   :  { %v3489_v40 = vpack.c.bf16 %v2687_v39, %v2687_v39 }
 0x300   :  { %v4015_v33 = vpop.f32.mrf.mxu1  ;;  %v4020_v55 = vpop.f32.mrf.mxu0 }
 0x301   :  { %3522 = vst.msk [vmem:[%s5501_s3 + $0x38] sm:$0xf] %vm3507_vm3, %v3489_v40 }
 0x302   :  { %v2733_v41 = vpop.f32.mrf.mxu1  ;;  %v2690_v45 = vpop.f32.mrf.mxu0 }
 0x303   :  { %v3490_v30 = vpack.c.bf16 %v2733_v41, %v2733_v41 }
 0x304   :  { %v4026_v42 = vpop.f32.mrf.mxu1  ;;  %v4021_v12 = vpop.f32.mrf.mxu0 }
 0x305   :  { %3523 = vst.msk [vmem:[%s5501_s3 + $0x3c] sm:$0xf] %vm3507_vm3, %v3490_v30 }
 0x306   :  { %v2736_v50 = vpop.f32.mrf.mxu1  ;;  %v2779_v51 = vpop.f32.mrf.mxu0 }
 0x307   :  { %v3491_v52 = vpack.c.bf16 %v2779_v51, %v2779_v51 }
 0x308   :  { %v4027_v53 = vpop.f32.mrf.mxu1  ;;  %v4032_v43 = vpop.f32.mrf.mxu0 }
 0x309   :  { %3524 = vst.msk [vmem:[%s5501_s3 + $0x40] sm:$0xf] %vm3507_vm3, %v3491_v52 }
 0x30a   :  { %v2825_v59 = vpop.f32.mrf.mxu1  ;;  %v2782_v46 = vpop.f32.mrf.mxu0 }
 0x30b   :  { %v3492_v47 = vpack.c.bf16 %v2825_v59, %v2825_v59 }
 0x30c   :  { %v4038_v56 = vpop.f32.mrf.mxu1  ;;  %v4033_v62 = vpop.f32.mrf.mxu0 }
 0x30d   :  { %3525 = vst.msk [vmem:[%s5501_s3 + $0x44] sm:$0xf] %vm3507_vm3, %v3492_v47 }
 0x30e   :  { %v2828_v58 = vpop.f32.mrf.mxu1  ;;  %v2871_v57 = vpop.f32.mrf.mxu0 }
 0x30f   :  { %v3493_v10 = vpack.c.bf16 %v2871_v57, %v2871_v57 }
 0x310   :  { %v4039_v63 = vpop.f32.mrf.mxu1  ;;  %v4044_v21 = vpop.f32.mrf.mxu0 }
 0x311   :  { %3526 = vst.msk [vmem:[%s5501_s3 + $0x48] sm:$0xf] %vm3507_vm3, %v3493_v10 }
 0x312   :  { %v2917_v34 = vpop.f32.mrf.mxu1  ;;  %v2874_v35 = vpop.f32.mrf.mxu0 }
 0x313   :  { %v3494_v4 = vpack.c.bf16 %v2917_v34, %v2917_v34 }
 0x314   :  { %v4050_v5 = vpop.f32.mrf.mxu1  ;;  %v4045_v22 = vpop.f32.mrf.mxu0 }
 0x315   :  { %3527 = vst.msk [vmem:[%s5501_s3 + $0x4c] sm:$0xf] %vm3507_vm3, %v3494_v4 }
 0x316   :  { %v2920_v37 = vpop.f32.mrf.mxu1  ;;  %v2963_v7 = vpop.f32.mrf.mxu0 }
 0x317   :  { %v3495_v6 = vpack.c.bf16 %v2963_v7, %v2963_v7 }
 0x318   :  { %v4051_v27 = vpop.f32.mrf.mxu1  ;;  %v4056_v9 = vpop.f32.mrf.mxu0 }
 0x319   :  { %3528 = vst.msk [vmem:[%s5501_s3 + $0x50] sm:$0xf] %vm3507_vm3, %v3495_v6 }
 0x31a   :  { %v3009_v48 = vpop.f32.mrf.mxu1  ;;  %v2966_v15 = vpop.f32.mrf.mxu0 }
 0x31b   :  { %v3496_v54 = vpack.c.bf16 %v3009_v48, %v3009_v48 }
 0x31c   :  { %v4062_v13 = vpop.f32.mrf.mxu1  ;;  %v4057_v14 = vpop.f32.mrf.mxu0 }
 0x31d   :  { %3529 = vst.msk [vmem:[%s5501_s3 + $0x54] sm:$0xf] %vm3507_vm3, %v3496_v54 }
 0x31e   :  { %v3012_v44 = vpop.f32.mrf.mxu1  ;;  %v3055_v23 = vpop.f32.mrf.mxu0 }
 0x31f   :  { %v3497_v49 = vpack.c.bf16 %v3055_v23, %v3055_v23 }
 0x320   :  { %v4063_v17 = vpop.f32.mrf.mxu1  ;;  %v4068_v8 = vpop.f32.mrf.mxu0 }
 0x321   :  { %3530 = vst.msk [vmem:[%s5501_s3 + $0x58] sm:$0xf] %vm3507_vm3, %v3497_v49 }
 0x322   :  { %v3101_v20 = vpop.f32.mrf.mxu1  ;;  %v3058_v32 = vpop.f32.mrf.mxu0 }
 0x323   :  { %v3498_v31 = vpack.c.bf16 %v3101_v20, %v3101_v20 }
 0x324   :  { %v4074_v25 = vpop.f32.mrf.mxu1  ;;  %v4069_v60 = vpop.f32.mrf.mxu0 }
 0x325   :  { %3531 = vst.msk [vmem:[%s5501_s3 + $0x5c] sm:$0xf] %vm3507_vm3, %v3498_v31 }
 0x326   :  { %v3104_v19 = vpop.f32.mrf.mxu1 }
 0x328   :  { %v4075_v38 = vpop.f32.mrf.mxu1 }
 0x366   :  { %v3147_v2 = vpop.f32.mrf.mxu0 }
 0x367   :  { %v3499_v28 = vpack.c.bf16 %v3147_v2, %v3147_v2 }
 0x368   :  { %v4080_v24 = vpop.f32.mrf.mxu0 }
 0x369   :  { %3532 = vst.msk [vmem:[%s5501_s3 + $0x60] sm:$0xf] %vm3507_vm3, %v3499_v28 }
 0x36a   :  { %v3150_v36 = vpop.f32.mrf.mxu0  ;;  %v3193_v18 = vpop.f32.mrf.mxu1 }
 0x36b   :  { %v3500_v11 = vpack.c.bf16 %v3193_v18, %v3193_v18 }
 0x36c   :  { %v4081_v3 = vpop.f32.mrf.mxu0  ;;  %v4086_v1 = vpop.f32.mrf.mxu1 }
 0x36d   :  { %3533 = vst.msk [vmem:[%s5501_s3 + $0x64] sm:$0xf] %vm3507_vm3, %v3500_v11 }
 0x36e   :  { %v3196_v61 = vpop.f32.mrf.mxu1  ;;  %v3239_v26 = vpop.f32.mrf.mxu0 }
 0x36f   :  { %v3501_v29 = vpack.c.bf16 %v3239_v26, %v3239_v26 }
 0x370   :  { %v4087_v16 = vpop.f32.mrf.mxu1  ;;  %v4092_v0 = vpop.f32.mrf.mxu0 }
 0x371   :  { %3534 = vst.msk [vmem:[%s5501_s3 + $0x68] sm:$0xf] %vm3507_vm3, %v3501_v29 }
 0x372   :  { %v3242_v39 = vpop.f32.mrf.mxu0  ;;  %v3285_v40 = vpop.f32.mrf.mxu1 }
 0x373   :  { %v3502_v33 = vpack.c.bf16 %v3285_v40, %v3285_v40 }
 0x374   :  { %v4093_v55 = vpop.f32.mrf.mxu0  ;;  %v4098_v41 = vpop.f32.mrf.mxu1 }
 0x375   :  { %3535 = vst.msk [vmem:[%s5501_s3 + $0x6c] sm:$0xf] %vm3507_vm3, %v3502_v33 }
 0x376   :  { %v3288_v45 = vpop.f32.mrf.mxu1  ;;  %v3331_v30 = vpop.f32.mrf.mxu0 }
 0x377   :  { %v3503_v42 = vpack.c.bf16 %v3331_v30, %v3331_v30 }
 0x378   :  { %v4099_v12 = vpop.f32.mrf.mxu1  ;;  %v4104_v50 = vpop.f32.mrf.mxu0 }
 0x379   :  { %3536 = vst.msk [vmem:[%s5501_s3 + $0x70] sm:$0xf] %vm3507_vm3, %v3503_v42 }
 0x37a   :  { %v3377_v51 = vpop.f32.mrf.mxu1  ;;  %v3334_v52 = vpop.f32.mrf.mxu0 }
 0x37b   :  { %v3504_v53 = vpack.c.bf16 %v3377_v51, %v3377_v51 }
 0x37c   :  { %v4110_v43 = vpop.f32.mrf.mxu1  ;;  %v4105_v59 = vpop.f32.mrf.mxu0 }
 0x37d   :  { %3537 = vst.msk [vmem:[%s5501_s3 + $0x74] sm:$0xf] %vm3507_vm3, %v3504_v53 }
 0x37e   :  { %v3380_v46 = vpop.f32.mrf.mxu1  ;;  %v3423_v47 = vpop.f32.mrf.mxu0 }
 0x37f   :  { %v3505_v56 = vpack.c.bf16 %v3423_v47, %v3423_v47 }
 0x380   :  { %v4111_v62 = vpop.f32.mrf.mxu1  ;;  %v4116_v58 = vpop.f32.mrf.mxu0 }
 0x381   :  { %3538 = vst.msk [vmem:[%s5501_s3 + $0x78] sm:$0xf] %vm3507_vm3, %v3505_v56 }
 0x382   :  { %v3469_v57 = vpop.f32.mrf.mxu1  ;;  %v3426_v10 = vpop.f32.mrf.mxu0 }
 0x383   :  { %v3506_v63 = vpack.c.bf16 %v3469_v57, %v3469_v57 }
 0x384   :  { %v4122_v21 = vpop.f32.mrf.mxu1  ;;  %v4117_v34 = vpop.f32.mrf.mxu0 }
 0x385   :  { %3539 = vst.msk [vmem:[%s5501_s3 + $0x7c] sm:$0xf] %vm3507_vm3, %v3506_v63 }
 0x386   :  { %v3472_v35 = vpop.f32.mrf.mxu1 }
 0x388   :  { %v4123_v4 = vpop.f32.mrf.mxu1 }

// kernel: tsti_encoder_forward.25
= control target key start
LH: loop header
LB: loop body
LE: loop exit
PB: predicated region body
PF: predicated region fallthrough
CT: control target
= control target key end

     0   :  { %vm108_vm0 = vcmask 261120   ;;  %s271_s0 = inlined_call_operand.vmem [shape: f32[64,32], index: 0, kind: input, shape index: {}]   ;;  %s272_s1 = inlined_call_operand.vmem [shape: f32[64,32], index: 1, kind: input, shape index: {}]   ;;  %s273_s2 = inlined_call_operand.vmem [shape: f32[1,32], index: 2, kind: input, shape index: {}]   ;;  %s274_s3 = inlined_call_operand.vmem [shape: f32[1,32], index: 3, kind: input, shape index: {}]   ;;  %s275_s4 = inlined_call_operand.vmem [shape: f32[1,32], index: 4, kind: input, shape index: {}]   ;;  %s276_s5 = inlined_call_operand.vmem [shape: f32[1,32], index: 5, kind: input, shape index: {}]   ;;  %s277_s6 = inlined_call_operand.hbm [shape: f32[64,32], index: 6, kind: output, shape index: {}]  }
   0x1   :  { %v24_v0 = vld [vmem:[%s271_s0] sm:$0xff]  ;;  %v25_v8 = vld [vmem:[%s271_s0 + $0x8] sm:$0xff]  ;;  %v26_v10 = vld [vmem:[%s271_s0 + $0x10] sm:$0xff] }
   0x2   :  { %v133_v1 = vld [vmem:[%s273_s2] ss:$0 sm:$0xff]  ;;  %v63_v9 = vld [vmem:[%s272_s1 + $0x8] sm:$0xff]  ;;  %v64_v15 = vld [vmem:[%s272_s1 + $0x10] sm:$0xff] }
   0x3   :  { %v134_v2 = vld [vmem:[%s274_s3] ss:$0 sm:$0xff]  ;;  %v39_v3 = vmul.f32 %v133_v1, %v24_v0  ;;  %v40_v12 = vmul.f32 %v133_v1, %v25_v8  ;;  %v41_v14 = vmul.f32 %v133_v1, %v26_v10  ;;  %v27_v16 = vld [vmem:[%s271_s0 + $0x18] sm:$0xff]  ;;  %v29_v24 = vld [vmem:[%s271_s0 + $0x28] sm:$0xff] }
   0x4   :  { %v62_v4 = vld [vmem:[%s272_s1] sm:$0xff]  ;;  %v65_v17 = vld [vmem:[%s272_s1 + $0x18] sm:$0xff]  ;;  %v42_v20 = vmul.f32 %v133_v1, %v27_v16  ;;  %v67_v29 = vld [vmem:[%s272_s1 + $0x28] sm:$0xff] }
   0x5   :  { %v135_v5 = vld [vmem:[%s275_s4] ss:$0 sm:$0xff]  ;;  %v54_v11 = vadd.f32 %v134_v2, %v39_v3  ;;  %v55_v25 = vadd.f32 %v134_v2, %v40_v12  ;;  %v56_v27 = vadd.f32 %v134_v2, %v41_v14  ;;  %v30_v30 = vld [vmem:[%s271_s0 + $0x30] sm:$0xff]  ;;  %v31_v36 = vld [vmem:[%s271_s0 + $0x38] sm:$0xff] }
   0x6   :  { %v136_v6 = vld [vmem:[%s276_s5] ss:$0 sm:$0xff]  ;;  %v77_v7 = vmul.f32 %v135_v5, %v62_v4  ;;  %v78_v13 = vmul.f32 %v135_v5, %v63_v9  ;;  %v79_v19 = vmul.f32 %v135_v5, %v64_v15  ;;  %v80_v21 = vmul.f32 %v135_v5, %v65_v17  ;;  %v68_v35 = vld [vmem:[%s272_s1 + $0x30] sm:$0xff] }
   0x7   :  { %v28_v22 = vld [vmem:[%s271_s0 + $0x20] sm:$0xff]  ;;  %v57_v33 = vadd.f32 %v134_v2, %v42_v20 }
   0x8   :  { %v92_v18 = vadd.f32 %v136_v6, %v77_v7  ;;  %v66_v23 = vld [vmem:[%s272_s1 + $0x20] sm:$0xff]  ;;  %v93_v26 = vadd.f32 %v136_v6, %v78_v13  ;;  %v43_v28 = vmul.f32 %v133_v1, %v28_v22  ;;  %v94_v32 = vadd.f32 %v136_v6, %v79_v19 }
   0x9   :  { %v95_v34 = vadd.f32 %v136_v6, %v80_v21 }
   0xa   :  { %v100_v31 = vadd.f32 %v92_v18, %v54_v11 }
   0xb   :  { %11 = vsyncpa [#allocation3], 0  ;;  %v101_v37 = vadd.f32 %v93_v26, %v55_v25  ;;  %v58_v38 = vadd.f32 %v134_v2, %v43_v28  ;;  %v81_v39 = vmul.f32 %v135_v5, %v66_v23  ;;  %v44_v40 = vmul.f32 %v133_v1, %v29_v24  ;;  %v69_v41 = vld [vmem:[%s272_s1 + $0x38] sm:$0xff]  ;;  %s162_s0 = smov [#allocation2]  }
   0xc   :  { %109 = vst.msk [vmem:[#allocation2] sm:$0xff] %vm108_vm0, %v100_v31  ;;  %v102_v42 = vadd.f32 %v94_v32, %v56_v27  ;;  %v103_v43 = vadd.f32 %v95_v34, %v57_v33  ;;  %v82_v44 = vmul.f32 %v135_v5, %v67_v29  ;;  %v45_v45 = vmul.f32 %v133_v1, %v30_v30  ;;  %s122_s1 = sshll.u32 %s162_s0, 4  ;;  %s123_s1 = int_to_ptr.vmem [resolvable:$true] %s122_s1 }
   0xd   :  { %110 = vst.msk [vmem:[#allocation2 + $0x8] sm:$0xff] %vm108_vm0, %v101_v37  ;;  %v96_v46 = vadd.f32 %v136_v6, %v81_v39  ;;  %v59_v47 = vadd.f32 %v134_v2, %v44_v40  ;;  %v83_v48 = vmul.f32 %v135_v5, %v68_v35  ;;  %v46_v49 = vmul.f32 %v133_v1, %v31_v36  ;;  %s140_s2 = scalar_lea.vmem %s123_s1, 1024  ;;  %p145_p1 = scmp.lt.s32.totalorder %s123_s1, %s123_s1 }
   0xe   :  { %111 = vst.msk [vmem:[#allocation2 + $0x10] sm:$0xff] %vm108_vm0, %v102_v42  ;;  %112 = vst.msk [vmem:[#allocation2 + $0x18] sm:$0xff] %vm108_vm0, %v103_v43  ;;  %v97_v50 = vadd.f32 %v136_v6, %v82_v44  ;;  %v60_v51 = vadd.f32 %v134_v2, %v45_v45  ;;  %v84_v52 = vmul.f32 %v135_v5, %v69_v41  ;;  %p141_p0 = scmp.ne.s32.totalorder %s123_s1, %s140_s2  ;;  %p146_p2 = scmp.lt.s32.totalorder %s140_s2, %s140_s2 }
   0xf   :  { %v104_v53 = vadd.f32 %v96_v46, %v58_v38  ;;  %v98_v54 = vadd.f32 %v136_v6, %v83_v48  ;;  %v61_v55 = vadd.f32 %v134_v2, %v46_v49 }
  0x10   :  { %v105_v56 = vadd.f32 %v97_v50, %v59_v47  ;;  %v99_v57 = vadd.f32 %v136_v6, %v84_v52  ;;  %p147_p3 = por %p146_p2, %p145_p1 }
  0x11   :  { %113 = vst.msk [vmem:[#allocation2 + $0x20] sm:$0xff] %vm108_vm0, %v104_v53  ;;  %v106_v58 = vadd.f32 %v98_v54, %v60_v51 }
  0x12   :  { %114 = vst.msk [vmem:[#allocation2 + $0x28] sm:$0xff] %vm108_vm0, %v105_v56  ;;  %v107_v59 = vadd.f32 %v99_v57, %v61_v55  ;;  %p148_p4 = pnand %p147_p3, %p141_p0 }
  0x13   :  { %115 = vst.msk [vmem:[#allocation2 + $0x30] sm:$0xff] %vm108_vm0, %v106_v58 }
  0x14   :  { %116 = vst.msk [vmem:[#allocation2 + $0x38] sm:$0xff] %vm108_vm0, %v107_v59 }
  0x15   :  { %151 = shalt.err (!%p148_p4)
}
  0x16   :  { %s163_s9 = smov 128   ;;  %s164_s3 = smov 8  }
  0x17   :  { %128 = dma.vmem_to_hbm [thread:$0]  %s123_s1, 1024, %s277_s6, [#allocation3], %s163_s9, %s163_s9, %s164_s3  }
  0x18   :  { %160 = dma.done.wait [#allocation3], 1024  }
  0x19   :  { %161 = vsyncadd [#allocation3], 4294966272 }
  0x1a   :  { %132 = vsyncpa [#allocation3], 1 }

// kernel: tsti_encoder_forward.21
= control target key start
LH: loop header
LB: loop body
LE: loop exit
PB: predicated region body
PF: predicated region fallthrough
CT: control target
= control target key end

     0   :  { %vm114_vm0 = vcmask 64512   ;;  %v4251_v0 = vmov 0.0   ;;  %vm4252_vm1 = vmmov 0   ;;  %vm2006_vm2 = vcmask 1043456   ;;  %s5448_s1 = inlined_call_operand.vmem [shape: bf16[32,8,8], index: 1, kind: input, shape index: {}]   ;;  %s5449_s0 = inlined_call_operand.vmem [shape: bf16[32,8,8], index: 0, kind: input, shape index: {}]   ;;  %s5450_s3 = inlined_call_operand.vmem [shape: f32[32,8,8], index: 3, kind: input, shape index: {}]   ;;  %s5451_s2 = inlined_call_operand.vmem [shape: bf16[32,8,8], index: 2, kind: input, shape index: {}]   ;;  %s5452_s4 = inlined_call_operand.vmem [shape: bf16[32,8,8], index: 4, kind: output, shape index: {}]  }
   0x1   :  { %3737 = vmatprep.subr.bf16.mxu0 %v4251_v0  ;;  %3743 = vmatprep.subr.bf16.mxu1 %v4251_v0  ;;  %v50_v1 = vld [vmem:[%s5448_s1] sm:$0xf]  ;;  %v51_v2 = vld [vmem:[%s5448_s1 + $0x4] sm:$0xf]  ;;  %v52_v5 = vld [vmem:[%s5448_s1 + $0x8] sm:$0xf] }
   0x2   :  { %v119_v3 = vsel %vm114_vm0, %v50_v1, 0  ;;  %v165_v4 = vsel %vm114_vm0, %v51_v2, 0  ;;  %3739 = vmatprep.mubr.msk.bf16.mxu0 %vm4252_vm1, %v4251_v0  ;;  %3745 = vmatprep.mubr.msk.bf16.mxu1 %vm4252_vm1, %v4251_v0  ;;  %v53_v6 = vld [vmem:[%s5448_s1 + $0xc] sm:$0xf]  ;;  %v18_v7 = vld [vmem:[%s5449_s0] sm:$0xf] }
   0x3   :  { %3738 = vmatpush3.bf16.xpose.msra.mxu0 %v119_v3  ;;  %3744 = vmatpush3.bf16.xpose.msra.mxu1 %v165_v4  ;;  %v19_v8 = vld [vmem:[%s5449_s0 + $0x4] sm:$0xf]  ;;  %v211_v9 = vsel %vm114_vm0, %v52_v5, 0  ;;  %v257_v10 = vsel %vm114_vm0, %v53_v6, 0  ;;  %v54_v11 = vld [vmem:[%s5448_s1 + $0x10] sm:$0xf] }
   0x4   :  { %3749 = vmatprep.subr.bf16.mxu0 %v4251_v0  ;;  %3755 = vmatprep.subr.bf16.mxu1 %v4251_v0  ;;  %v55_v12 = vld [vmem:[%s5448_s1 + $0x14] sm:$0xf]  ;;  %v20_v13 = vld [vmem:[%s5449_s0 + $0x8] sm:$0xf]  ;;  %v21_v14 = vld [vmem:[%s5449_s0 + $0xc] sm:$0xf] }
   0x5   :  { %v303_v15 = vsel %vm114_vm0, %v54_v11, 0  ;;  %v349_v16 = vsel %vm114_vm0, %v55_v12, 0  ;;  %v56_v17 = vld [vmem:[%s5448_s1 + $0x18] sm:$0xf]  ;;  %v57_v18 = vld [vmem:[%s5448_s1 + $0x1c] sm:$0xf] }
   0x6   :  { %v22_v19 = vld [vmem:[%s5449_s0 + $0x10] sm:$0xf]  ;;  %v23_v20 = vld [vmem:[%s5449_s0 + $0x14] sm:$0xf]  ;;  %v395_v21 = vsel %vm114_vm0, %v56_v17, 0  ;;  %v441_v22 = vsel %vm114_vm0, %v57_v18, 0 }
   0x7   :  { %v58_v23 = vld [vmem:[%s5448_s1 + $0x20] sm:$0xf]  ;;  %v59_v24 = vld [vmem:[%s5448_s1 + $0x24] sm:$0xf]  ;;  %v24_v25 = vld [vmem:[%s5449_s0 + $0x18] sm:$0xf] }
   0x8   :  { %v25_v26 = vld [vmem:[%s5449_s0 + $0x1c] sm:$0xf]  ;;  %v487_v27 = vsel %vm114_vm0, %v58_v23, 0  ;;  %v533_v28 = vsel %vm114_vm0, %v59_v24, 0  ;;  %v60_v29 = vld [vmem:[%s5448_s1 + $0x28] sm:$0xf] }
   0x9   :  { %v61_v30 = vld [vmem:[%s5448_s1 + $0x2c] sm:$0xf]  ;;  %v26_v31 = vld [vmem:[%s5449_s0 + $0x20] sm:$0xf]  ;;  %v27_v32 = vld [vmem:[%s5449_s0 + $0x24] sm:$0xf] }
   0xa   :  { %3740 = vmatmul.mubr.msk.bf16.vlgmr.msra.gmra.mxu0 %vm114_vm0, %v18_v7  ;;  %3746 = vmatmul.mubr.msk.bf16.vlgmr.msra.gmra.mxu1 %vm114_vm0, %v19_v8  ;;  %v579_v33 = vsel %vm114_vm0, %v60_v29, 0  ;;  %v625_v34 = vsel %vm114_vm0, %v61_v30, 0  ;;  %v62_v35 = vld [vmem:[%s5448_s1 + $0x30] sm:$0xf]  ;;  %v63_v36 = vld [vmem:[%s5448_s1 + $0x34] sm:$0xf] }
   0xb   :  { %3750 = vmatpush3.bf16.xpose.msra.mxu0 %v211_v9  ;;  %3756 = vmatpush3.bf16.xpose.msra.mxu1 %v257_v10  ;;  %v28_v37 = vld [vmem:[%s5449_s0 + $0x28] sm:$0xf]  ;;  %v29_v38 = vld [vmem:[%s5449_s0 + $0x2c] sm:$0xf]  ;;  %v671_v39 = vsel %vm114_vm0, %v62_v35, 0  ;;  %v717_v40 = vsel %vm114_vm0, %v63_v36, 0 }
   0xc   :  { %3751 = vmatprep.mubr.msk.bf16.mxu0 %vm4252_vm1, %v4251_v0  ;;  %3757 = vmatprep.mubr.msk.bf16.mxu1 %vm4252_vm1, %v4251_v0  ;;  %v64_v41 = vld [vmem:[%s5448_s1 + $0x38] sm:$0xf]  ;;  %v65_v42 = vld [vmem:[%s5448_s1 + $0x3c] sm:$0xf]  ;;  %v30_v43 = vld [vmem:[%s5449_s0 + $0x30] sm:$0xf] }
   0xd   :  { %3761 = vmatprep.subr.bf16.mxu0 %v4251_v0  ;;  %3767 = vmatprep.subr.bf16.mxu1 %v4251_v0  ;;  %v31_v44 = vld [vmem:[%s5449_s0 + $0x34] sm:$0xf]  ;;  %v763_v45 = vsel %vm114_vm0, %v64_v41, 0  ;;  %v809_v46 = vsel %vm114_vm0, %v65_v42, 0  ;;  %v66_v47 = vld [vmem:[%s5448_s1 + $0x40] sm:$0xf] }
   0xe   :  { %v67_v48 = vld [vmem:[%s5448_s1 + $0x44] sm:$0xf]  ;;  %v32_v49 = vld [vmem:[%s5449_s0 + $0x38] sm:$0xf]  ;;  %v33_v50 = vld [vmem:[%s5449_s0 + $0x3c] sm:$0xf] }
   0xf   :  { %v855_v51 = vsel %vm114_vm0, %v66_v47, 0  ;;  %v901_v52 = vsel %vm114_vm0, %v67_v48, 0  ;;  %v68_v53 = vld [vmem:[%s5448_s1 + $0x48] sm:$0xf]  ;;  %v69_v54 = vld [vmem:[%s5448_s1 + $0x4c] sm:$0xf] }
  0x10   :  { %v34_v55 = vld [vmem:[%s5449_s0 + $0x40] sm:$0xf]  ;;  %v35_v56 = vld [vmem:[%s5449_s0 + $0x44] sm:$0xf]  ;;  %v947_v57 = vsel %vm114_vm0, %v68_v53, 0  ;;  %v993_v58 = vsel %vm114_vm0, %v69_v54, 0 }
  0x11   :  { %v70_v59 = vld [vmem:[%s5448_s1 + $0x50] sm:$0xf]  ;;  %v71_v60 = vld [vmem:[%s5448_s1 + $0x54] sm:$0xf]  ;;  %v36_v61 = vld [vmem:[%s5449_s0 + $0x48] sm:$0xf] }
  0x12   :  { %3752 = vmatmul.mubr.msk.bf16.vlgmr.msra.gmra.mxu0 %vm114_vm0, %v20_v13  ;;  %3758 = vmatmul.mubr.msk.bf16.vlgmr.msra.gmra.mxu1 %vm114_vm0, %v21_v14  ;;  %v37_v62 = vld [vmem:[%s5449_s0 + $0x4c] sm:$0xf]  ;;  %v1039_v63 = vsel %vm114_vm0, %v70_v59, 0  ;;  %v1085_v1 = vsel %vm114_vm0, %v71_v60, 0  ;;  %v72_v2 = vld [vmem:[%s5448_s1 + $0x58] sm:$0xf] }
  0x13   :  { %3762 = vmatpush3.bf16.xpose.msra.mxu0 %v303_v15  ;;  %3768 = vmatpush3.bf16.xpose.msra.mxu1 %v349_v16  ;;  %v73_v3 = vld [vmem:[%s5448_s1 + $0x5c] sm:$0xf]  ;;  %v38_v4 = vld [vmem:[%s5449_s0 + $0x50] sm:$0xf]  ;;  %v39_v5 = vld [vmem:[%s5449_s0 + $0x54] sm:$0xf] }
  0x14   :  { %3763 = vmatprep.mubr.msk.bf16.mxu0 %vm4252_vm1, %v4251_v0  ;;  %3769 = vmatprep.mubr.msk.bf16.mxu1 %vm4252_vm1, %v4251_v0  ;;  %v1131_v6 = vsel %vm114_vm0, %v72_v2, 0  ;;  %v1177_v7 = vsel %vm114_vm0, %v73_v3, 0  ;;  %v74_v8 = vld [vmem:[%s5448_s1 + $0x60] sm:$0xf]  ;;  %v75_v9 = vld [vmem:[%s5448_s1 + $0x64] sm:$0xf] }
  0x15   :  { %3773 = vmatprep.subr.bf16.mxu0 %v4251_v0  ;;  %3779 = vmatprep.subr.bf16.mxu1 %v4251_v0  ;;  %v40_v10 = vld [vmem:[%s5449_s0 + $0x58] sm:$0xf]  ;;  %v41_v11 = vld [vmem:[%s5449_s0 + $0x5c] sm:$0xf]  ;;  %v1223_v12 = vsel %vm114_vm0, %v74_v8, 0  ;;  %v1269_v13 = vsel %vm114_vm0, %v75_v9, 0 }
  0x16   :  { %v76_v14 = vld [vmem:[%s5448_s1 + $0x68] sm:$0xf]  ;;  %v77_v15 = vld [vmem:[%s5448_s1 + $0x6c] sm:$0xf]  ;;  %v42_v16 = vld [vmem:[%s5449_s0 + $0x60] sm:$0xf] }
  0x17   :  { %v43_v17 = vld [vmem:[%s5449_s0 + $0x64] sm:$0xf]  ;;  %v1315_v18 = vsel %vm114_vm0, %v76_v14, 0  ;;  %v45_v23 = vld [vmem:[%s5449_s0 + $0x6c] sm:$0xf]  ;;  %v85_v48 = vld [vmem:[%s5450_s3 + $0x18] sm:$0xff] }
  0x18   :  { %v47_v29 = vld [vmem:[%s5449_s0 + $0x74] sm:$0xf]  ;;  %v83_v35 = vld [vmem:[%s5450_s3 + $0x8] sm:$0xff]  ;;  %v89_v14 = vld [vmem:[%s5450_s3 + $0x38] sm:$0xff]  ;;  %vm3508_vm3 = vcmask 60416  }
  0x1a   :  { %3764 = vmatmul.mubr.msk.bf16.vlgmr.msra.gmra.mxu0 %vm114_vm0, %v22_v19  ;;  %3770 = vmatmul.mubr.msk.bf16.vlgmr.msra.gmra.mxu1 %vm114_vm0, %v23_v20  ;;  %v1361_v19 = vsel %vm114_vm0, %v77_v15, 0  ;;  %v78_v20 = vld [vmem:[%s5448_s1 + $0x70] sm:$0xf] }
  0x1b   :  { %3774 = vmatpush3.bf16.xpose.msra.mxu0 %v395_v21  ;;  %3780 = vmatpush3.bf16.xpose.msra.mxu1 %v441_v22  ;;  %v79_v21 = vld [vmem:[%s5448_s1 + $0x74] sm:$0xf]  ;;  %v44_v22 = vld [vmem:[%s5449_s0 + $0x68] sm:$0xf]  ;;  %v1407_v24 = vsel %vm114_vm0, %v78_v20, 0 }
  0x1c   :  { %3775 = vmatprep.mubr.msk.bf16.mxu0 %vm4252_vm1, %v4251_v0  ;;  %3781 = vmatprep.mubr.msk.bf16.mxu1 %vm4252_vm1, %v4251_v0 }
  0x1d   :  { %3785 = vmatprep.subr.bf16.mxu0 %v4251_v0  ;;  %3791 = vmatprep.subr.bf16.mxu1 %v4251_v0 }
  0x22   :  { %3776 = vmatmul.mubr.msk.bf16.vlgmr.msra.gmra.mxu0 %vm114_vm0, %v24_v25  ;;  %3782 = vmatmul.mubr.msk.bf16.vlgmr.msra.gmra.mxu1 %vm114_vm0, %v25_v26  ;;  %v1453_v25 = vsel %vm114_vm0, %v79_v21, 0  ;;  %v80_v26 = vld [vmem:[%s5448_s1 + $0x78] sm:$0xf] }
  0x23   :  { %3786 = vmatpush3.bf16.xpose.msra.mxu0 %v487_v27  ;;  %3792 = vmatpush3.bf16.xpose.msra.mxu1 %v533_v28  ;;  %v81_v27 = vld [vmem:[%s5448_s1 + $0x7c] sm:$0xf]  ;;  %v46_v28 = vld [vmem:[%s5449_s0 + $0x70] sm:$0xf]  ;;  %v1499_v30 = vsel %vm114_vm0, %v80_v26, 0 }
  0x24   :  { %3787 = vmatprep.mubr.msk.bf16.mxu0 %vm4252_vm1, %v4251_v0  ;;  %3793 = vmatprep.mubr.msk.bf16.mxu1 %vm4252_vm1, %v4251_v0 }
  0x25   :  { %3797 = vmatprep.subr.bf16.mxu0 %v4251_v0  ;;  %3803 = vmatprep.subr.bf16.mxu1 %v4251_v0 }
  0x2a   :  { %3788 = vmatmul.mubr.msk.bf16.vlgmr.msra.gmra.mxu0 %vm114_vm0, %v26_v31  ;;  %3794 = vmatmul.mubr.msk.bf16.vlgmr.msra.gmra.mxu1 %vm114_vm0, %v27_v32  ;;  %v1545_v31 = vsel %vm114_vm0, %v81_v27, 0  ;;  %v48_v32 = vld [vmem:[%s5449_s0 + $0x78] sm:$0xf]  ;;  %v90_v27 = vld [vmem:[%s5450_s3 + $0x40] sm:$0xff] }
  0x2b   :  { %3798 = vmatpush3.bf16.xpose.msra.mxu0 %v579_v33  ;;  %3804 = vmatpush3.bf16.xpose.msra.mxu1 %v625_v34  ;;  %v49_v33 = vld [vmem:[%s5449_s0 + $0x7c] sm:$0xf]  ;;  %v82_v34 = vld [vmem:[%s5450_s3] sm:$0xff] }
  0x2c   :  { %3799 = vmatprep.mubr.msk.bf16.mxu0 %vm4252_vm1, %v4251_v0  ;;  %3805 = vmatprep.mubr.msk.bf16.mxu1 %vm4252_vm1, %v4251_v0 }
  0x2d   :  { %3809 = vmatprep.subr.bf16.mxu0 %v4251_v0  ;;  %3815 = vmatprep.subr.bf16.mxu1 %v4251_v0 }
  0x32   :  { %3800 = vmatmul.mubr.msk.bf16.vlgmr.msra.gmra.mxu0 %vm114_vm0, %v28_v37  ;;  %3806 = vmatmul.mubr.msk.bf16.vlgmr.msra.gmra.mxu1 %vm114_vm0, %v29_v38 }
  0x33   :  { %3810 = vmatpush3.bf16.xpose.msra.mxu0 %v671_v39  ;;  %3816 = vmatpush3.bf16.xpose.msra.mxu1 %v717_v40 }
  0x34   :  { %3811 = vmatprep.mubr.msk.bf16.mxu0 %vm4252_vm1, %v4251_v0  ;;  %3817 = vmatprep.mubr.msk.bf16.mxu1 %vm4252_vm1, %v4251_v0 }
  0x35   :  { %3821 = vmatprep.subr.bf16.mxu0 %v4251_v0  ;;  %3827 = vmatprep.subr.bf16.mxu1 %v4251_v0 }
  0x3a   :  { %3812 = vmatmul.mubr.msk.bf16.vlgmr.msra.gmra.mxu0 %vm114_vm0, %v30_v43  ;;  %3818 = vmatmul.mubr.msk.bf16.vlgmr.msra.gmra.mxu1 %vm114_vm0, %v31_v44 }
  0x3b   :  { %3822 = vmatpush3.bf16.xpose.msra.mxu0 %v763_v45  ;;  %3828 = vmatpush3.bf16.xpose.msra.mxu1 %v809_v46 }
  0x3c   :  { %3823 = vmatprep.mubr.msk.bf16.mxu0 %vm4252_vm1, %v4251_v0  ;;  %3829 = vmatprep.mubr.msk.bf16.mxu1 %vm4252_vm1, %v4251_v0 }
  0x3d   :  { %3833 = vmatprep.subr.bf16.mxu0 %v4251_v0  ;;  %3839 = vmatprep.subr.bf16.mxu1 %v4251_v0 }
  0x42   :  { %3824 = vmatmul.mubr.msk.bf16.vlgmr.msra.gmra.mxu0 %vm114_vm0, %v32_v49  ;;  %3830 = vmatmul.mubr.msk.bf16.vlgmr.msra.gmra.mxu1 %vm114_vm0, %v33_v50  ;;  %v84_v49 = vld [vmem:[%s5450_s3 + $0x10] sm:$0xff] }
  0x43   :  { %3834 = vmatpush3.bf16.xpose.msra.mxu0 %v855_v51  ;;  %3840 = vmatpush3.bf16.xpose.msra.mxu1 %v901_v52 }
  0x44   :  { %3835 = vmatprep.mubr.msk.bf16.mxu0 %vm4252_vm1, %v4251_v0  ;;  %3841 = vmatprep.mubr.msk.bf16.mxu1 %vm4252_vm1, %v4251_v0 }
  0x45   :  { %3845 = vmatprep.subr.bf16.mxu0 %v4251_v0  ;;  %3851 = vmatprep.subr.bf16.mxu1 %v4251_v0 }
  0x4a   :  { %3836 = vmatmul.mubr.msk.bf16.vlgmr.msra.gmra.mxu0 %vm114_vm0, %v34_v55  ;;  %3842 = vmatmul.mubr.msk.bf16.vlgmr.msra.gmra.mxu1 %vm114_vm0, %v35_v56 }
  0x4b   :  { %3846 = vmatpush3.bf16.xpose.msra.mxu0 %v947_v57  ;;  %3852 = vmatpush3.bf16.xpose.msra.mxu1 %v993_v58 }
  0x4c   :  { %3847 = vmatprep.mubr.msk.bf16.mxu0 %vm4252_vm1, %v4251_v0  ;;  %3853 = vmatprep.mubr.msk.bf16.mxu1 %vm4252_vm1, %v4251_v0 }
  0x4d   :  { %3857 = vmatprep.subr.bf16.mxu0 %v4251_v0  ;;  %3863 = vmatprep.subr.bf16.mxu1 %v4251_v0 }
  0x52   :  { %3848 = vmatmul.mubr.msk.bf16.vlgmr.msra.gmra.mxu0 %vm114_vm0, %v36_v61  ;;  %3854 = vmatmul.mubr.msk.bf16.vlgmr.msra.gmra.mxu1 %vm114_vm0, %v37_v62  ;;  %v87_v62 = vld [vmem:[%s5450_s3 + $0x28] sm:$0xff] }
  0x53   :  { %3858 = vmatpush3.bf16.xpose.msra.mxu0 %v1039_v63  ;;  %3864 = vmatpush3.bf16.xpose.msra.mxu1 %v1085_v1  ;;  %v86_v63 = vld [vmem:[%s5450_s3 + $0x20] sm:$0xff] }
  0x54   :  { %3859 = vmatprep.mubr.msk.bf16.mxu0 %vm4252_vm1, %v4251_v0  ;;  %3865 = vmatprep.mubr.msk.bf16.mxu1 %vm4252_vm1, %v4251_v0 }
  0x55   :  { %3869 = vmatprep.subr.bf16.mxu0 %v4251_v0  ;;  %3875 = vmatprep.subr.bf16.mxu1 %v4251_v0 }
  0x5a   :  { %3860 = vmatmul.mubr.msk.bf16.vlgmr.msra.gmra.mxu0 %vm114_vm0, %v38_v4  ;;  %3866 = vmatmul.mubr.msk.bf16.vlgmr.msra.gmra.mxu1 %vm114_vm0, %v39_v5 }
  0x5b   :  { %3870 = vmatpush3.bf16.xpose.msra.mxu0 %v1131_v6  ;;  %3876 = vmatpush3.bf16.xpose.msra.mxu1 %v1177_v7 }
  0x5c   :  { %3871 = vmatprep.mubr.msk.bf16.mxu0 %vm4252_vm1, %v4251_v0  ;;  %3877 = vmatprep.mubr.msk.bf16.mxu1 %vm4252_vm1, %v4251_v0 }
  0x5d   :  { %3881 = vmatprep.subr.bf16.mxu0 %v4251_v0  ;;  %3887 = vmatprep.subr.bf16.mxu1 %v4251_v0 }
  0x62   :  { %3872 = vmatmul.mubr.msk.bf16.vlgmr.msra.gmra.mxu0 %vm114_vm0, %v40_v10  ;;  %3878 = vmatmul.mubr.msk.bf16.vlgmr.msra.gmra.mxu1 %vm114_vm0, %v41_v11 }
  0x63   :  { %3882 = vmatpush3.bf16.xpose.msra.mxu0 %v1223_v12  ;;  %3888 = vmatpush3.bf16.xpose.msra.mxu1 %v1269_v13  ;;  %v88_v13 = vld [vmem:[%s5450_s3 + $0x30] sm:$0xff] }
  0x64   :  { %3883 = vmatprep.mubr.msk.bf16.mxu0 %vm4252_vm1, %v4251_v0  ;;  %3889 = vmatprep.mubr.msk.bf16.mxu1 %vm4252_vm1, %v4251_v0 }
  0x65   :  { %3893 = vmatprep.subr.bf16.mxu0 %v4251_v0  ;;  %3899 = vmatprep.subr.bf16.mxu1 %v4251_v0 }
  0x6a   :  { %3884 = vmatmul.mubr.msk.bf16.vlgmr.msra.gmra.mxu0 %vm114_vm0, %v42_v16  ;;  %3890 = vmatmul.mubr.msk.bf16.vlgmr.msra.gmra.mxu1 %vm114_vm0, %v43_v17 }
  0x6b   :  { %3894 = vmatpush3.bf16.xpose.msra.mxu0 %v1315_v18  ;;  %3900 = vmatpush3.bf16.xpose.msra.mxu1 %v1361_v19 }
  0x6c   :  { %3895 = vmatprep.mubr.msk.bf16.mxu0 %vm4252_vm1, %v4251_v0  ;;  %3901 = vmatprep.mubr.msk.bf16.mxu1 %vm4252_vm1, %v4251_v0 }
  0x6d   :  { %3905 = vmatprep.subr.bf16.mxu0 %v4251_v0  ;;  %3911 = vmatprep.subr.bf16.mxu1 %v4251_v0 }
  0x72   :  { %3896 = vmatmul.mubr.msk.bf16.vlgmr.msra.gmra.mxu0 %vm114_vm0, %v44_v22  ;;  %3902 = vmatmul.mubr.msk.bf16.vlgmr.msra.gmra.mxu1 %vm114_vm0, %v45_v23 }
  0x73   :  { %3906 = vmatpush3.bf16.xpose.msra.mxu0 %v1407_v24  ;;  %3912 = vmatpush3.bf16.xpose.msra.mxu1 %v1453_v25 }
  0x74   :  { %3907 = vmatprep.mubr.msk.bf16.mxu0 %vm4252_vm1, %v4251_v0  ;;  %3913 = vmatprep.mubr.msk.bf16.mxu1 %vm4252_vm1, %v4251_v0 }
  0x75   :  { %3917 = vmatprep.subr.bf16.mxu0 %v4251_v0  ;;  %3923 = vmatprep.subr.bf16.mxu1 %v4251_v0 }
  0x7a   :  { %3908 = vmatmul.mubr.msk.bf16.vlgmr.msra.gmra.mxu0 %vm114_vm0, %v46_v28  ;;  %3914 = vmatmul.mubr.msk.bf16.vlgmr.msra.gmra.mxu1 %vm114_vm0, %v47_v29  ;;  %v91_v28 = vld [vmem:[%s5450_s3 + $0x48] sm:$0xff] }
  0x7b   :  { %3918 = vmatpush3.bf16.xpose.msra.mxu0 %v1499_v30  ;;  %3924 = vmatpush3.bf16.xpose.msra.mxu1 %v1545_v31 }
  0x7c   :  { %3919 = vmatprep.mubr.msk.bf16.mxu0 %vm4252_vm1, %v4251_v0  ;;  %3925 = vmatprep.mubr.msk.bf16.mxu1 %vm4252_vm1, %v4251_v0 }
  0x7d   :  { %3929 = vmatprep.subr.bf16.mxu0 %v4251_v0  ;;  %3935 = vmatprep.subr.bf16.mxu1 %v4251_v0 }
  0x82   :  { %3920 = vmatmul.mubr.msk.bf16.vlgmr.msra.gmra.mxu0 %vm114_vm0, %v48_v32  ;;  %3926 = vmatmul.mubr.msk.bf16.vlgmr.msra.gmra.mxu1 %vm114_vm0, %v49_v33 }
  0x83   :  { %3931 = vmatprep.mubr.msk.bf16.mxu0 %vm4252_vm1, %v4251_v0  ;;  %3937 = vmatprep.mubr.msk.bf16.mxu1 %vm4252_vm1, %v4251_v0 }
  0xca   :  { %v155_v36 = vpop.f32.mrf.mxu0  ;;  %v201_v37 = vpop.f32.mrf.mxu1 }
  0xcb   :  { %v4642_v38 = vadd.f32 %v155_v36, %v82_v34  ;;  %v4644_v39 = vadd.f32 %v201_v37, %v83_v35 }
  0xcc   :  { %v3741_v40 = vpop.f32.mrf.mxu0  ;;  %v3747_v41 = vpop.f32.mrf.mxu1 }
  0xcd   :  { %v1587_v42 = vsel %vm114_vm0, %v4642_v38, -inf  ;;  %v1590_v45 = vsel %vm114_vm0, %v4644_v39, -inf }
  0xce   :  { %v204_v43 = vpop.f32.mrf.mxu1  ;;  %1588 = vmax.xlane.f32.xlu0 %v1587_v42  ;;  %v158_v44 = vpop.f32.mrf.mxu0 }
  0xcf   :  { %v92_v43 = vld [vmem:[%s5450_s3 + $0x50] sm:$0xff]  ;;  %v93_v44 = vld [vmem:[%s5450_s3 + $0x58] sm:$0xff] }
  0xd0   :  { %v3742_v46 = vpop.f32.mrf.mxu0  ;;  %v3748_v47 = vpop.f32.mrf.mxu1 }
  0xd2   :  { %v293_v50 = vpop.f32.mrf.mxu1  ;;  %1591 = vmax.xlane.f32.xlu0 %v1590_v45  ;;  %v247_v51 = vpop.f32.mrf.mxu0 }
  0xd3   :  { %v4656_v52 = vadd.f32 %v293_v50, %v85_v48  ;;  %v4658_v53 = vadd.f32 %v247_v51, %v84_v49 }
  0xd4   :  { %v3753_v54 = vpop.f32.mrf.mxu0  ;;  %v3759_v55 = vpop.f32.mrf.mxu1 }
  0xd5   :  { %v1593_v56 = vsel %vm114_vm0, %v4658_v53, -inf  ;;  %v1596_v59 = vsel %vm114_vm0, %v4656_v52, -inf }
  0xd6   :  { %v296_v57 = vpop.f32.mrf.mxu1  ;;  %1594 = vmax.xlane.f32.xlu1 %v1593_v56  ;;  %v250_v58 = vpop.f32.mrf.mxu0 }
  0xd8   :  { %v3754_v60 = vpop.f32.mrf.mxu0  ;;  %v3760_v61 = vpop.f32.mrf.mxu1 }
  0xd9   :  { %v95_v60 = vld [vmem:[%s5450_s3 + $0x68] sm:$0xff] }
  0xda   :  { %v385_v1 = vpop.f32.mrf.mxu1  ;;  %1597 = vmax.xlane.f32.xlu1 %v1596_v59  ;;  %v339_v2 = vpop.f32.mrf.mxu0  ;;  %v94_v59 = vld [vmem:[%s5450_s3 + $0x60] sm:$0xff] }
  0xdb   :  { %v4670_v3 = vadd.f32 %v385_v1, %v87_v62  ;;  %v4672_v4 = vadd.f32 %v339_v2, %v86_v63 }
  0xdc   :  { %v3765_v5 = vpop.f32.mrf.mxu0  ;;  %v3771_v6 = vpop.f32.mrf.mxu1 }
  0xdd   :  { %v1602_v7 = vsel %vm114_vm0, %v4670_v3, -inf  ;;  %v1599_v8 = vsel %vm114_vm0, %v4672_v4, -inf }
  0xde   :  { %v388_v9 = vpop.f32.mrf.mxu1  ;;  %1603 = vmax.xlane.f32.xlu1 %v1602_v7  ;;  %1600 = vmax.xlane.f32.xlu0 %v1599_v8  ;;  %v342_v10 = vpop.f32.mrf.mxu0 }
  0xe0   :  { %v3766_v11 = vpop.f32.mrf.mxu0  ;;  %v3772_v12 = vpop.f32.mrf.mxu1 }
  0xe1   :  { %v96_v12 = vld [vmem:[%s5450_s3 + $0x70] sm:$0xff] }
  0xe2   :  { %v431_v15 = vpop.f32.mrf.mxu0  ;;  %v477_v16 = vpop.f32.mrf.mxu1 }
  0xe3   :  { %v4684_v17 = vadd.f32 %v431_v15, %v88_v13  ;;  %v4686_v18 = vadd.f32 %v477_v16, %v89_v14  ;;  %v97_v13 = vld [vmem:[%s5450_s3 + $0x78] sm:$0xff] }
  0xe4   :  { %v3777_v19 = vpop.f32.mrf.mxu0  ;;  %v3783_v20 = vpop.f32.mrf.mxu1 }
  0xe5   :  { %v1608_v21 = vsel %vm114_vm0, %v4686_v18, -inf  ;;  %v1605_v22 = vsel %vm114_vm0, %v4684_v17, -inf }
  0xe6   :  { %v480_v23 = vpop.f32.mrf.mxu1  ;;  %1609 = vmax.xlane.f32.xlu1 %v1608_v21  ;;  %1606 = vmax.xlane.f32.xlu0 %v1605_v22  ;;  %v434_v24 = vpop.f32.mrf.mxu0 }
  0xe8   :  { %v3778_v25 = vpop.f32.mrf.mxu0  ;;  %v3784_v26 = vpop.f32.mrf.mxu1 }
  0xea   :  { %v523_v29 = vpop.f32.mrf.mxu0  ;;  %v569_v30 = vpop.f32.mrf.mxu1 }
  0xeb   :  { %v4698_v31 = vadd.f32 %v523_v29, %v90_v27  ;;  %v4700_v32 = vadd.f32 %v569_v30, %v91_v28  ;;  %v98_v28 = vld [vmem:[%s5450_s3 + $0x80] sm:$0xff]  ;;  %v99_v29 = vld [vmem:[%s5450_s3 + $0x88] sm:$0xff] }
  0xec   :  { %v3789_v33 = vpop.f32.mrf.mxu0  ;;  %v3795_v34 = vpop.f32.mrf.mxu1 }
  0xed   :  { %v1614_v35 = vsel %vm114_vm0, %v4700_v32, -inf  ;;  %v1611_v36 = vsel %vm114_vm0, %v4698_v31, -inf }
  0xee   :  { %v572_v37 = vpop.f32.mrf.mxu1  ;;  %1615 = vmax.xlane.f32.xlu1 %v1614_v35  ;;  %1612 = vmax.xlane.f32.xlu0 %v1611_v36  ;;  %v526_v40 = vpop.f32.mrf.mxu0 }
  0xf0   :  { %v3790_v41 = vpop.f32.mrf.mxu0  ;;  %v3796_v42 = vpop.f32.mrf.mxu1 }
  0xf2   :  { %v615_v45 = vpop.f32.mrf.mxu0  ;;  %v661_v46 = vpop.f32.mrf.mxu1 }
  0xf3   :  { %v4712_v47 = vadd.f32 %v615_v45, %v92_v43  ;;  %v4714_v48 = vadd.f32 %v661_v46, %v93_v44  ;;  %v100_v46 = vld [vmem:[%s5450_s3 + $0x90] sm:$0xff] }
  0xf4   :  { %v3801_v49 = vpop.f32.mrf.mxu0  ;;  %v3807_v50 = vpop.f32.mrf.mxu1 }
  0xf5   :  { %v1620_v51 = vsel %vm114_vm0, %v4714_v48, -inf  ;;  %v1617_v54 = vsel %vm114_vm0, %v4712_v47, -inf  ;;  %v101_v49 = vld [vmem:[%s5450_s3 + $0x98] sm:$0xff] }
  0xf6   :  { %v664_v55 = vpop.f32.mrf.mxu1  ;;  %1621 = vmax.xlane.f32.xlu1 %v1620_v51  ;;  %1618 = vmax.xlane.f32.xlu0 %v1617_v54  ;;  %v618_v56 = vpop.f32.mrf.mxu0 }
  0xf8   :  { %v3802_v57 = vpop.f32.mrf.mxu0  ;;  %v3808_v58 = vpop.f32.mrf.mxu1 }
  0xfa   :  { %v707_v61 = vpop.f32.mrf.mxu0  ;;  %v753_v62 = vpop.f32.mrf.mxu1 }
  0xfb   :  { %v4726_v63 = vadd.f32 %v707_v61, %v94_v59  ;;  %v4728_v1 = vadd.f32 %v753_v62, %v95_v60 }
  0xfc   :  { %v3813_v2 = vpop.f32.mrf.mxu0  ;;  %v3819_v5 = vpop.f32.mrf.mxu1 }
  0xfd   :  { %v1626_v6 = vsel %vm114_vm0, %v4728_v1, -inf  ;;  %v1623_v7 = vsel %vm114_vm0, %v4726_v63, -inf  ;;  %v102_v5 = vld [vmem:[%s5450_s3 + $0xa0] sm:$0xff] }
  0xfe   :  { %v756_v8 = vpop.f32.mrf.mxu1  ;;  %1627 = vmax.xlane.f32.xlu1 %v1626_v6  ;;  %1624 = vmax.xlane.f32.xlu0 %v1623_v7  ;;  %v710_v9 = vpop.f32.mrf.mxu0  ;;  %v103_v6 = vld [vmem:[%s5450_s3 + $0xa8] sm:$0xff] }
 0x100   :  { %v3814_v10 = vpop.f32.mrf.mxu0  ;;  %v3820_v11 = vpop.f32.mrf.mxu1 }
 0x102   :  { %v799_v14 = vpop.f32.mrf.mxu0  ;;  %v845_v15 = vpop.f32.mrf.mxu1 }
 0x103   :  { %v4740_v16 = vadd.f32 %v799_v14, %v96_v12  ;;  %v4742_v19 = vadd.f32 %v845_v15, %v97_v13 }
 0x104   :  { %v3825_v20 = vpop.f32.mrf.mxu0  ;;  %v3831_v21 = vpop.f32.mrf.mxu1 }
 0x105   :  { %v1632_v22 = vsel %vm114_vm0, %v4742_v19, -inf  ;;  %v1629_v23 = vsel %vm114_vm0, %v4740_v16, -inf }
 0x106   :  { %v848_v24 = vpop.f32.mrf.mxu1  ;;  %1633 = vmax.xlane.f32.xlu1 %v1632_v22  ;;  %1630 = vmax.xlane.f32.xlu0 %v1629_v23  ;;  %v802_v25 = vpop.f32.mrf.mxu0  ;;  %v104_v23 = vld [vmem:[%s5450_s3 + $0xb0] sm:$0xff] }
 0x107   :  { %v105_v24 = vld [vmem:[%s5450_s3 + $0xb8] sm:$0xff] }
 0x108   :  { %v3826_v26 = vpop.f32.mrf.mxu0  ;;  %v3832_v27 = vpop.f32.mrf.mxu1 }
 0x10a   :  { %v891_v30 = vpop.f32.mrf.mxu0  ;;  %v937_v33 = vpop.f32.mrf.mxu1 }
 0x10b   :  { %v4754_v34 = vadd.f32 %v891_v30, %v98_v28  ;;  %v4756_v35 = vadd.f32 %v937_v33, %v99_v29 }
 0x10c   :  { %v3837_v36 = vpop.f32.mrf.mxu0  ;;  %v3843_v37 = vpop.f32.mrf.mxu1 }
 0x10d   :  { %v1638_v40 = vsel %vm114_vm0, %v4756_v35, -inf  ;;  %v1635_v41 = vsel %vm114_vm0, %v4754_v34, -inf }
 0x10e   :  { %v940_v42 = vpop.f32.mrf.mxu1  ;;  %1639 = vmax.xlane.f32.xlu1 %v1638_v40  ;;  %1636 = vmax.xlane.f32.xlu0 %v1635_v41  ;;  %v894_v43 = vpop.f32.mrf.mxu0 }
 0x110   :  { %v3838_v44 = vpop.f32.mrf.mxu0  ;;  %v3844_v45 = vpop.f32.mrf.mxu1 }
 0x112   :  { %v983_v50 = vpop.f32.mrf.mxu0  ;;  %v1029_v51 = vpop.f32.mrf.mxu1 }
 0x113   :  { %v4768_v54 = vadd.f32 %v983_v50, %v100_v46  ;;  %v4770_v55 = vadd.f32 %v1029_v51, %v101_v49 }
 0x114   :  { %v3849_v56 = vpop.f32.mrf.mxu0  ;;  %v3855_v57 = vpop.f32.mrf.mxu1 }
 0x115   :  { %v1644_v58 = vsel %vm114_vm0, %v4770_v55, -inf  ;;  %v1641_v59 = vsel %vm114_vm0, %v4768_v54, -inf }
 0x116   :  { %v1032_v60 = vpop.f32.mrf.mxu1  ;;  %1645 = vmax.xlane.f32.xlu1 %v1644_v58  ;;  %1642 = vmax.xlane.f32.xlu0 %v1641_v59  ;;  %v986_v61 = vpop.f32.mrf.mxu0 }
 0x118   :  { %v3850_v62 = vpop.f32.mrf.mxu0  ;;  %v3856_v2 = vpop.f32.mrf.mxu1 }
 0x11a   :  { %v1075_v7 = vpop.f32.mrf.mxu0  ;;  %v1121_v8 = vpop.f32.mrf.mxu1 }
 0x11b   :  { %v4782_v9 = vadd.f32 %v1075_v7, %v102_v5  ;;  %v4784_v10 = vadd.f32 %v1121_v8, %v103_v6 }
 0x11c   :  { %v3861_v11 = vpop.f32.mrf.mxu0  ;;  %v3867_v12 = vpop.f32.mrf.mxu1 }
 0x11d   :  { %v1650_v13 = vsel %vm114_vm0, %v4784_v10, -inf  ;;  %v1647_v14 = vsel %vm114_vm0, %v4782_v9, -inf }
 0x11e   :  { %v1124_v15 = vpop.f32.mrf.mxu1  ;;  %1651 = vmax.xlane.f32.xlu1 %v1650_v13  ;;  %1648 = vmax.xlane.f32.xlu0 %v1647_v14  ;;  %v1078_v20 = vpop.f32.mrf.mxu0 }
 0x120   :  { %v3862_v21 = vpop.f32.mrf.mxu0  ;;  %v3868_v22 = vpop.f32.mrf.mxu1 }
 0x122   :  { %v1167_v25 = vpop.f32.mrf.mxu0  ;;  %v1213_v26 = vpop.f32.mrf.mxu1 }
 0x123   :  { %v4796_v27 = vadd.f32 %v1167_v25, %v104_v23  ;;  %v4798_v28 = vadd.f32 %v1213_v26, %v105_v24 }
 0x124   :  { %v3873_v29 = vpop.f32.mrf.mxu0  ;;  %v3879_v30 = vpop.f32.mrf.mxu1 }
 0x125   :  { %v1656_v33 = vsel %vm114_vm0, %v4798_v28, -inf  ;;  %v1653_v36 = vsel %vm114_vm0, %v4796_v27, -inf }
 0x126   :  { %1657 = vmax.xlane.f32.xlu1 %v1656_v33  ;;  %1654 = vmax.xlane.f32.xlu0 %v1653_v36  ;;  %v1170_v37 = vpop.f32.mrf.mxu0  ;;  %v1216_v40 = vpop.f32.mrf.mxu1 }
 0x128   :  { %v3874_v41 = vpop.f32.mrf.mxu0  ;;  %v3880_v42 = vpop.f32.mrf.mxu1 }
 0x12a   :  { %v1259_v43 = vpop.f32.mrf.mxu0  ;;  %v1305_v44 = vpop.f32.mrf.mxu1 }
 0x12c   :  { %v3885_v45 = vpop.f32.mrf.mxu0  ;;  %v3891_v46 = vpop.f32.mrf.mxu1 }
 0x12e   :  { %v1262_v49 = vpop.f32.mrf.mxu0  ;;  %v1308_v50 = vpop.f32.mrf.mxu1 }
 0x130   :  { %v3886_v51 = vpop.f32.mrf.mxu0  ;;  %v3892_v56 = vpop.f32.mrf.mxu1 }
 0x131   :  { %v106_v51 = vld [vmem:[%s5450_s3 + $0xc0] sm:$0xff] }
 0x132   :  { %v4804_v57 = vpop.f32.mrf.mxu0  ;;  %v4806_v58 = vpop.f32.mrf.mxu1 }
 0x134   :  { %v3897_v59 = vpop.f32.mrf.mxu0  ;;  %v3903_v60 = vpop.f32.mrf.mxu1 }
 0x136   :  { %v1354_v61 = vpop.f32.mrf.mxu0  ;;  %v1400_v62 = vpop.f32.mrf.mxu1 }
 0x137   :  { %v4825_v61 = vadd.f32 %v1259_v43, %v106_v51  ;;  %v108_v43 = vld [vmem:[%s5450_s3 + $0xd0] sm:$0xff] }
 0x138   :  { %v3898_v2 = vpop.f32.mrf.mxu0  ;;  %v3904_v5 = vpop.f32.mrf.mxu1 }
 0x13a   :  { %v4808_v6 = vpop.f32.mrf.mxu0  ;;  %v4810_v7 = vpop.f32.mrf.mxu1 }
 0x13c   :  { %v3909_v8 = vpop.f32.mrf.mxu0  ;;  %v3915_v11 = vpop.f32.mrf.mxu1 }
 0x13e   :  { %v1446_v12 = vpop.f32.mrf.mxu0  ;;  %v1492_v13 = vpop.f32.mrf.mxu1 }
 0x140   :  { %v3910_v14 = vpop.f32.mrf.mxu0  ;;  %v3916_v15 = vpop.f32.mrf.mxu1 }
 0x141   :  { %v4848_v15 = vadd.f32 %v4804_v57, %v108_v43 }
 0x142   :  { %v4812_v20 = vpop.f32.mrf.mxu0  ;;  %v4814_v21 = vpop.f32.mrf.mxu1 }
 0x144   :  { %v3921_v22 = vpop.f32.mrf.mxu0  ;;  %v3927_v23 = vpop.f32.mrf.mxu1 }
 0x146   :  { %v1538_v24 = vpop.f32.mrf.mxu0  ;;  %v1584_v25 = vpop.f32.mrf.mxu1 }
 0x147   :  { %v109_v24 = vld [vmem:[%s5450_s3 + $0xd8] sm:$0xff] }
 0x148   :  { %v3922_v26 = vpop.f32.mrf.mxu0  ;;  %v3928_v29 = vpop.f32.mrf.mxu1 }
 0x157   :  { %v1589_v30 = vpop.xlane.xlu0 %1588 }
 0x158   :  { %v1683_v33 = vsub.f32 %v4642_v38, %v1589_v30 }
 0x15a   :  { %v1715_v36 = vmul.f32 1.442695, %v1683_v33  ;;  %v110_v33 = vld [vmem:[%s5450_s3 + $0xe0] sm:$0xff] }
 0x15b   :  { %v1592_v37 = vpop.xlane.xlu0 %1591 }
 0x15c   :  { %4123 = vpow2.f32 %v1715_v36  ;;  %v1684_v40 = vsub.f32 %v4644_v39, %v1592_v37 }
 0x15e   :  { %v1717_v41 = vmul.f32 1.442695, %v1684_v40 }
 0x15f   :  { %v1595_v42 = vpop.xlane.xlu1 %1594 }
 0x160   :  { %4125 = vpow2.f32 %v1717_v41  ;;  %v1685_v45 = vsub.f32 %v4658_v53, %v1595_v42  ;;  %v4876_v42 = vadd.f32 %v4808_v6, %v110_v33 }
 0x162   :  { %v1719_v46 = vmul.f32 1.442695, %v1685_v45  ;;  %v111_v45 = vld [vmem:[%s5450_s3 + $0xe8] sm:$0xff]  ;;  %v1671_v6 = vsel %vm114_vm0, %v4876_v42, -inf }
 0x163   :  { %v1598_v49 = vpop.xlane.xlu1 %1597 }
 0x164   :  { %4127 = vpow2.f32 %v1719_v46  ;;  %v1686_v50 = vsub.f32 %v4656_v52, %v1598_v49  ;;  %v107_v52 = vld [vmem:[%s5450_s3 + $0xc8] sm:$0xff] }
 0x165   :  { %v4834_v8 = vadd.f32 %v1305_v44, %v107_v52 }
 0x166   :  { %v1721_v38 = vmul.f32 1.442695, %v1686_v50 }
 0x167   :  { %v1604_v56 = vpop.xlane.xlu1 %1603  ;;  %v1601_v59 = vpop.xlane.xlu0 %1600  ;;  %v1662_v22 = vsel %vm114_vm0, %v4834_v8, -inf }
 0x168   :  { %4129 = vpow2.f32 %v1721_v38  ;;  %v1688_v39 = vsub.f32 %v4670_v3, %v1604_v56  ;;  %v1687_v60 = vsub.f32 %v4672_v4, %v1601_v59  ;;  %v1659_v3 = vsel %vm114_vm0, %v4825_v61, -inf  ;;  %v112_v56 = vld [vmem:[%s5450_s3 + $0xf0] sm:$0xff] }
 0x169   :  { %v4827_v53 = vpop.eup %4123 }
 0x16a   :  { %v1725_v62 = vmul.f32 1.442695, %v1688_v39  ;;  %v1723_v2 = vmul.f32 1.442695, %v1687_v60  ;;  %v1779_v5 = vsel %vm114_vm0, %v4827_v53, 0.0 }
 0x16b   :  { %1780 = vadd.xlane.f32.xlu0 %v1779_v5 }
 0x16c   :  { %4131 = vpow2.f32 %v1723_v2  ;;  %v113_v2 = vld [vmem:[%s5450_s3 + $0xf8] sm:$0xff] }
 0x16d   :  { %v4838_v4 = vpop.eup %4125  ;;  %4133 = vpow2.f32 %v1725_v62  ;;  %v4902_v62 = vadd.f32 %v4812_v20, %v112_v56  ;;  %v4917_v20 = vadd.f32 %v4814_v21, %v113_v2  ;;  %v1972_v21 = vld [vmem:[%s5451_s2 + $0x4] sm:$0xf] }
 0x16e   :  { %v1782_v11 = vsel %vm114_vm0, %v4838_v4, 0.0 }
 0x16f   :  { %1783 = vadd.xlane.f32.xlu1 %v1782_v11  ;;  %v1610_v12 = vpop.xlane.xlu1 %1609  ;;  %v1607_v13 = vpop.xlane.xlu0 %1606  ;;  %1660 = vmax.xlane.f32.xlu0 %v1659_v3 }
 0x170   :  { %v1690_v44 = vsub.f32 %v4686_v18, %v1610_v12  ;;  %v1689_v14 = vsub.f32 %v4684_v17, %v1607_v13  ;;  %v4860_v17 = vadd.f32 %v4806_v58, %v109_v24  ;;  %v1665_v18 = vsel %vm114_vm0, %v4848_v15, -inf }
 0x171   :  { %v4852_v23 = vpop.eup %4127  ;;  %v1677_v13 = vsel %vm114_vm0, %v4902_v62, -inf }
 0x172   :  { %v1729_v25 = vmul.f32 1.442695, %v1690_v44  ;;  %v1727_v26 = vmul.f32 1.442695, %v1689_v14  ;;  %v1785_v29 = vsel %vm114_vm0, %v4852_v23, 0.0  ;;  %v1668_v41 = vsel %vm114_vm0, %v4860_v17, -inf }
 0x173   :  { %1663 = vmax.xlane.f32.xlu1 %v1662_v22  ;;  %1786 = vadd.xlane.f32.xlu0 %v1785_v29  ;;  %v2054_v29 = vsel %vm2006_vm2, %v1972_v21, 0 }
 0x174   :  { %4135 = vpow2.f32 %v1727_v26  ;;  %v1680_v26 = vsel %vm114_vm0, %v4917_v20, -inf  ;;  %3936 = vmatpush3.bf16.msra.mxu1 %v2054_v29 }
 0x175   :  { %v4864_v57 = vpop.eup %4129  ;;  %4137 = vpow2.f32 %v1729_v25  ;;  %3947 = vmatprep.subr.bf16.mxu1 %v4251_v0 }
 0x176   :  { %v1788_v30 = vsel %vm114_vm0, %v4864_v57, 0.0 }
 0x177   :  { %1789 = vadd.xlane.f32.xlu1 %v1788_v30  ;;  %v1616_v36 = vpop.xlane.xlu1 %1615  ;;  %v1613_v37 = vpop.xlane.xlu0 %1612  ;;  %1666 = vmax.xlane.f32.xlu0 %v1665_v18 }
 0x178   :  { %v1692_v58 = vsub.f32 %v4700_v32, %v1616_v36  ;;  %v1691_v40 = vsub.f32 %v4698_v31, %v1613_v37  ;;  %v4888_v32 = vadd.f32 %v4810_v7, %v111_v45 }
 0x179   :  { %v4881_v46 = vpop.eup %4131 }
 0x17a   :  { %v1733_v49 = vmul.f32 1.442695, %v1692_v58  ;;  %v1731_v50 = vmul.f32 1.442695, %v1691_v40  ;;  %v4883_v51 = vpop.eup %4133  ;;  %v1791_v31 = vsel %vm114_vm0, %v4881_v46, 0.0  ;;  %v1674_v52 = vsel %vm114_vm0, %v4888_v32, -inf }
 0x17b   :  { %1669 = vmax.xlane.f32.xlu1 %v1668_v41  ;;  %1792 = vadd.xlane.f32.xlu0 %v1791_v31  ;;  %v1794_v38 = vsel %vm114_vm0, %v4883_v51, 0.0 }
 0x17c   :  { %4139 = vpow2.f32 %v1731_v50 }
 0x17d   :  { %4141 = vpow2.f32 %v1733_v49 }
 0x17f   :  { %1795 = vadd.xlane.f32.xlu1 %v1794_v38  ;;  %v1622_v59 = vpop.xlane.xlu1 %1621  ;;  %v1619_v39 = vpop.xlane.xlu0 %1618  ;;  %1672 = vmax.xlane.f32.xlu0 %v1671_v6 }
 0x180   :  { %v1694_v60 = vsub.f32 %v4714_v48, %v1622_v59  ;;  %v1693_v7 = vsub.f32 %v4712_v47, %v1619_v39  ;;  %v1971_v48 = vld [vmem:[%s5451_s2] sm:$0xf] }
 0x181   :  { %v4907_v5 = vpop.eup %4135  ;;  %v2008_v12 = vsel %vm2006_vm2, %v1971_v48, 0 }
 0x182   :  { %v1737_v3 = vmul.f32 1.442695, %v1694_v60  ;;  %v1735_v43 = vmul.f32 1.442695, %v1693_v7  ;;  %v4909_v11 = vpop.eup %4137  ;;  %v1797_v47 = vsel %vm114_vm0, %v4907_v5, 0.0  ;;  %3930 = vmatpush3.bf16.msra.mxu0 %v2008_v12 }
 0x183   :  { %1675 = vmax.xlane.f32.xlu1 %v1674_v52  ;;  %1798 = vadd.xlane.f32.xlu0 %v1797_v47  ;;  %v1800_v44 = vsel %vm114_vm0, %v4909_v11, 0.0 }
 0x184   :  { %4143 = vpow2.f32 %v1737_v3  ;;  %3941 = vmatprep.subr.bf16.mxu0 %v4251_v0 }
 0x185   :  { %4145 = vpow2.f32 %v1735_v43 }
 0x187   :  { %1801 = vadd.xlane.f32.xlu1 %v1800_v44  ;;  %v1628_v14 = vpop.xlane.xlu1 %1627  ;;  %v1625_v22 = vpop.xlane.xlu0 %1624  ;;  %1678 = vmax.xlane.f32.xlu0 %v1677_v13 }
 0x188   :  { %v1696_v24 = vsub.f32 %v4728_v1, %v1628_v14  ;;  %v1695_v25 = vsub.f32 %v4726_v63, %v1625_v22 }
 0x189   :  { %v4933_v18 = vpop.eup %4139 }
 0x18a   :  { %v1741_v30 = vmul.f32 1.442695, %v1696_v24  ;;  %v1739_v33 = vmul.f32 1.442695, %v1695_v25  ;;  %v4936_v36 = vpop.eup %4141  ;;  %v1803_v1 = vsel %vm114_vm0, %v4933_v18, 0.0 }
 0x18b   :  { %1681 = vmax.xlane.f32.xlu1 %v1680_v26  ;;  %1804 = vadd.xlane.f32.xlu0 %v1803_v1  ;;  %v1806_v63 = vsel %vm114_vm0, %v4936_v36, 0.0 }
 0x18c   :  { %4147 = vpow2.f32 %v1741_v30 }
 0x18d   :  { %4149 = vpow2.f32 %v1739_v33 }
 0x18f   :  { %1807 = vadd.xlane.f32.xlu1 %v1806_v63  ;;  %v1634_v37 = vpop.xlane.xlu1 %1633  ;;  %v1631_v58 = vpop.xlane.xlu0 %1630 }
 0x190   :  { %v1698_v40 = vsub.f32 %v4742_v19, %v1634_v37  ;;  %v1697_v41 = vsub.f32 %v4740_v16, %v1631_v58 }
 0x191   :  { %v4944_v45 = vpop.eup %4143 }
 0x192   :  { %v4946_v49 = vpop.eup %4145  ;;  %v1745_v50 = vmul.f32 1.442695, %v1698_v40  ;;  %v1743_v31 = vmul.f32 1.442695, %v1697_v41  ;;  %v1812_v6 = vsel %vm114_vm0, %v4944_v45, 0.0 }
 0x193   :  { %1813 = vadd.xlane.f32.xlu1 %v1812_v6  ;;  %v1809_v38 = vsel %vm114_vm0, %v4946_v49, 0.0 }
 0x194   :  { %4151 = vpow2.f32 %v1745_v50  ;;  %1810 = vadd.xlane.f32.xlu0 %v1809_v38 }
 0x195   :  { %4153 = vpow2.f32 %v1743_v31 }
 0x197   :  { %v1640_v56 = vpop.xlane.xlu1 %1639  ;;  %v1637_v19 = vpop.xlane.xlu0 %1636 }
 0x198   :  { %v1700_v16 = vsub.f32 %v4756_v35, %v1640_v56  ;;  %v1699_v59 = vsub.f32 %v4754_v34, %v1637_v19 }
 0x199   :  { %v4954_v39 = vpop.eup %4147 }
 0x19a   :  { %v4956_v60 = vpop.eup %4149  ;;  %v1749_v7 = vmul.f32 1.442695, %v1700_v16  ;;  %v1747_v52 = vmul.f32 1.442695, %v1699_v59  ;;  %v1818_v2 = vsel %vm114_vm0, %v4954_v39, 0.0 }
 0x19b   :  { %1819 = vadd.xlane.f32.xlu1 %v1818_v2  ;;  %v1815_v3 = vsel %vm114_vm0, %v4956_v60, 0.0 }
 0x19c   :  { %4155 = vpow2.f32 %v1749_v7  ;;  %1816 = vadd.xlane.f32.xlu0 %v1815_v3 }
 0x19d   :  { %4157 = vpow2.f32 %v1747_v52 }
 0x19f   :  { %v1646_v43 = vpop.xlane.xlu1 %1645  ;;  %v1643_v35 = vpop.xlane.xlu0 %1642 }
 0x1a0   :  { %v1702_v34 = vsub.f32 %v4770_v55, %v1646_v43  ;;  %v1701_v47 = vsub.f32 %v4768_v54, %v1643_v35 }
 0x1a1   :  { %v4964_v48 = vpop.eup %4151 }
 0x1a2   :  { %v4966_v12 = vpop.eup %4153  ;;  %v1753_v13 = vmul.f32 1.442695, %v1702_v34  ;;  %v1751_v44 = vmul.f32 1.442695, %v1701_v47  ;;  %v1824_v14 = vsel %vm114_vm0, %v4964_v48, 0.0 }
 0x1a3   :  { %1825 = vadd.xlane.f32.xlu1 %v1824_v14  ;;  %v1821_v22 = vsel %vm114_vm0, %v4966_v12, 0.0 }
 0x1a4   :  { %4159 = vpow2.f32 %v1753_v13  ;;  %1822 = vadd.xlane.f32.xlu0 %v1821_v22 }
 0x1a5   :  { %4161 = vpow2.f32 %v1751_v44 }
 0x1a7   :  { %v1652_v21 = vpop.xlane.xlu1 %1651  ;;  %v1649_v55 = vpop.xlane.xlu0 %1648 }
 0x1a8   :  { %v1704_v54 = vsub.f32 %v4784_v10, %v1652_v21  ;;  %v1703_v24 = vsub.f32 %v4782_v9, %v1649_v55 }
 0x1a9   :  { %v4974_v25 = vpop.eup %4155 }
 0x1aa   :  { %v4976_v26 = vpop.eup %4157  ;;  %v1757_v29 = vmul.f32 1.442695, %v1704_v54  ;;  %v1755_v30 = vmul.f32 1.442695, %v1703_v24  ;;  %v1830_v33 = vsel %vm114_vm0, %v4974_v25, 0.0 }
 0x1ab   :  { %1831 = vadd.xlane.f32.xlu1 %v1830_v33  ;;  %v1827_v1 = vsel %vm114_vm0, %v4976_v26, 0.0  ;;  %v1973_v54 = vld [vmem:[%s5451_s2 + $0x8] sm:$0xf] }
 0x1ac   :  { %4163 = vpow2.f32 %v1757_v29  ;;  %1828 = vadd.xlane.f32.xlu0 %v1827_v1  ;;  %v2100_v1 = vsel %vm2006_vm2, %v1973_v54, 0 }
 0x1ad   :  { %4165 = vpow2.f32 %v1755_v30 }
 0x1af   :  { %v1658_v63 = vpop.xlane.xlu1 %1657  ;;  %v1655_v10 = vpop.xlane.xlu0 %1654 }
 0x1b0   :  { %v1706_v9 = vsub.f32 %v4798_v28, %v1658_v63  ;;  %v1705_v37 = vsub.f32 %v4796_v27, %v1655_v10 }
 0x1b1   :  { %v4984_v58 = vpop.eup %4159 }
 0x1b2   :  { %v4986_v40 = vpop.eup %4161  ;;  %v1761_v41 = vmul.f32 1.442695, %v1706_v9  ;;  %v1759_v50 = vmul.f32 1.442695, %v1705_v37  ;;  %v1836_v31 = vsel %vm114_vm0, %v4984_v58, 0.0 }
 0x1b3   :  { %1837 = vadd.xlane.f32.xlu1 %v1836_v31  ;;  %v1833_v6 = vsel %vm114_vm0, %v4986_v40, 0.0 }
 0x1b4   :  { %4167 = vpow2.f32 %v1761_v41  ;;  %1834 = vadd.xlane.f32.xlu0 %v1833_v6 }
 0x1b5   :  { %4169 = vpow2.f32 %v1759_v50 }
 0x1b9   :  { %v4992_v38 = vpop.eup %4163 }
 0x1ba   :  { %v4994_v28 = vpop.eup %4165  ;;  %v1842_v27 = vsel %vm114_vm0, %v4992_v38, 0.0 }
 0x1bb   :  { %1843 = vadd.xlane.f32.xlu1 %v1842_v27  ;;  %v1839_v56 = vsel %vm114_vm0, %v4994_v28, 0.0  ;;  %v1975_v27 = vld [vmem:[%s5451_s2 + $0x10] sm:$0xf] }
 0x1bc   :  { %1840 = vadd.xlane.f32.xlu0 %v1839_v56 }
 0x1c1   :  { %v5000_v19 = vpop.eup %4167 }
 0x1c2   :  { %v5002_v16 = vpop.eup %4169  ;;  %v1848_v59 = vsel %vm114_vm0, %v5000_v19, 0.0 }
 0x1c3   :  { %1849 = vadd.xlane.f32.xlu1 %v1848_v59  ;;  %v1845_v7 = vsel %vm114_vm0, %v5002_v16, 0.0 }
 0x1c4   :  { %1846 = vadd.xlane.f32.xlu0 %v1845_v7 }
 0x1f4   :  { %v1781_v52 = vpop.xlane.xlu0 %1780 }
 0x1f5   :  { %4171 = vrcp.f32 %v1781_v52 }
 0x1f8   :  { %v1784_v2 = vpop.xlane.xlu1 %1783  ;;  %v1661_v3 = vpop.xlane.xlu0 %1660 }
 0x1f9   :  { %4173 = vrcp.f32 %v1784_v2  ;;  %v1707_v43 = vsub.f32 %v4825_v61, %v1661_v3 }
 0x1fb   :  { %v1763_v35 = vmul.f32 1.442695, %v1707_v43  ;;  %v2192_v43 = vsel %vm2006_vm2, %v1975_v27, 0 }
 0x1fc   :  { %v1664_v34 = vpop.xlane.xlu1 %1663  ;;  %v1787_v47 = vpop.xlane.xlu0 %1786 }
 0x1fd   :  { %4175 = vpow2.f32 %v1763_v35  ;;  %v1708_v13 = vsub.f32 %v4834_v8, %v1664_v34 }
 0x1fe   :  { %4177 = vrcp.f32 %v1787_v47 }
 0x1ff   :  { %v1765_v44 = vmul.f32 1.442695, %v1708_v13 }
 0x200   :  { %v1790_v14 = vpop.xlane.xlu1 %1789  ;;  %v1667_v22 = vpop.xlane.xlu0 %1666 }
 0x201   :  { %4179 = vpow2.f32 %v1765_v44  ;;  %v1709_v21 = vsub.f32 %v4848_v15, %v1667_v22  ;;  %v1974_v15 = vld [vmem:[%s5451_s2 + $0xc] sm:$0xf] }
 0x202   :  { %v4172_v55 = vpop.eup %4171  ;;  %4181 = vrcp.f32 %v1790_v14  ;;  %v2146_v41 = vsel %vm2006_vm2, %v1974_v15, 0 }
 0x203   :  { %v1767_v61 = vmul.f32 1.442695, %v1709_v21  ;;  %v1876_v24 = vmul.f32 %v4172_v55, %v4827_v53 }
 0x204   :  { %v1670_v29 = vpop.xlane.xlu1 %1669  ;;  %v1793_v30 = vpop.xlane.xlu0 %1792 }
 0x205   :  { %4183 = vpow2.f32 %v1767_v61  ;;  %v1710_v8 = vsub.f32 %v4860_v17, %v1670_v29  ;;  %v1939_v33 = vpack.c.bf16 %v1876_v24, %v1876_v24  ;;  %v1977_v61 = vld [vmem:[%s5451_s2 + $0x18] sm:$0xf] }
 0x206   :  { %v4174_v63 = vpop.eup %4173  ;;  %4185 = vrcp.f32 %v1793_v30 }
 0x207   :  { %v1769_v10 = vmul.f32 1.442695, %v1710_v8  ;;  %3932 = vmatmul.mubr.msk.bf16.vlgmr.msra.gmra.mxu0 %vm114_vm0, %v1939_v33  ;;  %v1878_v9 = vmul.f32 %v4174_v63, %v4838_v4  ;;  %v2284_v63 = vsel %vm2006_vm2, %v1977_v61, 0 }
 0x208   :  { %v1796_v53 = vpop.xlane.xlu1 %1795  ;;  %3942 = vmatpush3.bf16.msra.mxu0 %v2100_v1  ;;  %3943 = vmatprep.mubr.msk.bf16.mxu0 %vm4252_vm1, %v4251_v0  ;;  %v1673_v17 = vpop.xlane.xlu0 %1672 }
 0x209   :  { %4187 = vpow2.f32 %v1769_v10  ;;  %v1940_v37 = vpack.c.bf16 %v1878_v9, %v1878_v9  ;;  %3953 = vmatprep.subr.bf16.mxu0 %v4251_v0  ;;  %v1711_v31 = vsub.f32 %v4876_v42, %v1673_v17 }
 0x20a   :  { %v5026_v50 = vpop.eup %4175  ;;  %4189 = vrcp.f32 %v1796_v53 }
 0x20b   :  { %v4178_v6 = vpop.eup %4177  ;;  %3938 = vmatmul.mubr.msk.bf16.vlgmr.msra.gmra.mxu1 %vm114_vm0, %v1940_v37  ;;  %v1851_v4 = vsel %vm114_vm0, %v5026_v50, 0.0  ;;  %v1771_v56 = vmul.f32 1.442695, %v1711_v31 }
 0x20c   :  { %v1676_v59 = vpop.xlane.xlu1 %1675  ;;  %1852 = vadd.xlane.f32.xlu0 %v1851_v4  ;;  %v1880_v7 = vmul.f32 %v4178_v6, %v4852_v23  ;;  %3948 = vmatpush3.bf16.msra.mxu1 %v2146_v41  ;;  %v1799_v2 = vpop.xlane.xlu0 %1798  ;;  %v1979_v4 = vld [vmem:[%s5451_s2 + $0x20] sm:$0xf] }
 0x20d   :  { %v1712_v52 = vsub.f32 %v4888_v32, %v1676_v59  ;;  %3949 = vmatprep.mubr.msk.bf16.mxu1 %vm4252_vm1, %v4251_v0  ;;  %3959 = vmatprep.subr.bf16.mxu1 %v4251_v0  ;;  %4191 = vpow2.f32 %v1771_v56  ;;  %v1976_v32 = vld [vmem:[%s5451_s2 + $0x14] sm:$0xf] }
 0x20e   :  { %v5040_v42 = vpop.eup %4179  ;;  %v1941_v3 = vpack.c.bf16 %v1880_v7, %v1880_v7  ;;  %4193 = vrcp.f32 %v1799_v2  ;;  %v2238_v55 = vsel %vm2006_vm2, %v1976_v32, 0 }
 0x20f   :  { %v4182_v35 = vpop.eup %4181  ;;  %v1773_v34 = vmul.f32 1.442695, %v1712_v52  ;;  %v1854_v23 = vsel %vm114_vm0, %v5040_v42, 0.0 }
 0x210   :  { %3944 = vmatmul.mubr.msk.bf16.vlgmr.msra.gmra.mxu0 %vm114_vm0, %v1941_v3  ;;  %1855 = vadd.xlane.f32.xlu1 %v1854_v23  ;;  %v1802_v47 = vpop.xlane.xlu1 %1801  ;;  %v1882_v13 = vmul.f32 %v4182_v35, %v4864_v57  ;;  %v1679_v44 = vpop.xlane.xlu0 %1678  ;;  %v2376_v3 = vsel %vm2006_vm2, %v1979_v4, 0 }
 0x211   :  { %4195 = vpow2.f32 %v1773_v34  ;;  %3954 = vmatpush3.bf16.msra.mxu0 %v2192_v43  ;;  %3955 = vmatprep.mubr.msk.bf16.mxu0 %vm4252_vm1, %v4251_v0  ;;  %v1713_v22 = vsub.f32 %v4902_v62, %v1679_v44 }
 0x212   :  { %v5052_v14 = vpop.eup %4183  ;;  %4197 = vrcp.f32 %v1802_v47  ;;  %v1942_v21 = vpack.c.bf16 %v1882_v13, %v1882_v13  ;;  %3965 = vmatprep.subr.bf16.mxu0 %v4251_v0  ;;  %v1981_v13 = vld [vmem:[%s5451_s2 + $0x28] sm:$0xf] }
 0x213   :  { %v4186_v54 = vpop.eup %4185  ;;  %v1857_v57 = vsel %vm114_vm0, %v5052_v14, 0.0  ;;  %v1775_v24 = vmul.f32 1.442695, %v1713_v22  ;;  %v2468_v61 = vsel %vm2006_vm2, %v1981_v13, 0 }
 0x214   :  { %3950 = vmatmul.mubr.msk.bf16.vlgmr.msra.gmra.mxu1 %vm114_vm0, %v1942_v21  ;;  %v1682_v29 = vpop.xlane.xlu1 %1681  ;;  %1858 = vadd.xlane.f32.xlu0 %v1857_v57  ;;  %v1884_v62 = vmul.f32 %v4186_v54, %v4881_v46  ;;  %v1805_v30 = vpop.xlane.xlu0 %1804 }
 0x215   :  { %v1714_v8 = vsub.f32 %v4917_v20, %v1682_v29  ;;  %3960 = vmatpush3.bf16.msra.mxu1 %v2238_v55  ;;  %3961 = vmatprep.mubr.msk.bf16.mxu1 %vm4252_vm1, %v4251_v0  ;;  %4199 = vpow2.f32 %v1775_v24  ;;  %v1978_v20 = vld [vmem:[%s5451_s2 + $0x1c] sm:$0xf] }
 0x216   :  { %v5067_v33 = vpop.eup %4187  ;;  %v1943_v1 = vpack.c.bf16 %v1884_v62, %v1884_v62  ;;  %3971 = vmatprep.subr.bf16.mxu1 %v4251_v0  ;;  %4201 = vrcp.f32 %v1805_v30  ;;  %v2330_v37 = vsel %vm2006_vm2, %v1978_v20, 0 }
 0x217   :  { %v4190_v15 = vpop.eup %4189  ;;  %v1777_v10 = vmul.f32 1.442695, %v1714_v8  ;;  %v1860_v46 = vsel %vm114_vm0, %v5067_v33, 0.0 }
 0x218   :  { %3956 = vmatmul.mubr.msk.bf16.vlgmr.msra.gmra.mxu0 %vm114_vm0, %v1943_v1  ;;  %1861 = vadd.xlane.f32.xlu1 %v1860_v46  ;;  %v1808_v9 = vpop.xlane.xlu1 %1807  ;;  %v1886_v53 = vmul.f32 %v4190_v15, %v4883_v51 }
 0x219   :  { %4203 = vpow2.f32 %v1777_v10  ;;  %3966 = vmatpush3.bf16.msra.mxu0 %v2284_v63  ;;  %3967 = vmatprep.mubr.msk.bf16.mxu0 %vm4252_vm1, %v4251_v0 }
 0x21a   :  { %4205 = vrcp.f32 %v1808_v9  ;;  %v1944_v17 = vpack.c.bf16 %v1886_v53, %v1886_v53  ;;  %3977 = vmatprep.subr.bf16.mxu0 %v4251_v0  ;;  %v5082_v41 = vpop.eup %4191 }
 0x21b   :  { %v4194_v31 = vpop.eup %4193  ;;  %v1863_v51 = vsel %vm114_vm0, %v5082_v41, 0.0 }
 0x21c   :  { %3962 = vmatmul.mubr.msk.bf16.vlgmr.msra.gmra.mxu1 %vm114_vm0, %v1944_v17  ;;  %v1814_v6 = vpop.xlane.xlu1 %1813  ;;  %1864 = vadd.xlane.f32.xlu0 %v1863_v51  ;;  %v1888_v56 = vmul.f32 %v4194_v31, %v4907_v5  ;;  %v1980_v5 = vld [vmem:[%s5451_s2 + $0x24] sm:$0xf] }
 0x21d   :  { %4207 = vrcp.f32 %v1814_v6  ;;  %v1811_v27 = vpop.xlane.xlu0 %1810  ;;  %3972 = vmatpush3.bf16.msra.mxu1 %v2330_v37  ;;  %3973 = vmatprep.mubr.msk.bf16.mxu1 %vm4252_vm1, %v4251_v0  ;;  %v2422_v34 = vsel %vm2006_vm2, %v1980_v5, 0  ;;  %v1985_v6 = vld [vmem:[%s5451_s2 + $0x38] sm:$0xf] }
 0x21e   :  { %v5091_v59 = vpop.eup %4195  ;;  %4209 = vrcp.f32 %v1811_v27  ;;  %3983 = vmatprep.subr.bf16.mxu1 %v4251_v0  ;;  %v1945_v52 = vpack.c.bf16 %v1888_v56, %v1888_v56  ;;  %v2652_v56 = vsel %vm2006_vm2, %v1985_v6, 0  ;;  %v1994_v6 = vld [vmem:[%s5451_s2 + $0x5c] sm:$0xf] }
 0x21f   :  { %v4198_v7 = vpop.eup %4197  ;;  %v1866_v2 = vsel %vm114_vm0, %v5091_v59, 0.0 }
 0x220   :  { %1867 = vadd.xlane.f32.xlu1 %v1866_v2  ;;  %v1890_v43 = vmul.f32 %v4198_v7, %v4909_v11  ;;  %3968 = vmatmul.mubr.msk.bf16.vlgmr.msra.gmra.mxu0 %vm114_vm0, %v1945_v52 }
 0x221   :  { %3978 = vmatpush3.bf16.msra.mxu0 %v2376_v3  ;;  %3979 = vmatprep.mubr.msk.bf16.mxu0 %vm4252_vm1, %v4251_v0 }
 0x222   :  { %v1946_v35 = vpack.c.bf16 %v1890_v43, %v1890_v43  ;;  %v5107_v23 = vpop.eup %4199  ;;  %3989 = vmatprep.subr.bf16.mxu0 %v4251_v0  ;;  %v1987_v43 = vld [vmem:[%s5451_s2 + $0x40] sm:$0xf] }
 0x223   :  { %v4202_v32 = vpop.eup %4201  ;;  %v1869_v11 = vsel %vm114_vm0, %v5107_v23, 0.0 }
 0x224   :  { %3974 = vmatmul.mubr.msk.bf16.vlgmr.msra.gmra.mxu1 %vm114_vm0, %v1946_v35  ;;  %v1820_v47 = vpop.xlane.xlu1 %1819  ;;  %1870 = vadd.xlane.f32.xlu0 %v1869_v11  ;;  %v1892_v22 = vmul.f32 %v4202_v32, %v4933_v18  ;;  %v1982_v18 = vld [vmem:[%s5451_s2 + $0x2c] sm:$0xf] }
 0x225   :  { %4211 = vrcp.f32 %v1820_v47  ;;  %v1817_v44 = vpop.xlane.xlu0 %1816  ;;  %3984 = vmatpush3.bf16.msra.mxu1 %v2422_v34  ;;  %3985 = vmatprep.mubr.msk.bf16.mxu1 %vm4252_vm1, %v4251_v0  ;;  %v2514_v8 = vsel %vm2006_vm2, %v1982_v18, 0  ;;  %v2744_v47 = vsel %vm2006_vm2, %v1987_v43, 0 }
 0x226   :  { %v5117_v21 = vpop.eup %4203  ;;  %4213 = vrcp.f32 %v1817_v44  ;;  %3995 = vmatprep.subr.bf16.mxu1 %v4251_v0  ;;  %v1947_v54 = vpack.c.bf16 %v1892_v22, %v1892_v22 }
 0x227   :  { %v4206_v55 = vpop.eup %4205  ;;  %v1872_v57 = vsel %vm114_vm0, %v5117_v21, 0.0 }
 0x228   :  { %1873 = vadd.xlane.f32.xlu1 %v1872_v57  ;;  %v1894_v24 = vmul.f32 %v4206_v55, %v4936_v36  ;;  %3980 = vmatmul.mubr.msk.bf16.vlgmr.msra.gmra.mxu0 %vm114_vm0, %v1947_v54  ;;  %v1983_v36 = vld [vmem:[%s5451_s2 + $0x30] sm:$0xf]  ;;  %v1989_v54 = vld [vmem:[%s5451_s2 + $0x48] sm:$0xf] }
 0x229   :  { %3990 = vmatpush3.bf16.msra.mxu0 %v2468_v61  ;;  %3991 = vmatprep.mubr.msk.bf16.mxu0 %vm4252_vm1, %v4251_v0  ;;  %v2560_v20 = vsel %vm2006_vm2, %v1983_v36, 0 }
 0x22a   :  { %v4208_v29 = vpop.eup %4207  ;;  %v1948_v62 = vpack.c.bf16 %v1894_v24, %v1894_v24  ;;  %4001 = vmatprep.subr.bf16.mxu0 %v4251_v0  ;;  %v2836_v24 = vsel %vm2006_vm2, %v1989_v54, 0 }
 0x22b   :  { %v4210_v30 = vpop.eup %4209  ;;  %v1898_v46 = vmul.f32 %v4208_v29, %v4944_v45 }
 0x22c   :  { %3986 = vmatmul.mubr.msk.bf16.vlgmr.msra.gmra.mxu1 %vm114_vm0, %v1948_v62  ;;  %v1826_v1 = vpop.xlane.xlu1 %1825  ;;  %v1896_v63 = vmul.f32 %v4210_v30, %v4946_v49  ;;  %v1984_v49 = vld [vmem:[%s5451_s2 + $0x34] sm:$0xf] }
 0x22d   :  { %4215 = vrcp.f32 %v1826_v1  ;;  %v1823_v15 = vpop.xlane.xlu0 %1822  ;;  %3996 = vmatpush3.bf16.msra.mxu1 %v2514_v8  ;;  %3997 = vmatprep.mubr.msk.bf16.mxu1 %vm4252_vm1, %v4251_v0  ;;  %v1950_v53 = vpack.c.bf16 %v1898_v46, %v1898_v46  ;;  %v2606_v17 = vsel %vm2006_vm2, %v1984_v49, 0 }
 0x22e   :  { %4217 = vrcp.f32 %v1823_v15  ;;  %v1949_v10 = vpack.c.bf16 %v1896_v63, %v1896_v63  ;;  %4007 = vmatprep.subr.bf16.mxu1 %v4251_v0  ;;  %v1991_v63 = vld [vmem:[%s5451_s2 + $0x50] sm:$0xf] }
 0x22f   :  { %v2928_v46 = vsel %vm2006_vm2, %v1991_v63, 0 }
 0x230   :  { %3992 = vmatmul.mubr.msk.bf16.vlgmr.msra.gmra.mxu0 %vm114_vm0, %v1949_v10 }
 0x231   :  { %4002 = vmatpush3.bf16.msra.mxu0 %v2560_v20  ;;  %4003 = vmatprep.mubr.msk.bf16.mxu0 %vm4252_vm1, %v4251_v0 }
 0x232   :  { %v4212_v9 = vpop.eup %4211  ;;  %4013 = vmatprep.subr.bf16.mxu0 %v4251_v0 }
 0x233   :  { %v4214_v37 = vpop.eup %4213  ;;  %v1902_v27 = vmul.f32 %v4212_v9, %v4954_v39 }
 0x234   :  { %3998 = vmatmul.mubr.msk.bf16.vlgmr.msra.gmra.mxu1 %vm114_vm0, %v1950_v53  ;;  %v1832_v45 = vpop.xlane.xlu1 %1831  ;;  %v1900_v31 = vmul.f32 %v4214_v37, %v4956_v60  ;;  %v1986_v60 = vld [vmem:[%s5451_s2 + $0x3c] sm:$0xf] }
 0x235   :  { %4219 = vrcp.f32 %v1832_v45  ;;  %v1829_v51 = vpop.xlane.xlu0 %1828  ;;  %4008 = vmatpush3.bf16.msra.mxu1 %v2606_v17  ;;  %4009 = vmatprep.mubr.msk.bf16.mxu1 %vm4252_vm1, %v4251_v0  ;;  %v1952_v52 = vpack.c.bf16 %v1902_v27, %v1902_v27  ;;  %v2698_v2 = vsel %vm2006_vm2, %v1986_v60, 0  ;;  %v1993_v17 = vld [vmem:[%s5451_s2 + $0x58] sm:$0xf] }
 0x236   :  { %4221 = vrcp.f32 %v1829_v51  ;;  %v1951_v4 = vpack.c.bf16 %v1900_v31, %v1900_v31  ;;  %4019 = vmatprep.subr.bf16.mxu1 %v4251_v0  ;;  %v3020_v31 = vsel %vm2006_vm2, %v1993_v17, 0 }
 0x238   :  { %4004 = vmatmul.mubr.msk.bf16.vlgmr.msra.gmra.mxu0 %vm114_vm0, %v1951_v4  ;;  %v3066_v4 = vsel %vm2006_vm2, %v1994_v6, 0 }
 0x239   :  { %4014 = vmatpush3.bf16.msra.mxu0 %v2652_v56  ;;  %4015 = vmatprep.mubr.msk.bf16.mxu0 %vm4252_vm1, %v4251_v0  ;;  %v1995_v56 = vld [vmem:[%s5451_s2 + $0x60] sm:$0xf] }
 0x23a   :  { %v4216_v7 = vpop.eup %4215  ;;  %4025 = vmatprep.subr.bf16.mxu0 %v4251_v0 }
 0x23b   :  { %v4218_v3 = vpop.eup %4217  ;;  %v1906_v32 = vmul.f32 %v4216_v7, %v4964_v48 }
 0x23c   :  { %4010 = vmatmul.mubr.msk.bf16.vlgmr.msra.gmra.mxu1 %vm114_vm0, %v1952_v52  ;;  %v1838_v39 = vpop.xlane.xlu1 %1837  ;;  %v1904_v5 = vmul.f32 %v4218_v3, %v4966_v12  ;;  %v1988_v12 = vld [vmem:[%s5451_s2 + $0x44] sm:$0xf]  ;;  %v3112_v52 = vsel %vm2006_vm2, %v1995_v56, 0 }
 0x23d   :  { %4223 = vrcp.f32 %v1838_v39  ;;  %v1835_v35 = vpop.xlane.xlu0 %1834  ;;  %4020 = vmatpush3.bf16.msra.mxu1 %v2698_v2  ;;  %4021 = vmatprep.mubr.msk.bf16.mxu1 %vm4252_vm1, %v4251_v0  ;;  %v1954_v13 = vpack.c.bf16 %v1906_v32, %v1906_v32  ;;  %v2790_v44 = vsel %vm2006_vm2, %v1988_v12, 0  ;;  %v1996_v2 = vld [vmem:[%s5451_s2 + $0x64] sm:$0xf] }
 0x23e   :  { %4225 = vrcp.f32 %v1835_v35  ;;  %v1953_v34 = vpack.c.bf16 %v1904_v5, %v1904_v5  ;;  %4031 = vmatprep.subr.bf16.mxu1 %v4251_v0  ;;  %v3158_v3 = vsel %vm2006_vm2, %v1996_v2, 0 }
 0x240   :  { %4016 = vmatmul.mubr.msk.bf16.vlgmr.msra.gmra.mxu0 %vm114_vm0, %v1953_v34  ;;  %v1997_v34 = vld [vmem:[%s5451_s2 + $0x68] sm:$0xf] }
 0x241   :  { %4026 = vmatpush3.bf16.msra.mxu0 %v2744_v47  ;;  %4027 = vmatprep.mubr.msk.bf16.mxu0 %vm4252_vm1, %v4251_v0 }
 0x242   :  { %v4220_v11 = vpop.eup %4219  ;;  %4037 = vmatprep.subr.bf16.mxu0 %v4251_v0 }
 0x243   :  { %v4222_v22 = vpop.eup %4221  ;;  %v1910_v18 = vmul.f32 %v4220_v11, %v4974_v25  ;;  %v3204_v11 = vsel %vm2006_vm2, %v1997_v34, 0 }
 0x244   :  { %4022 = vmatmul.mubr.msk.bf16.vlgmr.msra.gmra.mxu1 %vm114_vm0, %v1954_v13  ;;  %v1844_v48 = vpop.xlane.xlu1 %1843  ;;  %v1908_v55 = vmul.f32 %v4222_v22, %v4976_v26  ;;  %v1990_v26 = vld [vmem:[%s5451_s2 + $0x4c] sm:$0xf] }
 0x245   :  { %4227 = vrcp.f32 %v1844_v48  ;;  %v1841_v57 = vpop.xlane.xlu0 %1840  ;;  %4032 = vmatpush3.bf16.msra.mxu1 %v2790_v44  ;;  %4033 = vmatprep.mubr.msk.bf16.mxu1 %vm4252_vm1, %v4251_v0  ;;  %v1956_v62 = vpack.c.bf16 %v1910_v18, %v1910_v18  ;;  %v2882_v8 = vsel %vm2006_vm2, %v1990_v26, 0  ;;  %v1998_v44 = vld [vmem:[%s5451_s2 + $0x6c] sm:$0xf] }
 0x246   :  { %4229 = vrcp.f32 %v1841_v57  ;;  %v1955_v61 = vpack.c.bf16 %v1908_v55, %v1908_v55  ;;  %4043 = vmatprep.subr.bf16.mxu1 %v4251_v0  ;;  %v3250_v55 = vsel %vm2006_vm2, %v1998_v44, 0  ;;  %v1999_v57 = vld [vmem:[%s5451_s2 + $0x70] sm:$0xf] }
 0x248   :  { %4028 = vmatmul.mubr.msk.bf16.vlgmr.msra.gmra.mxu0 %vm114_vm0, %v1955_v61 }
 0x249   :  { %4038 = vmatpush3.bf16.msra.mxu0 %v2836_v24  ;;  %4039 = vmatprep.mubr.msk.bf16.mxu0 %vm4252_vm1, %v4251_v0  ;;  %v3296_v24 = vsel %vm2006_vm2, %v1999_v57, 0 }
 0x24a   :  { %v4224_v29 = vpop.eup %4223  ;;  %4049 = vmatprep.subr.bf16.mxu0 %v4251_v0 }
 0x24b   :  { %v4226_v30 = vpop.eup %4225  ;;  %v1914_v10 = vmul.f32 %v4224_v29, %v4984_v58  ;;  %v2000_v29 = vld [vmem:[%s5451_s2 + $0x74] sm:$0xf] }
 0x24c   :  { %4034 = vmatmul.mubr.msk.bf16.vlgmr.msra.gmra.mxu1 %vm114_vm0, %v1956_v62  ;;  %v1850_v25 = vpop.xlane.xlu1 %1849  ;;  %v1912_v1 = vmul.f32 %v4226_v30, %v4986_v40  ;;  %v1992_v40 = vld [vmem:[%s5451_s2 + $0x54] sm:$0xf]  ;;  %v3342_v30 = vsel %vm2006_vm2, %v2000_v29, 0 }
 0x24d   :  { %4231 = vrcp.f32 %v1850_v25  ;;  %v1847_v36 = vpop.xlane.xlu0 %1846  ;;  %4044 = vmatpush3.bf16.msra.mxu1 %v2882_v8  ;;  %4045 = vmatprep.mubr.msk.bf16.mxu1 %vm4252_vm1, %v4251_v0  ;;  %v1958_v49 = vpack.c.bf16 %v1914_v10, %v1914_v10  ;;  %v2974_v9 = vsel %vm2006_vm2, %v1992_v40, 0  ;;  %v2002_v10 = vld [vmem:[%s5451_s2 + $0x7c] sm:$0xf] }
 0x24e   :  { %4233 = vrcp.f32 %v1847_v36  ;;  %v1957_v15 = vpack.c.bf16 %v1912_v1, %v1912_v1  ;;  %4055 = vmatprep.subr.bf16.mxu1 %v4251_v0 }
 0x250   :  { %4040 = vmatmul.mubr.msk.bf16.vlgmr.msra.gmra.mxu0 %vm114_vm0, %v1957_v15 }
 0x251   :  { %4050 = vmatpush3.bf16.msra.mxu0 %v2928_v46  ;;  %4051 = vmatprep.mubr.msk.bf16.mxu0 %vm4252_vm1, %v4251_v0 }
 0x252   :  { %v4228_v20 = vpop.eup %4227  ;;  %4061 = vmatprep.subr.bf16.mxu0 %v4251_v0 }
 0x253   :  { %v4230_v53 = vpop.eup %4229  ;;  %v1918_v45 = vmul.f32 %v4228_v20, %v4992_v38 }
 0x254   :  { %4046 = vmatmul.mubr.msk.bf16.vlgmr.msra.gmra.mxu1 %vm114_vm0, %v1958_v49  ;;  %v1916_v58 = vmul.f32 %v4230_v53, %v4994_v28 }
 0x255   :  { %4056 = vmatpush3.bf16.msra.mxu1 %v2974_v9  ;;  %4057 = vmatprep.mubr.msk.bf16.mxu1 %vm4252_vm1, %v4251_v0  ;;  %v1960_v51 = vpack.c.bf16 %v1918_v45, %v1918_v45 }
 0x256   :  { %v1959_v37 = vpack.c.bf16 %v1916_v58, %v1916_v58  ;;  %4067 = vmatprep.subr.bf16.mxu1 %v4251_v0 }
 0x258   :  { %4052 = vmatmul.mubr.msk.bf16.vlgmr.msra.gmra.mxu0 %vm114_vm0, %v1959_v37 }
 0x259   :  { %4062 = vmatpush3.bf16.msra.mxu0 %v3020_v31  ;;  %4063 = vmatprep.mubr.msk.bf16.mxu0 %vm4252_vm1, %v4251_v0 }
 0x25a   :  { %v4232_v28 = vpop.eup %4231  ;;  %4073 = vmatprep.subr.bf16.mxu0 %v4251_v0 }
 0x25b   :  { %v4234_v27 = vpop.eup %4233  ;;  %v1922_v7 = vmul.f32 %v4232_v28, %v5000_v19 }
 0x25c   :  { %4058 = vmatmul.mubr.msk.bf16.vlgmr.msra.gmra.mxu1 %vm114_vm0, %v1960_v51  ;;  %v1920_v38 = vmul.f32 %v4234_v27, %v5002_v16 }
 0x25d   :  { %4068 = vmatpush3.bf16.msra.mxu1 %v3066_v4  ;;  %4069 = vmatprep.mubr.msk.bf16.mxu1 %vm4252_vm1, %v4251_v0  ;;  %v1962_v16 = vpack.c.bf16 %v1922_v7, %v1922_v7 }
 0x25e   :  { %v1961_v60 = vpack.c.bf16 %v1920_v38, %v1920_v38  ;;  %4079 = vmatprep.subr.bf16.mxu1 %v4251_v0 }
 0x260   :  { %4064 = vmatmul.mubr.msk.bf16.vlgmr.msra.gmra.mxu0 %vm114_vm0, %v1961_v60 }
 0x261   :  { %4074 = vmatpush3.bf16.msra.mxu0 %v3112_v52  ;;  %4075 = vmatprep.mubr.msk.bf16.mxu0 %vm4252_vm1, %v4251_v0 }
 0x262   :  { %4085 = vmatprep.subr.bf16.mxu0 %v4251_v0 }
 0x264   :  { %4070 = vmatmul.mubr.msk.bf16.vlgmr.msra.gmra.mxu1 %vm114_vm0, %v1962_v16 }
 0x265   :  { %4080 = vmatpush3.bf16.msra.mxu1 %v3158_v3  ;;  %4081 = vmatprep.mubr.msk.bf16.mxu1 %vm4252_vm1, %v4251_v0 }
 0x266   :  { %4091 = vmatprep.subr.bf16.mxu1 %v4251_v0 }
 0x295   :  { %v1853_v19 = vpop.xlane.xlu0 %1852 }
 0x296   :  { %4235 = vrcp.f32 %v1853_v19 }
 0x299   :  { %v1856_v39 = vpop.xlane.xlu1 %1855 }
 0x29a   :  { %4237 = vrcp.f32 %v1856_v39 }
 0x29d   :  { %v1859_v5 = vpop.xlane.xlu0 %1858 }
 0x29e   :  { %4239 = vrcp.f32 %v1859_v5 }
 0x2a1   :  { %v1862_v43 = vpop.xlane.xlu1 %1861 }
 0x2a2   :  { %4241 = vrcp.f32 %v1862_v43 }
 0x2a3   :  { %v4236_v35 = vpop.eup %4235 }
 0x2a4   :  { %v1924_v32 = vmul.f32 %v4236_v35, %v5026_v50 }
 0x2a5   :  { %v1865_v12 = vpop.xlane.xlu0 %1864 }
 0x2a6   :  { %v1963_v47 = vpack.c.bf16 %v1924_v32, %v1924_v32  ;;  %4243 = vrcp.f32 %v1865_v12 }
 0x2a7   :  { %v4238_v13 = vpop.eup %4237 }
 0x2a8   :  { %v1926_v22 = vmul.f32 %v4238_v13, %v5040_v42  ;;  %4076 = vmatmul.mubr.msk.bf16.vlgmr.msra.gmra.mxu0 %vm114_vm0, %v1963_v47 }
 0x2a9   :  { %v1868_v48 = vpop.xlane.xlu1 %1867  ;;  %4086 = vmatpush3.bf16.msra.mxu0 %v3204_v11  ;;  %4087 = vmatprep.mubr.msk.bf16.mxu0 %vm4252_vm1, %v4251_v0 }
 0x2aa   :  { %v1964_v50 = vpack.c.bf16 %v1926_v22, %v1926_v22  ;;  %4245 = vrcp.f32 %v1868_v48  ;;  %4097 = vmatprep.subr.bf16.mxu0 %v4251_v0 }
 0x2ab   :  { %v4240_v54 = vpop.eup %4239 }
 0x2ac   :  { %v1928_v42 = vmul.f32 %v4240_v54, %v5052_v14  ;;  %4082 = vmatmul.mubr.msk.bf16.vlgmr.msra.gmra.mxu1 %vm114_vm0, %v1964_v50 }
 0x2ad   :  { %4092 = vmatpush3.bf16.msra.mxu1 %v3250_v55  ;;  %4093 = vmatprep.mubr.msk.bf16.mxu1 %vm4252_vm1, %v4251_v0  ;;  %v1871_v18 = vpop.xlane.xlu0 %1870 }
 0x2ae   :  { %v1965_v61 = vpack.c.bf16 %v1928_v42, %v1928_v42  ;;  %4103 = vmatprep.subr.bf16.mxu1 %v4251_v0  ;;  %4247 = vrcp.f32 %v1871_v18 }
 0x2af   :  { %v4242_v26 = vpop.eup %4241 }
 0x2b0   :  { %v1930_v14 = vmul.f32 %v4242_v26, %v5067_v33  ;;  %4088 = vmatmul.mubr.msk.bf16.vlgmr.msra.gmra.mxu0 %vm114_vm0, %v1965_v61  ;;  %v2001_v33 = vld [vmem:[%s5451_s2 + $0x78] sm:$0xf] }
 0x2b1   :  { %v1874_v62 = vpop.xlane.xlu1 %1873  ;;  %4098 = vmatpush3.bf16.msra.mxu0 %v3296_v24  ;;  %4099 = vmatprep.mubr.msk.bf16.mxu0 %vm4252_vm1, %v4251_v0  ;;  %v3388_v15 = vsel %vm2006_vm2, %v2001_v33, 0 }
 0x2b2   :  { %v1966_v8 = vpack.c.bf16 %v1930_v14, %v1930_v14  ;;  %4249 = vrcp.f32 %v1874_v62  ;;  %4109 = vmatprep.subr.bf16.mxu0 %v4251_v0 }
 0x2b3   :  { %v4244_v25 = vpop.eup %4243 }
 0x2b4   :  { %4094 = vmatmul.mubr.msk.bf16.vlgmr.msra.gmra.mxu1 %vm114_vm0, %v1966_v8  ;;  %v1932_v1 = vmul.f32 %v4244_v25, %v5082_v41  ;;  %v3434_v41 = vsel %vm2006_vm2, %v2002_v10, 0 }
 0x2b5   :  { %4104 = vmatpush3.bf16.msra.mxu1 %v3342_v30  ;;  %4105 = vmatprep.mubr.msk.bf16.mxu1 %vm4252_vm1, %v4251_v0 }
 0x2b6   :  { %4115 = vmatprep.subr.bf16.mxu1 %v4251_v0  ;;  %v1967_v36 = vpack.c.bf16 %v1932_v1, %v1932_v1 }
 0x2b7   :  { %v4246_v63 = vpop.eup %4245 }
 0x2b8   :  { %v1934_v46 = vmul.f32 %v4246_v63, %v5091_v59  ;;  %4100 = vmatmul.mubr.msk.bf16.vlgmr.msra.gmra.mxu0 %vm114_vm0, %v1967_v36 }
 0x2b9   :  { %4110 = vmatpush3.bf16.msra.mxu0 %v3388_v15  ;;  %4111 = vmatprep.mubr.msk.bf16.mxu0 %vm4252_vm1, %v4251_v0 }
 0x2ba   :  { %v1968_v40 = vpack.c.bf16 %v1934_v46, %v1934_v46 }
 0x2bb   :  { %v4248_v20 = vpop.eup %4247 }
 0x2bc   :  { %4106 = vmatmul.mubr.msk.bf16.vlgmr.msra.gmra.mxu1 %vm114_vm0, %v1968_v40  ;;  %v1936_v49 = vmul.f32 %v4248_v20, %v5107_v23 }
 0x2bd   :  { %4116 = vmatpush3.bf16.msra.mxu1 %v3434_v41  ;;  %4117 = vmatprep.mubr.msk.bf16.mxu1 %vm4252_vm1, %v4251_v0 }
 0x2be   :  { %v1969_v59 = vpack.c.bf16 %v1936_v49, %v1936_v49 }
 0x2bf   :  { %v4250_v9 = vpop.eup %4249 }
 0x2c0   :  { %v1938_v53 = vmul.f32 %v4250_v9, %v5117_v21  ;;  %4112 = vmatmul.mubr.msk.bf16.vlgmr.msra.gmra.mxu0 %vm114_vm0, %v1969_v59 }
 0x2c2   :  { %v1970_v58 = vpack.c.bf16 %v1938_v53, %v1938_v53 }
 0x2c4   :  { %4118 = vmatmul.mubr.msk.bf16.vlgmr.msra.gmra.mxu1 %vm114_vm0, %v1970_v58 }
 0x2c7   :  { %v2044_v17 = vpop.f32.mrf.mxu0 }
 0x2c8   :  { %v3476_v37 = vpack.c.bf16 %v2044_v17, %v2044_v17 }
 0x2c9   :  { %v3933_v45 = vpop.f32.mrf.mxu0 }
 0x2ca   :  { %3509 = vst.msk [vmem:[%s5452_s4] sm:$0xf] %vm3508_vm3, %v3476_v37 }
 0x2cb   :  { %v2047_v23 = vpop.f32.mrf.mxu0  ;;  %v2090_v0 = vpop.f32.mrf.mxu1 }
 0x2cc   :  { %v3477_v31 = vpack.c.bf16 %v2090_v0, %v2090_v0 }
 0x2cd   :  { %v3934_v6 = vpop.f32.mrf.mxu0  ;;  %v3939_v28 = vpop.f32.mrf.mxu1 }
 0x2ce   :  { %3510 = vst.msk [vmem:[%s5452_s4 + $0x4] sm:$0xf] %vm3508_vm3, %v3477_v31 }
 0x2cf   :  { %v2093_v21 = vpop.f32.mrf.mxu1 }
 0x2d0   :  { %v2136_v51 = vpop.f32.mrf.mxu0 }
 0x2d1   :  { %v3478_v4 = vpack.c.bf16 %v2136_v51, %v2136_v51  ;;  %v3940_v27 = vpop.f32.mrf.mxu1 }
 0x2d2   :  { %v3945_v38 = vpop.f32.mrf.mxu0 }
 0x2d3   :  { %3511 = vst.msk [vmem:[%s5452_s4 + $0x8] sm:$0xf] %vm3508_vm3, %v3478_v4 }
 0x2d4   :  { %v2139_v56 = vpop.f32.mrf.mxu0  ;;  %v2182_v60 = vpop.f32.mrf.mxu1 }
 0x2d5   :  { %v3479_v7 = vpack.c.bf16 %v2182_v60, %v2182_v60 }
 0x2d6   :  { %v3946_v52 = vpop.f32.mrf.mxu0  ;;  %v3951_v2 = vpop.f32.mrf.mxu1 }
 0x2d7   :  { %3512 = vst.msk [vmem:[%s5452_s4 + $0xc] sm:$0xf] %vm3508_vm3, %v3479_v7 }
 0x2d8   :  { %v2185_v16 = vpop.f32.mrf.mxu1  ;;  %v2228_v3 = vpop.f32.mrf.mxu0 }
 0x2d9   :  { %v3480_v19 = vpack.c.bf16 %v2228_v3, %v2228_v3 }
 0x2da   :  { %v3952_v39 = vpop.f32.mrf.mxu1  ;;  %v3957_v5 = vpop.f32.mrf.mxu0 }
 0x2db   :  { %3513 = vst.msk [vmem:[%s5452_s4 + $0x10] sm:$0xf] %vm3508_vm3, %v3480_v19 }
 0x2dc   :  { %v2231_v43 = vpop.f32.mrf.mxu0  ;;  %v2274_v35 = vpop.f32.mrf.mxu1 }
 0x2dd   :  { %v3481_v34 = vpack.c.bf16 %v2274_v35, %v2274_v35 }
 0x2de   :  { %v3958_v32 = vpop.f32.mrf.mxu0  ;;  %v3963_v47 = vpop.f32.mrf.mxu1 }
 0x2df   :  { %3514 = vst.msk [vmem:[%s5452_s4 + $0x14] sm:$0xf] %vm3508_vm3, %v3481_v34 }
 0x2e0   :  { %v2277_v12 = vpop.f32.mrf.mxu1  ;;  %v2320_v11 = vpop.f32.mrf.mxu0 }
 0x2e1   :  { %v3482_v13 = vpack.c.bf16 %v2320_v11, %v2320_v11 }
 0x2e2   :  { %v3964_v44 = vpop.f32.mrf.mxu1  ;;  %v3969_v22 = vpop.f32.mrf.mxu0 }
 0x2e3   :  { %3515 = vst.msk [vmem:[%s5452_s4 + $0x18] sm:$0xf] %vm3508_vm3, %v3482_v13 }
 0x2e4   :  { %v2366_v48 = vpop.f32.mrf.mxu1  ;;  %v2323_v50 = vpop.f32.mrf.mxu0 }
 0x2e5   :  { %v3483_v55 = vpack.c.bf16 %v2366_v48, %v2366_v48 }
 0x2e6   :  { %v3975_v54 = vpop.f32.mrf.mxu1  ;;  %v3970_v57 = vpop.f32.mrf.mxu0 }
 0x2e7   :  { %3516 = vst.msk [vmem:[%s5452_s4 + $0x1c] sm:$0xf] %vm3508_vm3, %v3483_v55 }
 0x2e8   :  { %v2369_v42 = vpop.f32.mrf.mxu1  ;;  %v2412_v61 = vpop.f32.mrf.mxu0 }
 0x2e9   :  { %v3484_v18 = vpack.c.bf16 %v2412_v61, %v2412_v61 }
 0x2ea   :  { %v3976_v24 = vpop.f32.mrf.mxu1  ;;  %v3981_v26 = vpop.f32.mrf.mxu0 }
 0x2eb   :  { %3517 = vst.msk [vmem:[%s5452_s4 + $0x20] sm:$0xf] %vm3508_vm3, %v3484_v18 }
 0x2ec   :  { %v2458_v29 = vpop.f32.mrf.mxu1  ;;  %v2415_v14 = vpop.f32.mrf.mxu0 }
 0x2ed   :  { %v3485_v62 = vpack.c.bf16 %v2458_v29, %v2458_v29 }
 0x2ee   :  { %v3987_v8 = vpop.f32.mrf.mxu1  ;;  %v3982_v30 = vpop.f32.mrf.mxu0 }
 0x2ef   :  { %3518 = vst.msk [vmem:[%s5452_s4 + $0x24] sm:$0xf] %vm3508_vm3, %v3485_v62 }
 0x2f0   :  { %v2461_v25 = vpop.f32.mrf.mxu1  ;;  %v2504_v33 = vpop.f32.mrf.mxu0 }
 0x2f1   :  { %v3486_v1 = vpack.c.bf16 %v2504_v33, %v2504_v33 }
 0x2f2   :  { %v3988_v63 = vpop.f32.mrf.mxu1  ;;  %v3993_v36 = vpop.f32.mrf.mxu0 }
 0x2f3   :  { %3519 = vst.msk [vmem:[%s5452_s4 + $0x28] sm:$0xf] %vm3508_vm3, %v3486_v1 }
 0x2f4   :  { %v2550_v15 = vpop.f32.mrf.mxu1  ;;  %v2507_v10 = vpop.f32.mrf.mxu0 }
 0x2f5   :  { %v3487_v46 = vpack.c.bf16 %v2550_v15, %v2550_v15 }
 0x2f6   :  { %v3999_v40 = vpop.f32.mrf.mxu1  ;;  %v3994_v41 = vpop.f32.mrf.mxu0 }
 0x2f7   :  { %3520 = vst.msk [vmem:[%s5452_s4 + $0x2c] sm:$0xf] %vm3508_vm3, %v3487_v46 }
 0x2f8   :  { %v2553_v20 = vpop.f32.mrf.mxu1  ;;  %v2596_v49 = vpop.f32.mrf.mxu0 }
 0x2f9   :  { %v3488_v9 = vpack.c.bf16 %v2596_v49, %v2596_v49 }
 0x2fa   :  { %v4000_v59 = vpop.f32.mrf.mxu1  ;;  %v4005_v53 = vpop.f32.mrf.mxu0 }
 0x2fb   :  { %3521 = vst.msk [vmem:[%s5452_s4 + $0x30] sm:$0xf] %vm3508_vm3, %v3488_v9 }
 0x2fc   :  { %v2642_v58 = vpop.f32.mrf.mxu1  ;;  %v2599_v17 = vpop.f32.mrf.mxu0 }
 0x2fd   :  { %v3489_v37 = vpack.c.bf16 %v2642_v58, %v2642_v58 }
 0x2fe   :  { %v4011_v45 = vpop.f32.mrf.mxu1  ;;  %v4006_v23 = vpop.f32.mrf.mxu0 }
 0x2ff   :  { %3522 = vst.msk [vmem:[%s5452_s4 + $0x34] sm:$0xf] %vm3508_vm3, %v3489_v37 }
 0x300   :  { %v2645_v0 = vpop.f32.mrf.mxu1  ;;  %v2688_v31 = vpop.f32.mrf.mxu0 }
 0x301   :  { %v3490_v6 = vpack.c.bf16 %v2688_v31, %v2688_v31 }
 0x302   :  { %v4012_v28 = vpop.f32.mrf.mxu1  ;;  %v4017_v21 = vpop.f32.mrf.mxu0 }
 0x303   :  { %3523 = vst.msk [vmem:[%s5452_s4 + $0x38] sm:$0xf] %vm3508_vm3, %v3490_v6 }
 0x304   :  { %v2734_v51 = vpop.f32.mrf.mxu1  ;;  %v2691_v4 = vpop.f32.mrf.mxu0 }
 0x305   :  { %v3491_v27 = vpack.c.bf16 %v2734_v51, %v2734_v51 }
 0x306   :  { %v4023_v38 = vpop.f32.mrf.mxu1  ;;  %v4018_v56 = vpop.f32.mrf.mxu0 }
 0x307   :  { %3524 = vst.msk [vmem:[%s5452_s4 + $0x3c] sm:$0xf] %vm3508_vm3, %v3491_v27 }
 0x308   :  { %v2737_v60 = vpop.f32.mrf.mxu1  ;;  %v2780_v7 = vpop.f32.mrf.mxu0 }
 0x309   :  { %v3492_v52 = vpack.c.bf16 %v2780_v7, %v2780_v7 }
 0x30a   :  { %v4024_v2 = vpop.f32.mrf.mxu1  ;;  %v4029_v16 = vpop.f32.mrf.mxu0 }
 0x30b   :  { %3525 = vst.msk [vmem:[%s5452_s4 + $0x40] sm:$0xf] %vm3508_vm3, %v3492_v52 }
 0x30c   :  { %v2826_v3 = vpop.f32.mrf.mxu1  ;;  %v2783_v19 = vpop.f32.mrf.mxu0 }
 0x30d   :  { %v3493_v39 = vpack.c.bf16 %v2826_v3, %v2826_v3 }
 0x30e   :  { %v4035_v5 = vpop.f32.mrf.mxu1  ;;  %v4030_v43 = vpop.f32.mrf.mxu0 }
 0x30f   :  { %3526 = vst.msk [vmem:[%s5452_s4 + $0x44] sm:$0xf] %vm3508_vm3, %v3493_v39 }
 0x310   :  { %v2829_v35 = vpop.f32.mrf.mxu1  ;;  %v2872_v34 = vpop.f32.mrf.mxu0 }
 0x311   :  { %v3494_v32 = vpack.c.bf16 %v2872_v34, %v2872_v34 }
 0x312   :  { %v4036_v47 = vpop.f32.mrf.mxu1  ;;  %v4041_v12 = vpop.f32.mrf.mxu0 }
 0x313   :  { %3527 = vst.msk [vmem:[%s5452_s4 + $0x48] sm:$0xf] %vm3508_vm3, %v3494_v32 }
 0x314   :  { %v2918_v11 = vpop.f32.mrf.mxu1  ;;  %v2875_v13 = vpop.f32.mrf.mxu0 }
 0x315   :  { %v3495_v44 = vpack.c.bf16 %v2918_v11, %v2918_v11 }
 0x316   :  { %v4047_v22 = vpop.f32.mrf.mxu1  ;;  %v4042_v48 = vpop.f32.mrf.mxu0 }
 0x317   :  { %3528 = vst.msk [vmem:[%s5452_s4 + $0x4c] sm:$0xf] %vm3508_vm3, %v3495_v44 }
 0x318   :  { %v2921_v50 = vpop.f32.mrf.mxu1  ;;  %v2964_v55 = vpop.f32.mrf.mxu0 }
 0x319   :  { %v3496_v54 = vpack.c.bf16 %v2964_v55, %v2964_v55 }
 0x31a   :  { %v4048_v57 = vpop.f32.mrf.mxu1  ;;  %v4053_v42 = vpop.f32.mrf.mxu0 }
 0x31b   :  { %3529 = vst.msk [vmem:[%s5452_s4 + $0x50] sm:$0xf] %vm3508_vm3, %v3496_v54 }
 0x31c   :  { %v3010_v61 = vpop.f32.mrf.mxu1  ;;  %v2967_v18 = vpop.f32.mrf.mxu0 }
 0x31d   :  { %v3497_v24 = vpack.c.bf16 %v3010_v61, %v3010_v61 }
 0x31e   :  { %v4059_v26 = vpop.f32.mrf.mxu1  ;;  %v4054_v29 = vpop.f32.mrf.mxu0 }
 0x31f   :  { %3530 = vst.msk [vmem:[%s5452_s4 + $0x54] sm:$0xf] %vm3508_vm3, %v3497_v24 }
 0x320   :  { %v3013_v14 = vpop.f32.mrf.mxu1  ;;  %v3056_v62 = vpop.f32.mrf.mxu0 }
 0x321   :  { %v3498_v8 = vpack.c.bf16 %v3056_v62, %v3056_v62 }
 0x322   :  { %v4060_v30 = vpop.f32.mrf.mxu1  ;;  %v4065_v25 = vpop.f32.mrf.mxu0 }
 0x323   :  { %3531 = vst.msk [vmem:[%s5452_s4 + $0x58] sm:$0xf] %vm3508_vm3, %v3498_v8 }
 0x324   :  { %v3102_v33 = vpop.f32.mrf.mxu1  ;;  %v3059_v1 = vpop.f32.mrf.mxu0 }
 0x325   :  { %v3499_v63 = vpack.c.bf16 %v3102_v33, %v3102_v33 }
 0x326   :  { %v4071_v36 = vpop.f32.mrf.mxu1  ;;  %v4066_v15 = vpop.f32.mrf.mxu0 }
 0x327   :  { %3532 = vst.msk [vmem:[%s5452_s4 + $0x5c] sm:$0xf] %vm3508_vm3, %v3499_v63 }
 0x328   :  { %v3105_v10 = vpop.f32.mrf.mxu1 }
 0x32a   :  { %v4072_v46 = vpop.f32.mrf.mxu1 }
 0x368   :  { %v3148_v40 = vpop.f32.mrf.mxu0 }
 0x369   :  { %v3500_v41 = vpack.c.bf16 %v3148_v40, %v3148_v40 }
 0x36a   :  { %v4077_v20 = vpop.f32.mrf.mxu0 }
 0x36b   :  { %3533 = vst.msk [vmem:[%s5452_s4 + $0x60] sm:$0xf] %vm3508_vm3, %v3500_v41 }
 0x36c   :  { %v3151_v49 = vpop.f32.mrf.mxu0  ;;  %v3194_v9 = vpop.f32.mrf.mxu1 }
 0x36d   :  { %v3501_v59 = vpack.c.bf16 %v3194_v9, %v3194_v9 }
 0x36e   :  { %v4078_v53 = vpop.f32.mrf.mxu0  ;;  %v4083_v58 = vpop.f32.mrf.mxu1 }
 0x36f   :  { %3534 = vst.msk [vmem:[%s5452_s4 + $0x64] sm:$0xf] %vm3508_vm3, %v3501_v59 }
 0x370   :  { %v3197_v17 = vpop.f32.mrf.mxu1  ;;  %v3240_v37 = vpop.f32.mrf.mxu0 }
 0x371   :  { %v3502_v45 = vpack.c.bf16 %v3240_v37, %v3240_v37 }
 0x372   :  { %v4084_v23 = vpop.f32.mrf.mxu1  ;;  %v4089_v0 = vpop.f32.mrf.mxu0 }
 0x373   :  { %3535 = vst.msk [vmem:[%s5452_s4 + $0x68] sm:$0xf] %vm3508_vm3, %v3502_v45 }
 0x374   :  { %v3243_v31 = vpop.f32.mrf.mxu0  ;;  %v3286_v6 = vpop.f32.mrf.mxu1 }
 0x375   :  { %v3503_v28 = vpack.c.bf16 %v3286_v6, %v3286_v6 }
 0x376   :  { %v4090_v21 = vpop.f32.mrf.mxu0  ;;  %v4095_v51 = vpop.f32.mrf.mxu1 }
 0x377   :  { %3536 = vst.msk [vmem:[%s5452_s4 + $0x6c] sm:$0xf] %vm3508_vm3, %v3503_v28 }
 0x378   :  { %v3289_v4 = vpop.f32.mrf.mxu1  ;;  %v3332_v27 = vpop.f32.mrf.mxu0 }
 0x379   :  { %v3504_v38 = vpack.c.bf16 %v3332_v27, %v3332_v27 }
 0x37a   :  { %v4096_v56 = vpop.f32.mrf.mxu1  ;;  %v4101_v60 = vpop.f32.mrf.mxu0 }
 0x37b   :  { %3537 = vst.msk [vmem:[%s5452_s4 + $0x70] sm:$0xf] %vm3508_vm3, %v3504_v38 }
 0x37c   :  { %v3378_v7 = vpop.f32.mrf.mxu1  ;;  %v3335_v52 = vpop.f32.mrf.mxu0 }
 0x37d   :  { %v3505_v2 = vpack.c.bf16 %v3378_v7, %v3378_v7 }
 0x37e   :  { %v4107_v16 = vpop.f32.mrf.mxu1  ;;  %v4102_v3 = vpop.f32.mrf.mxu0 }
 0x37f   :  { %3538 = vst.msk [vmem:[%s5452_s4 + $0x74] sm:$0xf] %vm3508_vm3, %v3505_v2 }
 0x380   :  { %v3381_v19 = vpop.f32.mrf.mxu1  ;;  %v3424_v39 = vpop.f32.mrf.mxu0 }
 0x381   :  { %v3506_v5 = vpack.c.bf16 %v3424_v39, %v3424_v39 }
 0x382   :  { %v4108_v43 = vpop.f32.mrf.mxu1  ;;  %v4113_v35 = vpop.f32.mrf.mxu0 }
 0x383   :  { %3539 = vst.msk [vmem:[%s5452_s4 + $0x78] sm:$0xf] %vm3508_vm3, %v3506_v5 }
 0x384   :  { %v3470_v34 = vpop.f32.mrf.mxu1  ;;  %v3427_v32 = vpop.f32.mrf.mxu0 }
 0x385   :  { %v3507_v47 = vpack.c.bf16 %v3470_v34, %v3470_v34 }
 0x386   :  { %v4119_v12 = vpop.f32.mrf.mxu1  ;;  %v4114_v11 = vpop.f32.mrf.mxu0 }
 0x387   :  { %3540 = vst.msk [vmem:[%s5452_s4 + $0x7c] sm:$0xf] %vm3508_vm3, %v3507_v47 }
 0x388   :  { %v3473_v13 = vpop.f32.mrf.mxu1 }
 0x38a   :  { %v4120_v44 = vpop.f32.mrf.mxu1 }

</bundles_post_ra>
